<compile_context>
chip_gen: v6e
topology: v6e:2x2x1
jax: 0.10.0
libtpu: 0.0.40
codegen_flags: <defaults>
</compile_context>

<pallas_src>
import math

import jax
import jax.numpy as jnp
from jax import lax
from jax.experimental import pallas as pl
from jax.experimental.pallas import tpu as pltpu


# v7x-safe scoped-VMEM budget (64 MiB physical there); v5e/v6e (128 MiB) can raise it.
_VMEM_LIMIT_BYTES = 40 * 1024 * 1024


def _sublane_align(dtype):
    """Sublane alignment for second-minor block dims: 8 (f32), 16 (bf16), 32 (int8)."""
    return max(8, 32 // jnp.dtype(dtype).itemsize)


def _choose_block(dim, target, align):
    """Largest block <= target that is a multiple of `align` and divides `dim`.

    Falls back to the full dimension, so the grid always covers every element."""
    if dim <= target:
        return dim
    blk = (target // align) * align
    while blk >= align:
        if dim % blk == 0:
            return blk
        blk -= align
    return dim


def _heads_per_step(n_heads, d_kv):
    """Smallest head-group size whose lane width (hps*d_kv) is a multiple of 128."""
    need = 128 // math.gcd(d_kv, 128)
    if need <= n_heads and n_heads % need == 0:
        return need
    return n_heads  # fall back to all heads per step (blocks then equal full dims)


# ----------------------------------------------------------------------------
# Tiled matmul kernels (q/k/v/o projections)
# ----------------------------------------------------------------------------
def _matmul_kernel_single_k(x_ref, w_ref, o_ref):
    # Full-K block: no accumulator scratch needed (review item 7).
    o_ref[...] = jnp.dot(
        x_ref[...], w_ref[...], preferred_element_type=jnp.float32
    ).astype(o_ref.dtype)


def _matmul_kernel_acc(x_ref, w_ref, o_ref, acc_ref):
    @pl.when(pl.program_id(2) == 0)
    def _():
        acc_ref[...] = jnp.zeros_like(acc_ref)

    acc_ref[...] += jnp.dot(
        x_ref[...], w_ref[...], preferred_element_type=jnp.float32
    )

    @pl.when(pl.program_id(2) == pl.num_programs(2) - 1)
    def _():
        o_ref[...] = acc_ref[...].astype(o_ref.dtype)


def pallas_linear(x, w, *, tm_target=512, tn_target=512, tk_target=1024,
                  vmem_limit_bytes=_VMEM_LIMIT_BYTES):
    """y = x @ w (T5 nn.Linear has no bias). Tiled, f32 accumulation, MXU dtype."""
    M, K = x.shape
    K2, N = w.shape
    assert K == K2
    tm = _choose_block(M, tm_target, _sublane_align(x.dtype))
    tn = _choose_block(N, tn_target, 128)

    if K <= tk_target:
        # Single K block: simplest kernel, no scratch, 2-D parallel grid.
        return pl.pallas_call(
            _matmul_kernel_single_k,
            out_shape=jax.ShapeDtypeStruct((M, N), x.dtype),
            grid_spec=pltpu.PrefetchScalarGridSpec(
                num_scalar_prefetch=0,
                grid=(M // tm, N // tn),
                in_specs=[
                    pl.BlockSpec((tm, K), lambda i, j: (i, 0)),
                    pl.BlockSpec((K, tn), lambda i, j: (0, j)),
                ],
                out_specs=pl.BlockSpec((tm, tn), lambda i, j: (i, j)),
            ),
            compiler_params=pltpu.CompilerParams(
                dimension_semantics=("parallel", "parallel"),
                vmem_limit_bytes=vmem_limit_bytes,
            ),
        )(x, w)

    tk = _choose_block(K, tk_target, 128)
    return pl.pallas_call(
        _matmul_kernel_acc,
        out_shape=jax.ShapeDtypeStruct((M, N), x.dtype),
        grid_spec=pltpu.PrefetchScalarGridSpec(
            num_scalar_prefetch=0,
            grid=(M // tm, N // tn, K // tk),
            in_specs=[
                pl.BlockSpec((tm, tk), lambda i, j, kk: (i, kk)),
                pl.BlockSpec((tk, tn), lambda i, j, kk: (kk, j)),
            ],
            out_specs=pl.BlockSpec((tm, tn), lambda i, j, kk: (i, j)),
            scratch_shapes=[pltpu.VMEM((tm, tn), jnp.float32)],
        ),
        compiler_params=pltpu.CompilerParams(
            dimension_semantics=("parallel", "parallel", "arbitrary"),
            vmem_limit_bytes=vmem_limit_bytes,
        ),
    )(x, w)


# ----------------------------------------------------------------------------
# Flash attention kernel (online softmax; batch + a head-group inside each block)
# ----------------------------------------------------------------------------
def _make_flash_kernel(hps, d_kv, sm_scale, exp_dtype, approx_recip):
    def kernel(q_ref, k_ref, v_ref, b_ref, o_ref, m_sc, l_sc, acc_sc):
        ki = pl.program_id(2)

        @pl.when(ki == 0)
        def _init():
            m_sc[...] = jnp.full(m_sc.shape, -jnp.inf, jnp.float32)
            l_sc[...] = jnp.zeros(l_sc.shape, jnp.float32)
            acc_sc[...] = jnp.zeros(acc_sc.shape, jnp.float32)

        # Static unroll over the heads of this head group (hps is small: 1-8).
        for h in range(hps):
            sl = slice(h * d_kv, (h + 1) * d_kv)
            q = q_ref[:, :, sl]                        # (B, T, D) compute dtype
            if sm_scale != 1.0:                        # fold scale into the q tile once
                q = (q * sm_scale).astype(q.dtype)
            k = k_ref[:, :, sl]                        # (B, T, D)
            v = v_ref[:, :, sl]                        # (B, T, D)

            # QK^T on the MXU, contracting the last dims (no materialized transpose).
            s = lax.dot_general(
                q, k, (((2,), (2,)), ((0,), (0,))),
                preferred_element_type=jnp.float32,
            )                                          # (B, T, T) f32
            s = s + b_ref[h].astype(jnp.float32)       # (T, T) broadcasts over batch

            m_prev = m_sc[h]                           # (B, T, 1)
            m_new = jnp.maximum(m_prev, s.max(axis=-1, keepdims=True))
            alpha = jnp.exp(m_prev - m_new)            # (B, T, 1) f32
            # exp in bf16 when compute dtype is bf16 (EUP win on v6e/v7x); denominator
            # accumulates in f32.
            p = jnp.exp((s - m_new).astype(exp_dtype))
            l_sc[h] = alpha * l_sc[h] + p.astype(jnp.float32).sum(axis=-1, keepdims=True)
            pv = lax.dot_general(
                p.astype(v.dtype), v, (((2,), (1,)), ((0,), (0,))),
                preferred_element_type=jnp.float32,
            )                                          # (B, T, D) f32
            acc_sc[h] = alpha * acc_sc[h] + pv
            m_sc[h] = m_new

        @pl.when(ki == pl.num_programs(2) - 1)
        def _finalize():
            # No mask / causal path here, so l > 0 always.
            # TODO(synk): if masking is added, guard l against all -inf rows first.
            outs = []
            for h in range(hps):
                inv_l = pl.reciprocal(l_sc[h], approx=approx_recip)
                outs.append(acc_sc[h] * inv_l)
            # Single lane-dense store of the whole (B, T, hps*D) tile.
            o_ref[...] = jnp.concatenate(outs, axis=-1).astype(o_ref.dtype)

    return kernel


def flash_attention(qkv, bias_delta, *, n_heads, d_kv, block_size=512,
                    sm_scale=1.0, exp_dtype=None,
                    vmem_limit_bytes=_VMEM_LIMIT_BYTES):
    """Flash attention on the fused QKV activation.

    qkv:        (B, S, 3*n_heads*d_kv) -- lanes ordered [q heads | k heads | v heads].
    bias_delta: (H, num_q + num_kv - 1, T, T) banded T5 position bias (one Toeplitz
                tile per block diagonal), built by prepare_position_bias.
    Returns attention output in (B, S, n_heads*d_kv) layout (no head transpose needed).
    """
    B, S, three_inner = qkv.shape
    inner = n_heads * d_kv
    assert three_inner == 3 * inner, "qkv must be the fused [q|k|v] activation"

    T = _choose_block(S, block_size, 128)
    num_q = S // T
    num_kv = S // T
    hps = _heads_per_step(n_heads, d_kv)
    n_groups = n_heads // hps
    lane = hps * d_kv
    assert bias_delta.shape == (n_heads, num_q + num_kv - 1, T, T), (
        "bias_delta was built for a different block size")

    if exp_dtype is None:
        # v5e note: its EUP has no bf16 -- pass exp_dtype=jnp.float32 there.
        exp_dtype = jnp.bfloat16 if qkv.dtype == jnp.bfloat16 else jnp.float32
    approx_recip = jnp.dtype(qkv.dtype) != jnp.dtype(jnp.float32)

    kernel = _make_flash_kernel(hps, d_kv, sm_scale, exp_dtype, approx_recip)

    bias_spec = pl.BlockSpec(
        (hps, None, T, T), lambda hg, qi, ki: (hg, ki - qi + num_q - 1, 0, 0))
    out_spec = pl.BlockSpec((B, T, lane), lambda hg, qi, ki: (0, qi, hg))

    if lane % 128 == 0:
        # Zero-copy: read q/k/v directly out of the fused qkv activation (no split,
        # no per-head transpose). k/v lane-blocks sit at offsets inner and 2*inner.
        q_spec = pl.BlockSpec((B, T, lane), lambda hg, qi, ki: (0, qi, hg))
        k_spec = pl.BlockSpec((B, T, lane), lambda hg, qi, ki: (0, ki, n_groups + hg))
        v_spec = pl.BlockSpec((B, T, lane),
                              lambda hg, qi, ki: (0, ki, 2 * n_groups + hg))
        operands = (qkv, qkv, qkv, bias_delta)
    else:
        # Lane-dim (8,128) constraint can't be met by sub-blocks of the fused array:
        # fall back to three separate (B, S, inner) arrays (blocks equal full dims).
        q_in = qkv[:, :, :inner]
        k_in = qkv[:, :, inner:2 * inner]
        v_in = qkv[:, :, 2 * inner:]
        q_spec = pl.BlockSpec((B, T, lane), lambda hg, qi, ki: (0, qi, hg))
        k_spec = pl.BlockSpec((B, T, lane), lambda hg, qi, ki: (0, ki, hg))
        v_spec = pl.BlockSpec((B, T, lane), lambda hg, qi, ki: (0, ki, hg))
        operands = (q_in, k_in, v_in, bias_delta)

    # TODO(synk): on v5e, consider pipeline_mode=pl.Buffered(3) for k/v/bias specs.
    return pl.pallas_call(
        kernel,
        out_shape=jax.ShapeDtypeStruct((B, S, inner), qkv.dtype),
        grid_spec=pltpu.PrefetchScalarGridSpec(
            num_scalar_prefetch=0,
            grid=(n_groups, num_q, num_kv),
            in_specs=[q_spec, k_spec, v_spec, bias_spec],
            out_specs=out_spec,
            scratch_shapes=[
                pltpu.VMEM((hps, B, T, 1), jnp.float32),      # running max
                pltpu.VMEM((hps, B, T, 1), jnp.float32),      # running denominator
                pltpu.VMEM((hps, B, T, d_kv), jnp.float32),   # running numerator
            ],
        ),
        compiler_params=pltpu.CompilerParams(
            dimension_semantics=("parallel", "parallel", "arbitrary"),
            vmem_limit_bytes=vmem_limit_bytes,
        ),
    )(*operands)


# ----------------------------------------------------------------------------
# T5 relative-position bias (glue, plain JAX)
# ----------------------------------------------------------------------------
def _relative_position_bucket(relative_position, bidirectional=True,
                              num_buckets=32, max_distance=128):
    relative_buckets = jnp.zeros_like(relative_position)
    if bidirectional:
        num_buckets //= 2
        relative_buckets += (relative_position > 0).astype(jnp.int32) * num_buckets
        relative_position = jnp.abs(relative_position)
    else:
        relative_position = -jnp.minimum(relative_position,
                                         jnp.zeros_like(relative_position))
    max_exact = num_buckets // 2
    is_small = relative_position < max_exact
    rel_if_large = max_exact + (
        jnp.log(jnp.maximum(relative_position, 1).astype(jnp.float32) / max_exact)
        / math.log(max_distance / max_exact)
        * (num_buckets - max_exact)
    ).astype(jnp.int32)
    rel_if_large = jnp.minimum(rel_if_large, num_buckets - 1)
    relative_buckets += jnp.where(is_small, relative_position, rel_if_large)
    return relative_buckets


def compute_bias(rel_emb, query_length, key_length, num_buckets, max_distance,
                 bidirectional):
    """Compact T5 'virtual position' bias, shape (1, H, query_length + key_length - 1)."""
    virtual_position = jnp.arange(-query_length + 1, key_length, dtype=jnp.int32)
    buckets = _relative_position_bucket(
        virtual_position, bidirectional=bidirectional,
        num_buckets=num_buckets, max_distance=max_distance)
    virt_values = rel_emb[buckets]                       # (Sq+Sk-1, H)
    return jnp.transpose(virt_values, (1, 0))[None]      # (1, H, Sq+Sk-1)


def expand_delta_bias(position_bias, query_length, key_length, block):
    """Banded expansion: (1, H, Sq+Sk-1) -> (H, num_q+num_kv-1, T, T).

    delta[h, d, i, j] = virt[h, (d - (num_q-1))*T + (Sq-1) + (j - i)], so the attention
    tile (qi, ki) uses delta[:, ki - qi + num_q - 1]."""
    assert query_length % block == 0 and key_length % block == 0
    num_q = query_length // block
    num_kv = key_length // block
    n_delta = num_q + num_kv - 1
    d = jnp.arange(n_delta, dtype=jnp.int32) - (num_q - 1)
    i = jnp.arange(block, dtype=jnp.int32)
    j = jnp.arange(block, dtype=jnp.int32)
    idx = (d[:, None, None] * block + (query_length - 1)
           + (j[None, None, :] - i[None, :, None]))      # (n_delta, T, T), all in-range
    return position_bias[0][:, idx]                      # (H, n_delta, T, T)


def expand_virtual_bias(virt_bias, query_length, key_length):
    """Reference-only dense expansion (1, H, Sq+Sk-1) -> (H, Sq, Sk)."""
    ctx = jnp.arange(query_length, dtype=jnp.int32)[:, None]
    mem = jnp.arange(key_length, dtype=jnp.int32)[None, :]
    idx = mem - ctx + (query_length - 1)
    return virt_bias[0][:, idx]


# ----------------------------------------------------------------------------
# Parameter / bias preparation (hoisted out of the per-call forward, review 1 & 2)
# ----------------------------------------------------------------------------
def prepare_flash_t5_params(raw_params, *, compute_dtype=jnp.bfloat16):
    """raw_params hold wq/wk/wv as (d_model, inner), wo as (inner, d_model),
    rel_emb as (num_buckets, H).  Builds the fused QKV weight once."""
    w_qkv = jnp.concatenate(
        [raw_params["wq"], raw_params["wk"], raw_params["wv"]], axis=1)
    return {
        "w_qkv": w_qkv.astype(compute_dtype),
        "wo": raw_params["wo"].astype(compute_dtype),
        "rel_emb": raw_params["rel_emb"].astype(jnp.float32),
    }


def prepare_position_bias(rel_emb, query_length, key_length, *, num_buckets,
                          max_distance, bidirectional, block_size=512,
                          compute_dtype=jnp.bfloat16):
    """Build (compact, banded) position bias once; reuse across layers/steps."""
    compact = compute_bias(rel_emb, query_length, key_length, num_buckets,
                           max_distance, bidirectional)
    block = _choose_block(query_length, block_size, 128)
    delta = expand_delta_bias(compact, query_length, key_length,
                              block).astype(compute_dtype)
    return compact, delta


# ----------------------------------------------------------------------------
# FlashT5AttentionV6 forward (self-attention, no cache, no mask, not causal)
# ----------------------------------------------------------------------------
def flash_t5_attention_v6(hidden_states, params, *, n_heads, d_kv,
                          num_buckets=32, max_distance=128, is_decoder=False,
                          is_causal=False, sm_scale=1.0,
                          compute_dtype=jnp.bfloat16, block_size=512,
                          exp_dtype=None, position_bias=None, delta_bias=None):
    """params must come from prepare_flash_t5_params.

    TODO(synk): mask / is_causal / key_value_states (cross-attn) / past_key_value /
    pruned heads / sparsity_matrix / bias_shift_matrix / local_lengths /
    output_attentions are not implemented; this is the dense, non-causal
    self-attention default of the PyTorch module (dropout is never applied in its
    forward either)."""
    B, S, d_model = hidden_states.shape
    inner = n_heads * d_kv
    assert params["w_qkv"].shape == (d_model, 3 * inner)
    T = _choose_block(S, block_size, 128)

    # Fused QKV projection (activations read once, lane-dense output).
    x2 = hidden_states.reshape(B * S, d_model).astype(compute_dtype)
    qkv = pallas_linear(x2, params["w_qkv"]).reshape(B, S, 3 * inner)

    # Position bias: compact form is returned (module contract); the banded form is the
    # only thing the kernel reads.  Both can be precomputed and passed in (T5 shares
    # the bias across layers).
    if position_bias is None:
        position_bias = compute_bias(params["rel_emb"], S, S, num_buckets,
                                     max_distance, bidirectional=not is_decoder)
    if delta_bias is None:
        delta_bias = expand_delta_bias(position_bias, S, S, T).astype(compute_dtype)

    attn = flash_attention(qkv, delta_bias, n_heads=n_heads, d_kv=d_kv,
                           block_size=block_size, sm_scale=sm_scale,
                           exp_dtype=exp_dtype)          # (B, S, inner), no transpose

    attn_output = pallas_linear(attn.reshape(B * S, inner), params["wo"])
    attn_output = attn_output.reshape(B, S, d_model).astype(hidden_states.dtype)

    present_key_value_state = None  # is_decoder=False / use_cache=False
    return attn_output, present_key_value_state, position_bias


# ----------------------------------------------------------------------------
# Demo / self-check
# ----------------------------------------------------------------------------
if __name__ == "__main__":
    # Make the pure-JAX reference (and the interpreted/compiled kernel dots) run at
    # true f32 precision so the f32 comparison is meaningful on TPU.
    jax.config.update("jax_default_matmul_precision", "highest")

    B, S = 2, 256
    d_model, n_heads, d_kv = 128, 4, 32
    num_buckets, max_distance = 32, 128
    inner_dim = n_heads * d_kv

    key = jax.random.PRNGKey(0)
    k0, k1, k2, k3, k4, k5 = jax.random.split(key, 6)
    hidden_states = jax.random.normal(k0, (B, S, d_model), jnp.float32)

    wscale = 1.0 / math.sqrt(d_model)
    raw_params = {
        # extra 1/sqrt(d_kv) on wq keeps the demo softmax in a well-conditioned regime
        "wq": jax.random.normal(k1, (d_model, inner_dim), jnp.float32)
        * (wscale / math.sqrt(d_kv)),
        "wk": jax.random.normal(k2, (d_model, inner_dim), jnp.float32) * wscale,
        "wv": jax.random.normal(k3, (d_model, inner_dim), jnp.float32) * wscale,
        "wo": jax.random.normal(k4, (inner_dim, d_model), jnp.float32)
        * (1.0 / math.sqrt(inner_dim)),
        "rel_emb": jax.random.normal(k5, (num_buckets, n_heads), jnp.float32) * 0.1,
    }

    # ---- pure-JAX f32 reference of the same forward pass ----
    hp = lax.Precision.HIGHEST

    def shape_(s_):
        return s_.reshape(B, S, n_heads, d_kv).transpose(0, 2, 1, 3)

    x2r = hidden_states.reshape(B * S, d_model)
    q_r = shape_(jnp.matmul(x2r, raw_params["wq"], precision=hp))
    k_r = shape_(jnp.matmul(x2r, raw_params["wk"], precision=hp))
    v_r = shape_(jnp.matmul(x2r, raw_params["wv"], precision=hp))
    bias_compact_ref = compute_bias(raw_params["rel_emb"], S, S, num_buckets,
                                    max_distance, True)
    bias_dense_ref = expand_virtual_bias(bias_compact_ref, S, S)
    scores = jnp.einsum("bhqd,bhkd->bhqk", q_r, k_r, precision=hp) + bias_dense_ref[None]
    probs = jax.nn.softmax(scores, axis=-1)
    attn_r = jnp.einsum("bhqk,bhkd->bhqd", probs, v_r, precision=hp)
    ref = jnp.matmul(attn_r.transpose(0, 2, 1, 3).reshape(B * S, inner_dim),
                     raw_params["wo"], precision=hp).reshape(B, S, d_model)

    # 1) f32 path (block 128 -> 2 q blocks x 2 kv blocks per head group, multi-step
    #    online softmax and banded-bias indexing are exercised).
    params_f32 = prepare_flash_t5_params(raw_params, compute_dtype=jnp.float32)
    out_f32, present, position_bias = flash_t5_attention_v6(
        hidden_states, params_f32, n_heads=n_heads, d_kv=d_kv,
        num_buckets=num_buckets, max_distance=max_distance,
        is_decoder=False, is_causal=False, sm_scale=1.0,
        compute_dtype=jnp.float32, block_size=128)
    out_f32 = jax.block_until_ready(out_f32)

    # 2) production configuration: bf16 compute, bf16 softmax exp, position bias
    #    prepared once outside the forward (hoisted, reusable across layers/steps).
    params_bf16 = prepare_flash_t5_params(raw_params, compute_dtype=jnp.bfloat16)
    compact_bias, delta_bias = prepare_position_bias(
        params_bf16["rel_emb"], S, S, num_buckets=num_buckets,
        max_distance=max_distance, bidirectional=True, block_size=128,
        compute_dtype=jnp.bfloat16)
    out_bf16, _, _ = flash_t5_attention_v6(
        hidden_states, params_bf16, n_heads=n_heads, d_kv=d_kv,
        num_buckets=num_buckets, max_distance=max_distance,
        is_decoder=False, is_causal=False, sm_scale=1.0,
        compute_dtype=jnp.bfloat16, block_size=128,
        position_bias=compact_bias, delta_bias=delta_bias)
    out_bf16 = jax.block_until_ready(out_bf16)

    assert out_f32.shape == (B, S, d_model)
    assert out_bf16.shape == (B, S, d_model)
    assert present is None
    assert position_bias.shape == (1, n_heads, 2 * S - 1)
    assert jnp.allclose(out_f32, ref, rtol=1e-2, atol=1e-2), \
        "f32 path mismatch vs reference"
    assert jnp.allclose(out_bf16.astype(jnp.float32), ref, rtol=1e-1, atol=1e-1), \
        "bf16 path mismatch vs reference"

    print("KERNEL_OK")
</pallas_src>

<mosaic_0001>
module attributes {stable_mosaic.version = 11 : i64} {
  func.func @_matmul_kernel_single_k(%arg0: i32, %arg1: i32, %arg2: memref<512x128xf32, #tpu.memory_space<vmem>>, %arg3: memref<128x384xf32, #tpu.memory_space<vmem>>, %arg4: memref<512x384xf32, #tpu.memory_space<vmem>>) attributes {dimension_semantics = [#tpu.dimension_semantics<parallel>, #tpu.dimension_semantics<parallel>], iteration_bounds = array<i64: 1, 1>, scalar_prefetch = 0 : i64, scratch_operands = 0 : i64, tpu.core_type = #tpu.core_type<tc>, window_params = [{transform_indices = @transform_0, window_bounds = array<i64: 512, 128>}, {transform_indices = @transform_1, window_bounds = array<i64: 128, 384>}, {transform_indices = @transform_2, window_bounds = array<i64: 512, 384>}]} {
    %c0 = arith.constant 0 : index
    %c0_0 = arith.constant 0 : index
    %0 = vector.load %arg2[%c0, %c0_0] : memref<512x128xf32, #tpu.memory_space<vmem>>, vector<512x128xf32>
    %c0_1 = arith.constant 0 : index
    %c0_2 = arith.constant 0 : index
    %1 = vector.load %arg3[%c0_1, %c0_2] : memref<128x384xf32, #tpu.memory_space<vmem>>, vector<128x384xf32>
    %cst = arith.constant dense<0.000000e+00> : vector<512x384xf32>
    %2 = tpu.matmul %0, %1, %cst {dimension_numbers = #tpu.dot_dimension_numbers<[1], [0], [0], [1], [0, 0, 1, 1], [], []>, precision = #tpu.contract_precision<fp32>} : vector<512x128xf32>, vector<128x384xf32>, vector<512x384xf32> -> vector<512x384xf32>
    %c0_3 = arith.constant 0 : index
    %c0_4 = arith.constant 0 : index
    %3 = vector.load %arg4[%c0_3, %c0_4] : memref<512x384xf32, #tpu.memory_space<vmem>>, vector<512x384xf32>
    tpu.vector_store %arg4[%c0_3, %c0_4], %2 {strides = array<i32>} : memref<512x384xf32, #tpu.memory_space<vmem>>, vector<512x384xf32>,
    return
  }
  func.func @transform_0(%arg0: i32, %arg1: i32) -> (i32, i32) {
    %c0_i32 = arith.constant 0 : i32
    %c0_i32_0 = arith.constant 0 : i32
    return %arg0, %c0_i32 : i32, i32
  }
  func.func @transform_1(%arg0: i32, %arg1: i32) -> (i32, i32) {
    %c0_i32 = arith.constant 0 : i32
    %c0_i32_0 = arith.constant 0 : i32
    return %c0_i32, %arg1 : i32, i32
  }
  func.func @transform_2(%arg0: i32, %arg1: i32) -> (i32, i32) {
    %c0_i32 = arith.constant 0 : i32
    return %arg0, %arg1 : i32, i32
  }
}

</mosaic_0001>

<bundles_post_ra>
// kernel: tpu_custom_call.1
= control target key start
LH: loop header
LB: loop body
LE: loop exit
PB: predicated region body
PF: predicated region fallthrough
CT: control target
= control target key end

     0   :  { %7 = vsyncpa [#allocation3], 0  ;;  %s12982_s0 = inlined_call_operand.hbm [shape: f32[512,128], index: 0, kind: input, shape index: {}]   ;;  %s12983_s1 = inlined_call_operand.hbm [shape: f32[128,384], index: 1, kind: input, shape index: {}]   ;;  %s12984_s2 = inlined_call_operand.hbm [shape: f32[512,384], index: 2, kind: output, shape index: {}]  }
   0x1   :  { %8 = vsyncpa [#allocation6], 0 }
   0x2   :  { %9 = vsyncpa [#allocation4], 0  ;;  %s8976_s9 = smov [#allocation2]  }
   0x3   :  { %s15_s10 = sshll.u32 %s8976_s9, 4  ;;  %s16_s10 = int_to_ptr.vmem [resolvable:$true] %s15_s10 }
   0x4   :  { %s8918_s11 = scalar_lea.vmem %s16_s10, 8192  ;;  %p8923_p1 = scmp.lt.s32.totalorder %s16_s10, %s16_s10 }
   0x5   :  { %p8919_p0 = scmp.ne.s32.totalorder %s16_s10, %s8918_s11  ;;  %p8924_p2 = scmp.lt.s32.totalorder %s8918_s11, %s8918_s11 }
   0x7   :  { %p8925_p3 = por %p8924_p2, %p8923_p1 }
   0x9   :  { %p8926_p4 = pnand %p8925_p3, %p8919_p0 }
   0xb   :  { %8929 = shalt.err (!%p8926_p4)
}
   0xc   :  { %s8977_s12 = smov 128   ;;  %s8978_s13 = smov 8  }
   0xd   :  { %21 = dma.hbm_to_vmem [thread:$0]  %s12982_s0, 8192, %s16_s10, [#allocation3], %s8977_s12, %s8977_s12, %s8978_s13  }
   0xe   :  { %s8979_s16 = smov [#allocation5]  }
   0xf   :  { %s27_s17 = sshll.u32 %s8979_s16, 4  ;;  %s28_s17 = int_to_ptr.vmem [resolvable:$true] %s27_s17 }
  0x10   :  { %s8938_s18 = scalar_lea.vmem %s28_s17, 6144  ;;  %p8943_p6 = scmp.lt.s32.totalorder %s28_s17, %s28_s17 }
  0x11   :  { %p8939_p5 = scmp.ne.s32.totalorder %s28_s17, %s8938_s18  ;;  %p8944_p7 = scmp.lt.s32.totalorder %s8938_s18, %s8938_s18 }
  0x13   :  { %p8945_p8 = por %p8944_p7, %p8943_p6 }
  0x15   :  { %p8946_p9 = pnand %p8945_p8, %p8939_p5 }
  0x17   :  { %8949 = shalt.err (!%p8946_p9)
}
  0x18   :  { %s8980_s19 = smov 384   ;;  %s8981_s20 = smov 24  }
  0x19   :  { %33 = dma.hbm_to_vmem [thread:$0]  %s12983_s1, 6144, %s28_s17, [#allocation6], %s8980_s19, %s8980_s19, %s8981_s20  }
  0x1a   :  { %8970 = dma.done.wait [#allocation3], 8192  }
  0x1b   :  { %8971 = vsyncadd [#allocation3], 4294959104 }
  0x1c   :  { %8972 = dma.done.wait [#allocation6], 6144  }
  0x1d   :  { %8973 = vsyncadd [#allocation6], 4294961152  ;;  %v12999_v0 = vmov 0.0   ;;  %v150_v1 = vld [vmem:[#allocation5 + $0x170] sm:$0xff]  ;;  %v149_v2 = vld [vmem:[#allocation5 + $0x168] sm:$0xff]  ;;  %s8983_s0 = smov [#allocation7]  }
  0x1e   :  { %248 = vmatprep.mubr.f32.mxu0 %v12999_v0  ;;  %1177 = vmatprep.mubr.f32.mxu1 %v12999_v0  ;;  %v147_v3 = vld [vmem:[#allocation5 + $0x158] sm:$0xff]  ;;  %v9010_v4 = vand.u32 4294901760, %v150_v1  ;;  %v9012_v5 = vand.u32 4294901760, %v149_v2  ;;  %v146_v7 = vld [vmem:[#allocation5 + $0x150] sm:$0xff]  ;;  %v144_v8 = vld [vmem:[#allocation5 + $0x140] sm:$0xff]  ;;  %s7641_s1 = sshll.u32 %s8983_s0, 4  ;;  %s7642_s1 = int_to_ptr.vmem [resolvable:$true] %s7641_s1 }
  0x1f   :  { %v9014_v6 = vand.u32 4294901760, %v147_v3  ;;  %v143_v9 = vld [vmem:[#allocation5 + $0x138] sm:$0xff]  ;;  %v9016_v10 = vand.u32 4294901760, %v146_v7  ;;  %v9018_v11 = vand.u32 4294901760, %v144_v8  ;;  %v141_v13 = vld [vmem:[#allocation5 + $0x128] sm:$0xff]  ;;  %v140_v14 = vld [vmem:[#allocation5 + $0x120] sm:$0xff]  ;;  %p8955_p11 = scmp.lt.s32.totalorder %s7642_s1, %s7642_s1 }
  0x20   :  { %v9020_v12 = vand.u32 4294901760, %v143_v9  ;;  %v138_v15 = vld [vmem:[#allocation5 + $0x110] sm:$0xff]  ;;  %153 = vmatprep.subr.mxu0 %v9010_v4  ;;  %v9023_v16 = vand.u32 4294901760, %v141_v13  ;;  %v9025_v17 = vand.u32 4294901760, %v140_v14  ;;  %v9030_v19 = vsub.f32 %v150_v1, %v9010_v4  ;;  %v9032_v20 = vld [vmem:[#allocation5 + $0x108] sm:$0xff]  ;;  %v9034_v21 = vld [vmem:[#allocation5 + $0xf8] sm:$0xff] }
  0x21   :  { %v9027_v18 = vand.u32 4294901760, %v138_v15  ;;  %v9036_v22 = vld [vmem:[#allocation5 + $0xf0] sm:$0xff]  ;;  %155 = vmatpush1.msra.mxu0 %v9012_v5  ;;  %v9040_v23 = vand.u32 4294901760, %v9032_v20  ;;  %v9043_v24 = vsub.f32 %v149_v2, %v9012_v5  ;;  %v9046_v25 = vand.u32 4294901760, %v9034_v21  ;;  %v9051_v27 = vld [vmem:[#allocation5 + $0xe0] sm:$0xff]  ;;  %v9053_v28 = vld [vmem:[#allocation5 + $0xd8] sm:$0xff] }
  0x22   :  { %13637 = vst [vmem:[#allocation11_spill] sm:$0xff] %v9030_v19  ;;  %v9049_v26 = vsub.f32 %v147_v3, %v9014_v6  ;;  %v9055_v29 = vld [vmem:[#allocation5 + $0xc8] sm:$0xff]  ;;  %157 = vmatprep.subr.mxu0 %v9014_v6  ;;  %v12997_v30 = vand.u32 4294901760, %v9030_v19  ;;  %v9060_v31 = vand.u32 4294901760, %v9036_v22  ;;  %v9063_v32 = vsub.f32 %v146_v7, %v9016_v10  ;;  %v9077_v38 = vld [vmem:[#allocation5 + $0xc0] sm:$0xff]  ;;  %v9101_v47 = vld [vmem:[#allocation5 + $0xb0] sm:$0xff] }
  0x23   :  { %v9066_v33 = vand.u32 4294901760, %v9051_v27  ;;  %159 = vmatpush1.msra.mxu0 %v9016_v10  ;;  %v12996_v34 = vand.u32 4294901760, %v9043_v24  ;;  %v9072_v36 = vsub.f32 %v144_v8, %v9018_v11  ;;  %v9075_v37 = vand.u32 4294901760, %v9053_v28  ;;  %v9111_v52 = vld [vmem:[#allocation5 + $0xa8] sm:$0xff]  ;;  %v9118_v57 = vld [vmem:[#allocation5 + $0x98] sm:$0xff]  ;;  %v9130_v62 = vld [vmem:[#allocation5 + $0x90] sm:$0xff] }
  0x24   :  { %13638 = vst [vmem:[#allocation12_spill] sm:$0xff] %v9049_v26  ;;  %13639 = vst [vmem:[#allocation13_spill] sm:$0xff] %v9060_v31  ;;  %v12994_v35 = vand.u32 4294901760, %v9049_v26  ;;  %161 = vmatprep.subr.mxu0 %v9018_v11  ;;  %v956_v39 = vsub.f32 %v9030_v19, %v12997_v30  ;;  %v12992_v40 = vand.u32 4294901760, %v9063_v32  ;;  %v9085_v41 = vsub.f32 %v143_v9, %v9020_v12  ;;  %v9142_v7 = vld [vmem:[#allocation5 + $0x80] sm:$0xff]  ;;  %s8950_s23 = scalar_lea.vmem %s7642_s1, 24576 }
  0x25   :  { %13640 = vst [vmem:[#allocation14_spill] sm:$0xff] %v9066_v33  ;;  %13641 = vst [vmem:[#allocation15_spill] sm:$0xff] %v9075_v37  ;;  %v9088_v42 = vand.u32 4294901760, %v9055_v29  ;;  %163 = vmatpush1.msra.mxu0 %v9020_v12  ;;  %v962_v43 = vsub.f32 %v9043_v24, %v12996_v34  ;;  %v12991_v45 = vand.u32 4294901760, %v9072_v36  ;;  %v9099_v46 = vsub.f32 %v141_v13, %v9023_v16  ;;  %v9243_v34 = vld [vmem:[#allocation5 + $0x30] sm:$0xff]  ;;  %p8951_p10 = scmp.ne.s32.totalorder %s7642_s1, %s8950_s23  ;;  %p8956_p12 = scmp.lt.s32.totalorder %s8950_s23, %s8950_s23 }
  0x26   :  { %v968_v44 = vsub.f32 %v9049_v26, %v12994_v35  ;;  %165 = vmatprep.subr.mxu0 %v9023_v16  ;;  %v957_v48 = vand.u32 4294901760, %v956_v39  ;;  %v974_v49 = vsub.f32 %v9063_v32, %v12992_v40  ;;  %v12989_v50 = vand.u32 4294901760, %v9085_v41  ;;  %v9233_v35 = vld [vmem:[#allocation5 + $0x38] sm:$0xff] }
  0x27   :  { %13642 = vst [vmem:[#allocation16_spill] sm:$0xff] %v9088_v42  ;;  %v9109_v51 = vand.u32 4294901760, %v9077_v38  ;;  %167 = vmatpush1.msra.mxu0 %v9025_v17  ;;  %v963_v53 = vand.u32 4294901760, %v962_v43  ;;  %v980_v55 = vsub.f32 %v9072_v36, %v12991_v45  ;;  %v12987_v56 = vand.u32 4294901760, %v9099_v46  ;;  %v9220_v45 = vld [vmem:[#allocation5 + $0x48] sm:$0xff]  ;;  %p8957_p13 = por %p8956_p12, %p8955_p11 }
  0x28   :  { %v969_v54 = vand.u32 4294901760, %v968_v44  ;;  %169 = vmatprep.subr.mxu0 %v9027_v18  ;;  %958 = vmatprep.subr.mxu1 %v957_v48  ;;  %v975_v58 = vand.u32 4294901760, %v974_v49  ;;  %v986_v59 = vsub.f32 %v9085_v41, %v12989_v50  ;;  %v9125_v60 = vsub.f32 %v140_v14, %v9025_v17 }
  0x29   :  { %13643 = vst [vmem:[#allocation17_spill] sm:$0xff] %v9109_v51  ;;  %v9128_v61 = vand.u32 4294901760, %v9101_v47  ;;  %171 = vmatpush1.msra.mxu0 %v9040_v23  ;;  %964 = vmatpush1.msra.mxu1 %v963_v53  ;;  %v981_v63 = vand.u32 4294901760, %v980_v55  ;;  %v992_v1 = vsub.f32 %v9099_v46, %v12987_v56  ;;  %v9137_v2 = vsub.f32 %v138_v15, %v9027_v18  ;;  %v9153_v15 = vld [vmem:[#allocation5 + $0x78] sm:$0xff]  ;;  %p8958_p0 = pnand %p8957_p13, %p8951_p10 }
  0x2a   :  { %v9140_v3 = vand.u32 4294901760, %v9111_v52  ;;  %173 = vmatprep.subr.mxu0 %v9046_v25  ;;  %970 = vmatprep.subr.mxu1 %v969_v54  ;;  %v987_v8 = vand.u32 4294901760, %v986_v59  ;;  %v12986_v9 = vand.u32 4294901760, %v9125_v60  ;;  %v9148_v13 = vsub.f32 %v9032_v20, %v9040_v23 }
  0x2b   :  { %13644 = vst [vmem:[#allocation18_spill] sm:$0xff] %v9128_v61  ;;  %v9151_v14 = vand.u32 4294901760, %v9118_v57  ;;  %175 = vmatpush1.msra.mxu0 %v9060_v31  ;;  %976 = vmatpush1.msra.mxu1 %v975_v58  ;;  %v993_v39 = vand.u32 4294901760, %v992_v1  ;;  %v12985_v43 = vand.u32 4294901760, %v9137_v2  ;;  %v9159_v44 = vsub.f32 %v9034_v21, %v9046_v25  ;;  %v9176_v21 = vld [vmem:[#allocation5 + $0x68] sm:$0xff] }
  0x2c   :  { %13645 = vst [vmem:[#allocation19_spill] sm:$0xff] %v9140_v3  ;;  %v9162_v48 = vand.u32 4294901760, %v9130_v62  ;;  %177 = vmatprep.subr.mxu0 %v9066_v33  ;;  %982 = vmatprep.subr.mxu1 %v981_v63  ;;  %v998_v20 = vsub.f32 %v9125_v60, %v12986_v9  ;;  %v12988_v49 = vand.u32 4294901760, %v9148_v13  ;;  %v9171_v53 = vsub.f32 %v9036_v22, %v9060_v31  ;;  %v9199_v9 = vld [vmem:[#allocation5 + $0x60] sm:$0xff] }
  0x2d   :  { %13646 = vst [vmem:[#allocation20_spill] sm:$0xff] %v9151_v14  ;;  %v9174_v54 = vand.u32 4294901760, %v9142_v7  ;;  %179 = vmatpush1.msra.mxu0 %v9075_v37  ;;  %988 = vmatpush1.msra.mxu1 %v987_v8  ;;  %v1004_v55 = vsub.f32 %v9137_v2, %v12985_v43  ;;  %v12990_v58 = vand.u32 4294901760, %v9159_v44  ;;  %v9185_v59 = vsub.f32 %v9051_v27, %v9066_v33 }
  0x2e   :  { %13647 = vst [vmem:[#allocation21_spill] sm:$0xff] %v9162_v48  ;;  %v9188_v22 = vand.u32 4294901760, %v9153_v15  ;;  %181 = vmatprep.subr.mxu0 %v9088_v42  ;;  %994 = vmatprep.subr.mxu1 %v993_v39  ;;  %v999_v63 = vand.u32 4294901760, %v998_v20  ;;  %v1010_v1 = vsub.f32 %v9148_v13, %v12988_v49  ;;  %v12993_v8 = vand.u32 4294901760, %v9171_v53  ;;  %v9209_v49 = vld [vmem:[#allocation5 + $0x50] sm:$0xff] }
  0x2f   :  { %13648 = vst [vmem:[#allocation22_spill] sm:$0xff] %v9174_v54  ;;  %v9197_v43 = vsub.f32 %v9053_v28, %v9075_v37  ;;  %183 = vmatpush1.msra.mxu0 %v9109_v51  ;;  %v1005_v27 = vand.u32 4294901760, %v1004_v55  ;;  %v1016_v39 = vsub.f32 %v9159_v44, %v12990_v58  ;;  %v12995_v20 = vand.u32 4294901760, %v9185_v59 }
  0x30   :  { %13649 = vst [vmem:[#allocation23_spill] sm:$0xff] %v9188_v22  ;;  %v9207_v56 = vand.u32 4294901760, %v9176_v21  ;;  %1000 = vmatpush1.msra.mxu1 %v999_v63  ;;  %185 = vmatprep.subr.mxu0 %v9128_v61  ;;  %v1011_v28 = vand.u32 4294901760, %v1010_v1  ;;  %v1022_v50 = vsub.f32 %v9171_v53, %v12993_v8  ;;  %v9218_v58 = vsub.f32 %v9055_v29, %v9088_v42 }
  0x31   :  { %v12998_v55 = vand.u32 4294901760, %v9197_v43  ;;  %1006 = vmatprep.subr.mxu1 %v1005_v27  ;;  %187 = vmatpush1.msra.mxu0 %v9140_v3  ;;  %v1017_v40 = vand.u32 4294901760, %v1016_v39  ;;  %v1028_v63 = vsub.f32 %v9185_v59, %v12995_v20  ;;  %v9227_v1 = vand.u32 4294901760, %v9199_v9 }
  0x32   :  { %13650 = vst [vmem:[#allocation24_spill] sm:$0xff] %v9207_v56  ;;  %v9231_v8 = vsub.f32 %v9077_v38, %v9109_v51  ;;  %1012 = vmatpush1.msra.mxu1 %v1011_v28  ;;  %189 = vmatprep.subr.mxu0 %v9151_v14  ;;  %v1023_v29 = vand.u32 4294901760, %v1022_v50  ;;  %v13003_v39 = vand.u32 4294901760, %v9218_v58  ;;  %v9241_v20 = vand.u32 4294901760, %v9209_v49 }
  0x33   :  { %13651 = vst [vmem:[#allocation25_spill] sm:$0xff] %v9227_v1  ;;  %v1034_v27 = vsub.f32 %v9197_v43, %v12998_v55  ;;  %1018 = vmatprep.subr.mxu1 %v1017_v40  ;;  %191 = vmatpush1.msra.mxu0 %v9162_v48  ;;  %v1029_v38 = vand.u32 4294901760, %v1028_v63  ;;  %v9249_v50 = vsub.f32 %v9101_v47, %v9128_v61  ;;  %v9252_v30 = vand.u32 4294901760, %v9220_v45  ;;  %v9254_v55 = vld [vmem:[#allocation5 + $0x20] sm:$0xff] }
  0x34   :  { %13652 = vst [vmem:[#allocation26_spill] sm:$0xff] %v9241_v20  ;;  %v13006_v28 = vand.u32 4294901760, %v9231_v8  ;;  %1024 = vmatpush1.msra.mxu1 %v1023_v29  ;;  %193 = vmatprep.subr.mxu0 %v9174_v54  ;;  %v1040_v40 = vsub.f32 %v9218_v58, %v13003_v39  ;;  %v9262_v63 = vsub.f32 %v9111_v52, %v9140_v3  ;;  %v9265_v47 = vand.u32 4294901760, %v9233_v35  ;;  %v9279_v52 = vld [vmem:[#allocation5 + $0x18] sm:$0xff] }
  0x35   :  { %13653 = vst [vmem:[#allocation27_spill] sm:$0xff] %v9252_v30  ;;  %v1035_v0 = vand.u32 4294901760, %v1034_v27  ;;  %1030 = vmatprep.subr.mxu1 %v1029_v38  ;;  %195 = vmatpush1.msra.mxu0 %v9188_v22  ;;  %v9274_v61 = vsub.f32 %v9118_v57, %v9151_v14  ;;  %v9277_v39 = vand.u32 4294901760, %v9243_v34  ;;  %v9288_v27 = vand.u32 4294901760, %v9254_v55  ;;  %v9290_v57 = vld [vmem:[#allocation5 + $0x8] sm:$0xff] }
  0x36   :  { %13654 = vst [vmem:[#allocation28_spill] sm:$0xff] %v9262_v63  ;;  %13655 = vst [vmem:[#allocation29_spill] sm:$0xff] %v9265_v47  ;;  %v1046_v29 = vsub.f32 %v9231_v8, %v13006_v28  ;;  %197 = vmatprep.subr.mxu0 %v9207_v56  ;;  %v1041_v38 = vand.u32 4294901760, %v1040_v40  ;;  %v9285_v28 = vsub.f32 %v9130_v62, %v9162_v48  ;;  %v13659_v51 = vand.u32 4294901760, %v9249_v50  ;;  %v9313_v40 = vld [vmem:[#allocation5] sm:$0xff] }
  0x37   :  { %13656 = vst [vmem:[#allocation30_spill] sm:$0xff] %v9274_v61  ;;  %13657 = vst [vmem:[#allocation31_spill] sm:$0xff] %v9277_v39  ;;  %1036 = vmatpush1.msra.mxu1 %v1035_v0  ;;  %199 = vmatpush1.msra.mxu0 %v9227_v1  ;;  %v9299_v3 = vsub.f32 %v9142_v7, %v9174_v54  ;;  %v13661_v62 = vand.u32 4294901760, %v9262_v63  ;;  %v9321_v42 = vand.u32 4294901760, %v9290_v57 }
  0x38   :  { %13658 = vst [vmem:[#allocation32_spill] sm:$0xff] %v9288_v27  ;;  %v1047_v14 = vand.u32 4294901760, %v1046_v29  ;;  %v1052_v0 = vsub.f32 %v9249_v50, %v13659_v51  ;;  %1042 = vmatprep.subr.mxu1 %v1041_v38  ;;  %201 = vmatprep.subr.mxu0 %v9241_v20  ;;  %v9307_v29 = vand.u32 4294901760, %v9279_v52  ;;  %v9311_v51 = vsub.f32 %v9153_v15, %v9188_v22 }
  0x39   :  { %13660 = vst [vmem:[#allocation33_spill] sm:$0xff] %v9299_v3  ;;  %v1058_v48 = vsub.f32 %v9262_v63, %v13661_v62  ;;  %203 = vmatpush1.msra.mxu0 %v9252_v30  ;;  %v13663_v38 = vand.u32 4294901760, %v9274_v61  ;;  %v13027_v62 = vand.u32 4294901760, %v9299_v3  ;;  %13664 = vst [vmem:[#allocation35_spill] sm:$0xff] %v9321_v42  ;;  %v40_v63 = vld [vmem:[#allocation2] sm:$0xff]  ;;  %v13665_v15 = vand.u32 4294901760, %v9285_v28 }
  0x3a   :  { %13662 = vst [vmem:[#allocation34_spill] sm:$0xff] %v9307_v29  ;;  %1048 = vmatpush1.msra.mxu1 %v1047_v14  ;;  %v1053_v7 = vand.u32 4294901760, %v1052_v0  ;;  %205 = vmatprep.subr.mxu0 %v9265_v47  ;;  %v9330_v22 = vsub.f32 %v9176_v21, %v9207_v56  ;;  %v13667_v21 = vand.u32 4294901760, %v9311_v51  ;;  %v9348_v56 = vand.u32 4294901760, %v40_v63 }
  0x3b   :  { %v1064_v54 = vsub.f32 %v9274_v61, %v13663_v38  ;;  %v1059_v37 = vand.u32 4294901760, %v1058_v48  ;;  %v1070_v14 = vsub.f32 %v9285_v28, %v13665_v15  ;;  %207 = vmatpush1.msra.mxu0 %v9277_v39  ;;  %v1076_v48 = vsub.f32 %v9299_v3, %v13027_v62 }
  0x3c   :  { %1054 = vmatprep.subr.mxu1 %v1053_v7  ;;  %v9337_v61 = vand.u32 4294901760, %v9313_v40  ;;  %v9341_v15 = vsub.f32 %v9199_v9, %v9227_v1  ;;  %209 = vmatprep.subr.mxu0 %v9288_v27  ;;  %v13030_v7 = vand.u32 4294901760, %v9330_v22  ;;  %13668 = vst [vmem:[#allocation37_spill] sm:$0xff] %v9348_v56  ;;  %v9358_v9 = vsub.f32 %v9220_v45, %v9252_v30 }
  0x3d   :  { %v1065_v38 = vand.u32 4294901760, %v1064_v54  ;;  %1060 = vmatpush1.msra.mxu1 %v1059_v37  ;;  %v1071_v0 = vand.u32 4294901760, %v1070_v14  ;;  %v1082_v54 = vsub.f32 %v9311_v51, %v13667_v21  ;;  %v1077_v62 = vand.u32 4294901760, %v1076_v48  ;;  %211 = vmatpush1.msra.mxu0 %v9307_v29  ;;  %v41_v14 = vld [vmem:[#allocation2 + $0x8] sm:$0xff] }
  0x3e   :  { %13666 = vst [vmem:[#allocation36_spill] sm:$0xff] %v9337_v61  ;;  %v13033_v3 = vand.u32 4294901760, %v9341_v15  ;;  %v9354_v37 = vsub.f32 %v9209_v49, %v9241_v20  ;;  %13670 = vst [vmem:[#allocation39_spill] sm:$0xff] %v9358_v9  ;;  %213 = vmatprep.subr.mxu0 %v9321_v42  ;;  %v9365_v48 = vsub.f32 %v40_v63, %v9348_v56  ;;  %v13676_v30 = vand.u32 4294901760, %v9358_v9 }
  0x3f   :  { %1066 = vmatprep.subr.mxu1 %v1065_v38  ;;  %v1083_v21 = vand.u32 4294901760, %v1082_v54  ;;  %v1088_v38 = vsub.f32 %v9330_v22, %v13030_v7  ;;  %v9369_v49 = vsub.f32 %v9233_v35, %v9265_v47  ;;  %215 = vmatpush1.msra.mxu0 %v9337_v61  ;;  %v9379_v7 = vsub.f32 %v9243_v34, %v9277_v39 }
  0x40   :  { %13669 = vst [vmem:[#allocation38_spill] sm:$0xff] %v9354_v37  ;;  %1072 = vmatpush1.msra.mxu1 %v1071_v0  ;;  %13671 = vst [vmem:[#allocation40_spill] sm:$0xff] %v9365_v48  ;;  %v1094_v45 = vsub.f32 %v9341_v15, %v13033_v3  ;;  %v13038_v0 = vand.u32 4294901760, %v9354_v37  ;;  %v9382_v35 = vand.u32 4294901760, %v9365_v48  ;;  %v9385_v47 = vand.u32 4294901760, %v41_v14  ;;  %1628 = vmatprep.subr.mxu0 %v9030_v19 }
  0x41   :  { %13672 = vst [vmem:[#allocation41_spill] sm:$0xff] %v9369_v49  ;;  %1078 = vmatprep.subr.mxu1 %v1077_v62  ;;  %13673 = vst [vmem:[#allocation42_spill] sm:$0xff] %v9379_v7  ;;  %v1089_v63 = vand.u32 4294901760, %v1088_v38  ;;  %v13044_v62 = vand.u32 4294901760, %v9369_v49  ;;  %v1106_v34 = vsub.f32 %v9358_v9, %v13676_v30 }
  0x42   :  { %1084 = vmatpush1.msra.mxu1 %v1083_v21  ;;  %13674 = vst [vmem:[#allocation43_spill] sm:$0xff] %v9382_v35  ;;  %13675 = vst [vmem:[#allocation44_spill] sm:$0xff] %v9385_v47  ;;  %v1095_v3 = vand.u32 4294901760, %v1094_v45  ;;  %v1100_v54 = vsub.f32 %v9354_v37, %v13038_v0  ;;  %v13049_v21 = vand.u32 4294901760, %v9379_v7  ;;  %v252_v38 = vsub.f32 %v9365_v48, %v9382_v35  ;;  %v42_v48 = vld [vmem:[#allocation2 + $0x10] sm:$0xff] }
  0x43   :  { %1090 = vmatprep.subr.mxu1 %v1089_v63  ;;  %v1112_v39 = vsub.f32 %v9369_v49, %v13044_v62  ;;  %v9401_v45 = vsub.f32 %v41_v14, %v9385_v47  ;;  %v9405_v0 = vsub.f32 %v9254_v55, %v9288_v27  ;;  %v1107_v30 = vand.u32 4294901760, %v1106_v34  ;;  %v43_v62 = vld [vmem:[#allocation2 + $0x18] sm:$0xff]  ;;  %v44_v55 = vld [vmem:[#allocation2 + $0x20] sm:$0xff] }
  0x44   :  { %1096 = vmatpush1.msra.mxu1 %v1095_v3  ;;  %v1101_v19 = vand.u32 4294901760, %v1100_v54  ;;  %v1118_v63 = vsub.f32 %v9379_v7, %v13049_v21  ;;  %v9412_v35 = vsub.f32 %v9279_v52, %v9307_v29  ;;  %v9414_v20 = vand.u32 4294901760, %v252_v38 }
  0x45   :  { %13677 = vst [vmem:[#allocation45_spill] sm:$0xff] %v9401_v45  ;;  %13678 = vst [vmem:[#allocation46_spill] sm:$0xff] %v9405_v0  ;;  %v1113_v14 = vand.u32 4294901760, %v1112_v39  ;;  %v9417_v1 = vand.u32 4294901760, %v9401_v45  ;;  %v13055_v3 = vand.u32 4294901760, %v9405_v0  ;;  %v9423_v21 = vsub.f32 %v9290_v57, %v9321_v42 }
  0x46   :  { %13679 = vst [vmem:[#allocation47_spill] sm:$0xff] %v9412_v35  ;;  %13680 = vst [vmem:[#allocation48_spill] sm:$0xff] %v9414_v20  ;;  %1102 = vmatprep.subr.mxu1 %v1101_v19  ;;  %v1119_v54 = vand.u32 4294901760, %v1118_v63  ;;  %v13060_v34 = vand.u32 4294901760, %v9412_v35  ;;  %v9427_v52 = vsub.f32 %v9313_v40, %v9337_v61  ;;  %254 = vmatmul.mubr.f32.vlgmr.msra.gmra.mxu0 %v9414_v20  ;;  %v9435_v38 = vand.u32 4294901760, %v42_v48 }
  0x47   :  { %13681 = vst [vmem:[#allocation49_spill] sm:$0xff] %v9417_v1  ;;  %13682 = vst [vmem:[#allocation50_spill] sm:$0xff] %v9423_v21  ;;  %1108 = vmatpush1.msra.mxu1 %v1107_v30  ;;  %v263_v39 = vsub.f32 %v9401_v45, %v9417_v1  ;;  %v1124_v19 = vsub.f32 %v9405_v0, %v13055_v3  ;;  %v9437_v63 = vand.u32 4294901760, %v43_v62  ;;  %v13686_v57 = vmov 0.0   ;;  %v45_v45 = vld [vmem:[#allocation2 + $0x28] sm:$0xff]  ;;  %1631 = vmatpush1.msra.mxu0 %v9043_v24 }
  0x48   :  { %13683 = vst [vmem:[#allocation51_spill] sm:$0xff] %v9427_v52  ;;  %13684 = vst [vmem:[#allocation52_spill] sm:$0xff] %v9435_v38  ;;  %1114 = vmatprep.subr.mxu1 %v1113_v14  ;;  %259 = vmatprep.mubr.f32.mxu0 %v13686_v57  ;;  %v1130_v40 = vsub.f32 %v9412_v35, %v13060_v34  ;;  %v13065_v30 = vand.u32 4294901760, %v9423_v21  ;;  %v9445_v1 = vand.u32 4294901760, %v44_v55  ;;  %v46_v34 = vld [vmem:[#allocation2 + $0x30] sm:$0xff]  ;;  %v13691_v27 = vand.u32 4294901760, %v9427_v52 }
  0x49   :  { %13685 = vst [vmem:[#allocation53_spill] sm:$0xff] %v9437_v63  ;;  %1120 = vmatpush1.msra.mxu1 %v1119_v54  ;;  %v9447_v3 = vand.u32 4294901760, %v263_v39  ;;  %v1125_v61 = vand.u32 4294901760, %v1124_v19  ;;  %v9451_v14 = vsub.f32 %v42_v48, %v9435_v38  ;;  %v9454_v42 = vsub.f32 %v43_v62, %v9437_v63  ;;  %1634 = vmatprep.subr.mxu0 %v9049_v26 }
  0x4a   :  { %13687 = vst [vmem:[#allocation54_spill] sm:$0xff] %v9445_v1  ;;  %v1131_v29 = vand.u32 4294901760, %v1130_v40  ;;  %v1136_v20 = vsub.f32 %v9423_v21, %v13065_v30  ;;  %v1142_v54 = vsub.f32 %v9427_v52, %v13691_v27  ;;  %v9463_v39 = vsub.f32 %v44_v55, %v9445_v1  ;;  %1637 = vmatpush1.msra.mxu0 %v9063_v32 }
  0x4b   :  { %13688 = vst [vmem:[#allocation55_spill] sm:$0xff] %v9447_v3  ;;  %13689 = vst [vmem:[#allocation56_spill] sm:$0xff] %v9451_v14  ;;  %265 = vmatmul.mubr.f32.gmra.mxu0 %v9447_v3  ;;  %1126 = vmatprep.subr.mxu1 %v1125_v61  ;;  %v9468_v48 = vand.u32 4294901760, %v9451_v14  ;;  %v9471_v62 = vand.u32 4294901760, %v9454_v42  ;;  %v9473_v19 = vand.u32 4294901760, %v45_v45  ;;  %v9476_v55 = vand.u32 4294901760, %v46_v34 }
  0x4c   :  { %13690 = vst [vmem:[#allocation57_spill] sm:$0xff] %v9454_v42  ;;  %13692 = vst [vmem:[#allocation58_spill] sm:$0xff] %v9463_v39  ;;  %1132 = vmatpush1.msra.mxu1 %v1131_v29  ;;  %v1137_v40 = vand.u32 4294901760, %v1136_v20  ;;  %270 = vmatprep.mubr.f32.mxu0 %v13686_v57  ;;  %v1143_v27 = vand.u32 4294901760, %v1142_v54  ;;  %v9483_v3 = vand.u32 4294901760, %v9463_v39  ;;  %v47_v20 = vld [vmem:[#allocation2 + $0x38] sm:$0xff] }
  0x4d   :  { %13693 = vst [vmem:[#allocation59_spill] sm:$0xff] %v9468_v48  ;;  %13694 = vst [vmem:[#allocation60_spill] sm:$0xff] %v9471_v62  ;;  %v274_v30 = vsub.f32 %v9451_v14, %v9468_v48  ;;  %v285_v61 = vsub.f32 %v9454_v42, %v9471_v62  ;;  %v9486_v26 = vsub.f32 %v45_v45, %v9473_v19  ;;  %1640 = vmatprep.subr.mxu0 %v9072_v36 }
  0x4e   :  { %13695 = vst [vmem:[#allocation61_spill] sm:$0xff] %v9473_v19  ;;  %13696 = vst [vmem:[#allocation62_spill] sm:$0xff] %v9476_v55  ;;  %1138 = vmatprep.subr.mxu1 %v1137_v40  ;;  %1643 = vmatpush1.msra.mxu0 %v9085_v41  ;;  %v9495_v54 = vand.u32 4294901760, %v47_v20  ;;  %v296_v40 = vsub.f32 %v9463_v39, %v9483_v3 }
  0x4f   :  { %13697 = vst [vmem:[#allocation63_spill] sm:$0xff] %v9483_v3  ;;  %13698 = vst [vmem:[#allocation64_spill] sm:$0xff] %v9486_v26  ;;  %1144 = vmatpush1.msra.mxu1 %v1143_v27  ;;  %v9490_v29 = vand.u32 4294901760, %v274_v30  ;;  %v9499_v45 = vand.u32 4294901760, %v285_v61  ;;  %v9504_v30 = vand.u32 4294901760, %v9486_v26  ;;  %v9507_v27 = vsub.f32 %v46_v34, %v9476_v55  ;;  %1646 = vmatprep.subr.mxu0 %v9099_v46 }
  0x50   :  { %1179 = vmatmul.mubr.f32.vlgmr.msra.gmra.mxu1 %v9348_v56  ;;  %2268 = vmatprep.subr.mxu1 %v9010_v4  ;;  %13700 = vst [vmem:[#allocation66_spill] sm:$0xff] %v9495_v54  ;;  %v48_v56 = vld [vmem:[#allocation2 + $0x40] sm:$0xff]  ;;  %v9515_v61 = vsub.f32 %v47_v20, %v9495_v54  ;;  %v9520_v34 = vand.u32 4294901760, %v296_v40 }
  0x51   :  { %13699 = vst [vmem:[#allocation65_spill] sm:$0xff] %v9490_v29  ;;  %276 = vmatmul.mubr.f32.gmra.mxu0 %v9490_v29  ;;  %2270 = vmatpush1.msra.mxu1 %v9012_v5  ;;  %13701 = vst [vmem:[#allocation67_spill] sm:$0xff] %v9499_v45  ;;  %v307_v29 = vsub.f32 %v9486_v26, %v9504_v30  ;;  %v9525_v3 = vand.u32 4294901760, %v9507_v27  ;;  %v9527_v62 = vand.u32 4294901760, %v48_v56 }
  0x52   :  { %13702 = vst [vmem:[#allocation68_spill] sm:$0xff] %v9504_v30  ;;  %13703 = vst [vmem:[#allocation69_spill] sm:$0xff] %v9507_v27  ;;  %281 = vmatprep.mubr.f32.mxu0 %v13686_v57  ;;  %1184 = vmatprep.mubr.f32.mxu1 %v13686_v57  ;;  %v9543_v30 = vand.u32 4294901760, %v9515_v61 }
  0x53   :  { %2272 = vmatprep.subr.mxu1 %v9014_v6  ;;  %13704 = vst [vmem:[#allocation70_spill] sm:$0xff] %v9515_v61  ;;  %1649 = vmatpush1.msra.mxu0 %v9125_v60  ;;  %13705 = vst [vmem:[#allocation71_spill] sm:$0xff] %v9520_v34  ;;  %v9538_v40 = vand.u32 4294901760, %v307_v29  ;;  %v9546_v26 = vsub.f32 %v48_v56, %v9527_v62 }
  0x54   :  { %1186 = vmatmul.mubr.f32.gmra.mxu1 %v9385_v47  ;;  %13706 = vst [vmem:[#allocation72_spill] sm:$0xff] %v9525_v3  ;;  %13707 = vst [vmem:[#allocation73_spill] sm:$0xff] %v9527_v62  ;;  %v49_v47 = vld [vmem:[#allocation2 + $0x48] sm:$0xff]  ;;  %1652 = vmatprep.subr.mxu0 %v9137_v2 }
  0x55   :  { %287 = vmatmul.mubr.f32.gmra.mxu0 %v9499_v45  ;;  %1191 = vmatprep.mubr.f32.mxu1 %v13686_v57  ;;  %v9533_v20 = vand.u32 4294901760, %v49_v47  ;;  %13709 = vst [vmem:[#allocation75_spill] sm:$0xff] %v9538_v40  ;;  %v318_v45 = vsub.f32 %v9507_v27, %v9525_v3  ;;  %13710 = vst [vmem:[#allocation76_spill] sm:$0xff] %v9543_v30  ;;  %v9564_v3 = vand.u32 4294901760, %v9546_v26 }
  0x56   :  { %292 = vmatprep.mubr.f32.mxu0 %v13686_v57  ;;  %2274 = vmatpush1.msra.mxu1 %v9016_v10  ;;  %13711 = vst [vmem:[#allocation77_spill] sm:$0xff] %v9546_v26 }
  0x57   :  { %2276 = vmatprep.subr.mxu1 %v9018_v11  ;;  %13708 = vst [vmem:[#allocation74_spill] sm:$0xff] %v9533_v20  ;;  %1655 = vmatpush1.msra.mxu0 %v9148_v13  ;;  %v9554_v29 = vsub.f32 %v49_v47, %v9533_v20  ;;  %v9559_v56 = vand.u32 4294901760, %v318_v45  ;;  %13714 = vst [vmem:[#allocation80_spill] sm:$0xff] %v9564_v3 }
  0x58   :  { %1193 = vmatmul.mubr.f32.gmra.mxu1 %v9435_v38  ;;  %v50_v38 = vld [vmem:[#allocation2 + $0x50] sm:$0xff]  ;;  %1658 = vmatprep.subr.mxu0 %v9159_v44 }
  0x59   :  { %298 = vmatmul.mubr.f32.gmra.mxu0 %v9520_v34  ;;  %1198 = vmatprep.mubr.f32.mxu1 %v13686_v57  ;;  %13712 = vst [vmem:[#allocation78_spill] sm:$0xff] %v9554_v29  ;;  %13713 = vst [vmem:[#allocation79_spill] sm:$0xff] %v9559_v56  ;;  %v329_v34 = vsub.f32 %v9515_v61, %v9543_v30  ;;  %v9566_v27 = vand.u32 4294901760, %v50_v38  ;;  %v9583_v30 = vand.u32 4294901760, %v9554_v29 }
  0x5a   :  { %303 = vmatprep.mubr.f32.mxu0 %v13686_v57  ;;  %2278 = vmatpush1.msra.mxu1 %v9020_v12 }
  0x5b   :  { %2280 = vmatprep.subr.mxu1 %v9023_v16  ;;  %13715 = vst [vmem:[#allocation81_spill] sm:$0xff] %v9566_v27  ;;  %1661 = vmatpush1.msra.mxu0 %v9171_v53  ;;  %v9578_v45 = vand.u32 4294901760, %v329_v34  ;;  %13718 = vst [vmem:[#allocation84_spill] sm:$0xff] %v9583_v30  ;;  %v9586_v61 = vsub.f32 %v50_v38, %v9566_v27 }
  0x5c   :  { %1200 = vmatmul.mubr.f32.gmra.mxu1 %v9437_v63  ;;  %v51_v63 = vld [vmem:[#allocation2 + $0x58] sm:$0xff]  ;;  %1664 = vmatprep.subr.mxu0 %v9185_v59 }
  0x5d   :  { %309 = vmatmul.mubr.f32.gmra.mxu0 %v9538_v40  ;;  %1205 = vmatprep.mubr.f32.mxu1 %v13686_v57  ;;  %v9573_v47 = vand.u32 4294901760, %v51_v63  ;;  %13717 = vst [vmem:[#allocation83_spill] sm:$0xff] %v9578_v45  ;;  %v340_v40 = vsub.f32 %v9546_v26, %v9564_v3  ;;  %13719 = vst [vmem:[#allocation85_spill] sm:$0xff] %v9586_v61  ;;  %v9603_v3 = vand.u32 4294901760, %v9586_v61 }
  0x5e   :  { %314 = vmatprep.mubr.f32.mxu0 %v13686_v57  ;;  %2282 = vmatpush1.msra.mxu1 %v9025_v17 }
  0x5f   :  { %2284 = vmatprep.subr.mxu1 %v9027_v18  ;;  %13716 = vst [vmem:[#allocation82_spill] sm:$0xff] %v9573_v47  ;;  %1667 = vmatpush1.msra.mxu0 %v9197_v43  ;;  %v9598_v38 = vand.u32 4294901760, %v340_v40  ;;  %13722 = vst [vmem:[#allocation88_spill] sm:$0xff] %v9603_v3  ;;  %v9606_v26 = vsub.f32 %v51_v63, %v9573_v47 }
  0x60   :  { %1207 = vmatmul.mubr.f32.gmra.mxu1 %v9445_v1  ;;  %v52_v1 = vld [vmem:[#allocation2 + $0x60] sm:$0xff]  ;;  %1670 = vmatprep.subr.mxu0 %v9218_v58 }
  0x61   :  { %320 = vmatmul.mubr.f32.gmra.mxu0 %v9559_v56  ;;  %1212 = vmatprep.mubr.f32.mxu1 %v13686_v57  ;;  %v9593_v34 = vand.u32 4294901760, %v52_v1  ;;  %13721 = vst [vmem:[#allocation87_spill] sm:$0xff] %v9598_v38  ;;  %v351_v56 = vsub.f32 %v9554_v29, %v9583_v30  ;;  %13723 = vst [vmem:[#allocation89_spill] sm:$0xff] %v9606_v26  ;;  %v9624_v30 = vand.u32 4294901760, %v9606_v26 }
  0x62   :  { %325 = vmatprep.mubr.f32.mxu0 %v13686_v57  ;;  %2286 = vmatpush1.msra.mxu1 %v9040_v23 }
  0x63   :  { %2288 = vmatprep.subr.mxu1 %v9046_v25  ;;  %13720 = vst [vmem:[#allocation86_spill] sm:$0xff] %v9593_v34  ;;  %1673 = vmatpush1.msra.mxu0 %v9231_v8  ;;  %v9614_v40 = vsub.f32 %v52_v1, %v9593_v34  ;;  %v9619_v63 = vand.u32 4294901760, %v351_v56  ;;  %13726 = vst [vmem:[#allocation92_spill] sm:$0xff] %v9624_v30  ;;  %v13728_v1 = vld [vmem:[#allocation15_spill] sm:$0xff] }
  0x64   :  { %1214 = vmatmul.mubr.f32.gmra.mxu1 %v9473_v19  ;;  %v53_v19 = vld [vmem:[#allocation2 + $0x68] sm:$0xff]  ;;  %1676 = vmatprep.subr.mxu0 %v9249_v50 }
  0x65   :  { %331 = vmatmul.mubr.f32.gmra.mxu0 %v9578_v45  ;;  %1219 = vmatprep.mubr.f32.mxu1 %v13686_v57  ;;  %13724 = vst [vmem:[#allocation90_spill] sm:$0xff] %v9614_v40  ;;  %13725 = vst [vmem:[#allocation91_spill] sm:$0xff] %v9619_v63  ;;  %v362_v45 = vsub.f32 %v9586_v61, %v9603_v3  ;;  %v9626_v29 = vand.u32 4294901760, %v53_v19  ;;  %v373_v61 = vsub.f32 %v9606_v26, %v9624_v30 }
  0x66   :  { %336 = vmatprep.mubr.f32.mxu0 %v13686_v57  ;;  %2290 = vmatpush1.msra.mxu1 %v9060_v31  ;;  %v13732_v31 = vld [vmem:[#allocation30_spill] sm:$0xff] }
  0x67   :  { %2292 = vmatprep.subr.mxu1 %v9066_v33  ;;  %13727 = vst [vmem:[#allocation93_spill] sm:$0xff] %v9626_v29  ;;  %v13729_v33 = vld [vmem:[#allocation16_spill] sm:$0xff]  ;;  %v9638_v3 = vand.u32 4294901760, %v362_v45 }
  0x68   :  { %1221 = vmatmul.mubr.f32.gmra.mxu1 %v9476_v55  ;;  %v54_v55 = vld [vmem:[#allocation2 + $0x70] sm:$0xff] }
  0x69   :  { %342 = vmatmul.mubr.f32.gmra.mxu0 %v9598_v38  ;;  %1226 = vmatprep.mubr.f32.mxu1 %v13686_v57  ;;  %v13730_v38 = vld [vmem:[#allocation28_spill] sm:$0xff]  ;;  %v9633_v56 = vand.u32 4294901760, %v54_v55  ;;  %13733 = vst [vmem:[#allocation95_spill] sm:$0xff] %v9638_v3 }
  0x6a   :  { %347 = vmatprep.mubr.f32.mxu0 %v13686_v57  ;;  %2294 = vmatpush1.msra.mxu1 %v13728_v1  ;;  %v9643_v1 = vand.u32 4294901760, %v9614_v40 }
  0x6b   :  { %2296 = vmatprep.subr.mxu1 %v13729_v33  ;;  %1679 = vmatpush1.msra.mxu0 %v13730_v38  ;;  %13731 = vst [vmem:[#allocation94_spill] sm:$0xff] %v9633_v56  ;;  %v9646_v33 = vsub.f32 %v53_v19, %v9626_v29  ;;  %v13736_v38 = vld [vmem:[#allocation17_spill] sm:$0xff]  ;;  %v9658_v19 = vand.u32 4294901760, %v373_v61 }
  0x6c   :  { %1228 = vmatmul.mubr.f32.gmra.mxu1 %v9495_v54  ;;  %1682 = vmatprep.subr.mxu0 %v13732_v31  ;;  %13734 = vst [vmem:[#allocation96_spill] sm:$0xff] %v9643_v1  ;;  %v55_v54 = vld [vmem:[#allocation2 + $0x78] sm:$0xff]  ;;  %v384_v30 = vsub.f32 %v9614_v40, %v9643_v1 }
  0x6d   :  { %353 = vmatmul.mubr.f32.gmra.mxu0 %v9619_v63  ;;  %1233 = vmatprep.mubr.f32.mxu1 %v13686_v57  ;;  %13735 = vst [vmem:[#allocation97_spill] sm:$0xff] %v9646_v33  ;;  %v13737_v31 = vld [vmem:[#allocation18_spill] sm:$0xff]  ;;  %v9653_v45 = vand.u32 4294901760, %v55_v54  ;;  %v13739_v63 = vld [vmem:[#allocation33_spill] sm:$0xff]  ;;  %13740 = vst [vmem:[#allocation99_spill] sm:$0xff] %v9658_v19  ;;  %v9663_v26 = vand.u32 4294901760, %v9646_v33 }
  0x6e   :  { %358 = vmatprep.mubr.f32.mxu0 %v13686_v57  ;;  %2298 = vmatpush1.msra.mxu1 %v13736_v38  ;;  %v13743_v38 = vld [vmem:[#allocation19_spill] sm:$0xff] }
  0x6f   :  { %2300 = vmatprep.subr.mxu1 %v13737_v31  ;;  %1685 = vmatpush1.msra.mxu0 %v9285_v28  ;;  %13738 = vst [vmem:[#allocation98_spill] sm:$0xff] %v9653_v45  ;;  %13741 = vst [vmem:[#allocation100_spill] sm:$0xff] %v9663_v26  ;;  %v9666_v31 = vsub.f32 %v54_v55, %v9633_v56  ;;  %v9674_v61 = vsub.f32 %v55_v54, %v9653_v45  ;;  %v9679_v55 = vand.u32 4294901760, %v384_v30  ;;  %v13749_v54 = vld [vmem:[#allocation21_spill] sm:$0xff] }
  0x70   :  { %1235 = vmatmul.mubr.f32.gmra.mxu1 %v9527_v62  ;;  %1688 = vmatprep.subr.mxu0 %v13739_v63  ;;  %v56_v62 = vld [vmem:[#allocation2 + $0x80] sm:$0xff]  ;;  %v13744_v63 = vld [vmem:[#allocation20_spill] sm:$0xff] }
  0x71   :  { %364 = vmatmul.mubr.f32.gmra.mxu0 %v9638_v3  ;;  %1240 = vmatprep.mubr.f32.mxu1 %v13686_v57  ;;  %13742 = vst [vmem:[#allocation101_spill] sm:$0xff] %v9666_v31  ;;  %13745 = vst [vmem:[#allocation19_spill] sm:$0xff] %v9674_v61  ;;  %v395_v3 = vsub.f32 %v9646_v33, %v9663_v26  ;;  %v9684_v1 = vand.u32 4294901760, %v9666_v31  ;;  %v9686_v40 = vand.u32 4294901760, %v56_v62  ;;  %v9703_v33 = vand.u32 4294901760, %v9674_v61 }
  0x72   :  { %369 = vmatprep.mubr.f32.mxu0 %v13686_v57  ;;  %2302 = vmatpush1.msra.mxu1 %v13743_v38  ;;  %13746 = vst [vmem:[#allocation102_spill] sm:$0xff] %v9679_v55 }
  0x73   :  { %2304 = vmatprep.subr.mxu1 %v13744_v63  ;;  %1691 = vmatpush1.msra.mxu0 %v9311_v51  ;;  %13747 = vst [vmem:[#allocation103_spill] sm:$0xff] %v9684_v1  ;;  %13748 = vst [vmem:[#allocation104_spill] sm:$0xff] %v9686_v40  ;;  %v13750_v63 = vld [vmem:[#allocation22_spill] sm:$0xff]  ;;  %v406_v26 = vsub.f32 %v9666_v31, %v9684_v1 }
  0x74   :  { %1242 = vmatmul.mubr.f32.gmra.mxu1 %v9533_v20  ;;  %1694 = vmatprep.subr.mxu0 %v9330_v22  ;;  %v57_v20 = vld [vmem:[#allocation2 + $0x88] sm:$0xff]  ;;  %13753 = vst [vmem:[#allocation107_spill] sm:$0xff] %v9703_v33 }
  0x75   :  { %375 = vmatmul.mubr.f32.gmra.mxu0 %v9658_v19  ;;  %1247 = vmatprep.mubr.f32.mxu1 %v13686_v57  ;;  %v9693_v30 = vand.u32 4294901760, %v57_v20  ;;  %v9698_v19 = vand.u32 4294901760, %v395_v3 }
  0x76   :  { %380 = vmatprep.mubr.f32.mxu0 %v13686_v57  ;;  %2306 = vmatpush1.msra.mxu1 %v13749_v54  ;;  %v13755_v54 = vld [vmem:[#allocation23_spill] sm:$0xff] }
  0x77   :  { %2308 = vmatprep.subr.mxu1 %v13750_v63  ;;  %1697 = vmatpush1.msra.mxu0 %v9341_v15  ;;  %13751 = vst [vmem:[#allocation105_spill] sm:$0xff] %v9693_v30  ;;  %13752 = vst [vmem:[#allocation106_spill] sm:$0xff] %v9698_v19  ;;  %v9706_v63 = vsub.f32 %v56_v62, %v9686_v40  ;;  %v9714_v3 = vsub.f32 %v57_v20, %v9693_v30  ;;  %v9719_v62 = vand.u32 4294901760, %v406_v26  ;;  %v13761_v20 = vld [vmem:[#allocation25_spill] sm:$0xff] }
  0x78   :  { %1249 = vmatmul.mubr.f32.gmra.mxu1 %v9566_v27  ;;  %1700 = vmatprep.subr.mxu0 %v9354_v37  ;;  %v58_v27 = vld [vmem:[#allocation2 + $0x90] sm:$0xff]  ;;  %v13756_v37 = vld [vmem:[#allocation24_spill] sm:$0xff] }
  0x79   :  { %386 = vmatmul.mubr.f32.gmra.mxu0 %v9679_v55  ;;  %1254 = vmatprep.mubr.f32.mxu1 %v13686_v57  ;;  %13754 = vst [vmem:[#allocation108_spill] sm:$0xff] %v9706_v63  ;;  %13757 = vst [vmem:[#allocation109_spill] sm:$0xff] %v9714_v3  ;;  %v417_v55 = vsub.f32 %v9674_v61, %v9703_v33  ;;  %v9724_v1 = vand.u32 4294901760, %v9706_v63  ;;  %v9726_v31 = vand.u32 4294901760, %v58_v27  ;;  %v9743_v61 = vand.u32 4294901760, %v9714_v3 }
  0x7a   :  { %391 = vmatprep.mubr.f32.mxu0 %v13686_v57  ;;  %2310 = vmatpush1.msra.mxu1 %v13755_v54  ;;  %13758 = vst [vmem:[#allocation110_spill] sm:$0xff] %v9719_v62 }
  0x7b   :  { %2312 = vmatprep.subr.mxu1 %v13756_v37  ;;  %1703 = vmatpush1.msra.mxu0 %v9358_v9  ;;  %13759 = vst [vmem:[#allocation111_spill] sm:$0xff] %v9724_v1  ;;  %13760 = vst [vmem:[#allocation112_spill] sm:$0xff] %v9726_v31  ;;  %v13762_v37 = vld [vmem:[#allocation26_spill] sm:$0xff]  ;;  %v428_v33 = vsub.f32 %v9706_v63, %v9724_v1 }
  0x7c   :  { %1256 = vmatmul.mubr.f32.gmra.mxu1 %v9573_v47  ;;  %1706 = vmatprep.subr.mxu0 %v9369_v49  ;;  %v59_v47 = vld [vmem:[#allocation2 + $0x98] sm:$0xff]  ;;  %13765 = vst [vmem:[#allocation115_spill] sm:$0xff] %v9743_v61 }
  0x7d   :  { %397 = vmatmul.mubr.f32.gmra.mxu0 %v9698_v19  ;;  %1261 = vmatprep.mubr.f32.mxu1 %v13686_v57  ;;  %v9733_v26 = vand.u32 4294901760, %v59_v47  ;;  %v9738_v19 = vand.u32 4294901760, %v417_v55 }
  0x7e   :  { %402 = vmatprep.mubr.f32.mxu0 %v13686_v57  ;;  %2314 = vmatpush1.msra.mxu1 %v13761_v20  ;;  %v13767_v20 = vld [vmem:[#allocation27_spill] sm:$0xff] }
  0x7f   :  { %2316 = vmatprep.subr.mxu1 %v13762_v37  ;;  %1709 = vmatpush1.msra.mxu0 %v9379_v7  ;;  %13763 = vst [vmem:[#allocation113_spill] sm:$0xff] %v9733_v26  ;;  %13764 = vst [vmem:[#allocation114_spill] sm:$0xff] %v9738_v19  ;;  %v9746_v37 = vsub.f32 %v58_v27, %v9726_v31  ;;  %v9758_v27 = vand.u32 4294901760, %v428_v33  ;;  %v9766_v63 = vsub.f32 %v59_v47, %v9733_v26 }
  0x80   :  { %1263 = vmatmul.mubr.f32.gmra.mxu1 %v9593_v34  ;;  %1712 = vmatprep.subr.mxu0 %v9405_v0  ;;  %v60_v34 = vld [vmem:[#allocation2 + $0xa0] sm:$0xff]  ;;  %v13768_v0 = vld [vmem:[#allocation29_spill] sm:$0xff] }
  0x81   :  { %408 = vmatmul.mubr.f32.gmra.mxu0 %v9719_v62  ;;  %1268 = vmatprep.mubr.f32.mxu1 %v13686_v57  ;;  %13766 = vst [vmem:[#allocation116_spill] sm:$0xff] %v9746_v37  ;;  %v9753_v55 = vand.u32 4294901760, %v60_v34  ;;  %13770 = vst [vmem:[#allocation118_spill] sm:$0xff] %v9758_v27  ;;  %v439_v62 = vsub.f32 %v9714_v3, %v9743_v61  ;;  %v9763_v1 = vand.u32 4294901760, %v9746_v37 }
  0x82   :  { %413 = vmatprep.mubr.f32.mxu0 %v13686_v57  ;;  %2318 = vmatpush1.msra.mxu1 %v13767_v20  ;;  %13772 = vst [vmem:[#allocation120_spill] sm:$0xff] %v9766_v63  ;;  %v13774_v20 = vld [vmem:[#allocation32_spill] sm:$0xff] }
  0x83   :  { %2320 = vmatprep.subr.mxu1 %v13768_v0  ;;  %1715 = vmatpush1.msra.mxu0 %v9412_v35  ;;  %13769 = vst [vmem:[#allocation117_spill] sm:$0xff] %v9753_v55  ;;  %13771 = vst [vmem:[#allocation119_spill] sm:$0xff] %v9763_v1  ;;  %v13773_v0 = vld [vmem:[#allocation31_spill] sm:$0xff]  ;;  %v9774_v33 = vsub.f32 %v60_v34, %v9753_v55  ;;  %v9780_v47 = vand.u32 4294901760, %v439_v62  ;;  %v450_v3 = vsub.f32 %v9746_v37, %v9763_v1  ;;  %v13781_v34 = vld [vmem:[#allocation34_spill] sm:$0xff] }
  0x84   :  { %1270 = vmatmul.mubr.f32.gmra.mxu1 %v9626_v29  ;;  %1718 = vmatprep.subr.mxu0 %v9423_v21  ;;  %v61_v29 = vld [vmem:[#allocation2 + $0xa8] sm:$0xff]  ;;  %v95_v21 = vld [vmem:[#allocation2 + $0x1b8] sm:$0xff] }
  0x85   :  { %419 = vmatmul.mubr.f32.gmra.mxu0 %v9738_v19  ;;  %1275 = vmatprep.mubr.f32.mxu1 %v13686_v57  ;;  %13775 = vst [vmem:[#allocation121_spill] sm:$0xff] %v9774_v33  ;;  %v13776_v19 = vld [vmem:[#allocation11_spill] sm:$0xff]  ;;  %v9797_v62 = vand.u32 4294901760, %v450_v3  ;;  %v9802_v1 = vand.u32 4294901760, %v9774_v33 }
  0x86   :  { %424 = vmatprep.mubr.f32.mxu0 %v13686_v57  ;;  %2322 = vmatpush1.msra.mxu1 %v13773_v0  ;;  %v13777_v61 = vand.u32 4294901760, %v13776_v19  ;;  %13778 = vst [vmem:[#allocation11_spill] sm:$0xff] %v9780_v47  ;;  %v9787_v0 = vand.u32 4294901760, %v61_v29  ;;  %v13782_v19 = vld [vmem:[#allocation35_spill] sm:$0xff] }
  0x87   :  { %2324 = vmatprep.subr.mxu1 %v13774_v20  ;;  %1721 = vmatpush1.msra.mxu0 %v9427_v52  ;;  %v9785_v20 = vand.u32 4294901760, %v9766_v63  ;;  %13784 = vst [vmem:[#allocation125_spill] sm:$0xff] %v9797_v62  ;;  %13785 = vst [vmem:[#allocation126_spill] sm:$0xff] %v9802_v1 }
  0x88   :  { %1277 = vmatmul.mubr.f32.gmra.mxu1 %v9633_v56  ;;  %2943 = vmatprep.subr.mxu0 %v13777_v61  ;;  %13780 = vst [vmem:[#allocation123_spill] sm:$0xff] %v9787_v0  ;;  %v62_v56 = vld [vmem:[#allocation2 + $0xb0] sm:$0xff]  ;;  %v9805_v37 = vsub.f32 %v61_v29, %v9787_v0  ;;  %v472_v29 = vsub.f32 %v9774_v33, %v9802_v1  ;;  %v65_v33 = vld [vmem:[#allocation2 + $0xc8] sm:$0xff] }
  0x89   :  { %430 = vmatmul.mubr.f32.gmra.mxu0 %v9758_v27  ;;  %1282 = vmatprep.mubr.f32.mxu1 %v13686_v57  ;;  %13779 = vst [vmem:[#allocation122_spill] sm:$0xff] %v9785_v20  ;;  %v9793_v61 = vand.u32 4294901760, %v62_v56  ;;  %v461_v27 = vsub.f32 %v9766_v63, %v9785_v20 }
  0x8a   :  { %435 = vmatprep.mubr.f32.mxu0 %v13686_v57  ;;  %2326 = vmatpush1.msra.mxu1 %v13781_v34  ;;  %13786 = vst [vmem:[#allocation127_spill] sm:$0xff] %v9805_v37  ;;  %v9820_v20 = vand.u32 4294901760, %v9805_v37  ;;  %v94_v34 = vld [vmem:[#allocation2 + $0x1b0] sm:$0xff] }
  0x8b   :  { %2328 = vmatprep.subr.mxu1 %v13782_v19  ;;  %13783 = vst [vmem:[#allocation124_spill] sm:$0xff] %v9793_v61  ;;  %v63_v19 = vld [vmem:[#allocation2 + $0xb8] sm:$0xff]  ;;  %v9823_v63 = vsub.f32 %v62_v56, %v9793_v61 }
  0x8c   :  { %1284 = vmatmul.mubr.f32.gmra.mxu1 %v9653_v45  ;;  %v13787_v45 = vld [vmem:[#allocation36_spill] sm:$0xff]  ;;  %v9811_v3 = vand.u32 4294901760, %v63_v19  ;;  %13790 = vst [vmem:[#allocation130_spill] sm:$0xff] %v9820_v20 }
  0x8d   :  { %441 = vmatmul.mubr.f32.gmra.mxu0 %v9780_v47  ;;  %1289 = vmatprep.mubr.f32.mxu1 %v13686_v57  ;;  %v9815_v47 = vand.u32 4294901760, %v461_v27  ;;  %13791 = vst [vmem:[#allocation131_spill] sm:$0xff] %v9823_v63  ;;  %v9831_v27 = vand.u32 4294901760, %v472_v29  ;;  %v9836_v1 = vand.u32 4294901760, %v9823_v63 }
  0x8e   :  { %446 = vmatprep.mubr.f32.mxu0 %v13686_v57  ;;  %2330 = vmatpush1.msra.mxu1 %v13787_v45  ;;  %13788 = vst [vmem:[#allocation128_spill] sm:$0xff] %v9811_v3  ;;  %v9839_v56 = vsub.f32 %v63_v19, %v9811_v3 }
  0x8f   :  { %3550 = vmatprep.subr.mxu1 %v9010_v4  ;;  %13789 = vst [vmem:[#allocation129_spill] sm:$0xff] %v9815_v47  ;;  %v64_v4 = vld [vmem:[#allocation2 + $0xc0] sm:$0xff]  ;;  %13793 = vst [vmem:[#allocation133_spill] sm:$0xff] %v9831_v27 }
  0x90   :  { %1291 = vmatmul.mubr.f32.gmra.mxu1 %v9686_v40  ;;  %v9827_v40 = vand.u32 4294901760, %v64_v4  ;;  %13794 = vst [vmem:[#allocation134_spill] sm:$0xff] %v9836_v1  ;;  %13795 = vst [vmem:[#allocation135_spill] sm:$0xff] %v9839_v56 }
  0x91   :  { %452 = vmatmul.mubr.f32.gmra.mxu0 %v9797_v62  ;;  %1296 = vmatprep.mubr.f32.mxu1 %v13686_v57  ;;  %v483_v62 = vsub.f32 %v9805_v37, %v9820_v20  ;;  %v9852_v20 = vand.u32 4294901760, %v9839_v56  ;;  %v67_v37 = vld [vmem:[#allocation2 + $0xd8] sm:$0xff] }
  0x92   :  { %457 = vmatprep.mubr.f32.mxu0 %v13686_v57  ;;  %13792 = vst [vmem:[#allocation132_spill] sm:$0xff] %v9827_v40  ;;  %v9855_v19 = vsub.f32 %v64_v4, %v9827_v40 }
  0x93   :  { %v9847_v29 = vand.u32 4294901760, %v483_v62  ;;  %13798 = vst [vmem:[#allocation138_spill] sm:$0xff] %v9852_v20 }
  0x94   :  { %1298 = vmatmul.mubr.f32.gmra.mxu1 %v9693_v30  ;;  %v9843_v30 = vand.u32 4294901760, %v65_v33  ;;  %13799 = vst [vmem:[#allocation139_spill] sm:$0xff] %v9855_v19  ;;  %v9869_v4 = vand.u32 4294901760, %v9855_v19 }
  0x95   :  { %463 = vmatmul.mubr.f32.gmra.mxu0 %v9815_v47  ;;  %1303 = vmatprep.mubr.f32.mxu1 %v13686_v57  ;;  %13797 = vst [vmem:[#allocation137_spill] sm:$0xff] %v9847_v29  ;;  %v494_v47 = vsub.f32 %v9823_v63, %v9836_v1  ;;  %v505_v1 = vsub.f32 %v9839_v56, %v9852_v20  ;;  %v68_v56 = vld [vmem:[#allocation2 + $0xe0] sm:$0xff] }
  0x96   :  { %468 = vmatprep.mubr.f32.mxu0 %v13686_v57  ;;  %13796 = vst [vmem:[#allocation136_spill] sm:$0xff] %v9843_v30  ;;  %13802 = vst [vmem:[#allocation142_spill] sm:$0xff] %v9869_v4 }
  0x97   :  { %v9864_v62 = vand.u32 4294901760, %v494_v47  ;;  %v9879_v47 = vand.u32 4294901760, %v505_v1 }
  0x98   :  { %1305 = vmatmul.mubr.f32.gmra.mxu1 %v9726_v31  ;;  %v66_v31 = vld [vmem:[#allocation2 + $0xd0] sm:$0xff] }
  0x99   :  { %474 = vmatmul.mubr.f32.gmra.mxu0 %v9831_v27  ;;  %1310 = vmatprep.mubr.f32.mxu1 %v13686_v57  ;;  %v9860_v27 = vsub.f32 %v65_v33, %v9843_v30  ;;  %13801 = vst [vmem:[#allocation141_spill] sm:$0xff] %v9864_v62  ;;  %v9871_v63 = vand.u32 4294901760, %v66_v31  ;;  %v9875_v33 = vand.u32 4294901760, %v67_v37  ;;  %13805 = vst [vmem:[#allocation145_spill] sm:$0xff] %v9879_v47 }
  0x9a   :  { %479 = vmatprep.mubr.f32.mxu0 %v13686_v57 }
  0x9b   :  { %13800 = vst [vmem:[#allocation140_spill] sm:$0xff] %v9860_v27  ;;  %13803 = vst [vmem:[#allocation143_spill] sm:$0xff] %v9871_v63  ;;  %v9887_v20 = vsub.f32 %v66_v31, %v9871_v63  ;;  %v9903_v31 = vsub.f32 %v67_v37, %v9875_v33 }
  0x9c   :  { %1312 = vmatmul.mubr.f32.gmra.mxu1 %v9733_v26  ;;  %13804 = vst [vmem:[#allocation144_spill] sm:$0xff] %v9875_v33  ;;  %v9884_v26 = vand.u32 4294901760, %v9860_v27 }
  0x9d   :  { %485 = vmatmul.mubr.f32.gmra.mxu0 %v9847_v29  ;;  %1317 = vmatprep.mubr.f32.mxu1 %v13686_v57  ;;  %v516_v29 = vsub.f32 %v9855_v19, %v9869_v4  ;;  %13807 = vst [vmem:[#allocation147_spill] sm:$0xff] %v9887_v20  ;;  %v9900_v4 = vand.u32 4294901760, %v9887_v20  ;;  %13811 = vst [vmem:[#allocation151_spill] sm:$0xff] %v9903_v31  ;;  %v9917_v37 = vand.u32 4294901760, %v9903_v31  ;;  %v71_v19 = vld [vmem:[#allocation2 + $0xf8] sm:$0xff] }
  0x9e   :  { %490 = vmatprep.mubr.f32.mxu0 %v13686_v57  ;;  %13806 = vst [vmem:[#allocation146_spill] sm:$0xff] %v9884_v26 }
  0x9f   :  { %v9895_v1 = vand.u32 4294901760, %v516_v29  ;;  %13810 = vst [vmem:[#allocation150_spill] sm:$0xff] %v9900_v4  ;;  %13814 = vst [vmem:[#allocation154_spill] sm:$0xff] %v9917_v37 }
  0xa0   :  { %1319 = vmatmul.mubr.f32.gmra.mxu1 %v9753_v55  ;;  %v9891_v55 = vand.u32 4294901760, %v68_v56 }
  0xa1   :  { %496 = vmatmul.mubr.f32.gmra.mxu0 %v9864_v62  ;;  %1324 = vmatprep.mubr.f32.mxu1 %v13686_v57  ;;  %13809 = vst [vmem:[#allocation149_spill] sm:$0xff] %v9895_v1  ;;  %v527_v62 = vsub.f32 %v9860_v27, %v9884_v26  ;;  %v538_v26 = vsub.f32 %v9887_v20, %v9900_v4 }
  0xa2   :  { %501 = vmatprep.mubr.f32.mxu0 %v13686_v57  ;;  %13808 = vst [vmem:[#allocation148_spill] sm:$0xff] %v9891_v55 }
  0xa3   :  { %v9912_v29 = vand.u32 4294901760, %v527_v62  ;;  %v9928_v62 = vand.u32 4294901760, %v538_v26 }
  0xa4   :  { %1326 = vmatmul.mubr.f32.gmra.mxu1 %v9787_v0  ;;  %v69_v0 = vld [vmem:[#allocation2 + $0xe8] sm:$0xff] }
  0xa5   :  { %507 = vmatmul.mubr.f32.gmra.mxu0 %v9879_v47  ;;  %1331 = vmatprep.mubr.f32.mxu1 %v13686_v57  ;;  %v9908_v47 = vsub.f32 %v68_v56, %v9891_v55  ;;  %13813 = vst [vmem:[#allocation153_spill] sm:$0xff] %v9912_v29  ;;  %v9919_v27 = vand.u32 4294901760, %v69_v0  ;;  %13817 = vst [vmem:[#allocation157_spill] sm:$0xff] %v9928_v62 }
  0xa6   :  { %512 = vmatprep.mubr.f32.mxu0 %v13686_v57 }
  0xa7   :  { %13812 = vst [vmem:[#allocation152_spill] sm:$0xff] %v9908_v47  ;;  %13815 = vst [vmem:[#allocation155_spill] sm:$0xff] %v9919_v27  ;;  %v9924_v56 = vand.u32 4294901760, %v9908_v47  ;;  %v9933_v4 = vsub.f32 %v69_v0, %v9919_v27 }
  0xa8   :  { %1333 = vmatmul.mubr.f32.gmra.mxu1 %v9793_v61  ;;  %v70_v61 = vld [vmem:[#allocation2 + $0xf0] sm:$0xff] }
  0xa9   :  { %518 = vmatmul.mubr.f32.gmra.mxu0 %v9895_v1  ;;  %1338 = vmatprep.mubr.f32.mxu1 %v13686_v57  ;;  %13816 = vst [vmem:[#allocation156_spill] sm:$0xff] %v9924_v56  ;;  %v549_v1 = vsub.f32 %v9903_v31, %v9917_v37  ;;  %13818 = vst [vmem:[#allocation158_spill] sm:$0xff] %v9933_v4  ;;  %v9935_v20 = vand.u32 4294901760, %v70_v61  ;;  %v9948_v0 = vand.u32 4294901760, %v9933_v4  ;;  %v72_v31 = vld [vmem:[#allocation2 + $0x100] sm:$0xff] }
  0xaa   :  { %523 = vmatprep.mubr.f32.mxu0 %v13686_v57 }
  0xab   :  { %13819 = vst [vmem:[#allocation159_spill] sm:$0xff] %v9935_v20  ;;  %v9943_v26 = vand.u32 4294901760, %v549_v1  ;;  %13822 = vst [vmem:[#allocation162_spill] sm:$0xff] %v9948_v0  ;;  %v9951_v37 = vsub.f32 %v70_v61, %v9935_v20 }
  0xac   :  { %1340 = vmatmul.mubr.f32.gmra.mxu1 %v9811_v3  ;;  %v9939_v3 = vand.u32 4294901760, %v71_v19 }
  0xad   :  { %529 = vmatmul.mubr.f32.gmra.mxu0 %v9912_v29  ;;  %1345 = vmatprep.mubr.f32.mxu1 %v13686_v57  ;;  %13821 = vst [vmem:[#allocation161_spill] sm:$0xff] %v9943_v26  ;;  %v560_v29 = vsub.f32 %v9908_v47, %v9924_v56  ;;  %13823 = vst [vmem:[#allocation163_spill] sm:$0xff] %v9951_v37  ;;  %v9964_v56 = vand.u32 4294901760, %v9951_v37  ;;  %v73_v47 = vld [vmem:[#allocation2 + $0x108] sm:$0xff] }
  0xae   :  { %534 = vmatprep.mubr.f32.mxu0 %v13686_v57  ;;  %13820 = vst [vmem:[#allocation160_spill] sm:$0xff] %v9939_v3  ;;  %v9967_v61 = vsub.f32 %v71_v19, %v9939_v3 }
  0xaf   :  { %v9959_v1 = vand.u32 4294901760, %v560_v29  ;;  %13826 = vst [vmem:[#allocation166_spill] sm:$0xff] %v9964_v56 }
  0xb0   :  { %1347 = vmatmul.mubr.f32.gmra.mxu1 %v9827_v40  ;;  %v9955_v40 = vand.u32 4294901760, %v72_v31  ;;  %13827 = vst [vmem:[#allocation167_spill] sm:$0xff] %v9967_v61 }
  0xb1   :  { %540 = vmatmul.mubr.f32.gmra.mxu0 %v9928_v62  ;;  %1352 = vmatprep.mubr.f32.mxu1 %v13686_v57  ;;  %13825 = vst [vmem:[#allocation165_spill] sm:$0xff] %v9959_v1  ;;  %v571_v62 = vsub.f32 %v9933_v4, %v9948_v0  ;;  %v9980_v0 = vand.u32 4294901760, %v9967_v61  ;;  %v75_v4 = vld [vmem:[#allocation2 + $0x118] sm:$0xff] }
  0xb2   :  { %545 = vmatprep.mubr.f32.mxu0 %v13686_v57  ;;  %13824 = vst [vmem:[#allocation164_spill] sm:$0xff] %v9955_v40  ;;  %v9983_v19 = vsub.f32 %v72_v31, %v9955_v40 }
  0xb3   :  { %v9975_v29 = vand.u32 4294901760, %v571_v62  ;;  %13830 = vst [vmem:[#allocation170_spill] sm:$0xff] %v9980_v0 }
  0xb4   :  { %1354 = vmatmul.mubr.f32.gmra.mxu1 %v9843_v30  ;;  %v9971_v30 = vand.u32 4294901760, %v73_v47  ;;  %13831 = vst [vmem:[#allocation171_spill] sm:$0xff] %v9983_v19  ;;  %v9997_v31 = vand.u32 4294901760, %v9983_v19 }
  0xb5   :  { %551 = vmatmul.mubr.f32.gmra.mxu0 %v9943_v26  ;;  %1359 = vmatprep.mubr.f32.mxu1 %v13686_v57  ;;  %13829 = vst [vmem:[#allocation169_spill] sm:$0xff] %v9975_v29  ;;  %v582_v26 = vsub.f32 %v9951_v37, %v9964_v56  ;;  %v593_v56 = vsub.f32 %v9967_v61, %v9980_v0  ;;  %v76_v61 = vld [vmem:[#allocation2 + $0x120] sm:$0xff] }
  0xb6   :  { %556 = vmatprep.mubr.f32.mxu0 %v13686_v57  ;;  %13828 = vst [vmem:[#allocation168_spill] sm:$0xff] %v9971_v30  ;;  %13834 = vst [vmem:[#allocation174_spill] sm:$0xff] %v9997_v31 }
  0xb7   :  { %v9992_v62 = vand.u32 4294901760, %v582_v26  ;;  %v10007_v26 = vand.u32 4294901760, %v593_v56 }
  0xb8   :  { %1361 = vmatmul.mubr.f32.gmra.mxu1 %v9871_v63  ;;  %v74_v63 = vld [vmem:[#allocation2 + $0x110] sm:$0xff] }
  0xb9   :  { %562 = vmatmul.mubr.f32.gmra.mxu0 %v9959_v1  ;;  %1366 = vmatprep.mubr.f32.mxu1 %v13686_v57  ;;  %v9988_v1 = vsub.f32 %v73_v47, %v9971_v30  ;;  %13833 = vst [vmem:[#allocation173_spill] sm:$0xff] %v9992_v62  ;;  %v9999_v37 = vand.u32 4294901760, %v74_v63  ;;  %v10003_v47 = vand.u32 4294901760, %v75_v4  ;;  %13837 = vst [vmem:[#allocation177_spill] sm:$0xff] %v10007_v26 }
  0xba   :  { %567 = vmatprep.mubr.f32.mxu0 %v13686_v57 }
  0xbb   :  { %13832 = vst [vmem:[#allocation172_spill] sm:$0xff] %v9988_v1  ;;  %13835 = vst [vmem:[#allocation175_spill] sm:$0xff] %v9999_v37  ;;  %v10015_v0 = vsub.f32 %v74_v63, %v9999_v37  ;;  %v10031_v63 = vsub.f32 %v75_v4, %v10003_v47 }
  0xbc   :  { %1368 = vmatmul.mubr.f32.gmra.mxu1 %v9875_v33  ;;  %13836 = vst [vmem:[#allocation176_spill] sm:$0xff] %v10003_v47  ;;  %v10012_v33 = vand.u32 4294901760, %v9988_v1 }
  0xbd   :  { %573 = vmatmul.mubr.f32.gmra.mxu0 %v9975_v29  ;;  %1373 = vmatprep.mubr.f32.mxu1 %v13686_v57  ;;  %v604_v29 = vsub.f32 %v9983_v19, %v9997_v31  ;;  %13839 = vst [vmem:[#allocation179_spill] sm:$0xff] %v10015_v0  ;;  %v10028_v31 = vand.u32 4294901760, %v10015_v0  ;;  %13843 = vst [vmem:[#allocation183_spill] sm:$0xff] %v10031_v63  ;;  %v10045_v4 = vand.u32 4294901760, %v10031_v63  ;;  %v79_v19 = vld [vmem:[#allocation2 + $0x138] sm:$0xff] }
  0xbe   :  { %578 = vmatprep.mubr.f32.mxu0 %v13686_v57  ;;  %13838 = vst [vmem:[#allocation178_spill] sm:$0xff] %v10012_v33 }
  0xbf   :  { %v10023_v56 = vand.u32 4294901760, %v604_v29  ;;  %13842 = vst [vmem:[#allocation182_spill] sm:$0xff] %v10028_v31  ;;  %13846 = vst [vmem:[#allocation186_spill] sm:$0xff] %v10045_v4 }
  0xc0   :  { %1375 = vmatmul.mubr.f32.gmra.mxu1 %v9891_v55  ;;  %v10019_v55 = vand.u32 4294901760, %v76_v61 }
  0xc1   :  { %584 = vmatmul.mubr.f32.gmra.mxu0 %v9992_v62  ;;  %1380 = vmatprep.mubr.f32.mxu1 %v13686_v57  ;;  %13841 = vst [vmem:[#allocation181_spill] sm:$0xff] %v10023_v56  ;;  %v615_v62 = vsub.f32 %v9988_v1, %v10012_v33  ;;  %v626_v33 = vsub.f32 %v10015_v0, %v10028_v31 }
  0xc2   :  { %589 = vmatprep.mubr.f32.mxu0 %v13686_v57  ;;  %13840 = vst [vmem:[#allocation180_spill] sm:$0xff] %v10019_v55 }
  0xc3   :  { %v10040_v29 = vand.u32 4294901760, %v615_v62  ;;  %v10056_v62 = vand.u32 4294901760, %v626_v33 }
  0xc4   :  { %1382 = vmatmul.mubr.f32.gmra.mxu1 %v9919_v27  ;;  %v77_v27 = vld [vmem:[#allocation2 + $0x128] sm:$0xff] }
  0xc5   :  { %595 = vmatmul.mubr.f32.gmra.mxu0 %v10007_v26  ;;  %1387 = vmatprep.mubr.f32.mxu1 %v13686_v57  ;;  %v10036_v26 = vsub.f32 %v76_v61, %v10019_v55  ;;  %13845 = vst [vmem:[#allocation185_spill] sm:$0xff] %v10040_v29  ;;  %v10047_v1 = vand.u32 4294901760, %v77_v27  ;;  %13849 = vst [vmem:[#allocation189_spill] sm:$0xff] %v10056_v62 }
  0xc6   :  { %600 = vmatprep.mubr.f32.mxu0 %v13686_v57 }
  0xc7   :  { %13844 = vst [vmem:[#allocation184_spill] sm:$0xff] %v10036_v26  ;;  %13847 = vst [vmem:[#allocation187_spill] sm:$0xff] %v10047_v1  ;;  %v10052_v61 = vand.u32 4294901760, %v10036_v26  ;;  %v10061_v31 = vsub.f32 %v77_v27, %v10047_v1 }
  0xc8   :  { %1389 = vmatmul.mubr.f32.gmra.mxu1 %v9935_v20  ;;  %v78_v20 = vld [vmem:[#allocation2 + $0x130] sm:$0xff] }
  0xc9   :  { %606 = vmatmul.mubr.f32.gmra.mxu0 %v10023_v56  ;;  %1394 = vmatprep.mubr.f32.mxu1 %v13686_v57  ;;  %13848 = vst [vmem:[#allocation188_spill] sm:$0xff] %v10052_v61  ;;  %v637_v56 = vsub.f32 %v10031_v63, %v10045_v4  ;;  %13850 = vst [vmem:[#allocation190_spill] sm:$0xff] %v10061_v31  ;;  %v10063_v0 = vand.u32 4294901760, %v78_v20  ;;  %v10076_v27 = vand.u32 4294901760, %v10061_v31  ;;  %v80_v63 = vld [vmem:[#allocation2 + $0x140] sm:$0xff] }
  0xca   :  { %611 = vmatprep.mubr.f32.mxu0 %v13686_v57 }
  0xcb   :  { %13851 = vst [vmem:[#allocation191_spill] sm:$0xff] %v10063_v0  ;;  %v10071_v33 = vand.u32 4294901760, %v637_v56  ;;  %13854 = vst [vmem:[#allocation194_spill] sm:$0xff] %v10076_v27  ;;  %v10079_v4 = vsub.f32 %v78_v20, %v10063_v0 }
  0xcc   :  { %1396 = vmatmul.mubr.f32.gmra.mxu1 %v9939_v3  ;;  %v10067_v3 = vand.u32 4294901760, %v79_v19 }
  0xcd   :  { %617 = vmatmul.mubr.f32.gmra.mxu0 %v10040_v29  ;;  %1401 = vmatprep.mubr.f32.mxu1 %v13686_v57  ;;  %13853 = vst [vmem:[#allocation193_spill] sm:$0xff] %v10071_v33  ;;  %v648_v29 = vsub.f32 %v10036_v26, %v10052_v61  ;;  %13855 = vst [vmem:[#allocation195_spill] sm:$0xff] %v10079_v4  ;;  %v10092_v61 = vand.u32 4294901760, %v10079_v4  ;;  %v81_v26 = vld [vmem:[#allocation2 + $0x148] sm:$0xff] }
  0xce   :  { %622 = vmatprep.mubr.f32.mxu0 %v13686_v57  ;;  %13852 = vst [vmem:[#allocation192_spill] sm:$0xff] %v10067_v3  ;;  %v10095_v20 = vsub.f32 %v79_v19, %v10067_v3 }
  0xcf   :  { %v10087_v56 = vand.u32 4294901760, %v648_v29  ;;  %13858 = vst [vmem:[#allocation198_spill] sm:$0xff] %v10092_v61 }
  0xd0   :  { %1403 = vmatmul.mubr.f32.gmra.mxu1 %v9955_v40  ;;  %v10083_v40 = vand.u32 4294901760, %v80_v63  ;;  %13859 = vst [vmem:[#allocation199_spill] sm:$0xff] %v10095_v20 }
  0xd1   :  { %628 = vmatmul.mubr.f32.gmra.mxu0 %v10056_v62  ;;  %1408 = vmatprep.mubr.f32.mxu1 %v13686_v57  ;;  %13857 = vst [vmem:[#allocation197_spill] sm:$0xff] %v10087_v56  ;;  %v659_v62 = vsub.f32 %v10061_v31, %v10076_v27  ;;  %v10108_v27 = vand.u32 4294901760, %v10095_v20  ;;  %v83_v31 = vld [vmem:[#allocation2 + $0x158] sm:$0xff] }
  0xd2   :  { %633 = vmatprep.mubr.f32.mxu0 %v13686_v57  ;;  %13856 = vst [vmem:[#allocation196_spill] sm:$0xff] %v10083_v40  ;;  %v10111_v19 = vsub.f32 %v80_v63, %v10083_v40 }
  0xd3   :  { %v10103_v29 = vand.u32 4294901760, %v659_v62  ;;  %13862 = vst [vmem:[#allocation202_spill] sm:$0xff] %v10108_v27 }
  0xd4   :  { %1410 = vmatmul.mubr.f32.gmra.mxu1 %v9971_v30  ;;  %v10099_v30 = vand.u32 4294901760, %v81_v26  ;;  %13863 = vst [vmem:[#allocation203_spill] sm:$0xff] %v10111_v19  ;;  %v10125_v63 = vand.u32 4294901760, %v10111_v19 }
  0xd5   :  { %639 = vmatmul.mubr.f32.gmra.mxu0 %v10071_v33  ;;  %1415 = vmatprep.mubr.f32.mxu1 %v13686_v57  ;;  %13861 = vst [vmem:[#allocation201_spill] sm:$0xff] %v10103_v29  ;;  %v670_v33 = vsub.f32 %v10079_v4, %v10092_v61  ;;  %v681_v61 = vsub.f32 %v10095_v20, %v10108_v27  ;;  %v84_v20 = vld [vmem:[#allocation2 + $0x160] sm:$0xff] }
  0xd6   :  { %644 = vmatprep.mubr.f32.mxu0 %v13686_v57  ;;  %13860 = vst [vmem:[#allocation200_spill] sm:$0xff] %v10099_v30  ;;  %13866 = vst [vmem:[#allocation206_spill] sm:$0xff] %v10125_v63 }
  0xd7   :  { %v10120_v62 = vand.u32 4294901760, %v670_v33  ;;  %v10135_v33 = vand.u32 4294901760, %v681_v61 }
  0xd8   :  { %1417 = vmatmul.mubr.f32.gmra.mxu1 %v9999_v37  ;;  %v82_v37 = vld [vmem:[#allocation2 + $0x150] sm:$0xff] }
  0xd9   :  { %650 = vmatmul.mubr.f32.gmra.mxu0 %v10087_v56  ;;  %1422 = vmatprep.mubr.f32.mxu1 %v13686_v57  ;;  %v10116_v56 = vsub.f32 %v81_v26, %v10099_v30  ;;  %13865 = vst [vmem:[#allocation205_spill] sm:$0xff] %v10120_v62  ;;  %v10127_v4 = vand.u32 4294901760, %v82_v37  ;;  %v10131_v26 = vand.u32 4294901760, %v83_v31  ;;  %13869 = vst [vmem:[#allocation209_spill] sm:$0xff] %v10135_v33 }
  0xda   :  { %655 = vmatprep.mubr.f32.mxu0 %v13686_v57 }
  0xdb   :  { %13864 = vst [vmem:[#allocation204_spill] sm:$0xff] %v10116_v56  ;;  %13867 = vst [vmem:[#allocation207_spill] sm:$0xff] %v10127_v4  ;;  %v10143_v27 = vsub.f32 %v82_v37, %v10127_v4  ;;  %v10159_v37 = vsub.f32 %v83_v31, %v10131_v26 }
  0xdc   :  { %1424 = vmatmul.mubr.f32.gmra.mxu1 %v10003_v47  ;;  %13868 = vst [vmem:[#allocation208_spill] sm:$0xff] %v10131_v26  ;;  %v10140_v47 = vand.u32 4294901760, %v10116_v56 }
  0xdd   :  { %661 = vmatmul.mubr.f32.gmra.mxu0 %v10103_v29  ;;  %1429 = vmatprep.mubr.f32.mxu1 %v13686_v57  ;;  %v692_v29 = vsub.f32 %v10111_v19, %v10125_v63  ;;  %13871 = vst [vmem:[#allocation211_spill] sm:$0xff] %v10143_v27  ;;  %v10156_v63 = vand.u32 4294901760, %v10143_v27  ;;  %13875 = vst [vmem:[#allocation215_spill] sm:$0xff] %v10159_v37  ;;  %v10173_v31 = vand.u32 4294901760, %v10159_v37  ;;  %v87_v19 = vld [vmem:[#allocation2 + $0x178] sm:$0xff] }
  0xde   :  { %666 = vmatprep.mubr.f32.mxu0 %v13686_v57  ;;  %13870 = vst [vmem:[#allocation210_spill] sm:$0xff] %v10140_v47 }
  0xdf   :  { %v10151_v61 = vand.u32 4294901760, %v692_v29  ;;  %13874 = vst [vmem:[#allocation214_spill] sm:$0xff] %v10156_v63  ;;  %13878 = vst [vmem:[#allocation218_spill] sm:$0xff] %v10173_v31 }
  0xe0   :  { %1431 = vmatmul.mubr.f32.gmra.mxu1 %v10019_v55  ;;  %v10147_v55 = vand.u32 4294901760, %v84_v20 }
  0xe1   :  { %672 = vmatmul.mubr.f32.gmra.mxu0 %v10120_v62  ;;  %1436 = vmatprep.mubr.f32.mxu1 %v13686_v57  ;;  %13873 = vst [vmem:[#allocation213_spill] sm:$0xff] %v10151_v61  ;;  %v703_v62 = vsub.f32 %v10116_v56, %v10140_v47  ;;  %v714_v47 = vsub.f32 %v10143_v27, %v10156_v63 }
  0xe2   :  { %677 = vmatprep.mubr.f32.mxu0 %v13686_v57  ;;  %13872 = vst [vmem:[#allocation212_spill] sm:$0xff] %v10147_v55 }
  0xe3   :  { %v10168_v29 = vand.u32 4294901760, %v703_v62  ;;  %v10184_v62 = vand.u32 4294901760, %v714_v47 }
  0xe4   :  { %1438 = vmatmul.mubr.f32.gmra.mxu1 %v10047_v1  ;;  %v85_v1 = vld [vmem:[#allocation2 + $0x168] sm:$0xff] }
  0xe5   :  { %683 = vmatmul.mubr.f32.gmra.mxu0 %v10135_v33  ;;  %1443 = vmatprep.mubr.f32.mxu1 %v13686_v57  ;;  %v10164_v33 = vsub.f32 %v84_v20, %v10147_v55  ;;  %13877 = vst [vmem:[#allocation217_spill] sm:$0xff] %v10168_v29  ;;  %v10175_v56 = vand.u32 4294901760, %v85_v1  ;;  %13881 = vst [vmem:[#allocation221_spill] sm:$0xff] %v10184_v62 }
  0xe6   :  { %688 = vmatprep.mubr.f32.mxu0 %v13686_v57 }
  0xe7   :  { %13876 = vst [vmem:[#allocation216_spill] sm:$0xff] %v10164_v33  ;;  %13879 = vst [vmem:[#allocation219_spill] sm:$0xff] %v10175_v56  ;;  %v10180_v20 = vand.u32 4294901760, %v10164_v33  ;;  %v10189_v63 = vsub.f32 %v85_v1, %v10175_v56 }
  0xe8   :  { %1445 = vmatmul.mubr.f32.gmra.mxu1 %v10063_v0  ;;  %v86_v0 = vld [vmem:[#allocation2 + $0x170] sm:$0xff] }
  0xe9   :  { %694 = vmatmul.mubr.f32.gmra.mxu0 %v10151_v61  ;;  %1450 = vmatprep.mubr.f32.mxu1 %v13686_v57  ;;  %13880 = vst [vmem:[#allocation220_spill] sm:$0xff] %v10180_v20  ;;  %v725_v61 = vsub.f32 %v10159_v37, %v10173_v31  ;;  %13882 = vst [vmem:[#allocation222_spill] sm:$0xff] %v10189_v63  ;;  %v10191_v27 = vand.u32 4294901760, %v86_v0  ;;  %v10204_v1 = vand.u32 4294901760, %v10189_v63  ;;  %v88_v37 = vld [vmem:[#allocation2 + $0x180] sm:$0xff] }
  0xea   :  { %699 = vmatprep.mubr.f32.mxu0 %v13686_v57 }
  0xeb   :  { %13883 = vst [vmem:[#allocation223_spill] sm:$0xff] %v10191_v27  ;;  %v10199_v47 = vand.u32 4294901760, %v725_v61  ;;  %13886 = vst [vmem:[#allocation226_spill] sm:$0xff] %v10204_v1  ;;  %v10207_v31 = vsub.f32 %v86_v0, %v10191_v27 }
  0xec   :  { %1452 = vmatmul.mubr.f32.gmra.mxu1 %v10067_v3  ;;  %v10195_v3 = vand.u32 4294901760, %v87_v19 }
  0xed   :  { %705 = vmatmul.mubr.f32.gmra.mxu0 %v10168_v29  ;;  %1457 = vmatprep.mubr.f32.mxu1 %v13686_v57  ;;  %13885 = vst [vmem:[#allocation225_spill] sm:$0xff] %v10199_v47  ;;  %v736_v29 = vsub.f32 %v10164_v33, %v10180_v20  ;;  %13887 = vst [vmem:[#allocation227_spill] sm:$0xff] %v10207_v31  ;;  %v10220_v20 = vand.u32 4294901760, %v10207_v31  ;;  %v89_v33 = vld [vmem:[#allocation2 + $0x188] sm:$0xff] }
  0xee   :  { %710 = vmatprep.mubr.f32.mxu0 %v13686_v57  ;;  %13884 = vst [vmem:[#allocation224_spill] sm:$0xff] %v10195_v3  ;;  %v10223_v0 = vsub.f32 %v87_v19, %v10195_v3 }
  0xef   :  { %v10215_v61 = vand.u32 4294901760, %v736_v29  ;;  %13890 = vst [vmem:[#allocation230_spill] sm:$0xff] %v10220_v20 }
  0xf0   :  { %1459 = vmatmul.mubr.f32.gmra.mxu1 %v10083_v40  ;;  %v10211_v40 = vand.u32 4294901760, %v88_v37  ;;  %13891 = vst [vmem:[#allocation231_spill] sm:$0xff] %v10223_v0 }
  0xf1   :  { %716 = vmatmul.mubr.f32.gmra.mxu0 %v10184_v62  ;;  %1464 = vmatprep.mubr.f32.mxu1 %v13686_v57  ;;  %13889 = vst [vmem:[#allocation229_spill] sm:$0xff] %v10215_v61  ;;  %v747_v62 = vsub.f32 %v10189_v63, %v10204_v1  ;;  %v10236_v1 = vand.u32 4294901760, %v10223_v0 }
  0xf2   :  { %721 = vmatprep.mubr.f32.mxu0 %v13686_v57  ;;  %13888 = vst [vmem:[#allocation228_spill] sm:$0xff] %v10211_v40  ;;  %v10239_v19 = vsub.f32 %v88_v37, %v10211_v40 }
  0xf3   :  { %v10231_v29 = vand.u32 4294901760, %v747_v62  ;;  %13894 = vst [vmem:[#allocation234_spill] sm:$0xff] %v10236_v1 }
  0xf4   :  { %1466 = vmatmul.mubr.f32.gmra.mxu1 %v10099_v30  ;;  %v10227_v30 = vand.u32 4294901760, %v89_v33  ;;  %13895 = vst [vmem:[#allocation235_spill] sm:$0xff] %v10239_v19  ;;  %v10253_v37 = vand.u32 4294901760, %v10239_v19 }
  0xf5   :  { %727 = vmatmul.mubr.f32.gmra.mxu0 %v10199_v47  ;;  %1471 = vmatprep.mubr.f32.mxu1 %v13686_v57  ;;  %13893 = vst [vmem:[#allocation233_spill] sm:$0xff] %v10231_v29  ;;  %v758_v47 = vsub.f32 %v10207_v31, %v10220_v20  ;;  %v769_v20 = vsub.f32 %v10223_v0, %v10236_v1 }
  0xf6   :  { %732 = vmatprep.mubr.f32.mxu0 %v13686_v57  ;;  %13892 = vst [vmem:[#allocation232_spill] sm:$0xff] %v10227_v30  ;;  %13898 = vst [vmem:[#allocation238_spill] sm:$0xff] %v10253_v37 }
  0xf7   :  { %v10248_v62 = vand.u32 4294901760, %v758_v47  ;;  %v10264_v47 = vand.u32 4294901760, %v769_v20 }
  0xf8   :  { %1473 = vmatmul.mubr.f32.gmra.mxu1 %v10127_v4  ;;  %v90_v4 = vld [vmem:[#allocation2 + $0x190] sm:$0xff] }
  0xf9   :  { %738 = vmatmul.mubr.f32.gmra.mxu0 %v10215_v61  ;;  %1478 = vmatprep.mubr.f32.mxu1 %v13686_v57  ;;  %v10244_v61 = vsub.f32 %v89_v33, %v10227_v30  ;;  %13897 = vst [vmem:[#allocation237_spill] sm:$0xff] %v10248_v62  ;;  %v10255_v31 = vand.u32 4294901760, %v90_v4  ;;  %13901 = vst [vmem:[#allocation241_spill] sm:$0xff] %v10264_v47 }
  0xfa   :  { %743 = vmatprep.mubr.f32.mxu0 %v13686_v57 }
  0xfb   :  { %13896 = vst [vmem:[#allocation236_spill] sm:$0xff] %v10244_v61  ;;  %13899 = vst [vmem:[#allocation239_spill] sm:$0xff] %v10255_v31  ;;  %v10260_v33 = vand.u32 4294901760, %v10244_v61  ;;  %v10269_v1 = vsub.f32 %v90_v4, %v10255_v31 }
  0xfc   :  { %1480 = vmatmul.mubr.f32.gmra.mxu1 %v10131_v26  ;;  %v91_v26 = vld [vmem:[#allocation2 + $0x198] sm:$0xff] }
  0xfd   :  { %749 = vmatmul.mubr.f32.gmra.mxu0 %v10231_v29  ;;  %1485 = vmatprep.mubr.f32.mxu1 %v13686_v57  ;;  %13900 = vst [vmem:[#allocation240_spill] sm:$0xff] %v10260_v33  ;;  %v780_v29 = vsub.f32 %v10239_v19, %v10253_v37  ;;  %13902 = vst [vmem:[#allocation242_spill] sm:$0xff] %v10269_v1  ;;  %v10271_v0 = vand.u32 4294901760, %v91_v26  ;;  %v10282_v37 = vand.u32 4294901760, %v10269_v1 }
  0xfe   :  { %754 = vmatprep.mubr.f32.mxu0 %v13686_v57 }
  0xff   :  { %13903 = vst [vmem:[#allocation243_spill] sm:$0xff] %v10271_v0  ;;  %v10279_v20 = vand.u32 4294901760, %v780_v29  ;;  %13905 = vst [vmem:[#allocation245_spill] sm:$0xff] %v10282_v37  ;;  %v10285_v4 = vsub.f32 %v91_v26, %v10271_v0 }
 0x100   :  { %1487 = vmatmul.mubr.f32.gmra.mxu1 %v10147_v55  ;;  %v92_v55 = vld [vmem:[#allocation2 + $0x1a0] sm:$0xff] }
 0x101   :  { %760 = vmatmul.mubr.f32.gmra.mxu0 %v10248_v62  ;;  %1492 = vmatprep.mubr.f32.mxu1 %v13686_v57  ;;  %v791_v62 = vsub.f32 %v10244_v61, %v10260_v33  ;;  %13904 = vst [vmem:[#allocation244_spill] sm:$0xff] %v10279_v20  ;;  %13906 = vst [vmem:[#allocation246_spill] sm:$0xff] %v10285_v4  ;;  %v10287_v19 = vand.u32 4294901760, %v92_v55  ;;  %v10298_v26 = vand.u32 4294901760, %v10285_v4 }
 0x102   :  { %765 = vmatprep.mubr.f32.mxu0 %v13686_v57 }
 0x103   :  { %13907 = vst [vmem:[#allocation247_spill] sm:$0xff] %v10287_v19  ;;  %v10291_v33 = vand.u32 4294901760, %v791_v62  ;;  %13909 = vst [vmem:[#allocation249_spill] sm:$0xff] %v10298_v26  ;;  %v10301_v61 = vsub.f32 %v92_v55, %v10287_v19  ;;  %v813_v55 = vsub.f32 %v10285_v4, %v10298_v26 }
 0x104   :  { %1494 = vmatmul.mubr.f32.gmra.mxu1 %v10175_v56  ;;  %v93_v56 = vld [vmem:[#allocation2 + $0x1a8] sm:$0xff] }
 0x105   :  { %771 = vmatmul.mubr.f32.gmra.mxu0 %v10264_v47  ;;  %1499 = vmatprep.mubr.f32.mxu1 %v13686_v57  ;;  %13908 = vst [vmem:[#allocation248_spill] sm:$0xff] %v10291_v33  ;;  %v802_v47 = vsub.f32 %v10269_v1, %v10282_v37  ;;  %13910 = vst [vmem:[#allocation250_spill] sm:$0xff] %v10301_v61  ;;  %v10303_v45 = vand.u32 4294901760, %v93_v56  ;;  %v10316_v1 = vand.u32 4294901760, %v10301_v61 }
 0x106   :  { %776 = vmatprep.mubr.f32.mxu0 %v13686_v57  ;;  %v255_v63 = vpop.f32.mrf.mxu0 }
 0x107   :  { %13911 = vst [vmem:[#allocation251_spill] sm:$0xff] %v10303_v45  ;;  %v10311_v37 = vand.u32 4294901760, %v802_v47  ;;  %13914 = vst [vmem:[#allocation254_spill] sm:$0xff] %v10316_v1  ;;  %v10319_v52 = vsub.f32 %v93_v56, %v10303_v45  ;;  %v10326_v47 = vand.u32 4294901760, %v95_v21  ;;  %v10332_v56 = vand.u32 4294901760, %v813_v55 }
 0x108   :  { %1501 = vmatmul.mubr.f32.gmra.mxu1 %v10191_v27  ;;  %v257_v29 = vpop.f32.mrf.mxu0  ;;  %v824_v4 = vsub.f32 %v10301_v61, %v10316_v1 }
 0x109   :  { %782 = vmatmul.mubr.f32.gmra.mxu0 %v10279_v20  ;;  %1506 = vmatprep.mubr.f32.mxu1 %v13686_v57  ;;  %v10307_v20 = vand.u32 4294901760, %v94_v34  ;;  %13913 = vst [vmem:[#allocation253_spill] sm:$0xff] %v10311_v37  ;;  %13915 = vst [vmem:[#allocation255_spill] sm:$0xff] %v10319_v52  ;;  %v10337_v7 = vand.u32 4294901760, %v10319_v52 }
 0x10a   :  { %787 = vmatprep.mubr.f32.mxu0 %v13686_v57  ;;  %13917 = vst [vmem:[#allocation257_spill] sm:$0xff] %v10326_v47  ;;  %13919 = vst [vmem:[#allocation259_spill] sm:$0xff] %v10332_v56  ;;  %v10353_v61 = vand.u32 4294901760, %v824_v4 }
 0x10b   :  { %v266_v62 = vpop.f32.mrf.mxu0  ;;  %13912 = vst [vmem:[#allocation252_spill] sm:$0xff] %v10307_v20  ;;  %13920 = vst [vmem:[#allocation260_spill] sm:$0xff] %v10337_v7 }
 0x10c   :  { %1508 = vmatmul.mubr.f32.gmra.mxu1 %v10195_v3  ;;  %13925 = vst [vmem:[#allocation265_spill] sm:$0xff] %v10353_v61 }
 0x10d   :  { %793 = vmatmul.mubr.f32.gmra.mxu0 %v10291_v33  ;;  %v268_v27 = vpop.f32.mrf.mxu0  ;;  %1513 = vmatprep.mubr.f32.mxu1 %v13686_v57  ;;  %v10324_v33 = vsub.f32 %v94_v34, %v10307_v20  ;;  %v96_v34 = vld [vmem:[#allocation2 + $0x1c0] sm:$0xff] }
 0x10e   :  { %798 = vmatprep.mubr.f32.mxu0 %v13686_v57 }
 0x10f   :  { %13916 = vst [vmem:[#allocation256_spill] sm:$0xff] %v10324_v33 }
 0x110   :  { %v1180_v3 = vpop.f32.mrf.mxu1  ;;  %1515 = vmatmul.mubr.f32.gmra.mxu1 %v10211_v40 }
 0x111   :  { %v277_v35 = vpop.f32.mrf.mxu0  ;;  %804 = vmatmul.mubr.f32.gmra.mxu0 %v10311_v37  ;;  %v10329_v26 = vadd.f32 %v1180_v3, %v255_v63  ;;  %1520 = vmatprep.mubr.f32.mxu1 %v13686_v57  ;;  %v10344_v3 = vand.u32 4294901760, %v10324_v33  ;;  %v10347_v63 = vsub.f32 %v95_v21, %v10326_v47 }
 0x112   :  { %v1182_v40 = vpop.f32.mrf.mxu1  ;;  %809 = vmatprep.mubr.f32.mxu0 %v13686_v57 }
 0x113   :  { %13918 = vst [vmem:[#allocation258_spill] sm:$0xff] %v10329_v26  ;;  %v279_v54 = vpop.f32.mrf.mxu0  ;;  %v10340_v49 = vadd.f32 %v1182_v40, %v257_v29  ;;  %13922 = vst [vmem:[#allocation262_spill] sm:$0xff] %v10344_v3  ;;  %v835_v40 = vsub.f32 %v10319_v52, %v10337_v7  ;;  %v10357_v29 = vand.u32 4294901760, %v96_v34  ;;  %v10366_v4 = vand.u32 4294901760, %v10347_v63 }
 0x114   :  { %v1187_v37 = vpop.f32.mrf.mxu1  ;;  %1522 = vmatmul.mubr.f32.gmra.mxu1 %v10227_v30  ;;  %13923 = vst [vmem:[#allocation263_spill] sm:$0xff] %v10347_v63 }
 0x115   :  { %13921 = vst [vmem:[#allocation261_spill] sm:$0xff] %v10340_v49  ;;  %v288_v55 = vpop.f32.mrf.mxu0  ;;  %815 = vmatmul.mubr.f32.gmra.mxu0 %v10332_v56  ;;  %v10350_v1 = vadd.f32 %v1187_v37, %v266_v62  ;;  %1527 = vmatprep.mubr.f32.mxu1 %v13686_v57  ;;  %13926 = vst [vmem:[#allocation266_spill] sm:$0xff] %v10357_v29  ;;  %v97_v49 = vld [vmem:[#allocation2 + $0x1c8] sm:$0xff]  ;;  %v846_v37 = vsub.f32 %v10324_v33, %v10344_v3  ;;  %v10372_v7 = vand.u32 4294901760, %v835_v40  ;;  %v98_v3 = vld [vmem:[#allocation2 + $0x1d0] sm:$0xff] }
 0x116   :  { %v1189_v30 = vpop.f32.mrf.mxu1  ;;  %820 = vmatprep.mubr.f32.mxu0 %v13686_v57  ;;  %13928 = vst [vmem:[#allocation268_spill] sm:$0xff] %v10366_v4 }
 0x117   :  { %13924 = vst [vmem:[#allocation264_spill] sm:$0xff] %v10350_v1  ;;  %v290_v21 = vpop.f32.mrf.mxu0  ;;  %v10360_v26 = vadd.f32 %v1189_v30, %v268_v27  ;;  %13930 = vst [vmem:[#allocation270_spill] sm:$0xff] %v10372_v7  ;;  %v10375_v30 = vsub.f32 %v96_v34, %v10357_v29  ;;  %v10377_v27 = vand.u32 4294901760, %v97_v49 }
 0x118   :  { %v1194_v9 = vpop.f32.mrf.mxu1  ;;  %1529 = vmatmul.mubr.f32.gmra.mxu1 %v10255_v31 }
 0x119   :  { %13927 = vst [vmem:[#allocation267_spill] sm:$0xff] %v10360_v26  ;;  %v299_v62 = vpop.f32.mrf.mxu0  ;;  %826 = vmatmul.mubr.f32.gmra.mxu0 %v10353_v61  ;;  %v10369_v56 = vadd.f32 %v1194_v9, %v277_v35  ;;  %1534 = vmatprep.mubr.f32.mxu1 %v13686_v57  ;;  %13931 = vst [vmem:[#allocation271_spill] sm:$0xff] %v10375_v30  ;;  %v10383_v9 = vand.u32 4294901760, %v846_v37  ;;  %v857_v35 = vsub.f32 %v10347_v63, %v10366_v4  ;;  %v99_v37 = vld [vmem:[#allocation2 + $0x1d8] sm:$0xff] }
 0x11a   :  { %13932 = vst [vmem:[#allocation272_spill] sm:$0xff] %v10377_v27  ;;  %v1196_v31 = vpop.f32.mrf.mxu1  ;;  %831 = vmatprep.mubr.f32.mxu0 %v13686_v57  ;;  %v10392_v61 = vand.u32 4294901760, %v10375_v30 }
 0x11b   :  { %13929 = vst [vmem:[#allocation269_spill] sm:$0xff] %v10369_v56  ;;  %v301_v33 = vpop.f32.mrf.mxu0  ;;  %v10380_v52 = vadd.f32 %v1196_v31, %v279_v54  ;;  %13934 = vst [vmem:[#allocation274_spill] sm:$0xff] %v10383_v9  ;;  %v10395_v54 = vsub.f32 %v97_v49, %v10377_v27  ;;  %v10397_v31 = vand.u32 4294901760, %v98_v3 }
 0x11c   :  { %v1201_v26 = vpop.f32.mrf.mxu1  ;;  %1536 = vmatmul.mubr.f32.gmra.mxu1 %v10271_v0  ;;  %13936 = vst [vmem:[#allocation276_spill] sm:$0xff] %v10392_v61 }
 0x11d   :  { %13933 = vst [vmem:[#allocation273_spill] sm:$0xff] %v10380_v52  ;;  %v310_v40 = vpop.f32.mrf.mxu0  ;;  %837 = vmatmul.mubr.f32.gmra.mxu0 %v10372_v7  ;;  %v10388_v34 = vadd.f32 %v1201_v26, %v288_v55  ;;  %1541 = vmatprep.mubr.f32.mxu1 %v13686_v57  ;;  %13937 = vst [vmem:[#allocation277_spill] sm:$0xff] %v10395_v54  ;;  %v10403_v26 = vand.u32 4294901760, %v857_v35  ;;  %v10405_v55 = vand.u32 4294901760, %v99_v37  ;;  %v100_v35 = vld [vmem:[#allocation2 + $0x1e0] sm:$0xff] }
 0x11e   :  { %13938 = vst [vmem:[#allocation278_spill] sm:$0xff] %v10397_v31  ;;  %v1203_v0 = vpop.f32.mrf.mxu1  ;;  %842 = vmatprep.mubr.f32.mxu0 %v13686_v57  ;;  %v868_v52 = vsub.f32 %v10375_v30, %v10392_v61 }
 0x11f   :  { %13935 = vst [vmem:[#allocation275_spill] sm:$0xff] %v10388_v34  ;;  %v312_v4 = vpop.f32.mrf.mxu0  ;;  %v10400_v63 = vadd.f32 %v1203_v0, %v290_v21  ;;  %13940 = vst [vmem:[#allocation280_spill] sm:$0xff] %v10403_v26  ;;  %v10414_v0 = vand.u32 4294901760, %v10395_v54  ;;  %v10417_v21 = vsub.f32 %v98_v3, %v10397_v31 }
 0x120   :  { %v1208_v7 = vpop.f32.mrf.mxu1  ;;  %1543 = vmatmul.mubr.f32.gmra.mxu1 %v10287_v19  ;;  %13941 = vst [vmem:[#allocation281_spill] sm:$0xff] %v10405_v55  ;;  %v10432_v30 = vand.u32 4294901760, %v868_v52 }
 0x121   :  { %13939 = vst [vmem:[#allocation279_spill] sm:$0xff] %v10400_v63  ;;  %v321_v34 = vpop.f32.mrf.mxu0  ;;  %848 = vmatmul.mubr.f32.gmra.mxu0 %v10383_v9  ;;  %v10408_v49 = vadd.f32 %v1208_v7, %v299_v62  ;;  %1548 = vmatprep.mubr.f32.mxu1 %v13686_v57  ;;  %13943 = vst [vmem:[#allocation283_spill] sm:$0xff] %v10414_v0  ;;  %v10424_v62 = vsub.f32 %v99_v37, %v10405_v55  ;;  %v10426_v9 = vand.u32 4294901760, %v100_v35  ;;  %v101_v37 = vld [vmem:[#allocation2 + $0x1e8] sm:$0xff] }
 0x122   :  { %13944 = vst [vmem:[#allocation284_spill] sm:$0xff] %v10417_v21  ;;  %v1210_v19 = vpop.f32.mrf.mxu1  ;;  %853 = vmatprep.mubr.f32.mxu0 %v13686_v57  ;;  %13949 = vst [vmem:[#allocation289_spill] sm:$0xff] %v10432_v30 }
 0x123   :  { %13942 = vst [vmem:[#allocation282_spill] sm:$0xff] %v10408_v49  ;;  %v323_v63 = vpop.f32.mrf.mxu0  ;;  %v10420_v56 = vadd.f32 %v1210_v19, %v301_v33  ;;  %13946 = vst [vmem:[#allocation286_spill] sm:$0xff] %v10424_v62  ;;  %v879_v19 = vsub.f32 %v10395_v54, %v10414_v0  ;;  %v10437_v33 = vand.u32 4294901760, %v10417_v21  ;;  %v10447_v52 = vsub.f32 %v100_v35, %v10426_v9 }
 0x124   :  { %v1215_v7 = vpop.f32.mrf.mxu1  ;;  %1550 = vmatmul.mubr.f32.gmra.mxu1 %v10303_v45  ;;  %13947 = vst [vmem:[#allocation287_spill] sm:$0xff] %v10426_v9 }
 0x125   :  { %13945 = vst [vmem:[#allocation285_spill] sm:$0xff] %v10420_v56  ;;  %v332_v61 = vpop.f32.mrf.mxu0  ;;  %859 = vmatmul.mubr.f32.gmra.mxu0 %v10403_v26  ;;  %v10429_v3 = vadd.f32 %v1215_v7, %v310_v40  ;;  %1555 = vmatprep.mubr.f32.mxu1 %v13686_v57  ;;  %13950 = vst [vmem:[#allocation290_spill] sm:$0xff] %v10437_v33  ;;  %v10444_v40 = vand.u32 4294901760, %v10424_v62  ;;  %v10453_v54 = vand.u32 4294901760, %v879_v19 }
 0x126   :  { %v1217_v45 = vpop.f32.mrf.mxu1  ;;  %864 = vmatprep.mubr.f32.mxu0 %v13686_v57  ;;  %13953 = vst [vmem:[#allocation293_spill] sm:$0xff] %v10447_v52 }
 0x127   :  { %13948 = vst [vmem:[#allocation288_spill] sm:$0xff] %v10429_v3  ;;  %v334_v56 = vpop.f32.mrf.mxu0  ;;  %v10440_v49 = vadd.f32 %v1217_v45, %v312_v4  ;;  %13952 = vst [vmem:[#allocation292_spill] sm:$0xff] %v10444_v40  ;;  %v890_v45 = vsub.f32 %v10417_v21, %v10437_v33  ;;  %v10457_v4 = vand.u32 4294901760, %v101_v37 }
 0x128   :  { %v1222_v26 = vpop.f32.mrf.mxu1  ;;  %1557 = vmatmul.mubr.f32.gmra.mxu1 %v10307_v20  ;;  %13954 = vst [vmem:[#allocation294_spill] sm:$0xff] %v10453_v54 }
 0x129   :  { %13951 = vst [vmem:[#allocation291_spill] sm:$0xff] %v10440_v49  ;;  %v343_v7 = vpop.f32.mrf.mxu0  ;;  %870 = vmatmul.mubr.f32.gmra.mxu0 %v10432_v30  ;;  %v10450_v0 = vadd.f32 %v1222_v26, %v321_v34  ;;  %1562 = vmatprep.mubr.f32.mxu1 %v13686_v57  ;;  %13955 = vst [vmem:[#allocation295_spill] sm:$0xff] %v10457_v4  ;;  %v102_v49 = vld [vmem:[#allocation2 + $0x1f0] sm:$0xff]  ;;  %v901_v34 = vsub.f32 %v10424_v62, %v10444_v40  ;;  %v10466_v26 = vand.u32 4294901760, %v10447_v52  ;;  %v103_v40 = vld [vmem:[#allocation2 + $0x1f8] sm:$0xff] }
 0x12a   :  { %v1224_v20 = vpop.f32.mrf.mxu1  ;;  %875 = vmatprep.mubr.f32.mxu0 %v13686_v57  ;;  %v10472_v33 = vand.u32 4294901760, %v890_v45 }
 0x12b   :  { %v345_v35 = vpop.f32.mrf.mxu0  ;;  %v10460_v3 = vadd.f32 %v1224_v20, %v323_v63  ;;  %13957 = vst [vmem:[#allocation297_spill] sm:$0xff] %v10466_v26  ;;  %v10475_v20 = vsub.f32 %v101_v37, %v10457_v4  ;;  %v10477_v63 = vand.u32 4294901760, %v102_v49 }
 0x12c   :  { %v1229_v1 = vpop.f32.mrf.mxu1  ;;  %1564 = vmatmul.mubr.f32.gmra.mxu1 %v10326_v47  ;;  %13958 = vst [vmem:[#allocation298_spill] sm:$0xff] %v10472_v33 }
 0x12d   :  { %13956 = vst [vmem:[#allocation296_spill] sm:$0xff] %v10460_v3  ;;  %v354_v19 = vpop.f32.mrf.mxu0  ;;  %881 = vmatmul.mubr.f32.gmra.mxu0 %v10453_v54  ;;  %v10469_v30 = vadd.f32 %v1229_v1, %v332_v61  ;;  %1569 = vmatprep.mubr.f32.mxu1 %v13686_v57  ;;  %13959 = vst [vmem:[#allocation299_spill] sm:$0xff] %v10475_v20  ;;  %v10483_v1 = vand.u32 4294901760, %v901_v34  ;;  %v912_v61 = vsub.f32 %v10447_v52, %v10466_v26 }
 0x12e   :  { %13960 = vst [vmem:[#allocation300_spill] sm:$0xff] %v10477_v63  ;;  %v1231_v47 = vpop.f32.mrf.mxu1  ;;  %886 = vmatprep.mubr.f32.mxu0 %v13686_v57  ;;  %v10492_v54 = vand.u32 4294901760, %v10475_v20 }
 0x12f   :  { %v356_v62 = vpop.f32.mrf.mxu0  ;;  %v10480_v21 = vadd.f32 %v1231_v47, %v334_v56  ;;  %13961 = vst [vmem:[#allocation301_spill] sm:$0xff] %v10483_v1  ;;  %v10495_v47 = vsub.f32 %v102_v49, %v10477_v63  ;;  %v10497_v56 = vand.u32 4294901760, %v103_v40 }
 0x130   :  { %v1236_v3 = vpop.f32.mrf.mxu1  ;;  %1571 = vmatmul.mubr.f32.gmra.mxu1 %v10357_v29  ;;  %13963 = vst [vmem:[#allocation303_spill] sm:$0xff] %v10492_v54  ;;  %v923_v49 = vsub.f32 %v10475_v20, %v10492_v54 }
 0x131   :  { %v365_v45 = vpop.f32.mrf.mxu0  ;;  %892 = vmatmul.mubr.f32.gmra.mxu0 %v10472_v33  ;;  %v10488_v37 = vadd.f32 %v1236_v3, %v343_v7  ;;  %1576 = vmatprep.mubr.f32.mxu1 %v13686_v57  ;;  %13964 = vst [vmem:[#allocation304_spill] sm:$0xff] %v10495_v47  ;;  %13965 = vst [vmem:[#allocation305_spill] sm:$0xff] %v10497_v56  ;;  %v10503_v3 = vand.u32 4294901760, %v912_v61 }
 0x132   :  { %v1238_v34 = vpop.f32.mrf.mxu1  ;;  %897 = vmatprep.mubr.f32.mxu0 %v13686_v57  ;;  %v10525_v54 = vand.u32 4294901760, %v923_v49 }
 0x133   :  { %13962 = vst [vmem:[#allocation302_spill] sm:$0xff] %v10488_v37  ;;  %v367_v29 = vpop.f32.mrf.mxu0  ;;  %v10500_v26 = vadd.f32 %v1238_v34, %v345_v35  ;;  %13966 = vst [vmem:[#allocation306_spill] sm:$0xff] %v10503_v3  ;;  %v10512_v37 = vand.u32 4294901760, %v10495_v47  ;;  %v10515_v35 = vsub.f32 %v103_v40, %v10497_v56 }
 0x134   :  { %v1243_v52 = vpop.f32.mrf.mxu1  ;;  %1578 = vmatmul.mubr.f32.gmra.mxu1 %v10377_v27  ;;  %13970 = vst [vmem:[#allocation310_spill] sm:$0xff] %v10525_v54 }
 0x135   :  { %v376_v7 = vpop.f32.mrf.mxu0  ;;  %903 = vmatmul.mubr.f32.gmra.mxu0 %v10483_v1  ;;  %v10506_v33 = vadd.f32 %v1243_v52, %v354_v19  ;;  %1583 = vmatprep.mubr.f32.mxu1 %v13686_v57  ;;  %13967 = vst [vmem:[#allocation307_spill] sm:$0xff] %v10512_v37  ;;  %13968 = vst [vmem:[#allocation308_spill] sm:$0xff] %v10515_v35  ;;  %v934_v40 = vsub.f32 %v10495_v47, %v10512_v37  ;;  %v10530_v20 = vand.u32 4294901760, %v10515_v35 }
 0x136   :  { %v1245_v34 = vpop.f32.mrf.mxu1  ;;  %908 = vmatprep.mubr.f32.mxu0 %v13686_v57 }
 0x137   :  { %v378_v61 = vpop.f32.mrf.mxu0  ;;  %v10518_v27 = vadd.f32 %v1245_v34, %v356_v62  ;;  %13971 = vst [vmem:[#allocation311_spill] sm:$0xff] %v10530_v20  ;;  %v10540_v49 = vand.u32 4294901760, %v934_v40 }
 0x138   :  { %v1250_v1 = vpop.f32.mrf.mxu1  ;;  %1585 = vmatmul.mubr.f32.gmra.mxu1 %v10397_v31 }
 0x139   :  { %13969 = vst [vmem:[#allocation309_spill] sm:$0xff] %v10518_v27  ;;  %v387_v52 = vpop.f32.mrf.mxu0  ;;  %914 = vmatmul.mubr.f32.gmra.mxu0 %v10503_v3  ;;  %v10522_v19 = vadd.f32 %v1250_v1, %v365_v45  ;;  %1590 = vmatprep.mubr.f32.mxu1 %v13686_v57  ;;  %13972 = vst [vmem:[#allocation312_spill] sm:$0xff] %v10540_v49  ;;  %v945_v3 = vsub.f32 %v10515_v35, %v10530_v20 }
 0x13a   :  { %v1252_v62 = vpop.f32.mrf.mxu1  ;;  %919 = vmatprep.mubr.f32.mxu0 %v13686_v57 }
 0x13b   :  { %v389_v34 = vpop.f32.mrf.mxu0  ;;  %v10533_v31 = vadd.f32 %v1252_v62, %v367_v29 }
 0x13c   :  { %v1257_v27 = vpop.f32.mrf.mxu1  ;;  %1592 = vmatmul.mubr.f32.gmra.mxu1 %v10405_v55 }
 0x13d   :  { %v398_v1 = vpop.f32.mrf.mxu0  ;;  %925 = vmatmul.mubr.f32.gmra.mxu0 %v10525_v54  ;;  %v10537_v45 = vadd.f32 %v1257_v27, %v376_v7  ;;  %1597 = vmatprep.mubr.f32.mxu1 %v13686_v57  ;;  %v10552_v7 = vand.u32 4294901760, %v945_v3 }
 0x13e   :  { %v1259_v37 = vpop.f32.mrf.mxu1  ;;  %930 = vmatprep.mubr.f32.mxu0 %v13686_v57 }
 0x13f   :  { %v400_v29 = vpop.f32.mrf.mxu0  ;;  %v10545_v62 = vadd.f32 %v1259_v37, %v378_v61  ;;  %13973 = vst [vmem:[#allocation313_spill] sm:$0xff] %v10552_v7 }
 0x140   :  { %v1264_v47 = vpop.f32.mrf.mxu1  ;;  %1599 = vmatmul.mubr.f32.gmra.mxu1 %v10426_v9 }
 0x141   :  { %v409_v55 = vpop.f32.mrf.mxu0  ;;  %936 = vmatmul.mubr.f32.gmra.mxu0 %v10540_v49  ;;  %v10549_v27 = vadd.f32 %v1264_v47, %v387_v52  ;;  %1604 = vmatprep.mubr.f32.mxu1 %v13686_v57 }
 0x142   :  { %v1266_v40 = vpop.f32.mrf.mxu1  ;;  %941 = vmatprep.mubr.f32.mxu0 %v13686_v57 }
 0x143   :  { %v411_v54 = vpop.f32.mrf.mxu0  ;;  %v10555_v20 = vadd.f32 %v1266_v40, %v389_v34 }
 0x144   :  { %v1271_v37 = vpop.f32.mrf.mxu1  ;;  %1606 = vmatmul.mubr.f32.gmra.mxu1 %v10457_v4  ;;  %v13975_v4 = vld [vmem:[#allocation40_spill] sm:$0xff] }
 0x145   :  { %v420_v61 = vpop.f32.mrf.mxu0  ;;  %947 = vmatmul.mubr.f32.gmra.mxu0 %v10552_v7  ;;  %v10559_v9 = vadd.f32 %v1271_v37, %v398_v1  ;;  %1611 = vmatprep.mubr.f32.mxu1 %v13686_v57  ;;  %v13976_v37 = vand.u32 4294901760, %v9043_v24 }
 0x146   :  { %v1273_v47 = vpop.f32.mrf.mxu1  ;;  %1754 = vmatprep.mubr.f32.mxu0 %v13686_v57 }
 0x147   :  { %v422_v3 = vpop.f32.mrf.mxu0  ;;  %v10563_v52 = vadd.f32 %v1273_v47, %v400_v29  ;;  %v13977_v29 = vld [vmem:[#allocation12_spill] sm:$0xff] }
 0x148   :  { %v1278_v49 = vpop.f32.mrf.mxu1  ;;  %1613 = vmatmul.mubr.f32.gmra.mxu1 %v10477_v63  ;;  %v13978_v47 = vand.u32 4294901760, %v13977_v29  ;;  %v13982_v29 = vand.u32 4294901760, %v9085_v41 }
 0x149   :  { %v431_v34 = vpop.f32.mrf.mxu0  ;;  %v10566_v40 = vadd.f32 %v1278_v49, %v409_v55  ;;  %1757 = vmatmul.mubr.f32.vlgmr.msra.gmra.mxu0 %v13975_v4  ;;  %1618 = vmatprep.mubr.f32.mxu1 %v13686_v57  ;;  %v13979_v55 = vand.u32 4294901760, %v9063_v32 }
 0x14a   :  { %v1280_v1 = vpop.f32.mrf.mxu1  ;;  %1762 = vmatprep.mubr.f32.mxu0 %v13686_v57  ;;  %2947 = vmatpush1.msra.mxu0 %v13976_v37 }
 0x14b   :  { %13974 = vst [vmem:[#allocation314_spill] sm:$0xff] %v10566_v40  ;;  %v433_v7 = vpop.f32.mrf.mxu0  ;;  %v10573_v35 = vadd.f32 %v1280_v1, %v411_v54  ;;  %2951 = vmatprep.subr.mxu0 %v13978_v47  ;;  %v13980_v40 = vld [vmem:[#allocation45_spill] sm:$0xff]  ;;  %v13981_v54 = vand.u32 4294901760, %v9072_v36  ;;  %v13983_v47 = vld [vmem:[#allocation43_spill] sm:$0xff] }
 0x14c   :  { %v1285_v63 = vpop.f32.mrf.mxu1  ;;  %1620 = vmatmul.mubr.f32.gmra.mxu1 %v10497_v56  ;;  %2955 = vmatpush1.msra.mxu0 %v13979_v55 }
 0x14d   :  { %v442_v49 = vpop.f32.mrf.mxu0  ;;  %v10580_v4 = vadd.f32 %v1285_v63, %v420_v61  ;;  %1765 = vmatmul.mubr.f32.gmra.mxu0 %v13980_v40  ;;  %2363 = vmatprep.mubr.f32.mxu1 %v13686_v57  ;;  %v13984_v63 = vand.u32 4294901760, %v9099_v46  ;;  %v13985_v46 = vand.u32 4294901760, %v9125_v60 }
 0x14e   :  { %v1287_v24 = vpop.f32.mrf.mxu1  ;;  %1770 = vmatprep.mubr.f32.mxu0 %v13686_v57  ;;  %2959 = vmatprep.subr.mxu0 %v13981_v54  ;;  %v13987_v54 = vand.u32 4294901760, %v9137_v2  ;;  %v13988_v2 = vand.u32 4294901760, %v9148_v13 }
 0x14f   :  { %v444_v1 = vpop.f32.mrf.mxu0  ;;  %v10587_v37 = vadd.f32 %v1287_v24, %v422_v3  ;;  %2963 = vmatpush1.msra.mxu0 %v13982_v29 }
 0x150   :  { %v1292_v32 = vpop.f32.mrf.mxu1  ;;  %2367 = vmatmul.mubr.f32.vlgmr.msra.gmra.mxu1 %v13983_v47  ;;  %2967 = vmatprep.subr.mxu0 %v13984_v63  ;;  %v14066_v47 = vld [vmem:[#allocation34_spill] sm:$0xff] }
 0x151   :  { %v453_v61 = vpop.f32.mrf.mxu0  ;;  %v10594_v55 = vadd.f32 %v1292_v32, %v431_v34  ;;  %1773 = vmatmul.mubr.f32.gmra.mxu0 %v9451_v14  ;;  %3552 = vmatpush1.msra.mxu1 %v9012_v5  ;;  %v13986_v34 = vld [vmem:[#allocation49_spill] sm:$0xff]  ;;  %v14072_v14 = vld [vmem:[#allocation36_spill] sm:$0xff] }
 0x152   :  { %v1294_v36 = vpop.f32.mrf.mxu1  ;;  %1778 = vmatprep.mubr.f32.mxu0 %v13686_v57  ;;  %2372 = vmatprep.mubr.f32.mxu1 %v13686_v57 }
 0x153   :  { %v455_v41 = vpop.f32.mrf.mxu0  ;;  %v10600_v3 = vadd.f32 %v1294_v36, %v433_v7  ;;  %3554 = vmatprep.subr.mxu1 %v9014_v6  ;;  %2971 = vmatpush1.msra.mxu0 %v13985_v46  ;;  %v13992_v46 = vand.u32 4294901760, %v9185_v59  ;;  %v13994_v59 = vand.u32 4294901760, %v9197_v43 }
 0x154   :  { %v1299_v24 = vpop.f32.mrf.mxu1  ;;  %2376 = vmatmul.mubr.f32.gmra.mxu1 %v13986_v34  ;;  %2975 = vmatprep.subr.mxu0 %v13987_v54  ;;  %v14052_v34 = vld [vmem:[#allocation101_spill] sm:$0xff] }
 0x155   :  { %v464_v5 = vpop.f32.mrf.mxu0  ;;  %v10608_v29 = vadd.f32 %v1299_v24, %v442_v49  ;;  %1781 = vmatmul.mubr.f32.gmra.mxu0 %v9454_v42  ;;  %2381 = vmatprep.mubr.f32.mxu1 %v13686_v57  ;;  %v13989_v49 = vand.u32 4294901760, %v9159_v44  ;;  %v13990_v44 = vand.u32 4294901760, %v9171_v53  ;;  %v14069_v42 = vld [vmem:[#allocation107_spill] sm:$0xff] }
 0x156   :  { %v1301_v7 = vpop.f32.mrf.mxu1  ;;  %1786 = vmatprep.mubr.f32.mxu0 %v13686_v57  ;;  %3556 = vmatpush1.msra.mxu1 %v9016_v10 }
 0x157   :  { %v466_v6 = vpop.f32.mrf.mxu0  ;;  %v10614_v60 = vadd.f32 %v1301_v7, %v444_v1  ;;  %3558 = vmatprep.subr.mxu1 %v9018_v11  ;;  %2979 = vmatpush1.msra.mxu0 %v13988_v2  ;;  %v13993_v7 = vld [vmem:[#allocation64_spill] sm:$0xff]  ;;  %v13996_v2 = vand.u32 4294901760, %v9218_v58  ;;  %v13998_v58 = vand.u32 4294901760, %v9231_v8 }
 0x158   :  { %v1306_v32 = vpop.f32.mrf.mxu1  ;;  %2385 = vmatmul.mubr.f32.gmra.mxu1 %v9468_v48  ;;  %2983 = vmatprep.subr.mxu0 %v13989_v49 }
 0x159   :  { %v475_v63 = vpop.f32.mrf.mxu0  ;;  %v10622_v36 = vadd.f32 %v1306_v32, %v453_v61  ;;  %1789 = vmatmul.mubr.f32.gmra.mxu0 %v9463_v39  ;;  %2390 = vmatprep.mubr.f32.mxu1 %v13686_v57  ;;  %v13991_v61 = vld [vmem:[#allocation60_spill] sm:$0xff] }
 0x15a   :  { %v1308_v10 = vpop.f32.mrf.mxu1  ;;  %1794 = vmatprep.mubr.f32.mxu0 %v13686_v57  ;;  %3560 = vmatpush1.msra.mxu1 %v9020_v12 }
 0x15b   :  { %v477_v11 = vpop.f32.mrf.mxu0  ;;  %v10628_v13 = vadd.f32 %v1308_v10, %v455_v41  ;;  %3562 = vmatprep.subr.mxu1 %v9023_v16  ;;  %2987 = vmatpush1.msra.mxu0 %v13990_v44  ;;  %v13997_v10 = vld [vmem:[#allocation69_spill] sm:$0xff]  ;;  %v14000_v44 = vand.u32 4294901760, %v9249_v50 }
 0x15c   :  { %v1313_v1 = vpop.f32.mrf.mxu1  ;;  %2394 = vmatmul.mubr.f32.gmra.mxu1 %v13991_v61  ;;  %2991 = vmatprep.subr.mxu0 %v13992_v46  ;;  %v14036_v61 = vld [vmem:[#allocation90_spill] sm:$0xff] }
 0x15d   :  { %v486_v24 = vpop.f32.mrf.mxu0  ;;  %v10636_v54 = vadd.f32 %v1313_v1, %v464_v5  ;;  %1797 = vmatmul.mubr.f32.gmra.mxu0 %v13993_v7  ;;  %2399 = vmatprep.mubr.f32.mxu1 %v13686_v57  ;;  %v13995_v5 = vld [vmem:[#allocation63_spill] sm:$0xff] }
 0x15e   :  { %v1315_v12 = vpop.f32.mrf.mxu1  ;;  %1802 = vmatprep.mubr.f32.mxu0 %v13686_v57  ;;  %3564 = vmatpush1.msra.mxu1 %v9025_v17 }
 0x15f   :  { %v488_v16 = vpop.f32.mrf.mxu0  ;;  %v10642_v53 = vadd.f32 %v1315_v12, %v466_v6  ;;  %3566 = vmatprep.subr.mxu1 %v9027_v18  ;;  %2995 = vmatpush1.msra.mxu0 %v13994_v59  ;;  %v14001_v12 = vld [vmem:[#allocation70_spill] sm:$0xff] }
 0x160   :  { %v1320_v41 = vpop.f32.mrf.mxu1  ;;  %2403 = vmatmul.mubr.f32.gmra.mxu1 %v13995_v5  ;;  %2999 = vmatprep.subr.mxu0 %v13996_v2  ;;  %v14003_v59 = vld [vmem:[#allocation14_spill] sm:$0xff] }
 0x161   :  { %v497_v32 = vpop.f32.mrf.mxu0  ;;  %v10650_v49 = vadd.f32 %v1320_v41, %v475_v63  ;;  %1805 = vmatmul.mubr.f32.gmra.mxu0 %v13997_v10  ;;  %2408 = vmatprep.mubr.f32.mxu1 %v13686_v57  ;;  %v13999_v63 = vld [vmem:[#allocation68_spill] sm:$0xff]  ;;  %v14016_v5 = vld [vmem:[#allocation78_spill] sm:$0xff]  ;;  %v14044_v10 = vld [vmem:[#allocation97_spill] sm:$0xff] }
 0x162   :  { %v1322_v17 = vpop.f32.mrf.mxu1  ;;  %1810 = vmatprep.mubr.f32.mxu0 %v13686_v57  ;;  %3568 = vmatpush1.msra.mxu1 %v9040_v23  ;;  %v14004_v41 = vld [vmem:[#allocation28_spill] sm:$0xff] }
 0x163   :  { %v499_v18 = vpop.f32.mrf.mxu0  ;;  %v10656_v43 = vadd.f32 %v1322_v17, %v477_v11  ;;  %3570 = vmatprep.subr.mxu1 %v9046_v25  ;;  %3003 = vmatpush1.msra.mxu0 %v13998_v58  ;;  %v14002_v25 = vld [vmem:[#allocation13_spill] sm:$0xff]  ;;  %v14005_v50 = vand.u32 4294901760, %v14004_v41  ;;  %v14007_v17 = vld [vmem:[#allocation30_spill] sm:$0xff]  ;;  %v14011_v41 = vld [vmem:[#allocation16_spill] sm:$0xff] }
 0x164   :  { %v1327_v6 = vpop.f32.mrf.mxu1  ;;  %2412 = vmatmul.mubr.f32.gmra.mxu1 %v13999_v63  ;;  %3007 = vmatprep.subr.mxu0 %v14000_v44  ;;  %v14008_v58 = vand.u32 4294901760, %v14007_v17  ;;  %v14009_v63 = vld [vmem:[#allocation77_spill] sm:$0xff] }
 0x165   :  { %v508_v1 = vpop.f32.mrf.mxu0  ;;  %v10664_v46 = vadd.f32 %v1327_v6, %v486_v24  ;;  %1813 = vmatmul.mubr.f32.gmra.mxu0 %v14001_v12  ;;  %2417 = vmatprep.mubr.f32.mxu1 %v13686_v57  ;;  %v14006_v24 = vld [vmem:[#allocation72_spill] sm:$0xff] }
 0x166   :  { %v1329_v23 = vpop.f32.mrf.mxu1  ;;  %1818 = vmatprep.mubr.f32.mxu0 %v13686_v57  ;;  %3572 = vmatpush1.msra.mxu1 %v14002_v25 }
 0x167   :  { %v510_v8 = vpop.f32.mrf.mxu0  ;;  %v10670_v11 = vadd.f32 %v1329_v23, %v488_v16  ;;  %3574 = vmatprep.subr.mxu1 %v14003_v59  ;;  %3011 = vmatpush1.msra.mxu0 %v14005_v50  ;;  %v14010_v23 = vld [vmem:[#allocation15_spill] sm:$0xff]  ;;  %v14012_v50 = vand.u32 4294901760, %v9285_v28 }
 0x168   :  { %v1334_v2 = vpop.f32.mrf.mxu1  ;;  %2421 = vmatmul.mubr.f32.gmra.mxu1 %v14006_v24  ;;  %3015 = vmatprep.subr.mxu0 %v14008_v58 }
 0x169   :  { %v519_v6 = vpop.f32.mrf.mxu0  ;;  %v10678_v44 = vadd.f32 %v1334_v2, %v497_v32  ;;  %1821 = vmatmul.mubr.f32.gmra.mxu0 %v14009_v63  ;;  %2426 = vmatprep.mubr.f32.mxu1 %v13686_v57  ;;  %v14013_v32 = vld [vmem:[#allocation76_spill] sm:$0xff]  ;;  %v14014_v2 = vld [vmem:[#allocation33_spill] sm:$0xff] }
 0x16a   :  { %v1336_v16 = vpop.f32.mrf.mxu1  ;;  %1826 = vmatprep.mubr.f32.mxu0 %v13686_v57  ;;  %3576 = vmatpush1.msra.mxu1 %v14010_v23  ;;  %v14015_v58 = vand.u32 4294901760, %v14014_v2 }
 0x16b   :  { %v521_v25 = vpop.f32.mrf.mxu0  ;;  %v10684_v59 = vadd.f32 %v1336_v16, %v499_v18  ;;  %3578 = vmatprep.subr.mxu1 %v14011_v41  ;;  %3019 = vmatpush1.msra.mxu0 %v14012_v50  ;;  %v14017_v16 = vld [vmem:[#allocation17_spill] sm:$0xff]  ;;  %v14018_v41 = vld [vmem:[#allocation18_spill] sm:$0xff]  ;;  %v14019_v50 = vand.u32 4294901760, %v9311_v51 }
 0x16c   :  { %v1341_v17 = vpop.f32.mrf.mxu1  ;;  %2430 = vmatmul.mubr.f32.gmra.mxu1 %v14013_v32  ;;  %3023 = vmatprep.subr.mxu0 %v14015_v58 }
 0x16d   :  { %v530_v24 = vpop.f32.mrf.mxu0  ;;  %v10692_v63 = vadd.f32 %v1341_v17, %v508_v1  ;;  %1829 = vmatmul.mubr.f32.gmra.mxu0 %v14016_v5  ;;  %2435 = vmatprep.mubr.f32.mxu1 %v13686_v57  ;;  %v14020_v1 = vld [vmem:[#allocation80_spill] sm:$0xff]  ;;  %v14021_v17 = vand.u32 4294901760, %v9330_v22  ;;  %v14022_v5 = vld [vmem:[#allocation85_spill] sm:$0xff]  ;;  %v14024_v22 = vand.u32 4294901760, %v9341_v15 }
 0x16e   :  { %v1343_v18 = vpop.f32.mrf.mxu1  ;;  %1834 = vmatprep.mubr.f32.mxu0 %v13686_v57  ;;  %3580 = vmatpush1.msra.mxu1 %v14017_v16  ;;  %v14023_v16 = vld [vmem:[#allocation20_spill] sm:$0xff] }
 0x16f   :  { %v532_v28 = vpop.f32.mrf.mxu0  ;;  %v10698_v23 = vadd.f32 %v1343_v18, %v510_v8  ;;  %3582 = vmatprep.subr.mxu1 %v14018_v41  ;;  %3027 = vmatpush1.msra.mxu0 %v14019_v50  ;;  %v14026_v50 = vld [vmem:[#allocation38_spill] sm:$0xff] }
 0x170   :  { %v1348_v2 = vpop.f32.mrf.mxu1  ;;  %2439 = vmatmul.mubr.f32.gmra.mxu1 %v14020_v1  ;;  %3031 = vmatprep.subr.mxu0 %v14021_v17 }
 0x171   :  { %v541_v58 = vpop.f32.mrf.mxu0  ;;  %v10706_v32 = vadd.f32 %v1348_v2, %v519_v6  ;;  %1837 = vmatmul.mubr.f32.gmra.mxu0 %v14022_v5  ;;  %2444 = vmatprep.mubr.f32.mxu1 %v13686_v57  ;;  %v14025_v6 = vld [vmem:[#allocation84_spill] sm:$0xff]  ;;  %v14027_v2 = vand.u32 4294901760, %v14026_v50  ;;  %v14028_v5 = vld [vmem:[#allocation89_spill] sm:$0xff] }
 0x172   :  { %v1350_v8 = vpop.f32.mrf.mxu1  ;;  %1842 = vmatprep.mubr.f32.mxu0 %v13686_v57  ;;  %3584 = vmatpush1.msra.mxu1 %v13743_v38 }
 0x173   :  { %v543_v51 = vpop.f32.mrf.mxu0  ;;  %v10712_v18 = vadd.f32 %v1350_v8, %v521_v25  ;;  %3586 = vmatprep.subr.mxu1 %v14023_v16  ;;  %3035 = vmatpush1.msra.mxu0 %v14024_v22  ;;  %v14029_v25 = vld [vmem:[#allocation21_spill] sm:$0xff]  ;;  %v14030_v16 = vld [vmem:[#allocation22_spill] sm:$0xff]  ;;  %v14031_v22 = vld [vmem:[#allocation39_spill] sm:$0xff] }
 0x174   :  { %v1355_v41 = vpop.f32.mrf.mxu1  ;;  %2448 = vmatmul.mubr.f32.gmra.mxu1 %v14025_v6  ;;  %3039 = vmatprep.subr.mxu0 %v14027_v2  ;;  %v14032_v50 = vand.u32 4294901760, %v14031_v22  ;;  %v14038_v22 = vld [vmem:[#allocation24_spill] sm:$0xff] }
 0x175   :  { %v552_v17 = vpop.f32.mrf.mxu0  ;;  %v10720_v1 = vadd.f32 %v1355_v41, %v530_v24  ;;  %1845 = vmatmul.mubr.f32.gmra.mxu0 %v14028_v5  ;;  %2453 = vmatprep.mubr.f32.mxu1 %v13686_v57  ;;  %v14033_v24 = vld [vmem:[#allocation88_spill] sm:$0xff]  ;;  %v14034_v41 = vld [vmem:[#allocation41_spill] sm:$0xff] }
 0x176   :  { %v1357_v38 = vpop.f32.mrf.mxu1  ;;  %1850 = vmatprep.mubr.f32.mxu0 %v13686_v57  ;;  %3588 = vmatpush1.msra.mxu1 %v14029_v25  ;;  %v14035_v6 = vand.u32 4294901760, %v14034_v41 }
 0x177   :  { %v554_v15 = vpop.f32.mrf.mxu0  ;;  %v10726_v8 = vadd.f32 %v1357_v38, %v532_v28  ;;  %3590 = vmatprep.subr.mxu1 %v14030_v16  ;;  %3043 = vmatpush1.msra.mxu0 %v14032_v50  ;;  %v14037_v38 = vld [vmem:[#allocation23_spill] sm:$0xff]  ;;  %v14039_v50 = vld [vmem:[#allocation42_spill] sm:$0xff] }
 0x178   :  { %v1362_v2 = vpop.f32.mrf.mxu1  ;;  %2457 = vmatmul.mubr.f32.gmra.mxu1 %v14033_v24  ;;  %3047 = vmatprep.subr.mxu0 %v14035_v6  ;;  %v14040_v41 = vand.u32 4294901760, %v14039_v50  ;;  %v14046_v50 = vld [vmem:[#allocation26_spill] sm:$0xff] }
 0x179   :  { %v563_v5 = vpop.f32.mrf.mxu0  ;;  %v10734_v12 = vadd.f32 %v1362_v2, %v541_v58  ;;  %1853 = vmatmul.mubr.f32.gmra.mxu0 %v14036_v61  ;;  %2462 = vmatprep.mubr.f32.mxu1 %v13686_v57  ;;  %v14041_v58 = vld [vmem:[#allocation92_spill] sm:$0xff]  ;;  %v14042_v2 = vld [vmem:[#allocation46_spill] sm:$0xff] }
 0x17a   :  { %v1364_v28 = vpop.f32.mrf.mxu1  ;;  %1858 = vmatprep.mubr.f32.mxu0 %v13686_v57  ;;  %3592 = vmatpush1.msra.mxu1 %v14037_v38  ;;  %v14043_v24 = vand.u32 4294901760, %v14042_v2 }
 0x17b   :  { %v565_v25 = vpop.f32.mrf.mxu0  ;;  %v10740_v16 = vadd.f32 %v1364_v28, %v543_v51  ;;  %3594 = vmatprep.subr.mxu1 %v14038_v22  ;;  %3051 = vmatpush1.msra.mxu0 %v14040_v41  ;;  %v14045_v28 = vld [vmem:[#allocation25_spill] sm:$0xff]  ;;  %v14047_v41 = vld [vmem:[#allocation47_spill] sm:$0xff] }
 0x17c   :  { %v1369_v6 = vpop.f32.mrf.mxu1  ;;  %2466 = vmatmul.mubr.f32.gmra.mxu1 %v14041_v58  ;;  %3055 = vmatprep.subr.mxu0 %v14043_v24  ;;  %v14048_v2 = vand.u32 4294901760, %v14047_v41  ;;  %v14054_v41 = vld [vmem:[#allocation29_spill] sm:$0xff] }
 0x17d   :  { %v574_v61 = vpop.f32.mrf.mxu0  ;;  %v10748_v48 = vadd.f32 %v1369_v6, %v552_v17  ;;  %1861 = vmatmul.mubr.f32.gmra.mxu0 %v14044_v10  ;;  %2471 = vmatprep.mubr.f32.mxu1 %v13686_v57  ;;  %v14049_v17 = vld [vmem:[#allocation96_spill] sm:$0xff]  ;;  %v14050_v6 = vld [vmem:[#allocation50_spill] sm:$0xff] }
 0x17e   :  { %v1371_v51 = vpop.f32.mrf.mxu1  ;;  %1866 = vmatprep.mubr.f32.mxu0 %v13686_v57  ;;  %3596 = vmatpush1.msra.mxu1 %v14045_v28  ;;  %v14051_v58 = vand.u32 4294901760, %v14050_v6 }
 0x17f   :  { %v576_v38 = vpop.f32.mrf.mxu0  ;;  %v10754_v22 = vadd.f32 %v1371_v51, %v554_v15  ;;  %3598 = vmatprep.subr.mxu1 %v14046_v50  ;;  %3059 = vmatpush1.msra.mxu0 %v14048_v2  ;;  %v14053_v51 = vld [vmem:[#allocation27_spill] sm:$0xff] }
 0x180   :  { %v1376_v24 = vpop.f32.mrf.mxu1  ;;  %2475 = vmatmul.mubr.f32.gmra.mxu1 %v14049_v17  ;;  %3063 = vmatprep.subr.mxu0 %v14051_v58  ;;  %v14055_v2 = vld [vmem:[#allocation51_spill] sm:$0xff] }
 0x181   :  { %v585_v10 = vpop.f32.mrf.mxu0  ;;  %v10762_v7 = vadd.f32 %v1376_v24, %v563_v5  ;;  %1869 = vmatmul.mubr.f32.gmra.mxu0 %v14052_v34  ;;  %2480 = vmatprep.mubr.f32.mxu1 %v13686_v57  ;;  %v14056_v6 = vand.u32 4294901760, %v14055_v2  ;;  %v14057_v5 = vld [vmem:[#allocation100_spill] sm:$0xff]  ;;  %v14059_v34 = vld [vmem:[#allocation19_spill] sm:$0xff] }
 0x182   :  { %v1378_v15 = vpop.f32.mrf.mxu1  ;;  %1874 = vmatprep.mubr.f32.mxu0 %v13686_v57  ;;  %3600 = vmatpush1.msra.mxu1 %v14053_v51 }
 0x183   :  { %v587_v28 = vpop.f32.mrf.mxu0  ;;  %v10768_v50 = vadd.f32 %v1378_v15, %v565_v25  ;;  %3602 = vmatprep.subr.mxu1 %v14054_v41  ;;  %3067 = vmatpush1.msra.mxu0 %v14056_v6  ;;  %v14060_v25 = vld [vmem:[#allocation31_spill] sm:$0xff]  ;;  %v14062_v41 = vld [vmem:[#allocation32_spill] sm:$0xff] }
 0x184   :  { %v1383_v58 = vpop.f32.mrf.mxu1  ;;  %2484 = vmatmul.mubr.f32.gmra.mxu1 %v14057_v5  ;;  %v14063_v6 = vld [vmem:[#allocation103_spill] sm:$0xff] }
 0x185   :  { %v596_v24 = vpop.f32.mrf.mxu0  ;;  %v10774_v17 = vadd.f32 %v1383_v58, %v574_v61  ;;  %1877 = vmatmul.mubr.f32.gmra.mxu0 %v14059_v34  ;;  %2489 = vmatprep.mubr.f32.mxu1 %v13686_v57  ;;  %v14065_v58 = vld [vmem:[#allocation108_spill] sm:$0xff] }
 0x186   :  { %v1385_v39 = vpop.f32.mrf.mxu1  ;;  %1882 = vmatprep.mubr.f32.mxu0 %v13686_v57  ;;  %3604 = vmatpush1.msra.mxu1 %v14060_v25 }
 0x187   :  { %14058 = vst [vmem:[#allocation12_spill] sm:$0xff] %v10774_v17  ;;  %v598_v15 = vpop.f32.mrf.mxu0  ;;  %v10780_v51 = vadd.f32 %v1385_v39, %v576_v38  ;;  %3606 = vmatprep.subr.mxu1 %v14062_v41  ;;  %v14068_v38 = vld [vmem:[#allocation35_spill] sm:$0xff]  ;;  %v14215_v17 = vld [vmem:[#allocation246_spill] sm:$0xff] }
 0x188   :  { %v1390_v2 = vpop.f32.mrf.mxu1  ;;  %2493 = vmatmul.mubr.f32.gmra.mxu1 %v14063_v6 }
 0x189   :  { %14061 = vst [vmem:[#allocation13_spill] sm:$0xff] %v10780_v51  ;;  %v607_v5 = vpop.f32.mrf.mxu0  ;;  %v10784_v61 = vadd.f32 %v1390_v2, %v585_v10  ;;  %1885 = vmatmul.mubr.f32.gmra.mxu0 %v14065_v58  ;;  %2498 = vmatprep.mubr.f32.mxu1 %v13686_v57  ;;  %v14071_v2 = vld [vmem:[#allocation109_spill] sm:$0xff]  ;;  %v14202_v51 = vld [vmem:[#allocation234_spill] sm:$0xff] }
 0x18a   :  { %v1392_v34 = vpop.f32.mrf.mxu1  ;;  %1890 = vmatprep.mubr.f32.mxu0 %v13686_v57  ;;  %3608 = vmatpush1.msra.mxu1 %v14066_v47 }
 0x18b   :  { %14064 = vst [vmem:[#allocation14_spill] sm:$0xff] %v10784_v61  ;;  %v609_v25 = vpop.f32.mrf.mxu0  ;;  %v10790_v39 = vadd.f32 %v1392_v34, %v587_v28  ;;  %3610 = vmatprep.subr.mxu1 %v14068_v38  ;;  %v14074_v38 = vld [vmem:[#allocation111_spill] sm:$0xff]  ;;  %v14160_v61 = vld [vmem:[#allocation194_spill] sm:$0xff] }
 0x18c   :  { %v1397_v41 = vpop.f32.mrf.mxu1  ;;  %2502 = vmatmul.mubr.f32.gmra.mxu1 %v14069_v42 }
 0x18d   :  { %14067 = vst [vmem:[#allocation28_spill] sm:$0xff] %v10790_v39  ;;  %v618_v6 = vpop.f32.mrf.mxu0  ;;  %v10794_v10 = vadd.f32 %v1397_v41, %v596_v24  ;;  %1893 = vmatmul.mubr.f32.gmra.mxu0 %v14071_v2  ;;  %2507 = vmatprep.mubr.f32.mxu1 %v13686_v57  ;;  %v14076_v24 = vld [vmem:[#allocation116_spill] sm:$0xff] }
 0x18e   :  { %v1399_v58 = vpop.f32.mrf.mxu1  ;;  %1898 = vmatprep.mubr.f32.mxu0 %v13686_v57  ;;  %3612 = vmatpush1.msra.mxu1 %v14072_v14 }
 0x18f   :  { %14070 = vst [vmem:[#allocation30_spill] sm:$0xff] %v10794_v10  ;;  %v620_v47 = vpop.f32.mrf.mxu0  ;;  %v10800_v34 = vadd.f32 %v1399_v58, %v598_v15  ;;  %v14078_v10 = vld [vmem:[#allocation115_spill] sm:$0xff] }
 0x190   :  { %v1404_v28 = vpop.f32.mrf.mxu1  ;;  %2511 = vmatmul.mubr.f32.gmra.mxu1 %v14074_v38  ;;  %v14080_v38 = vld [vmem:[#allocation120_spill] sm:$0xff] }
 0x191   :  { %14073 = vst [vmem:[#allocation15_spill] sm:$0xff] %v10800_v34  ;;  %v629_v40 = vpop.f32.mrf.mxu0  ;;  %v10803_v42 = vadd.f32 %v1404_v28, %v607_v5  ;;  %1901 = vmatmul.mubr.f32.gmra.mxu0 %v14076_v24  ;;  %2516 = vmatprep.mubr.f32.mxu1 %v13686_v57  ;;  %v14082_v34 = vld [vmem:[#allocation119_spill] sm:$0xff] }
 0x192   :  { %v1406_v41 = vpop.f32.mrf.mxu1  ;;  %1906 = vmatprep.mubr.f32.mxu0 %v13686_v57 }
 0x193   :  { %14075 = vst [vmem:[#allocation16_spill] sm:$0xff] %v10803_v42  ;;  %v631_v2 = vpop.f32.mrf.mxu0  ;;  %v10808_v56 = vadd.f32 %v1406_v41, %v609_v25 }
 0x194   :  { %v1411_v14 = vpop.f32.mrf.mxu1  ;;  %2520 = vmatmul.mubr.f32.gmra.mxu1 %v14078_v10  ;;  %v14084_v10 = vld [vmem:[#allocation121_spill] sm:$0xff] }
 0x195   :  { %14077 = vst [vmem:[#allocation33_spill] sm:$0xff] %v10808_v56  ;;  %v640_v15 = vpop.f32.mrf.mxu0  ;;  %v10811_v58 = vadd.f32 %v1411_v14, %v618_v6  ;;  %1909 = vmatmul.mubr.f32.gmra.mxu0 %v14080_v38  ;;  %2525 = vmatprep.mubr.f32.mxu1 %v13686_v57  ;;  %v14086_v56 = vld [vmem:[#allocation122_spill] sm:$0xff] }
 0x196   :  { %v1413_v5 = vpop.f32.mrf.mxu1  ;;  %1914 = vmatprep.mubr.f32.mxu0 %v13686_v57 }
 0x197   :  { %14079 = vst [vmem:[#allocation17_spill] sm:$0xff] %v10811_v58  ;;  %v642_v28 = vpop.f32.mrf.mxu0  ;;  %v10816_v24 = vadd.f32 %v1413_v5, %v620_v47 }
 0x198   :  { %v1418_v42 = vpop.f32.mrf.mxu1  ;;  %2529 = vmatmul.mubr.f32.gmra.mxu1 %v14082_v34  ;;  %v14088_v34 = vld [vmem:[#allocation127_spill] sm:$0xff] }
 0x199   :  { %14081 = vst [vmem:[#allocation18_spill] sm:$0xff] %v10816_v24  ;;  %v651_v25 = vpop.f32.mrf.mxu0  ;;  %v10819_v41 = vadd.f32 %v1418_v42, %v629_v40  ;;  %1917 = vmatmul.mubr.f32.gmra.mxu0 %v14084_v10  ;;  %2534 = vmatprep.mubr.f32.mxu1 %v13686_v57  ;;  %v14090_v24 = vld [vmem:[#allocation126_spill] sm:$0xff] }
 0x19a   :  { %v1420_v6 = vpop.f32.mrf.mxu1  ;;  %1922 = vmatprep.mubr.f32.mxu0 %v13686_v57 }
 0x19b   :  { %14083 = vst [vmem:[#allocation20_spill] sm:$0xff] %v10819_v41  ;;  %v653_v14 = vpop.f32.mrf.mxu0  ;;  %v10824_v38 = vadd.f32 %v1420_v6, %v631_v2 }
 0x19c   :  { %v1425_v58 = vpop.f32.mrf.mxu1  ;;  %2538 = vmatmul.mubr.f32.gmra.mxu1 %v14086_v56  ;;  %v14092_v56 = vld [vmem:[#allocation131_spill] sm:$0xff] }
 0x19d   :  { %14085 = vst [vmem:[#allocation38_spill] sm:$0xff] %v10824_v38  ;;  %v662_v47 = vpop.f32.mrf.mxu0  ;;  %v10827_v5 = vadd.f32 %v1425_v58, %v640_v15  ;;  %1925 = vmatmul.mubr.f32.gmra.mxu0 %v14088_v34  ;;  %2543 = vmatprep.mubr.f32.mxu1 %v13686_v57  ;;  %v14094_v38 = vld [vmem:[#allocation130_spill] sm:$0xff] }
 0x19e   :  { %v1427_v42 = vpop.f32.mrf.mxu1  ;;  %1930 = vmatprep.mubr.f32.mxu0 %v13686_v57 }
 0x19f   :  { %14087 = vst [vmem:[#allocation21_spill] sm:$0xff] %v10827_v5  ;;  %v664_v40 = vpop.f32.mrf.mxu0  ;;  %v10832_v10 = vadd.f32 %v1427_v42, %v642_v28 }
 0x1a0   :  { %v1432_v41 = vpop.f32.mrf.mxu1  ;;  %2547 = vmatmul.mubr.f32.gmra.mxu1 %v14090_v24  ;;  %v14096_v24 = vld [vmem:[#allocation135_spill] sm:$0xff] }
 0x1a1   :  { %14089 = vst [vmem:[#allocation22_spill] sm:$0xff] %v10832_v10  ;;  %v673_v2 = vpop.f32.mrf.mxu0  ;;  %v10835_v6 = vadd.f32 %v1432_v41, %v651_v25  ;;  %1933 = vmatmul.mubr.f32.gmra.mxu0 %v14092_v56  ;;  %2552 = vmatprep.mubr.f32.mxu1 %v13686_v57  ;;  %v14098_v10 = vld [vmem:[#allocation134_spill] sm:$0xff] }
 0x1a2   :  { %v1434_v15 = vpop.f32.mrf.mxu1  ;;  %1938 = vmatprep.mubr.f32.mxu0 %v13686_v57 }
 0x1a3   :  { %14091 = vst [vmem:[#allocation39_spill] sm:$0xff] %v10835_v6  ;;  %v675_v58 = vpop.f32.mrf.mxu0  ;;  %v10840_v34 = vadd.f32 %v1434_v15, %v653_v14 }
 0x1a4   :  { %v1439_v5 = vpop.f32.mrf.mxu1  ;;  %2556 = vmatmul.mubr.f32.gmra.mxu1 %v14094_v38  ;;  %v14100_v38 = vld [vmem:[#allocation139_spill] sm:$0xff] }
 0x1a5   :  { %14093 = vst [vmem:[#allocation41_spill] sm:$0xff] %v10840_v34  ;;  %v684_v28 = vpop.f32.mrf.mxu0  ;;  %v10843_v42 = vadd.f32 %v1439_v5, %v662_v47  ;;  %1941 = vmatmul.mubr.f32.gmra.mxu0 %v14096_v24  ;;  %2561 = vmatprep.mubr.f32.mxu1 %v13686_v57  ;;  %v14102_v34 = vld [vmem:[#allocation138_spill] sm:$0xff] }
 0x1a6   :  { %v1441_v25 = vpop.f32.mrf.mxu1  ;;  %1946 = vmatprep.mubr.f32.mxu0 %v13686_v57 }
 0x1a7   :  { %14095 = vst [vmem:[#allocation23_spill] sm:$0xff] %v10843_v42  ;;  %v686_v41 = vpop.f32.mrf.mxu0  ;;  %v10848_v56 = vadd.f32 %v1441_v25, %v664_v40 }
 0x1a8   :  { %v1446_v6 = vpop.f32.mrf.mxu1  ;;  %2565 = vmatmul.mubr.f32.gmra.mxu1 %v14098_v10  ;;  %v14104_v10 = vld [vmem:[#allocation140_spill] sm:$0xff] }
 0x1a9   :  { %14097 = vst [vmem:[#allocation24_spill] sm:$0xff] %v10848_v56  ;;  %v695_v14 = vpop.f32.mrf.mxu0  ;;  %v10851_v15 = vadd.f32 %v1446_v6, %v673_v2  ;;  %1949 = vmatmul.mubr.f32.gmra.mxu0 %v14100_v38  ;;  %2570 = vmatprep.mubr.f32.mxu1 %v13686_v57  ;;  %v14106_v56 = vld [vmem:[#allocation142_spill] sm:$0xff] }
 0x1aa   :  { %v1448_v47 = vpop.f32.mrf.mxu1  ;;  %1954 = vmatprep.mubr.f32.mxu0 %v13686_v57 }
 0x1ab   :  { %14099 = vst [vmem:[#allocation42_spill] sm:$0xff] %v10851_v15  ;;  %v697_v5 = vpop.f32.mrf.mxu0  ;;  %v10856_v24 = vadd.f32 %v1448_v47, %v675_v58 }
 0x1ac   :  { %v1453_v42 = vpop.f32.mrf.mxu1  ;;  %2574 = vmatmul.mubr.f32.gmra.mxu1 %v14102_v34  ;;  %v14108_v34 = vld [vmem:[#allocation147_spill] sm:$0xff] }
 0x1ad   :  { %14101 = vst [vmem:[#allocation46_spill] sm:$0xff] %v10856_v24  ;;  %v706_v40 = vpop.f32.mrf.mxu0  ;;  %v10859_v25 = vadd.f32 %v1453_v42, %v684_v28  ;;  %1957 = vmatmul.mubr.f32.gmra.mxu0 %v14104_v10  ;;  %2579 = vmatprep.mubr.f32.mxu1 %v13686_v57  ;;  %v14110_v24 = vld [vmem:[#allocation146_spill] sm:$0xff] }
 0x1ae   :  { %v1455_v2 = vpop.f32.mrf.mxu1  ;;  %1962 = vmatprep.mubr.f32.mxu0 %v13686_v57 }
 0x1af   :  { %14103 = vst [vmem:[#allocation25_spill] sm:$0xff] %v10859_v25  ;;  %v708_v6 = vpop.f32.mrf.mxu0  ;;  %v10864_v38 = vadd.f32 %v1455_v2, %v686_v41 }
 0x1b0   :  { %v1460_v15 = vpop.f32.mrf.mxu1  ;;  %2583 = vmatmul.mubr.f32.gmra.mxu1 %v14106_v56  ;;  %v14112_v56 = vld [vmem:[#allocation151_spill] sm:$0xff] }
 0x1b1   :  { %14105 = vst [vmem:[#allocation26_spill] sm:$0xff] %v10864_v38  ;;  %v717_v58 = vpop.f32.mrf.mxu0  ;;  %v10867_v47 = vadd.f32 %v1460_v15, %v695_v14  ;;  %1965 = vmatmul.mubr.f32.gmra.mxu0 %v14108_v34  ;;  %2588 = vmatprep.mubr.f32.mxu1 %v13686_v57  ;;  %v14114_v38 = vld [vmem:[#allocation150_spill] sm:$0xff] }
 0x1b2   :  { %v1462_v28 = vpop.f32.mrf.mxu1  ;;  %1970 = vmatprep.mubr.f32.mxu0 %v13686_v57 }
 0x1b3   :  { %14107 = vst [vmem:[#allocation47_spill] sm:$0xff] %v10867_v47  ;;  %v719_v42 = vpop.f32.mrf.mxu0  ;;  %v10872_v10 = vadd.f32 %v1462_v28, %v697_v5 }
 0x1b4   :  { %v1467_v25 = vpop.f32.mrf.mxu1  ;;  %2592 = vmatmul.mubr.f32.gmra.mxu1 %v14110_v24  ;;  %v14116_v24 = vld [vmem:[#allocation152_spill] sm:$0xff] }
 0x1b5   :  { %14109 = vst [vmem:[#allocation50_spill] sm:$0xff] %v10872_v10  ;;  %v728_v41 = vpop.f32.mrf.mxu0  ;;  %v10875_v2 = vadd.f32 %v1467_v25, %v706_v40  ;;  %1973 = vmatmul.mubr.f32.gmra.mxu0 %v14112_v56  ;;  %2597 = vmatprep.mubr.f32.mxu1 %v13686_v57  ;;  %v14118_v10 = vld [vmem:[#allocation154_spill] sm:$0xff] }
 0x1b6   :  { %v1469_v14 = vpop.f32.mrf.mxu1  ;;  %1978 = vmatprep.mubr.f32.mxu0 %v13686_v57 }
 0x1b7   :  { %14111 = vst [vmem:[#allocation27_spill] sm:$0xff] %v10875_v2  ;;  %v730_v15 = vpop.f32.mrf.mxu0  ;;  %v10880_v34 = vadd.f32 %v1469_v14, %v708_v6 }
 0x1b8   :  { %v1474_v47 = vpop.f32.mrf.mxu1  ;;  %2601 = vmatmul.mubr.f32.gmra.mxu1 %v14114_v38  ;;  %v14120_v38 = vld [vmem:[#allocation158_spill] sm:$0xff] }
 0x1b9   :  { %14113 = vst [vmem:[#allocation29_spill] sm:$0xff] %v10880_v34  ;;  %v739_v5 = vpop.f32.mrf.mxu0  ;;  %v10883_v28 = vadd.f32 %v1474_v47, %v717_v58  ;;  %1981 = vmatmul.mubr.f32.gmra.mxu0 %v14116_v24  ;;  %2606 = vmatprep.mubr.f32.mxu1 %v13686_v57  ;;  %v14122_v34 = vld [vmem:[#allocation156_spill] sm:$0xff] }
 0x1ba   :  { %v1476_v40 = vpop.f32.mrf.mxu1  ;;  %1986 = vmatprep.mubr.f32.mxu0 %v13686_v57 }
 0x1bb   :  { %14115 = vst [vmem:[#allocation51_spill] sm:$0xff] %v10883_v28  ;;  %v741_v25 = vpop.f32.mrf.mxu0  ;;  %v10888_v56 = vadd.f32 %v1476_v40, %v719_v42 }
 0x1bc   :  { %v1481_v2 = vpop.f32.mrf.mxu1  ;;  %2610 = vmatmul.mubr.f32.gmra.mxu1 %v14118_v10  ;;  %v14124_v10 = vld [vmem:[#allocation163_spill] sm:$0xff] }
 0x1bd   :  { %14117 = vst [vmem:[#allocation31_spill] sm:$0xff] %v10888_v56  ;;  %v750_v6 = vpop.f32.mrf.mxu0  ;;  %v10891_v14 = vadd.f32 %v1481_v2, %v728_v41  ;;  %1989 = vmatmul.mubr.f32.gmra.mxu0 %v14120_v38  ;;  %2615 = vmatprep.mubr.f32.mxu1 %v13686_v57  ;;  %v14126_v56 = vld [vmem:[#allocation162_spill] sm:$0xff] }
 0x1be   :  { %v1483_v58 = vpop.f32.mrf.mxu1  ;;  %1994 = vmatprep.mubr.f32.mxu0 %v13686_v57 }
 0x1bf   :  { %14119 = vst [vmem:[#allocation32_spill] sm:$0xff] %v10891_v14  ;;  %v752_v47 = vpop.f32.mrf.mxu0  ;;  %v10896_v24 = vadd.f32 %v1483_v58, %v730_v15 }
 0x1c0   :  { %v1488_v28 = vpop.f32.mrf.mxu1  ;;  %2619 = vmatmul.mubr.f32.gmra.mxu1 %v14122_v34  ;;  %v14128_v34 = vld [vmem:[#allocation167_spill] sm:$0xff] }
 0x1c1   :  { %14121 = vst [vmem:[#allocation34_spill] sm:$0xff] %v10896_v24  ;;  %v761_v42 = vpop.f32.mrf.mxu0  ;;  %v10899_v40 = vadd.f32 %v1488_v28, %v739_v5  ;;  %1997 = vmatmul.mubr.f32.gmra.mxu0 %v14124_v10  ;;  %2624 = vmatprep.mubr.f32.mxu1 %v13686_v57  ;;  %v14130_v24 = vld [vmem:[#allocation166_spill] sm:$0xff] }
 0x1c2   :  { %v1490_v41 = vpop.f32.mrf.mxu1  ;;  %2002 = vmatprep.mubr.f32.mxu0 %v13686_v57 }
 0x1c3   :  { %14123 = vst [vmem:[#allocation35_spill] sm:$0xff] %v10899_v40  ;;  %v763_v2 = vpop.f32.mrf.mxu0  ;;  %v10904_v38 = vadd.f32 %v1490_v41, %v741_v25 }
 0x1c4   :  { %v1495_v14 = vpop.f32.mrf.mxu1  ;;  %2628 = vmatmul.mubr.f32.gmra.mxu1 %v14126_v56  ;;  %v14132_v56 = vld [vmem:[#allocation171_spill] sm:$0xff] }
 0x1c5   :  { %14125 = vst [vmem:[#allocation36_spill] sm:$0xff] %v10904_v38  ;;  %v772_v15 = vpop.f32.mrf.mxu0  ;;  %v10907_v58 = vadd.f32 %v1495_v14, %v750_v6  ;;  %2005 = vmatmul.mubr.f32.gmra.mxu0 %v14128_v34  ;;  %2633 = vmatprep.mubr.f32.mxu1 %v13686_v57  ;;  %v14134_v38 = vld [vmem:[#allocation170_spill] sm:$0xff] }
 0x1c6   :  { %v1497_v5 = vpop.f32.mrf.mxu1  ;;  %2010 = vmatprep.mubr.f32.mxu0 %v13686_v57 }
 0x1c7   :  { %14127 = vst [vmem:[#allocation315_spill] sm:$0xff] %v10907_v58  ;;  %v774_v28 = vpop.f32.mrf.mxu0  ;;  %v10912_v10 = vadd.f32 %v1497_v5, %v752_v47 }
 0x1c8   :  { %v1502_v40 = vpop.f32.mrf.mxu1  ;;  %2637 = vmatmul.mubr.f32.gmra.mxu1 %v14130_v24  ;;  %v14136_v24 = vld [vmem:[#allocation172_spill] sm:$0xff] }
 0x1c9   :  { %14129 = vst [vmem:[#allocation316_spill] sm:$0xff] %v10912_v10  ;;  %v783_v25 = vpop.f32.mrf.mxu0  ;;  %v10915_v41 = vadd.f32 %v1502_v40, %v761_v42  ;;  %2013 = vmatmul.mubr.f32.gmra.mxu0 %v14132_v56  ;;  %2642 = vmatprep.mubr.f32.mxu1 %v13686_v57  ;;  %v14138_v10 = vld [vmem:[#allocation174_spill] sm:$0xff] }
 0x1ca   :  { %v1504_v6 = vpop.f32.mrf.mxu1  ;;  %2018 = vmatprep.mubr.f32.mxu0 %v13686_v57 }
 0x1cb   :  { %14131 = vst [vmem:[#allocation317_spill] sm:$0xff] %v10915_v41  ;;  %v785_v14 = vpop.f32.mrf.mxu0  ;;  %v10920_v34 = vadd.f32 %v1504_v6, %v763_v2  ;;  %v151_v2 = vld [vmem:[#allocation5 + $0x178] sm:$0xff] }
 0x1cc   :  { %v1509_v58 = vpop.f32.mrf.mxu1  ;;  %2646 = vmatmul.mubr.f32.gmra.mxu1 %v14134_v38  ;;  %v14140_v38 = vld [vmem:[#allocation179_spill] sm:$0xff] }
 0x1cd   :  { %14133 = vst [vmem:[#allocation318_spill] sm:$0xff] %v10920_v34  ;;  %v794_v47 = vpop.f32.mrf.mxu0  ;;  %v10923_v5 = vadd.f32 %v1509_v58, %v772_v15  ;;  %2021 = vmatmul.mubr.f32.gmra.mxu0 %v14136_v24  ;;  %2651 = vmatprep.mubr.f32.mxu1 %v13686_v57  ;;  %v10935_v15 = vand.u32 4294901760, %v151_v2 }
 0x1ce   :  { %v1511_v42 = vpop.f32.mrf.mxu1  ;;  %2026 = vmatprep.mubr.f32.mxu0 %v13686_v57 }
 0x1cf   :  { %14135 = vst [vmem:[#allocation319_spill] sm:$0xff] %v10923_v5  ;;  %v796_v40 = vpop.f32.mrf.mxu0  ;;  %v10928_v56 = vadd.f32 %v1511_v42, %v774_v28  ;;  %8134 = vmatprep.subr.mxu0 %v10935_v15  ;;  %v10942_v28 = vsub.f32 %v151_v2, %v10935_v15 }
 0x1d0   :  { %v1516_v41 = vpop.f32.mrf.mxu1  ;;  %2655 = vmatmul.mubr.f32.gmra.mxu1 %v14138_v10 }
 0x1d1   :  { %14137 = vst [vmem:[#allocation320_spill] sm:$0xff] %v10928_v56  ;;  %v805_v6 = vpop.f32.mrf.mxu0  ;;  %v10931_v34 = vadd.f32 %v1516_v41, %v783_v25  ;;  %2029 = vmatmul.mubr.f32.gmra.mxu0 %v14140_v38  ;;  %2660 = vmatprep.mubr.f32.mxu1 %v13686_v57  ;;  %14142 = vst [vmem:[#allocation323_spill] sm:$0xff] %v10942_v28  ;;  %v14143_v25 = vld [vmem:[#allocation178_spill] sm:$0xff]  ;;  %v14145_v38 = vld [vmem:[#allocation183_spill] sm:$0xff] }
 0x1d2   :  { %v1518_v58 = vpop.f32.mrf.mxu1  ;;  %2034 = vmatprep.mubr.f32.mxu0 %v13686_v57  ;;  %v14148_v56 = vld [vmem:[#allocation182_spill] sm:$0xff] }
 0x1d3   :  { %14139 = vst [vmem:[#allocation321_spill] sm:$0xff] %v10931_v34  ;;  %v807_v24 = vpop.f32.mrf.mxu0  ;;  %v10938_v5 = vadd.f32 %v1518_v58, %v785_v14  ;;  %v10950_v34 = vand.u32 4294901760, %v10942_v28 }
 0x1d4   :  { %v1523_v42 = vpop.f32.mrf.mxu1  ;;  %2664 = vmatmul.mubr.f32.gmra.mxu1 %v14143_v25 }
 0x1d5   :  { %14141 = vst [vmem:[#allocation322_spill] sm:$0xff] %v10938_v5  ;;  %v816_v41 = vpop.f32.mrf.mxu0  ;;  %v10945_v10 = vadd.f32 %v1523_v42, %v794_v47  ;;  %2037 = vmatmul.mubr.f32.gmra.mxu0 %v14145_v38  ;;  %2669 = vmatprep.mubr.f32.mxu1 %v13686_v57  ;;  %14146 = vst [vmem:[#allocation325_spill] sm:$0xff] %v10950_v34  ;;  %v4819_v2 = vsub.f32 %v10942_v28, %v10950_v34  ;;  %v14150_v38 = vld [vmem:[#allocation184_spill] sm:$0xff] }
 0x1d6   :  { %v1525_v14 = vpop.f32.mrf.mxu1  ;;  %2042 = vmatprep.mubr.f32.mxu0 %v13686_v57 }
 0x1d7   :  { %14144 = vst [vmem:[#allocation324_spill] sm:$0xff] %v10945_v10  ;;  %v818_v58 = vpop.f32.mrf.mxu0  ;;  %v10953_v5 = vadd.f32 %v1525_v14, %v796_v40  ;;  %v10962_v10 = vand.u32 4294901760, %v4819_v2 }
 0x1d8   :  { %v1530_v25 = vpop.f32.mrf.mxu1  ;;  %2673 = vmatmul.mubr.f32.gmra.mxu1 %v14148_v56 }
 0x1d9   :  { %14147 = vst [vmem:[#allocation326_spill] sm:$0xff] %v10953_v5  ;;  %v827_v47 = vpop.f32.mrf.mxu0  ;;  %v10958_v42 = vadd.f32 %v1530_v25, %v805_v6  ;;  %2045 = vmatmul.mubr.f32.gmra.mxu0 %v14150_v38  ;;  %2678 = vmatprep.mubr.f32.mxu1 %v13686_v57  ;;  %v14152_v5 = vld [vmem:[#allocation186_spill] sm:$0xff] }
 0x1da   :  { %v1532_v39 = vpop.f32.mrf.mxu1  ;;  %2050 = vmatprep.mubr.f32.mxu0 %v13686_v57  ;;  %8262 = vmatprep.subr.mxu1 %v10962_v10  ;;  %v14154_v25 = vld [vmem:[#allocation190_spill] sm:$0xff] }
 0x1db   :  { %14149 = vst [vmem:[#allocation327_spill] sm:$0xff] %v10958_v42  ;;  %v829_v40 = vpop.f32.mrf.mxu0  ;;  %v10965_v14 = vadd.f32 %v1532_v39, %v807_v24  ;;  %v14156_v24 = vld [vmem:[#allocation188_spill] sm:$0xff] }
 0x1dc   :  { %v1537_v34 = vpop.f32.mrf.mxu1  ;;  %2682 = vmatmul.mubr.f32.gmra.mxu1 %v14152_v5  ;;  %v14158_v5 = vld [vmem:[#allocation195_spill] sm:$0xff] }
 0x1dd   :  { %14151 = vst [vmem:[#allocation328_spill] sm:$0xff] %v10965_v14  ;;  %v838_v56 = vpop.f32.mrf.mxu0  ;;  %v10969_v6 = vadd.f32 %v1537_v34, %v816_v41  ;;  %2053 = vmatmul.mubr.f32.gmra.mxu0 %v14154_v25  ;;  %2687 = vmatprep.mubr.f32.mxu1 %v13686_v57 }
 0x1de   :  { %v1539_v2 = vpop.f32.mrf.mxu1  ;;  %2058 = vmatprep.mubr.f32.mxu0 %v13686_v57 }
 0x1df   :  { %14153 = vst [vmem:[#allocation329_spill] sm:$0xff] %v10969_v6  ;;  %v840_v38 = vpop.f32.mrf.mxu0  ;;  %v10974_v42 = vadd.f32 %v1539_v2, %v818_v58 }
 0x1e0   :  { %v1544_v39 = vpop.f32.mrf.mxu1  ;;  %2691 = vmatmul.mubr.f32.gmra.mxu1 %v14156_v24  ;;  %v14162_v24 = vld [vmem:[#allocation199_spill] sm:$0xff] }
 0x1e1   :  { %14155 = vst [vmem:[#allocation330_spill] sm:$0xff] %v10974_v42  ;;  %v849_v14 = vpop.f32.mrf.mxu0  ;;  %v10977_v28 = vadd.f32 %v1544_v39, %v827_v47  ;;  %2061 = vmatmul.mubr.f32.gmra.mxu0 %v14158_v5  ;;  %2696 = vmatprep.mubr.f32.mxu1 %v13686_v57  ;;  %v14164_v42 = vld [vmem:[#allocation198_spill] sm:$0xff] }
 0x1e2   :  { %v1546_v34 = vpop.f32.mrf.mxu1  ;;  %2066 = vmatprep.mubr.f32.mxu0 %v13686_v57 }
 0x1e3   :  { %14157 = vst [vmem:[#allocation331_spill] sm:$0xff] %v10977_v28  ;;  %v851_v41 = vpop.f32.mrf.mxu0  ;;  %v10982_v25 = vadd.f32 %v1546_v34, %v829_v40 }
 0x1e4   :  { %v1551_v6 = vpop.f32.mrf.mxu1  ;;  %2700 = vmatmul.mubr.f32.gmra.mxu1 %v14160_v61  ;;  %v14166_v61 = vld [vmem:[#allocation203_spill] sm:$0xff] }
 0x1e5   :  { %14159 = vst [vmem:[#allocation332_spill] sm:$0xff] %v10982_v25  ;;  %v860_v58 = vpop.f32.mrf.mxu0  ;;  %v10985_v2 = vadd.f32 %v1551_v6, %v838_v56  ;;  %2069 = vmatmul.mubr.f32.gmra.mxu0 %v14162_v24  ;;  %2705 = vmatprep.mubr.f32.mxu1 %v13686_v57  ;;  %v14168_v25 = vld [vmem:[#allocation202_spill] sm:$0xff] }
 0x1e6   :  { %v1553_v47 = vpop.f32.mrf.mxu1  ;;  %2074 = vmatprep.mubr.f32.mxu0 %v13686_v57 }
 0x1e7   :  { %14161 = vst [vmem:[#allocation333_spill] sm:$0xff] %v10985_v2  ;;  %v862_v39 = vpop.f32.mrf.mxu0  ;;  %v10990_v5 = vadd.f32 %v1553_v47, %v840_v38 }
 0x1e8   :  { %v1558_v28 = vpop.f32.mrf.mxu1  ;;  %2709 = vmatmul.mubr.f32.gmra.mxu1 %v14164_v42  ;;  %v14170_v42 = vld [vmem:[#allocation204_spill] sm:$0xff] }
 0x1e9   :  { %14163 = vst [vmem:[#allocation334_spill] sm:$0xff] %v10990_v5  ;;  %v871_v40 = vpop.f32.mrf.mxu0  ;;  %v10993_v34 = vadd.f32 %v1558_v28, %v849_v14  ;;  %2077 = vmatmul.mubr.f32.gmra.mxu0 %v14166_v61  ;;  %2714 = vmatprep.mubr.f32.mxu1 %v13686_v57  ;;  %v14172_v5 = vld [vmem:[#allocation206_spill] sm:$0xff] }
 0x1ea   :  { %v1560_v56 = vpop.f32.mrf.mxu1  ;;  %2082 = vmatprep.mubr.f32.mxu0 %v13686_v57 }
 0x1eb   :  { %14165 = vst [vmem:[#allocation335_spill] sm:$0xff] %v10993_v34  ;;  %v873_v6 = vpop.f32.mrf.mxu0  ;;  %v10998_v24 = vadd.f32 %v1560_v56, %v851_v41 }
 0x1ec   :  { %v1565_v2 = vpop.f32.mrf.mxu1  ;;  %2718 = vmatmul.mubr.f32.gmra.mxu1 %v14168_v25  ;;  %v14174_v25 = vld [vmem:[#allocation211_spill] sm:$0xff] }
 0x1ed   :  { %14167 = vst [vmem:[#allocation336_spill] sm:$0xff] %v10998_v24  ;;  %v882_v38 = vpop.f32.mrf.mxu0  ;;  %v11001_v47 = vadd.f32 %v1565_v2, %v860_v58  ;;  %2085 = vmatmul.mubr.f32.gmra.mxu0 %v14170_v42  ;;  %2723 = vmatprep.mubr.f32.mxu1 %v13686_v57  ;;  %v14176_v24 = vld [vmem:[#allocation210_spill] sm:$0xff] }
 0x1ee   :  { %v1567_v28 = vpop.f32.mrf.mxu1  ;;  %2090 = vmatprep.mubr.f32.mxu0 %v13686_v57 }
 0x1ef   :  { %14169 = vst [vmem:[#allocation337_spill] sm:$0xff] %v11001_v47  ;;  %v884_v14 = vpop.f32.mrf.mxu0  ;;  %v11006_v61 = vadd.f32 %v1567_v28, %v862_v39 }
 0x1f0   :  { %v1572_v34 = vpop.f32.mrf.mxu1  ;;  %2727 = vmatmul.mubr.f32.gmra.mxu1 %v14172_v5  ;;  %v14178_v5 = vld [vmem:[#allocation215_spill] sm:$0xff] }
 0x1f1   :  { %14171 = vst [vmem:[#allocation338_spill] sm:$0xff] %v11006_v61  ;;  %v893_v41 = vpop.f32.mrf.mxu0  ;;  %v11009_v56 = vadd.f32 %v1572_v34, %v871_v40  ;;  %2093 = vmatmul.mubr.f32.gmra.mxu0 %v14174_v25  ;;  %2732 = vmatprep.mubr.f32.mxu1 %v13686_v57  ;;  %v14180_v61 = vld [vmem:[#allocation214_spill] sm:$0xff] }
 0x1f2   :  { %v1574_v58 = vpop.f32.mrf.mxu1  ;;  %2098 = vmatprep.mubr.f32.mxu0 %v13686_v57 }
 0x1f3   :  { %14173 = vst [vmem:[#allocation339_spill] sm:$0xff] %v11009_v56  ;;  %v895_v2 = vpop.f32.mrf.mxu0  ;;  %v11014_v42 = vadd.f32 %v1574_v58, %v873_v6 }
 0x1f4   :  { %v1579_v47 = vpop.f32.mrf.mxu1  ;;  %2736 = vmatmul.mubr.f32.gmra.mxu1 %v14176_v24  ;;  %v14182_v24 = vld [vmem:[#allocation216_spill] sm:$0xff] }
 0x1f5   :  { %14175 = vst [vmem:[#allocation340_spill] sm:$0xff] %v11014_v42  ;;  %v904_v39 = vpop.f32.mrf.mxu0  ;;  %v11017_v28 = vadd.f32 %v1579_v47, %v882_v38  ;;  %2101 = vmatmul.mubr.f32.gmra.mxu0 %v14178_v5  ;;  %2741 = vmatprep.mubr.f32.mxu1 %v13686_v57  ;;  %v14184_v42 = vld [vmem:[#allocation218_spill] sm:$0xff] }
 0x1f6   :  { %v1581_v40 = vpop.f32.mrf.mxu1  ;;  %2106 = vmatprep.mubr.f32.mxu0 %v13686_v57 }
 0x1f7   :  { %14177 = vst [vmem:[#allocation341_spill] sm:$0xff] %v11017_v28  ;;  %v906_v34 = vpop.f32.mrf.mxu0  ;;  %v11022_v25 = vadd.f32 %v1581_v40, %v884_v14 }
 0x1f8   :  { %v1586_v56 = vpop.f32.mrf.mxu1  ;;  %2745 = vmatmul.mubr.f32.gmra.mxu1 %v14180_v61  ;;  %v14186_v61 = vld [vmem:[#allocation222_spill] sm:$0xff] }
 0x1f9   :  { %14179 = vst [vmem:[#allocation342_spill] sm:$0xff] %v11022_v25  ;;  %v915_v6 = vpop.f32.mrf.mxu0  ;;  %v11025_v58 = vadd.f32 %v1586_v56, %v893_v41  ;;  %2109 = vmatmul.mubr.f32.gmra.mxu0 %v14182_v24  ;;  %2750 = vmatprep.mubr.f32.mxu1 %v13686_v57  ;;  %v14188_v25 = vld [vmem:[#allocation220_spill] sm:$0xff] }
 0x1fa   :  { %v1588_v38 = vpop.f32.mrf.mxu1  ;;  %2114 = vmatprep.mubr.f32.mxu0 %v13686_v57 }
 0x1fb   :  { %14181 = vst [vmem:[#allocation343_spill] sm:$0xff] %v11025_v58  ;;  %v917_v47 = vpop.f32.mrf.mxu0  ;;  %v11030_v5 = vadd.f32 %v1588_v38, %v895_v2 }
 0x1fc   :  { %v1593_v28 = vpop.f32.mrf.mxu1  ;;  %2754 = vmatmul.mubr.f32.gmra.mxu1 %v14184_v42  ;;  %v14190_v42 = vld [vmem:[#allocation227_spill] sm:$0xff] }
 0x1fd   :  { %14183 = vst [vmem:[#allocation344_spill] sm:$0xff] %v11030_v5  ;;  %v926_v14 = vpop.f32.mrf.mxu0  ;;  %v11033_v40 = vadd.f32 %v1593_v28, %v904_v39  ;;  %2117 = vmatmul.mubr.f32.gmra.mxu0 %v14186_v61  ;;  %2759 = vmatprep.mubr.f32.mxu1 %v13686_v57  ;;  %v14192_v5 = vld [vmem:[#allocation226_spill] sm:$0xff] }
 0x1fe   :  { %v1595_v41 = vpop.f32.mrf.mxu1  ;;  %2122 = vmatprep.mubr.f32.mxu0 %v13686_v57 }
 0x1ff   :  { %14185 = vst [vmem:[#allocation345_spill] sm:$0xff] %v11033_v40  ;;  %v928_v56 = vpop.f32.mrf.mxu0  ;;  %v11038_v24 = vadd.f32 %v1595_v41, %v906_v34 }
 0x200   :  { %v1600_v58 = vpop.f32.mrf.mxu1  ;;  %2763 = vmatmul.mubr.f32.gmra.mxu1 %v14188_v25  ;;  %v14194_v25 = vld [vmem:[#allocation231_spill] sm:$0xff] }
 0x201   :  { %14187 = vst [vmem:[#allocation346_spill] sm:$0xff] %v11038_v24  ;;  %v937_v2 = vpop.f32.mrf.mxu0  ;;  %v11041_v38 = vadd.f32 %v1600_v58, %v915_v6  ;;  %2125 = vmatmul.mubr.f32.gmra.mxu0 %v14190_v42  ;;  %2768 = vmatprep.mubr.f32.mxu1 %v13686_v57  ;;  %v14196_v24 = vld [vmem:[#allocation230_spill] sm:$0xff] }
 0x202   :  { %v1602_v39 = vpop.f32.mrf.mxu1  ;;  %2130 = vmatprep.mubr.f32.mxu0 %v13686_v57 }
 0x203   :  { %14189 = vst [vmem:[#allocation347_spill] sm:$0xff] %v11041_v38  ;;  %v939_v28 = vpop.f32.mrf.mxu0  ;;  %v11046_v61 = vadd.f32 %v1602_v39, %v917_v47 }
 0x204   :  { %v1607_v40 = vpop.f32.mrf.mxu1  ;;  %2772 = vmatmul.mubr.f32.gmra.mxu1 %v14192_v5  ;;  %v14198_v5 = vld [vmem:[#allocation235_spill] sm:$0xff] }
 0x205   :  { %14191 = vst [vmem:[#allocation348_spill] sm:$0xff] %v11046_v61  ;;  %v948_v34 = vpop.f32.mrf.mxu0  ;;  %v11049_v41 = vadd.f32 %v1607_v40, %v926_v14  ;;  %2133 = vmatmul.mubr.f32.gmra.mxu0 %v14194_v25  ;;  %2777 = vmatprep.mubr.f32.mxu1 %v13686_v57  ;;  %v14199_v14 = vld [vmem:[#allocation258_spill] sm:$0xff] }
 0x206   :  { %v1609_v6 = vpop.f32.mrf.mxu1  ;;  %2138 = vmatprep.mubr.f32.mxu0 %v13686_v57 }
 0x207   :  { %14193 = vst [vmem:[#allocation349_spill] sm:$0xff] %v11049_v41  ;;  %v950_v58 = vpop.f32.mrf.mxu0  ;;  %v11054_v42 = vadd.f32 %v1609_v6, %v928_v56  ;;  %v14201_v56 = vld [vmem:[#allocation261_spill] sm:$0xff] }
 0x208   :  { %v1614_v38 = vpop.f32.mrf.mxu1  ;;  %2781 = vmatmul.mubr.f32.gmra.mxu1 %v14196_v24  ;;  %v14204_v24 = vld [vmem:[#allocation236_spill] sm:$0xff] }
 0x209   :  { %14195 = vst [vmem:[#allocation350_spill] sm:$0xff] %v11054_v42  ;;  %v11057_v47 = vadd.f32 %v1614_v38, %v937_v2  ;;  %v1758_v39 = vpop.f32.mrf.mxu0  ;;  %2141 = vmatmul.mubr.f32.gmra.mxu0 %v14198_v5  ;;  %2786 = vmatprep.mubr.f32.mxu1 %v13686_v57  ;;  %v14205_v5 = vld [vmem:[#allocation264_spill] sm:$0xff] }
 0x20a   :  { %v1759_v40 = vadd.f32 %v1758_v39, %v14199_v14  ;;  %v1616_v25 = vpop.f32.mrf.mxu1  ;;  %2146 = vmatprep.mubr.f32.mxu0 %v13686_v57 }
 0x20b   :  { %14197 = vst [vmem:[#allocation351_spill] sm:$0xff] %v11057_v47  ;;  %v11063_v41 = vadd.f32 %v1616_v25, %v939_v28  ;;  %v1760_v61 = vpop.f32.mrf.mxu0  ;;  %v14208_v47 = vld [vmem:[#allocation238_spill] sm:$0xff] }
 0x20c   :  { %v1761_v6 = vadd.f32 %v1760_v61, %v14201_v56  ;;  %v1621_v42 = vpop.f32.mrf.mxu1  ;;  %2790 = vmatmul.mubr.f32.gmra.mxu1 %v14202_v51 }
 0x20d   :  { %14200 = vst [vmem:[#allocation258_spill] sm:$0xff] %v11063_v41  ;;  %v11067_v2 = vadd.f32 %v1621_v42, %v948_v34  ;;  %v1766_v38 = vpop.f32.mrf.mxu0  ;;  %2149 = vmatmul.mubr.f32.gmra.mxu0 %v14204_v24  ;;  %2795 = vmatprep.mubr.f32.mxu1 %v13686_v57  ;;  %v14207_v41 = vld [vmem:[#allocation267_spill] sm:$0xff]  ;;  %v14209_v34 = vld [vmem:[#allocation242_spill] sm:$0xff]  ;;  %v14211_v24 = vld [vmem:[#allocation269_spill] sm:$0xff] }
 0x20e   :  { %v1767_v39 = vadd.f32 %v1766_v38, %v14205_v5  ;;  %v1623_v14 = vpop.f32.mrf.mxu1  ;;  %2154 = vmatprep.mubr.f32.mxu0 %v13686_v57 }
 0x20f   :  { %14203 = vst [vmem:[#allocation261_spill] sm:$0xff] %v11067_v2  ;;  %v11073_v25 = vadd.f32 %v1623_v14, %v950_v58  ;;  %v1768_v28 = vpop.f32.mrf.mxu0  ;;  %v14214_v2 = vld [vmem:[#allocation240_spill] sm:$0xff] }
 0x210   :  { %v1769_v61 = vadd.f32 %v1768_v28, %v14207_v41  ;;  %v2368_v56 = vpop.f32.mrf.mxu1  ;;  %2799 = vmatmul.mubr.f32.gmra.mxu1 %v14208_v47 }
 0x211   :  { %14206 = vst [vmem:[#allocation264_spill] sm:$0xff] %v11073_v25  ;;  %v1774_v42 = vpop.f32.mrf.mxu0  ;;  %2157 = vmatmul.mubr.f32.gmra.mxu0 %v14209_v34  ;;  %v11078_v51 = vadd.f32 %v2368_v56, %v1759_v40  ;;  %2804 = vmatprep.mubr.f32.mxu1 %v13686_v57  ;;  %v14213_v25 = vld [vmem:[#allocation273_spill] sm:$0xff]  ;;  %v14217_v56 = vld [vmem:[#allocation275_spill] sm:$0xff] }
 0x212   :  { %v1775_v5 = vadd.f32 %v1774_v42, %v14211_v24  ;;  %v2370_v38 = vpop.f32.mrf.mxu1  ;;  %2162 = vmatprep.mubr.f32.mxu0 %v13686_v57 }
 0x213   :  { %14210 = vst [vmem:[#allocation267_spill] sm:$0xff] %v11078_v51  ;;  %v1776_v58 = vpop.f32.mrf.mxu0  ;;  %v11083_v14 = vadd.f32 %v2370_v38, %v1761_v6  ;;  %v14219_v38 = vld [vmem:[#allocation279_spill] sm:$0xff]  ;;  %v14221_v51 = vld [vmem:[#allocation250_spill] sm:$0xff] }
 0x214   :  { %v1777_v41 = vadd.f32 %v1776_v58, %v14213_v25  ;;  %v2377_v28 = vpop.f32.mrf.mxu1  ;;  %2808 = vmatmul.mubr.f32.gmra.mxu1 %v14214_v2 }
 0x215   :  { %14212 = vst [vmem:[#allocation269_spill] sm:$0xff] %v11083_v14  ;;  %v1782_v47 = vpop.f32.mrf.mxu0  ;;  %2165 = vmatmul.mubr.f32.gmra.mxu0 %v14215_v17  ;;  %v11088_v40 = vadd.f32 %v2377_v28, %v1767_v39  ;;  %2813 = vmatprep.mubr.f32.mxu1 %v13686_v57  ;;  %v14220_v14 = vld [vmem:[#allocation245_spill] sm:$0xff]  ;;  %v14223_v28 = vld [vmem:[#allocation282_spill] sm:$0xff] }
 0x216   :  { %v1783_v24 = vadd.f32 %v1782_v47, %v14217_v56  ;;  %v2379_v42 = vpop.f32.mrf.mxu1  ;;  %2170 = vmatprep.mubr.f32.mxu0 %v13686_v57 }
 0x217   :  { %14216 = vst [vmem:[#allocation273_spill] sm:$0xff] %v11088_v40  ;;  %v1784_v34 = vpop.f32.mrf.mxu0  ;;  %v11093_v6 = vadd.f32 %v2379_v42, %v1769_v61  ;;  %v14225_v42 = vld [vmem:[#allocation285_spill] sm:$0xff]  ;;  %v14227_v40 = vld [vmem:[#allocation255_spill] sm:$0xff] }
 0x218   :  { %v1785_v25 = vadd.f32 %v1784_v34, %v14219_v38  ;;  %v2386_v58 = vpop.f32.mrf.mxu1  ;;  %2817 = vmatmul.mubr.f32.gmra.mxu1 %v14220_v14 }
 0x219   :  { %14218 = vst [vmem:[#allocation275_spill] sm:$0xff] %v11093_v6  ;;  %v1790_v2 = vpop.f32.mrf.mxu0  ;;  %2173 = vmatmul.mubr.f32.gmra.mxu0 %v14221_v51  ;;  %v11098_v39 = vadd.f32 %v2386_v58, %v1775_v5  ;;  %2822 = vmatprep.mubr.f32.mxu1 %v13686_v57  ;;  %v14226_v6 = vld [vmem:[#allocation249_spill] sm:$0xff]  ;;  %v14228_v58 = vld [vmem:[#allocation288_spill] sm:$0xff] }
 0x21a   :  { %v1791_v47 = vadd.f32 %v1790_v2, %v14223_v28  ;;  %v2388_v56 = vpop.f32.mrf.mxu1  ;;  %2178 = vmatprep.mubr.f32.mxu0 %v13686_v57 }
 0x21b   :  { %14222 = vst [vmem:[#allocation279_spill] sm:$0xff] %v11098_v39  ;;  %v1792_v17 = vpop.f32.mrf.mxu0  ;;  %v11103_v61 = vadd.f32 %v2388_v56, %v1777_v41  ;;  %v14230_v56 = vld [vmem:[#allocation291_spill] sm:$0xff]  ;;  %v14232_v39 = vld [vmem:[#allocation256_spill] sm:$0xff] }
 0x21c   :  { %v1793_v34 = vadd.f32 %v1792_v17, %v14225_v42  ;;  %v2395_v38 = vpop.f32.mrf.mxu1  ;;  %2826 = vmatmul.mubr.f32.gmra.mxu1 %v14226_v6 }
 0x21d   :  { %14224 = vst [vmem:[#allocation282_spill] sm:$0xff] %v11103_v61  ;;  %v1798_v14 = vpop.f32.mrf.mxu0  ;;  %2181 = vmatmul.mubr.f32.gmra.mxu0 %v14227_v40  ;;  %v11108_v5 = vadd.f32 %v2395_v38, %v1783_v24  ;;  %2831 = vmatprep.mubr.f32.mxu1 %v13686_v57  ;;  %v14231_v61 = vld [vmem:[#allocation254_spill] sm:$0xff]  ;;  %v14234_v40 = vld [vmem:[#allocation260_spill] sm:$0xff] }
 0x21e   :  { %v1799_v2 = vadd.f32 %v1798_v14, %v14228_v58  ;;  %v2397_v28 = vpop.f32.mrf.mxu1  ;;  %2186 = vmatprep.mubr.f32.mxu0 %v13686_v57 }
 0x21f   :  { %v1800_v51 = vpop.f32.mrf.mxu0  ;;  %v11113_v41 = vadd.f32 %v2397_v28, %v1785_v25  ;;  %v14233_v28 = vld [vmem:[#allocation296_spill] sm:$0xff] }
 0x220   :  { %v1801_v17 = vadd.f32 %v1800_v51, %v14230_v56  ;;  %v2404_v42 = vpop.f32.mrf.mxu1  ;;  %2835 = vmatmul.mubr.f32.gmra.mxu1 %v14231_v61 }
 0x221   :  { %14229 = vst [vmem:[#allocation285_spill] sm:$0xff] %v11113_v41  ;;  %v1806_v6 = vpop.f32.mrf.mxu0  ;;  %2189 = vmatmul.mubr.f32.gmra.mxu0 %v14232_v39  ;;  %v11118_v24 = vadd.f32 %v2404_v42, %v1791_v47  ;;  %2840 = vmatprep.mubr.f32.mxu1 %v13686_v57  ;;  %v14235_v41 = vld [vmem:[#allocation263_spill] sm:$0xff] }
 0x222   :  { %v1807_v14 = vadd.f32 %v1806_v6, %v10450_v0  ;;  %v2406_v38 = vpop.f32.mrf.mxu1  ;;  %2194 = vmatprep.mubr.f32.mxu0 %v13686_v57  ;;  %v14238_v39 = vld [vmem:[#allocation271_spill] sm:$0xff] }
 0x223   :  { %v1808_v58 = vpop.f32.mrf.mxu0  ;;  %v11123_v25 = vadd.f32 %v2406_v38, %v1793_v34 }
 0x224   :  { %v1809_v51 = vadd.f32 %v1808_v58, %v14233_v28  ;;  %v2413_v56 = vpop.f32.mrf.mxu1  ;;  %2844 = vmatmul.mubr.f32.gmra.mxu1 %v14234_v40  ;;  %v14237_v28 = vld [vmem:[#allocation262_spill] sm:$0xff] }
 0x225   :  { %v1814_v61 = vpop.f32.mrf.mxu0  ;;  %2197 = vmatmul.mubr.f32.gmra.mxu0 %v14235_v41  ;;  %v11128_v47 = vadd.f32 %v2413_v56, %v1799_v2  ;;  %2849 = vmatprep.mubr.f32.mxu1 %v13686_v57  ;;  %v14239_v56 = vld [vmem:[#allocation302_spill] sm:$0xff] }
 0x226   :  { %v1815_v0 = vadd.f32 %v1814_v61, %v10469_v30  ;;  %v2415_v6 = vpop.f32.mrf.mxu1  ;;  %2202 = vmatprep.mubr.f32.mxu0 %v13686_v57 }
 0x227   :  { %v1816_v42 = vpop.f32.mrf.mxu0  ;;  %v11133_v34 = vadd.f32 %v2415_v6, %v1801_v17 }
 0x228   :  { %v1817_v38 = vadd.f32 %v1816_v42, %v10480_v21  ;;  %v2422_v58 = vpop.f32.mrf.mxu1  ;;  %2853 = vmatmul.mubr.f32.gmra.mxu1 %v14237_v28  ;;  %v14241_v42 = vld [vmem:[#allocation268_spill] sm:$0xff] }
 0x229   :  { %14236 = vst [vmem:[#allocation288_spill] sm:$0xff] %v11133_v34  ;;  %v1822_v40 = vpop.f32.mrf.mxu0  ;;  %2205 = vmatmul.mubr.f32.gmra.mxu0 %v14238_v39  ;;  %v11138_v2 = vadd.f32 %v2422_v58, %v1807_v14  ;;  %2858 = vmatprep.mubr.f32.mxu1 %v13686_v57  ;;  %v14242_v34 = vld [vmem:[#allocation277_spill] sm:$0xff]  ;;  %v14244_v39 = vld [vmem:[#allocation276_spill] sm:$0xff] }
 0x22a   :  { %v1823_v30 = vadd.f32 %v1822_v40, %v14239_v56  ;;  %v2424_v61 = vpop.f32.mrf.mxu1  ;;  %2210 = vmatprep.mubr.f32.mxu0 %v13686_v57 }
 0x22b   :  { %v1824_v41 = vpop.f32.mrf.mxu0  ;;  %v11143_v17 = vadd.f32 %v2424_v61, %v1809_v51  ;;  %v14243_v61 = vld [vmem:[#allocation309_spill] sm:$0xff] }
 0x22c   :  { %v1825_v21 = vadd.f32 %v1824_v41, %v10500_v26  ;;  %v2431_v6 = vpop.f32.mrf.mxu1  ;;  %2862 = vmatmul.mubr.f32.gmra.mxu1 %v14241_v42 }
 0x22d   :  { %14240 = vst [vmem:[#allocation291_spill] sm:$0xff] %v11143_v17  ;;  %v1830_v28 = vpop.f32.mrf.mxu0  ;;  %2213 = vmatmul.mubr.f32.gmra.mxu0 %v14242_v34  ;;  %v11148_v14 = vadd.f32 %v2431_v6, %v1815_v0  ;;  %2867 = vmatprep.mubr.f32.mxu1 %v13686_v57  ;;  %v14245_v17 = vld [vmem:[#allocation284_spill] sm:$0xff]  ;;  %v14247_v34 = vld [vmem:[#allocation286_spill] sm:$0xff] }
 0x22e   :  { %v1831_v40 = vadd.f32 %v1830_v28, %v10506_v33  ;;  %v2433_v58 = vpop.f32.mrf.mxu1  ;;  %2218 = vmatprep.mubr.f32.mxu0 %v13686_v57 }
 0x22f   :  { %v1832_v56 = vpop.f32.mrf.mxu0  ;;  %v11153_v51 = vadd.f32 %v2433_v58, %v1817_v38 }
 0x230   :  { %v1833_v26 = vadd.f32 %v1832_v56, %v14243_v61  ;;  %v2440_v41 = vpop.f32.mrf.mxu1  ;;  %2871 = vmatmul.mubr.f32.gmra.mxu1 %v14244_v39  ;;  %v14246_v61 = vld [vmem:[#allocation283_spill] sm:$0xff] }
 0x231   :  { %v1838_v42 = vpop.f32.mrf.mxu0  ;;  %2221 = vmatmul.mubr.f32.gmra.mxu0 %v14245_v17  ;;  %v11158_v0 = vadd.f32 %v2440_v41, %v1823_v30  ;;  %2876 = vmatprep.mubr.f32.mxu1 %v13686_v57  ;;  %v14249_v17 = vld [vmem:[#allocation293_spill] sm:$0xff] }
 0x232   :  { %v1839_v33 = vadd.f32 %v1838_v42, %v10522_v19  ;;  %v2442_v28 = vpop.f32.mrf.mxu1  ;;  %2226 = vmatprep.mubr.f32.mxu0 %v13686_v57 }
 0x233   :  { %v1840_v6 = vpop.f32.mrf.mxu0  ;;  %v11163_v38 = vadd.f32 %v2442_v28, %v1825_v21 }
 0x234   :  { %v1841_v58 = vadd.f32 %v1840_v6, %v10533_v31  ;;  %v2449_v56 = vpop.f32.mrf.mxu1  ;;  %2880 = vmatmul.mubr.f32.gmra.mxu1 %v14246_v61  ;;  %v14248_v6 = vld [vmem:[#allocation290_spill] sm:$0xff] }
 0x235   :  { %v1846_v39 = vpop.f32.mrf.mxu0  ;;  %2229 = vmatmul.mubr.f32.gmra.mxu0 %v14247_v34  ;;  %v11168_v30 = vadd.f32 %v2449_v56, %v1831_v40  ;;  %2885 = vmatprep.mubr.f32.mxu1 %v13686_v57 }
 0x236   :  { %v1847_v19 = vadd.f32 %v1846_v39, %v10537_v45  ;;  %v2451_v42 = vpop.f32.mrf.mxu1  ;;  %2234 = vmatprep.mubr.f32.mxu0 %v13686_v57 }
 0x237   :  { %v1848_v41 = vpop.f32.mrf.mxu0  ;;  %v11173_v21 = vadd.f32 %v2451_v42, %v1833_v26  ;;  %v148_v42 = vld [vmem:[#allocation5 + $0x160] sm:$0xff] }
 0x238   :  { %v1849_v31 = vadd.f32 %v1848_v41, %v10545_v62  ;;  %v2458_v28 = vpop.f32.mrf.mxu1  ;;  %2889 = vmatmul.mubr.f32.gmra.mxu1 %v14248_v6  ;;  %v14251_v6 = vld [vmem:[#allocation292_spill] sm:$0xff] }
 0x239   :  { %v1854_v61 = vpop.f32.mrf.mxu0  ;;  %2237 = vmatmul.mubr.f32.gmra.mxu0 %v14249_v17  ;;  %v11178_v40 = vadd.f32 %v2458_v28, %v1839_v33  ;;  %2894 = vmatprep.mubr.f32.mxu1 %v13686_v57  ;;  %v14252_v17 = vld [vmem:[#allocation299_spill] sm:$0xff] }
 0x23a   :  { %v1855_v45 = vadd.f32 %v1854_v61, %v10549_v27  ;;  %v2460_v39 = vpop.f32.mrf.mxu1  ;;  %2242 = vmatprep.mubr.f32.mxu0 %v13686_v57 }
 0x23b   :  { %v1856_v56 = vpop.f32.mrf.mxu0  ;;  %v11183_v26 = vadd.f32 %v2460_v39, %v1841_v58  ;;  %v11193_v58 = vand.u32 4294901760, %v148_v42 }
 0x23c   :  { %v1857_v62 = vadd.f32 %v1856_v56, %v10555_v20  ;;  %v2467_v41 = vpop.f32.mrf.mxu1  ;;  %2898 = vmatmul.mubr.f32.gmra.mxu1 %v14251_v6  ;;  %v14256_v6 = vld [vmem:[#allocation297_spill] sm:$0xff] }
 0x23d   :  { %14250 = vst [vmem:[#allocation296_spill] sm:$0xff] %v11183_v26  ;;  %v1862_v34 = vpop.f32.mrf.mxu0  ;;  %2245 = vmatmul.mubr.f32.gmra.mxu0 %v14252_v17  ;;  %v11188_v33 = vadd.f32 %v2467_v41, %v1847_v19  ;;  %2903 = vmatprep.mubr.f32.mxu1 %v13686_v57  ;;  %14254 = vst [vmem:[#allocation309_spill] sm:$0xff] %v11193_v58  ;;  %v145_v17 = vld [vmem:[#allocation5 + $0x148] sm:$0xff] }
 0x23e   :  { %v1863_v27 = vadd.f32 %v1862_v34, %v10559_v9  ;;  %v2469_v61 = vpop.f32.mrf.mxu1  ;;  %2250 = vmatprep.mubr.f32.mxu0 %v13686_v57  ;;  %v14257_v41 = vld [vmem:[#allocation304_spill] sm:$0xff]  ;;  %v14259_v9 = vld [vmem:[#allocation314_spill] sm:$0xff] }
 0x23f   :  { %14253 = vst [vmem:[#allocation302_spill] sm:$0xff] %v11188_v33  ;;  %v1864_v28 = vpop.f32.mrf.mxu0  ;;  %v11195_v39 = vadd.f32 %v2469_v61, %v1849_v31  ;;  %v11206_v31 = vsub.f32 %v148_v42, %v11193_v58 }
 0x240   :  { %v1865_v20 = vadd.f32 %v1864_v28, %v10563_v52  ;;  %v2476_v56 = vpop.f32.mrf.mxu1  ;;  %2907 = vmatmul.mubr.f32.gmra.mxu1 %v14256_v6  ;;  %v11210_v28 = vand.u32 4294901760, %v145_v17 }
 0x241   :  { %14255 = vst [vmem:[#allocation352_spill] sm:$0xff] %v11195_v39  ;;  %v1870_v19 = vpop.f32.mrf.mxu0  ;;  %2253 = vmatmul.mubr.f32.gmra.mxu0 %v14257_v41  ;;  %v11200_v33 = vadd.f32 %v2476_v56, %v1855_v45  ;;  %2912 = vmatprep.mubr.f32.mxu1 %v13686_v57  ;;  %14260 = vst [vmem:[#allocation314_spill] sm:$0xff] %v11206_v31  ;;  %v14263_v45 = vld [vmem:[#allocation303_spill] sm:$0xff]  ;;  %v142_v56 = vld [vmem:[#allocation5 + $0x130] sm:$0xff] }
 0x242   :  { %v1871_v34 = vadd.f32 %v1870_v19, %v14259_v9  ;;  %v2478_v26 = vpop.f32.mrf.mxu1  ;;  %2258 = vmatprep.mubr.f32.mxu0 %v13686_v57  ;;  %14262 = vst [vmem:[#allocation355_spill] sm:$0xff] %v11210_v28  ;;  %v14264_v39 = vld [vmem:[#allocation308_spill] sm:$0xff] }
 0x243   :  { %14258 = vst [vmem:[#allocation353_spill] sm:$0xff] %v11200_v33  ;;  %v1872_v52 = vpop.f32.mrf.mxu0  ;;  %v11208_v61 = vadd.f32 %v2478_v26, %v1857_v62  ;;  %v11221_v26 = vand.u32 4294901760, %v11206_v31 }
 0x244   :  { %v1873_v6 = vadd.f32 %v1872_v52, %v10573_v35  ;;  %v2485_v41 = vpop.f32.mrf.mxu1  ;;  %2916 = vmatmul.mubr.f32.gmra.mxu1 %v14263_v45  ;;  %v11226_v52 = vsub.f32 %v145_v17, %v11210_v28  ;;  %v11228_v45 = vand.u32 4294901760, %v142_v56 }
 0x245   :  { %14261 = vst [vmem:[#allocation354_spill] sm:$0xff] %v11208_v61  ;;  %v1878_v33 = vpop.f32.mrf.mxu0  ;;  %2261 = vmatmul.mubr.f32.gmra.mxu0 %v14264_v39  ;;  %v11215_v19 = vadd.f32 %v2485_v41, %v1863_v27  ;;  %2921 = vmatprep.mubr.f32.mxu1 %v13686_v57  ;;  %14266 = vst [vmem:[#allocation357_spill] sm:$0xff] %v11221_v26  ;;  %v139_v27 = vld [vmem:[#allocation5 + $0x118] sm:$0xff]  ;;  %v14272_v61 = vld [vmem:[#allocation37_spill] sm:$0xff] }
 0x246   :  { %v1879_v42 = vadd.f32 %v1878_v33, %v10580_v4  ;;  %v2487_v9 = vpop.f32.mrf.mxu1  ;;  %3100 = vmatprep.mubr.f32.mxu0 %v13686_v57  ;;  %14268 = vst [vmem:[#allocation359_spill] sm:$0xff] %v11226_v52  ;;  %14269 = vst [vmem:[#allocation360_spill] sm:$0xff] %v11228_v45  ;;  %v11241_v17 = vand.u32 4294901760, %v139_v27 }
 0x247   :  { %14265 = vst [vmem:[#allocation356_spill] sm:$0xff] %v11215_v19  ;;  %v1880_v35 = vpop.f32.mrf.mxu0  ;;  %v11223_v62 = vadd.f32 %v2487_v9, %v1865_v20  ;;  %v14270_v19 = vld [vmem:[#allocation307_spill] sm:$0xff] }
 0x248   :  { %v1881_v41 = vadd.f32 %v1880_v35, %v10587_v37  ;;  %v2494_v39 = vpop.f32.mrf.mxu1  ;;  %2925 = vmatmul.mubr.f32.gmra.mxu1 %v14270_v19  ;;  %v4826_v37 = vsub.f32 %v11206_v31, %v11221_v26  ;;  %14273 = vst [vmem:[#allocation362_spill] sm:$0xff] %v11241_v17  ;;  %v136_v26 = vld [vmem:[#allocation5 + $0x100] sm:$0xff] }
 0x249   :  { %14267 = vst [vmem:[#allocation358_spill] sm:$0xff] %v11223_v62  ;;  %v1886_v4 = vpop.f32.mrf.mxu0  ;;  %v11232_v33 = vadd.f32 %v2494_v39, %v1871_v34  ;;  %3102 = vmatmul.mubr.f32.vlgmr.msra.gmra.mxu0 %v14272_v61  ;;  %2930 = vmatprep.mubr.f32.mxu1 %v13686_v57  ;;  %v11247_v39 = vand.u32 4294901760, %v11226_v52 }
 0x24a   :  { %v1887_v20 = vadd.f32 %v1886_v4, %v10594_v55  ;;  %v2496_v9 = vpop.f32.mrf.mxu1  ;;  %3107 = vmatprep.mubr.f32.mxu0 %v13686_v57  ;;  %8135 = vmatpush3.msra.mxu0 %v10935_v15  ;;  %v11250_v55 = vsub.f32 %v142_v56, %v11228_v45  ;;  %v4827_v56 = vand.u32 4294901760, %v4826_v37 }
 0x24b   :  { %14271 = vst [vmem:[#allocation361_spill] sm:$0xff] %v11232_v33  ;;  %v1888_v35 = vpop.f32.mrf.mxu0  ;;  %v11243_v19 = vadd.f32 %v2496_v9, %v1873_v6  ;;  %8136 = vmatprep.subr.mxu0 %v11193_v58  ;;  %14275 = vst [vmem:[#allocation364_spill] sm:$0xff] %v11247_v39  ;;  %v14276_v33 = vld [vmem:[#allocation311_spill] sm:$0xff]  ;;  %v14277_v6 = vld [vmem:[#allocation44_spill] sm:$0xff] }
 0x24c   :  { %v1889_v34 = vadd.f32 %v1888_v35, %v10600_v3  ;;  %v2503_v4 = vpop.f32.mrf.mxu1  ;;  %2934 = vmatmul.mubr.f32.gmra.mxu1 %v14276_v33  ;;  %8137 = vmatpush3.msra.mxu0 %v11193_v58  ;;  %v11263_v3 = vsub.f32 %v139_v27, %v11241_v17 }
 0x24d   :  { %14274 = vst [vmem:[#allocation363_spill] sm:$0xff] %v11243_v19  ;;  %v1894_v31 = vpop.f32.mrf.mxu0  ;;  %v11255_v62 = vadd.f32 %v2503_v4, %v1879_v42  ;;  %3109 = vmatmul.mubr.f32.gmra.mxu0 %v14277_v6  ;;  %3645 = vmatprep.mubr.f32.mxu1 %v13686_v57  ;;  %v4833_v42 = vsub.f32 %v11226_v52, %v11247_v39  ;;  %v11271_v4 = vand.u32 4294901760, %v11250_v55 }
 0x24e   :  { %v1895_v9 = vadd.f32 %v1894_v31, %v10608_v29  ;;  %v2505_v19 = vpop.f32.mrf.mxu1  ;;  %3114 = vmatprep.mubr.f32.mxu0 %v13686_v57  ;;  %8138 = vmatprep.subr.mxu0 %v11210_v28  ;;  %14278 = vst [vmem:[#allocation44_spill] sm:$0xff] %v11263_v3  ;;  %v11273_v29 = vand.u32 4294901760, %v136_v26  ;;  %v133_v31 = vld [vmem:[#allocation5 + $0xe8] sm:$0xff] }
 0x24f   :  { %v1896_v35 = vpop.f32.mrf.mxu0  ;;  %v11265_v33 = vadd.f32 %v2505_v19, %v1881_v41  ;;  %8139 = vmatpush3.msra.mxu0 %v11210_v28  ;;  %14279 = vst [vmem:[#allocation365_spill] sm:$0xff] %v11271_v4  ;;  %v14282_v41 = vld [vmem:[#allocation52_spill] sm:$0xff] }
 0x250   :  { %14280 = vst [vmem:[#allocation366_spill] sm:$0xff] %v11273_v29  ;;  %v1897_v37 = vadd.f32 %v1896_v35, %v10614_v60  ;;  %v2512_v58 = vpop.f32.mrf.mxu1  ;;  %3647 = vmatmul.mubr.f32.vlgmr.msra.gmra.mxu1 %v14272_v61  ;;  %8140 = vmatprep.subr.mxu0 %v11228_v45  ;;  %v11286_v60 = vand.u32 4294901760, %v11263_v3  ;;  %v11288_v35 = vand.u32 4294901760, %v133_v31 }
 0x251   :  { %v1902_v19 = vpop.f32.mrf.mxu0  ;;  %v11278_v27 = vadd.f32 %v2512_v58, %v1887_v20  ;;  %3116 = vmatmul.mubr.f32.gmra.mxu0 %v14282_v41  ;;  %8263 = vmatpush3.msra.mxu1 %v10962_v10  ;;  %v4834_v58 = vand.u32 4294901760, %v4833_v42  ;;  %v11296_v10 = vsub.f32 %v136_v26, %v11273_v29  ;;  %v14286_v42 = vld [vmem:[#allocation53_spill] sm:$0xff] }
 0x252   :  { %v1903_v39 = vadd.f32 %v1902_v19, %v10622_v36  ;;  %v2514_v28 = vpop.f32.mrf.mxu1  ;;  %3121 = vmatprep.mubr.f32.mxu0 %v13686_v57  ;;  %3652 = vmatprep.mubr.f32.mxu1 %v13686_v57  ;;  %14283 = vst [vmem:[#allocation52_spill] sm:$0xff] %v11286_v60  ;;  %14284 = vst [vmem:[#allocation368_spill] sm:$0xff] %v11288_v35  ;;  %v4840_v36 = vsub.f32 %v11250_v55, %v11271_v4 }
 0x253   :  { %14281 = vst [vmem:[#allocation367_spill] sm:$0xff] %v11278_v27  ;;  %v1904_v52 = vpop.f32.mrf.mxu0  ;;  %v11290_v61 = vadd.f32 %v2514_v28, %v1889_v34  ;;  %8264 = vmatprep.subr.mxu1 %v4827_v56  ;;  %8141 = vmatpush3.msra.mxu0 %v11228_v45  ;;  %v130_v27 = vld [vmem:[#allocation5 + $0xd0] sm:$0xff]  ;;  %v11310_v26 = vsub.f32 %v133_v31, %v11288_v35  ;;  %v127_v31 = vld [vmem:[#allocation5 + $0xb8] sm:$0xff] }
 0x254   :  { %v1905_v20 = vadd.f32 %v1904_v52, %v10628_v13  ;;  %v2521_v19 = vpop.f32.mrf.mxu1  ;;  %3654 = vmatmul.mubr.f32.gmra.mxu1 %v14277_v6  ;;  %8142 = vmatprep.subr.mxu0 %v11241_v17  ;;  %v4847_v13 = vsub.f32 %v11263_v3, %v11286_v60 }
 0x255   :  { %14285 = vst [vmem:[#allocation369_spill] sm:$0xff] %v11290_v61  ;;  %v1910_v28 = vpop.f32.mrf.mxu0  ;;  %v11301_v34 = vadd.f32 %v2521_v19, %v1895_v9  ;;  %3123 = vmatmul.mubr.f32.gmra.mxu0 %v14286_v42  ;;  %3659 = vmatprep.mubr.f32.mxu1 %v13686_v57  ;;  %v4841_v9 = vand.u32 4294901760, %v4840_v36  ;;  %v11316_v19 = vand.u32 4294901760, %v11296_v10 }
 0x256   :  { %v1911_v4 = vadd.f32 %v1910_v28, %v10636_v54  ;;  %v2523_v45 = vpop.f32.mrf.mxu1  ;;  %3128 = vmatprep.mubr.f32.mxu0 %v13686_v57  ;;  %8265 = vmatpush3.msra.mxu1 %v4827_v56  ;;  %v11318_v54 = vand.u32 4294901760, %v130_v27 }
 0x257   :  { %v1912_v52 = vpop.f32.mrf.mxu0  ;;  %v11312_v61 = vadd.f32 %v2523_v45, %v1897_v37  ;;  %8266 = vmatprep.subr.mxu1 %v4834_v58  ;;  %8143 = vmatpush3.msra.mxu0 %v11241_v17  ;;  %14288 = vst [vmem:[#allocation370_spill] sm:$0xff] %v11316_v19  ;;  %v14290_v37 = vld [vmem:[#allocation54_spill] sm:$0xff] }
 0x258   :  { %14289 = vst [vmem:[#allocation371_spill] sm:$0xff] %v11318_v54  ;;  %v1913_v56 = vadd.f32 %v1912_v52, %v10642_v53  ;;  %v2530_v28 = vpop.f32.mrf.mxu1  ;;  %3661 = vmatmul.mubr.f32.gmra.mxu1 %v14282_v41  ;;  %8144 = vmatprep.subr.mxu0 %v11273_v29  ;;  %v4848_v53 = vand.u32 4294901760, %v4847_v13  ;;  %v11330_v52 = vand.u32 4294901760, %v11310_v26  ;;  %v14294_v13 = vld [vmem:[#allocation61_spill] sm:$0xff] }
 0x259   :  { %14287 = vst [vmem:[#allocation53_spill] sm:$0xff] %v11312_v61  ;;  %v1918_v60 = vpop.f32.mrf.mxu0  ;;  %v11323_v45 = vadd.f32 %v2530_v28, %v1903_v39  ;;  %3130 = vmatmul.mubr.f32.gmra.mxu0 %v14290_v37  ;;  %3666 = vmatprep.mubr.f32.mxu1 %v13686_v57  ;;  %v4854_v39 = vsub.f32 %v11296_v10, %v11316_v19 }
 0x25a   :  { %v1919_v36 = vadd.f32 %v1918_v60, %v10650_v49  ;;  %v2532_v17 = vpop.f32.mrf.mxu1  ;;  %3135 = vmatprep.mubr.f32.mxu0 %v13686_v57  ;;  %8267 = vmatpush3.msra.mxu1 %v4834_v58  ;;  %14291 = vst [vmem:[#allocation54_spill] sm:$0xff] %v11330_v52  ;;  %v11338_v28 = vsub.f32 %v130_v27, %v11318_v54  ;;  %v11340_v49 = vand.u32 4294901760, %v127_v31 }
 0x25b   :  { %v1920_v61 = vpop.f32.mrf.mxu0  ;;  %v11332_v3 = vadd.f32 %v2532_v17, %v1905_v20  ;;  %8268 = vmatprep.subr.mxu1 %v4841_v9  ;;  %8145 = vmatpush3.msra.mxu0 %v11273_v29 }
 0x25c   :  { %14293 = vst [vmem:[#allocation373_spill] sm:$0xff] %v11340_v49  ;;  %v1921_v60 = vadd.f32 %v1920_v61, %v10656_v43  ;;  %v2539_v58 = vpop.f32.mrf.mxu1  ;;  %3668 = vmatmul.mubr.f32.gmra.mxu1 %v14286_v42  ;;  %8146 = vmatprep.subr.mxu0 %v11288_v35  ;;  %v4861_v43 = vsub.f32 %v11310_v26, %v11330_v52 }
 0x25d   :  { %14292 = vst [vmem:[#allocation372_spill] sm:$0xff] %v11332_v3  ;;  %v1926_v17 = vpop.f32.mrf.mxu0  ;;  %v11345_v20 = vadd.f32 %v2539_v58, %v1911_v4  ;;  %3137 = vmatmul.mubr.f32.gmra.mxu0 %v14294_v13  ;;  %3673 = vmatprep.mubr.f32.mxu1 %v13686_v57  ;;  %v4855_v3 = vand.u32 4294901760, %v4854_v39  ;;  %v11357_v4 = vand.u32 4294901760, %v11338_v28  ;;  %v11360_v58 = vsub.f32 %v127_v31, %v11340_v49  ;;  %v14298_v39 = vld [vmem:[#allocation62_spill] sm:$0xff] }
 0x25e   :  { %v1927_v19 = vadd.f32 %v1926_v17, %v10664_v46  ;;  %v2541_v27 = vpop.f32.mrf.mxu1  ;;  %3142 = vmatprep.mubr.f32.mxu0 %v13686_v57  ;;  %8269 = vmatpush3.msra.mxu1 %v4841_v9  ;;  %v124_v9 = vld [vmem:[#allocation5 + $0xa0] sm:$0xff] }
 0x25f   :  { %v1928_v61 = vpop.f32.mrf.mxu0  ;;  %v11353_v29 = vadd.f32 %v2541_v27, %v1913_v56  ;;  %8270 = vmatprep.subr.mxu1 %v4848_v53  ;;  %8147 = vmatpush3.msra.mxu0 %v11288_v35  ;;  %14296 = vst [vmem:[#allocation374_spill] sm:$0xff] %v11357_v4  ;;  %v11369_v52 = vand.u32 4294901760, %v124_v9 }
 0x260   :  { %v1929_v46 = vadd.f32 %v1928_v61, %v10670_v11  ;;  %v2548_v17 = vpop.f32.mrf.mxu1  ;;  %3675 = vmatmul.mubr.f32.gmra.mxu1 %v14290_v37  ;;  %8148 = vmatprep.subr.mxu0 %v11318_v54  ;;  %v4862_v11 = vand.u32 4294901760, %v4861_v43 }
 0x261   :  { %14295 = vst [vmem:[#allocation61_spill] sm:$0xff] %v11353_v29  ;;  %v1934_v56 = vpop.f32.mrf.mxu0  ;;  %v11365_v27 = vadd.f32 %v2548_v17, %v1919_v36  ;;  %3144 = vmatmul.mubr.f32.gmra.mxu0 %v14298_v39  ;;  %3680 = vmatprep.mubr.f32.mxu1 %v13686_v57  ;;  %14299 = vst [vmem:[#allocation62_spill] sm:$0xff] %v11369_v52  ;;  %v4868_v36 = vsub.f32 %v11338_v28, %v11357_v4  ;;  %v11379_v17 = vand.u32 4294901760, %v11360_v58 }
 0x262   :  { %v1935_v31 = vadd.f32 %v1934_v56, %v10678_v44  ;;  %v2550_v35 = vpop.f32.mrf.mxu1  ;;  %3149 = vmatprep.mubr.f32.mxu0 %v13686_v57  ;;  %8271 = vmatpush3.msra.mxu1 %v4848_v53 }
 0x263   :  { %14297 = vst [vmem:[#allocation375_spill] sm:$0xff] %v11365_v27  ;;  %v1936_v61 = vpop.f32.mrf.mxu0  ;;  %v11373_v29 = vadd.f32 %v2550_v35, %v1921_v60  ;;  %8272 = vmatprep.subr.mxu1 %v4855_v3  ;;  %8149 = vmatpush3.msra.mxu0 %v11318_v54  ;;  %14300 = vst [vmem:[#allocation376_spill] sm:$0xff] %v11379_v17  ;;  %v11382_v27 = vsub.f32 %v124_v9, %v11369_v52  ;;  %v14301_v60 = vld [vmem:[#allocation66_spill] sm:$0xff] }
 0x264   :  { %v1937_v44 = vadd.f32 %v1936_v61, %v10684_v59  ;;  %v2557_v56 = vpop.f32.mrf.mxu1  ;;  %3682 = vmatmul.mubr.f32.gmra.mxu1 %v14294_v13  ;;  %8150 = vmatprep.subr.mxu0 %v11340_v49  ;;  %v4869_v61 = vand.u32 4294901760, %v4868_v36 }
 0x265   :  { %v1942_v35 = vpop.f32.mrf.mxu0  ;;  %v11387_v53 = vadd.f32 %v2557_v56, %v1927_v19  ;;  %3151 = vmatmul.mubr.f32.gmra.mxu0 %v14301_v60  ;;  %3687 = vmatprep.mubr.f32.mxu1 %v13686_v57  ;;  %v4875_v19 = vsub.f32 %v11360_v58, %v11379_v17  ;;  %v11399_v56 = vand.u32 4294901760, %v11382_v27 }
 0x266   :  { %v1943_v43 = vadd.f32 %v1942_v35, %v10692_v63  ;;  %v2559_v4 = vpop.f32.mrf.mxu1  ;;  %3156 = vmatprep.mubr.f32.mxu0 %v13686_v57  ;;  %8273 = vmatpush3.msra.mxu1 %v4855_v3 }
 0x267   :  { %v1944_v9 = vpop.f32.mrf.mxu0  ;;  %v11393_v59 = vadd.f32 %v2559_v4, %v1929_v46  ;;  %8274 = vmatprep.subr.mxu1 %v4862_v11  ;;  %8151 = vmatpush3.msra.mxu0 %v11340_v49  ;;  %14302 = vst [vmem:[#allocation66_spill] sm:$0xff] %v11399_v56  ;;  %v14304_v46 = vld [vmem:[#allocation73_spill] sm:$0xff] }
 0x268   :  { %v1945_v54 = vadd.f32 %v1944_v9, %v10698_v23  ;;  %v2566_v63 = vpop.f32.mrf.mxu1  ;;  %3689 = vmatmul.mubr.f32.gmra.mxu1 %v14298_v39  ;;  %8152 = vmatprep.subr.mxu0 %v11369_v52  ;;  %v4876_v9 = vand.u32 4294901760, %v4875_v19 }
 0x269   :  { %v1950_v3 = vpop.f32.mrf.mxu0  ;;  %v11404_v4 = vadd.f32 %v2566_v63, %v1935_v31  ;;  %3158 = vmatmul.mubr.f32.gmra.mxu0 %v14304_v46  ;;  %3694 = vmatprep.mubr.f32.mxu1 %v13686_v57  ;;  %v4882_v31 = vsub.f32 %v11382_v27, %v11399_v56 }
 0x26a   :  { %v1951_v36 = vadd.f32 %v1950_v3, %v10706_v32  ;;  %v2568_v35 = vpop.f32.mrf.mxu1  ;;  %3163 = vmatprep.mubr.f32.mxu0 %v13686_v57  ;;  %8275 = vmatpush3.msra.mxu1 %v4862_v11 }
 0x26b   :  { %14303 = vst [vmem:[#allocation377_spill] sm:$0xff] %v11404_v4  ;;  %v1952_v17 = vpop.f32.mrf.mxu0  ;;  %v11410_v23 = vadd.f32 %v2568_v35, %v1937_v44  ;;  %8276 = vmatprep.subr.mxu1 %v4869_v61  ;;  %8153 = vmatpush3.msra.mxu0 %v11369_v52  ;;  %v14306_v4 = vld [vmem:[#allocation74_spill] sm:$0xff] }
 0x26c   :  { %v1953_v63 = vadd.f32 %v1952_v17, %v10712_v18  ;;  %v2575_v49 = vpop.f32.mrf.mxu1  ;;  %3696 = vmatmul.mubr.f32.gmra.mxu1 %v14301_v60  ;;  %v4883_v18 = vand.u32 4294901760, %v4882_v31 }
 0x26d   :  { %v1958_v32 = vpop.f32.mrf.mxu0  ;;  %v11417_v3 = vadd.f32 %v2575_v49, %v1943_v43  ;;  %3165 = vmatmul.mubr.f32.gmra.mxu0 %v14306_v4  ;;  %3701 = vmatprep.mubr.f32.mxu1 %v13686_v57  ;;  %v121_v49 = vld [vmem:[#allocation5 + $0x88] sm:$0xff] }
 0x26e   :  { %v1959_v11 = vadd.f32 %v1958_v32, %v10720_v1  ;;  %v2577_v44 = vpop.f32.mrf.mxu1  ;;  %3170 = vmatprep.mubr.f32.mxu0 %v13686_v57  ;;  %8277 = vmatpush3.msra.mxu1 %v4869_v61  ;;  %v11431_v1 = vand.u32 4294901760, %v121_v49 }
 0x26f   :  { %14305 = vst [vmem:[#allocation73_spill] sm:$0xff] %v11417_v3  ;;  %v1960_v19 = vpop.f32.mrf.mxu0  ;;  %v11423_v35 = vadd.f32 %v2577_v44, %v1945_v54  ;;  %8278 = vmatprep.subr.mxu1 %v4876_v9  ;;  %v14309_v3 = vld [vmem:[#allocation81_spill] sm:$0xff] }
 0x270   :  { %v1961_v17 = vadd.f32 %v1960_v19, %v10726_v8  ;;  %v2584_v56 = vpop.f32.mrf.mxu1  ;;  %3703 = vmatmul.mubr.f32.gmra.mxu1 %v14304_v46  ;;  %14310 = vst [vmem:[#allocation81_spill] sm:$0xff] %v11431_v1  ;;  %8154 = vmatprep.subr.mxu0 %v11431_v1 }
 0x271   :  { %14307 = vst [vmem:[#allocation74_spill] sm:$0xff] %v11423_v35  ;;  %v1966_v43 = vpop.f32.mrf.mxu0  ;;  %v11427_v52 = vadd.f32 %v2584_v56, %v1951_v36  ;;  %3172 = vmatmul.mubr.f32.gmra.mxu0 %v14309_v3  ;;  %3708 = vmatprep.mubr.f32.mxu1 %v13686_v57  ;;  %v11439_v56 = vsub.f32 %v121_v49, %v11431_v1 }
 0x272   :  { %v1967_v54 = vadd.f32 %v1966_v43, %v10734_v12  ;;  %v2586_v61 = vpop.f32.mrf.mxu1  ;;  %3177 = vmatprep.mubr.f32.mxu0 %v13686_v57  ;;  %8279 = vmatpush3.msra.mxu1 %v4876_v9  ;;  %v14314_v9 = vld [vmem:[#allocation82_spill] sm:$0xff] }
 0x273   :  { %14308 = vst [vmem:[#allocation378_spill] sm:$0xff] %v11427_v52  ;;  %v1968_v8 = vpop.f32.mrf.mxu0  ;;  %v11435_v31 = vadd.f32 %v2586_v61, %v1953_v63  ;;  %8280 = vmatprep.subr.mxu1 %v4883_v18  ;;  %14312 = vst [vmem:[#allocation380_spill] sm:$0xff] %v11439_v56  ;;  %8155 = vmatpush3.msra.mxu0 %v11431_v1  ;;  %v11449_v63 = vand.u32 4294901760, %v11439_v56  ;;  %v14339_v52 = vld [vmem:[#allocation104_spill] sm:$0xff] }
 0x274   :  { %v1969_v36 = vadd.f32 %v1968_v8, %v10740_v16  ;;  %v2593_v32 = vpop.f32.mrf.mxu1  ;;  %3710 = vmatmul.mubr.f32.gmra.mxu1 %v14306_v4 }
 0x275   :  { %14311 = vst [vmem:[#allocation379_spill] sm:$0xff] %v11435_v31  ;;  %v1974_v12 = vpop.f32.mrf.mxu0  ;;  %v11444_v44 = vadd.f32 %v2593_v32, %v1959_v11  ;;  %3179 = vmatmul.mubr.f32.gmra.mxu0 %v14314_v9  ;;  %3715 = vmatprep.mubr.f32.mxu1 %v13686_v57  ;;  %14315 = vst [vmem:[#allocation82_spill] sm:$0xff] %v11449_v63  ;;  %v4889_v11 = vsub.f32 %v11439_v56, %v11449_v63  ;;  %v14321_v63 = vld [vmem:[#allocation93_spill] sm:$0xff] }
 0x276   :  { %v1975_v19 = vadd.f32 %v1974_v12, %v10748_v48  ;;  %v2595_v49 = vpop.f32.mrf.mxu1  ;;  %3184 = vmatprep.mubr.f32.mxu0 %v13686_v57  ;;  %8281 = vmatpush3.msra.mxu1 %v4883_v18 }
 0x277   :  { %14313 = vst [vmem:[#allocation381_spill] sm:$0xff] %v11444_v44  ;;  %v1976_v16 = vpop.f32.mrf.mxu0  ;;  %v11453_v43 = vadd.f32 %v2595_v49, %v1961_v17  ;;  %v14318_v44 = vld [vmem:[#allocation86_spill] sm:$0xff]  ;;  %v4890_v48 = vand.u32 4294901760, %v4889_v11 }
 0x278   :  { %v1977_v61 = vadd.f32 %v1976_v16, %v10754_v22  ;;  %v2602_v8 = vpop.f32.mrf.mxu1  ;;  %3717 = vmatmul.mubr.f32.gmra.mxu1 %v14309_v3 }
 0x279   :  { %14316 = vst [vmem:[#allocation382_spill] sm:$0xff] %v11453_v43  ;;  %v1982_v32 = vpop.f32.mrf.mxu0  ;;  %v11459_v1 = vadd.f32 %v2602_v8, %v1967_v54  ;;  %3186 = vmatmul.mubr.f32.gmra.mxu0 %v14318_v44  ;;  %3722 = vmatprep.mubr.f32.mxu1 %v13686_v57 }
 0x27a   :  { %v1983_v18 = vadd.f32 %v1982_v32, %v10762_v7  ;;  %v2604_v17 = vpop.f32.mrf.mxu1  ;;  %3191 = vmatprep.mubr.f32.mxu0 %v13686_v57  ;;  %8282 = vmatprep.subr.mxu1 %v4890_v48  ;;  %v14322_v7 = vld [vmem:[#allocation12_spill] sm:$0xff] }
 0x27b   :  { %14317 = vst [vmem:[#allocation383_spill] sm:$0xff] %v11459_v1  ;;  %v1984_v12 = vpop.f32.mrf.mxu0  ;;  %v11465_v49 = vadd.f32 %v2604_v17, %v1969_v36  ;;  %8283 = vmatpush3.msra.mxu1 %v4890_v48  ;;  %v14326_v1 = vld [vmem:[#allocation94_spill] sm:$0xff] }
 0x27c   :  { %v1985_v22 = vadd.f32 %v1984_v12, %v10768_v50  ;;  %v2611_v16 = vpop.f32.mrf.mxu1  ;;  %3724 = vmatmul.mubr.f32.gmra.mxu1 %v14314_v9  ;;  %v14324_v50 = vld [vmem:[#allocation13_spill] sm:$0xff] }
 0x27d   :  { %14319 = vst [vmem:[#allocation86_spill] sm:$0xff] %v11465_v49  ;;  %v1990_v54 = vpop.f32.mrf.mxu0  ;;  %v11469_v8 = vadd.f32 %v2611_v16, %v1975_v19  ;;  %3193 = vmatmul.mubr.f32.gmra.mxu0 %v14321_v63  ;;  %3729 = vmatprep.mubr.f32.mxu1 %v13686_v57  ;;  %v118_v19 = vld [vmem:[#allocation5 + $0x70] sm:$0xff] }
 0x27e   :  { %v1991_v11 = vadd.f32 %v1990_v54, %v14322_v7  ;;  %v2613_v32 = vpop.f32.mrf.mxu1  ;;  %3198 = vmatprep.mubr.f32.mxu0 %v13686_v57  ;;  %v11483_v54 = vand.u32 4294901760, %v118_v19  ;;  %v14328_v7 = vld [vmem:[#allocation14_spill] sm:$0xff] }
 0x27f   :  { %14320 = vst [vmem:[#allocation384_spill] sm:$0xff] %v11469_v8  ;;  %v1992_v36 = vpop.f32.mrf.mxu0  ;;  %v11475_v17 = vadd.f32 %v2613_v32, %v1977_v61 }
 0x280   :  { %v1993_v12 = vadd.f32 %v1992_v36, %v14324_v50  ;;  %v2620_v49 = vpop.f32.mrf.mxu1  ;;  %3731 = vmatmul.mubr.f32.gmra.mxu1 %v14318_v44  ;;  %14327 = vst [vmem:[#allocation385_spill] sm:$0xff] %v11483_v54  ;;  %8156 = vmatprep.subr.mxu0 %v11483_v54  ;;  %v11491_v36 = vsub.f32 %v118_v19, %v11483_v54 }
 0x281   :  { %14323 = vst [vmem:[#allocation12_spill] sm:$0xff] %v11475_v17  ;;  %v1998_v16 = vpop.f32.mrf.mxu0  ;;  %v11479_v8 = vadd.f32 %v2620_v49, %v1983_v18  ;;  %3200 = vmatmul.mubr.f32.gmra.mxu0 %v14326_v1  ;;  %3736 = vmatprep.mubr.f32.mxu1 %v13686_v57  ;;  %v14331_v18 = vld [vmem:[#allocation28_spill] sm:$0xff] }
 0x282   :  { %v1999_v48 = vadd.f32 %v1998_v16, %v14328_v7  ;;  %v2622_v43 = vpop.f32.mrf.mxu1  ;;  %3205 = vmatprep.mubr.f32.mxu0 %v13686_v57  ;;  %14330 = vst [vmem:[#allocation386_spill] sm:$0xff] %v11491_v36  ;;  %8157 = vmatpush3.msra.mxu0 %v11483_v54  ;;  %v14333_v7 = vld [vmem:[#allocation98_spill] sm:$0xff] }
 0x283   :  { %14325 = vst [vmem:[#allocation13_spill] sm:$0xff] %v11479_v8  ;;  %v2000_v61 = vpop.f32.mrf.mxu0  ;;  %v11487_v32 = vadd.f32 %v2622_v43, %v1985_v22  ;;  %v11501_v43 = vand.u32 4294901760, %v11491_v36  ;;  %v14335_v22 = vld [vmem:[#allocation30_spill] sm:$0xff] }
 0x284   :  { %v2001_v49 = vadd.f32 %v2000_v61, %v14331_v18  ;;  %v2629_v50 = vpop.f32.mrf.mxu1  ;;  %3738 = vmatmul.mubr.f32.gmra.mxu1 %v14321_v63 }
 0x285   :  { %14329 = vst [vmem:[#allocation14_spill] sm:$0xff] %v11487_v32  ;;  %v2006_v8 = vpop.f32.mrf.mxu0  ;;  %v11496_v16 = vadd.f32 %v2629_v50, %v1991_v11  ;;  %3207 = vmatmul.mubr.f32.gmra.mxu0 %v14333_v7  ;;  %3743 = vmatprep.mubr.f32.mxu1 %v13686_v57  ;;  %14334 = vst [vmem:[#allocation387_spill] sm:$0xff] %v11501_v43  ;;  %v4896_v17 = vsub.f32 %v11491_v36, %v11501_v43  ;;  %v14337_v11 = vld [vmem:[#allocation15_spill] sm:$0xff]  ;;  %v14349_v36 = vld [vmem:[#allocation112_spill] sm:$0xff] }
 0x286   :  { %v2007_v19 = vadd.f32 %v2006_v8, %v14335_v22  ;;  %v2631_v32 = vpop.f32.mrf.mxu1  ;;  %3212 = vmatprep.mubr.f32.mxu0 %v13686_v57  ;;  %v14340_v22 = vld [vmem:[#allocation16_spill] sm:$0xff] }
 0x287   :  { %14332 = vst [vmem:[#allocation28_spill] sm:$0xff] %v11496_v16  ;;  %v2008_v61 = vpop.f32.mrf.mxu0  ;;  %v11505_v18 = vadd.f32 %v2631_v32, %v1993_v12  ;;  %v4897_v8 = vand.u32 4294901760, %v4896_v17  ;;  %v14345_v17 = vld [vmem:[#allocation17_spill] sm:$0xff] }
 0x288   :  { %v2009_v50 = vadd.f32 %v2008_v61, %v14337_v11  ;;  %v2638_v16 = vpop.f32.mrf.mxu1  ;;  %3745 = vmatmul.mubr.f32.gmra.mxu1 %v14326_v1  ;;  %v14342_v61 = vld [vmem:[#allocation33_spill] sm:$0xff] }
 0x289   :  { %14336 = vst [vmem:[#allocation30_spill] sm:$0xff] %v11505_v18  ;;  %v2014_v54 = vpop.f32.mrf.mxu0  ;;  %v11511_v31 = vadd.f32 %v2638_v16, %v1999_v48  ;;  %3214 = vmatmul.mubr.f32.gmra.mxu0 %v14339_v52  ;;  %3750 = vmatprep.mubr.f32.mxu1 %v13686_v57 }
 0x28a   :  { %v2015_v35 = vadd.f32 %v2014_v54, %v14340_v22  ;;  %v2640_v12 = vpop.f32.mrf.mxu1  ;;  %3219 = vmatprep.mubr.f32.mxu0 %v13686_v57  ;;  %8284 = vmatprep.subr.mxu1 %v4897_v8 }
 0x28b   :  { %14338 = vst [vmem:[#allocation15_spill] sm:$0xff] %v11511_v31  ;;  %v2016_v32 = vpop.f32.mrf.mxu0  ;;  %v11517_v43 = vadd.f32 %v2640_v12, %v2001_v49  ;;  %v14344_v31 = vld [vmem:[#allocation105_spill] sm:$0xff]  ;;  %8285 = vmatpush3.msra.mxu1 %v4897_v8 }
 0x28c   :  { %v2017_v11 = vadd.f32 %v2016_v32, %v14342_v61  ;;  %v2647_v18 = vpop.f32.mrf.mxu1  ;;  %3752 = vmatmul.mubr.f32.gmra.mxu1 %v14333_v7  ;;  %v14347_v32 = vld [vmem:[#allocation18_spill] sm:$0xff] }
 0x28d   :  { %14341 = vst [vmem:[#allocation16_spill] sm:$0xff] %v11517_v43  ;;  %v2022_v48 = vpop.f32.mrf.mxu0  ;;  %v11521_v16 = vadd.f32 %v2647_v18, %v2007_v19  ;;  %3221 = vmatmul.mubr.f32.gmra.mxu0 %v14344_v31  ;;  %3757 = vmatprep.mubr.f32.mxu1 %v13686_v57  ;;  %v115_v19 = vld [vmem:[#allocation5 + $0x58] sm:$0xff] }
 0x28e   :  { %v2023_v54 = vadd.f32 %v2022_v48, %v14345_v17  ;;  %v2649_v22 = vpop.f32.mrf.mxu1  ;;  %3226 = vmatprep.mubr.f32.mxu0 %v13686_v57  ;;  %v11535_v48 = vand.u32 4294901760, %v115_v19  ;;  %v14351_v17 = vld [vmem:[#allocation20_spill] sm:$0xff] }
 0x28f   :  { %14343 = vst [vmem:[#allocation33_spill] sm:$0xff] %v11521_v16  ;;  %v2024_v49 = vpop.f32.mrf.mxu0  ;;  %v11527_v12 = vadd.f32 %v2649_v22, %v2009_v50 }
 0x290   :  { %v2025_v61 = vadd.f32 %v2024_v49, %v14347_v32  ;;  %v2656_v43 = vpop.f32.mrf.mxu1  ;;  %3759 = vmatmul.mubr.f32.gmra.mxu1 %v14339_v52  ;;  %14350 = vst [vmem:[#allocation388_spill] sm:$0xff] %v11535_v48  ;;  %8158 = vmatprep.subr.mxu0 %v11535_v48  ;;  %v11543_v49 = vsub.f32 %v115_v19, %v11535_v48  ;;  %v14362_v52 = vld [vmem:[#allocation117_spill] sm:$0xff] }
 0x291   :  { %14346 = vst [vmem:[#allocation17_spill] sm:$0xff] %v11527_v12  ;;  %v2030_v18 = vpop.f32.mrf.mxu0  ;;  %v11531_v16 = vadd.f32 %v2656_v43, %v2015_v35  ;;  %3228 = vmatmul.mubr.f32.gmra.mxu0 %v14349_v36  ;;  %3764 = vmatprep.mubr.f32.mxu1 %v13686_v57  ;;  %v14354_v35 = vld [vmem:[#allocation38_spill] sm:$0xff] }
 0x292   :  { %v2031_v8 = vadd.f32 %v2030_v18, %v14351_v17  ;;  %v2658_v56 = vpop.f32.mrf.mxu1  ;;  %3233 = vmatprep.mubr.f32.mxu0 %v13686_v57  ;;  %14353 = vst [vmem:[#allocation389_spill] sm:$0xff] %v11543_v49  ;;  %8159 = vmatpush3.msra.mxu0 %v11535_v48  ;;  %v14356_v17 = vld [vmem:[#allocation113_spill] sm:$0xff] }
 0x293   :  { %14348 = vst [vmem:[#allocation18_spill] sm:$0xff] %v11531_v16  ;;  %v2032_v50 = vpop.f32.mrf.mxu0  ;;  %v11539_v22 = vadd.f32 %v2658_v56, %v2017_v11  ;;  %v11553_v56 = vand.u32 4294901760, %v11543_v49  ;;  %v14358_v11 = vld [vmem:[#allocation21_spill] sm:$0xff] }
 0x294   :  { %v2033_v43 = vadd.f32 %v2032_v50, %v14354_v35  ;;  %v2665_v32 = vpop.f32.mrf.mxu1  ;;  %3766 = vmatmul.mubr.f32.gmra.mxu1 %v14344_v31 }
 0x295   :  { %14352 = vst [vmem:[#allocation20_spill] sm:$0xff] %v11539_v22  ;;  %v2038_v16 = vpop.f32.mrf.mxu0  ;;  %v11548_v18 = vadd.f32 %v2665_v32, %v2023_v54  ;;  %3235 = vmatmul.mubr.f32.gmra.mxu0 %v14356_v17  ;;  %3771 = vmatprep.mubr.f32.mxu1 %v13686_v57  ;;  %14357 = vst [vmem:[#allocation390_spill] sm:$0xff] %v11553_v56  ;;  %v4903_v12 = vsub.f32 %v11543_v49, %v11553_v56  ;;  %v14360_v54 = vld [vmem:[#allocation22_spill] sm:$0xff] }
 0x296   :  { %v2039_v19 = vadd.f32 %v2038_v16, %v14358_v11  ;;  %v2667_v22 = vpop.f32.mrf.mxu1  ;;  %3240 = vmatprep.mubr.f32.mxu0 %v13686_v57  ;;  %v14363_v11 = vld [vmem:[#allocation39_spill] sm:$0xff] }
 0x297   :  { %14355 = vst [vmem:[#allocation38_spill] sm:$0xff] %v11548_v18  ;;  %v2040_v50 = vpop.f32.mrf.mxu0  ;;  %v11557_v35 = vadd.f32 %v2667_v22, %v2025_v61  ;;  %v4904_v16 = vand.u32 4294901760, %v4903_v12  ;;  %v14368_v12 = vld [vmem:[#allocation23_spill] sm:$0xff] }
 0x298   :  { %v2041_v32 = vadd.f32 %v2040_v50, %v14360_v54  ;;  %v2674_v18 = vpop.f32.mrf.mxu1  ;;  %3773 = vmatmul.mubr.f32.gmra.mxu1 %v14349_v36  ;;  %v14365_v50 = vld [vmem:[#allocation41_spill] sm:$0xff] }
 0x299   :  { %14359 = vst [vmem:[#allocation21_spill] sm:$0xff] %v11557_v35  ;;  %v2046_v48 = vpop.f32.mrf.mxu0  ;;  %v11563_v31 = vadd.f32 %v2674_v18, %v2031_v8  ;;  %3242 = vmatmul.mubr.f32.gmra.mxu0 %v14362_v52  ;;  %3778 = vmatprep.mubr.f32.mxu1 %v13686_v57 }
 0x29a   :  { %v2047_v7 = vadd.f32 %v2046_v48, %v14363_v11  ;;  %v2676_v61 = vpop.f32.mrf.mxu1  ;;  %3247 = vmatprep.mubr.f32.mxu0 %v13686_v57  ;;  %8286 = vmatprep.subr.mxu1 %v4904_v16 }
 0x29b   :  { %14361 = vst [vmem:[#allocation22_spill] sm:$0xff] %v11563_v31  ;;  %v2048_v22 = vpop.f32.mrf.mxu0  ;;  %v11569_v56 = vadd.f32 %v2676_v61, %v2033_v43  ;;  %v14367_v31 = vld [vmem:[#allocation123_spill] sm:$0xff]  ;;  %8287 = vmatpush3.msra.mxu1 %v4904_v16 }
 0x29c   :  { %v2049_v54 = vadd.f32 %v2048_v22, %v14365_v50  ;;  %v2683_v35 = vpop.f32.mrf.mxu1  ;;  %3780 = vmatmul.mubr.f32.gmra.mxu1 %v14356_v17  ;;  %v14370_v22 = vld [vmem:[#allocation24_spill] sm:$0xff] }
 0x29d   :  { %14364 = vst [vmem:[#allocation39_spill] sm:$0xff] %v11569_v56  ;;  %v2054_v8 = vpop.f32.mrf.mxu0  ;;  %v11573_v18 = vadd.f32 %v2683_v35, %v2039_v19  ;;  %3249 = vmatmul.mubr.f32.gmra.mxu0 %v14367_v31  ;;  %3785 = vmatprep.mubr.f32.mxu1 %v13686_v57 }
 0x29e   :  { %v2055_v48 = vadd.f32 %v2054_v8, %v14368_v12  ;;  %v2685_v11 = vpop.f32.mrf.mxu1  ;;  %3254 = vmatprep.mubr.f32.mxu0 %v13686_v57  ;;  %v112_v8 = vld [vmem:[#allocation5 + $0x40] sm:$0xff]  ;;  %v14373_v12 = vld [vmem:[#allocation42_spill] sm:$0xff] }
 0x29f   :  { %14366 = vst [vmem:[#allocation41_spill] sm:$0xff] %v11573_v18  ;;  %v2056_v43 = vpop.f32.mrf.mxu0  ;;  %v11579_v61 = vadd.f32 %v2685_v11, %v2041_v32  ;;  %v14372_v18 = vld [vmem:[#allocation124_spill] sm:$0xff]  ;;  %v11589_v32 = vand.u32 4294901760, %v112_v8 }
 0x2a0   :  { %v2057_v50 = vadd.f32 %v2056_v43, %v14370_v22  ;;  %v2692_v56 = vpop.f32.mrf.mxu1  ;;  %3787 = vmatmul.mubr.f32.gmra.mxu1 %v14362_v52  ;;  %v14376_v43 = vld [vmem:[#allocation46_spill] sm:$0xff] }
 0x2a1   :  { %14369 = vst [vmem:[#allocation23_spill] sm:$0xff] %v11579_v61  ;;  %v2062_v19 = vpop.f32.mrf.mxu0  ;;  %v11583_v35 = vadd.f32 %v2692_v56, %v2047_v7  ;;  %3256 = vmatmul.mubr.f32.gmra.mxu0 %v14372_v18  ;;  %3792 = vmatprep.mubr.f32.mxu1 %v13686_v57  ;;  %14374 = vst [vmem:[#allocation42_spill] sm:$0xff] %v11589_v32  ;;  %v11597_v7 = vsub.f32 %v112_v8, %v11589_v32 }
 0x2a2   :  { %v2063_v49 = vadd.f32 %v2062_v19, %v14373_v12  ;;  %v2694_v17 = vpop.f32.mrf.mxu1  ;;  %3261 = vmatprep.mubr.f32.mxu0 %v13686_v57  ;;  %8160 = vmatprep.subr.mxu0 %v11589_v32  ;;  %v14379_v12 = vld [vmem:[#allocation128_spill] sm:$0xff] }
 0x2a3   :  { %14371 = vst [vmem:[#allocation24_spill] sm:$0xff] %v11583_v35  ;;  %v2064_v16 = vpop.f32.mrf.mxu0  ;;  %v11591_v11 = vadd.f32 %v2694_v17, %v2049_v54  ;;  %14377 = vst [vmem:[#allocation46_spill] sm:$0xff] %v11597_v7  ;;  %v14380_v35 = vld [vmem:[#allocation25_spill] sm:$0xff]  ;;  %8161 = vmatpush3.msra.mxu0 %v11589_v32  ;;  %v14386_v32 = vld [vmem:[#allocation47_spill] sm:$0xff] }
 0x2a4   :  { %v2065_v22 = vadd.f32 %v2064_v16, %v14376_v43  ;;  %v2701_v61 = vpop.f32.mrf.mxu1  ;;  %3794 = vmatmul.mubr.f32.gmra.mxu1 %v14367_v31  ;;  %v11607_v16 = vand.u32 4294901760, %v11597_v7  ;;  %v14385_v31 = vld [vmem:[#allocation132_spill] sm:$0xff] }
 0x2a5   :  { %14375 = vst [vmem:[#allocation391_spill] sm:$0xff] %v11591_v11  ;;  %v2070_v56 = vpop.f32.mrf.mxu0  ;;  %v11599_v19 = vadd.f32 %v2701_v61, %v2055_v48  ;;  %3263 = vmatmul.mubr.f32.gmra.mxu0 %v14379_v12  ;;  %3799 = vmatprep.mubr.f32.mxu1 %v13686_v57  ;;  %v14383_v11 = vld [vmem:[#allocation26_spill] sm:$0xff] }
 0x2a6   :  { %v2071_v17 = vadd.f32 %v2070_v56, %v14380_v35  ;;  %v2703_v54 = vpop.f32.mrf.mxu1  ;;  %3268 = vmatprep.mubr.f32.mxu0 %v13686_v57  ;;  %14381 = vst [vmem:[#allocation25_spill] sm:$0xff] %v11607_v16 }
 0x2a7   :  { %14378 = vst [vmem:[#allocation392_spill] sm:$0xff] %v11599_v19  ;;  %v2072_v43 = vpop.f32.mrf.mxu0  ;;  %v11609_v8 = vadd.f32 %v2703_v54, %v2057_v50  ;;  %v4910_v19 = vsub.f32 %v11597_v7, %v11607_v16  ;;  %v14390_v16 = vld [vmem:[#allocation136_spill] sm:$0xff] }
 0x2a8   :  { %v2073_v48 = vadd.f32 %v2072_v43, %v14383_v11  ;;  %v2710_v61 = vpop.f32.mrf.mxu1  ;;  %3801 = vmatmul.mubr.f32.gmra.mxu1 %v14372_v18  ;;  %v14388_v43 = vld [vmem:[#allocation50_spill] sm:$0xff] }
 0x2a9   :  { %14382 = vst [vmem:[#allocation393_spill] sm:$0xff] %v11609_v8  ;;  %v2078_v35 = vpop.f32.mrf.mxu0  ;;  %v11615_v56 = vadd.f32 %v2710_v61, %v2063_v49  ;;  %3270 = vmatmul.mubr.f32.gmra.mxu0 %v14385_v31  ;;  %3806 = vmatprep.mubr.f32.mxu1 %v13686_v57  ;;  %v4911_v50 = vand.u32 4294901760, %v4910_v19  ;;  %v14393_v19 = vld [vmem:[#allocation29_spill] sm:$0xff] }
 0x2aa   :  { %v2079_v52 = vadd.f32 %v2078_v35, %v14386_v32  ;;  %v2712_v36 = vpop.f32.mrf.mxu1  ;;  %3275 = vmatprep.mubr.f32.mxu0 %v13686_v57  ;;  %v14391_v32 = vld [vmem:[#allocation27_spill] sm:$0xff] }
 0x2ab   :  { %14384 = vst [vmem:[#allocation26_spill] sm:$0xff] %v11615_v56  ;;  %v2080_v11 = vpop.f32.mrf.mxu0  ;;  %v11621_v54 = vadd.f32 %v2712_v36, %v2065_v22  ;;  %8288 = vmatprep.subr.mxu1 %v4911_v50 }
 0x2ac   :  { %v2081_v8 = vadd.f32 %v2080_v11, %v14388_v43  ;;  %v2719_v18 = vpop.f32.mrf.mxu1  ;;  %3808 = vmatmul.mubr.f32.gmra.mxu1 %v14379_v12 }
 0x2ad   :  { %14387 = vst [vmem:[#allocation47_spill] sm:$0xff] %v11621_v54  ;;  %v2086_v49 = vpop.f32.mrf.mxu0  ;;  %v11625_v61 = vadd.f32 %v2719_v18, %v2071_v17  ;;  %3277 = vmatmul.mubr.f32.gmra.mxu0 %v14390_v16  ;;  %3813 = vmatprep.mubr.f32.mxu1 %v13686_v57 }
 0x2ae   :  { %v2087_v35 = vadd.f32 %v2086_v49, %v14391_v32  ;;  %v2721_v56 = vpop.f32.mrf.mxu1  ;;  %3282 = vmatprep.mubr.f32.mxu0 %v13686_v57  ;;  %8289 = vmatpush3.msra.mxu1 %v4911_v50  ;;  %v109_v49 = vld [vmem:[#allocation5 + $0x28] sm:$0xff]  ;;  %v14396_v32 = vld [vmem:[#allocation51_spill] sm:$0xff] }
 0x2af   :  { %14389 = vst [vmem:[#allocation50_spill] sm:$0xff] %v11625_v61  ;;  %v2088_v36 = vpop.f32.mrf.mxu0  ;;  %v11631_v22 = vadd.f32 %v2721_v56, %v2073_v48  ;;  %v14395_v61 = vld [vmem:[#allocation143_spill] sm:$0xff]  ;;  %v11641_v48 = vand.u32 4294901760, %v109_v49 }
 0x2b0   :  { %v2089_v11 = vadd.f32 %v2088_v36, %v14393_v19  ;;  %v2728_v43 = vpop.f32.mrf.mxu1  ;;  %3815 = vmatmul.mubr.f32.gmra.mxu1 %v14385_v31  ;;  %v14399_v36 = vld [vmem:[#allocation31_spill] sm:$0xff] }
 0x2b1   :  { %14392 = vst [vmem:[#allocation27_spill] sm:$0xff] %v11631_v22  ;;  %v2094_v18 = vpop.f32.mrf.mxu0  ;;  %v11635_v17 = vadd.f32 %v2728_v43, %v2079_v52  ;;  %3284 = vmatmul.mubr.f32.gmra.mxu0 %v14395_v61  ;;  %3820 = vmatprep.mubr.f32.mxu1 %v13686_v57  ;;  %14397 = vst [vmem:[#allocation51_spill] sm:$0xff] %v11641_v48  ;;  %v11649_v52 = vsub.f32 %v109_v49, %v11641_v48 }
 0x2b2   :  { %v2095_v54 = vadd.f32 %v2094_v18, %v14396_v32  ;;  %v2730_v12 = vpop.f32.mrf.mxu1  ;;  %3289 = vmatprep.mubr.f32.mxu0 %v13686_v57  ;;  %8162 = vmatprep.subr.mxu0 %v11641_v48  ;;  %v14402_v32 = vld [vmem:[#allocation144_spill] sm:$0xff] }
 0x2b3   :  { %14394 = vst [vmem:[#allocation29_spill] sm:$0xff] %v11635_v17  ;;  %v2096_v56 = vpop.f32.mrf.mxu0  ;;  %v11643_v50 = vadd.f32 %v2730_v12, %v2081_v8  ;;  %14400 = vst [vmem:[#allocation31_spill] sm:$0xff] %v11649_v52  ;;  %v14403_v17 = vld [vmem:[#allocation32_spill] sm:$0xff]  ;;  %8163 = vmatpush3.msra.mxu0 %v11641_v48  ;;  %v14409_v48 = vld [vmem:[#allocation35_spill] sm:$0xff] }
 0x2b4   :  { %v2097_v19 = vadd.f32 %v2096_v56, %v14399_v36  ;;  %v2737_v22 = vpop.f32.mrf.mxu1  ;;  %3822 = vmatmul.mubr.f32.gmra.mxu1 %v14390_v16  ;;  %v11659_v56 = vand.u32 4294901760, %v11649_v52  ;;  %v14408_v16 = vld [vmem:[#allocation148_spill] sm:$0xff] }
 0x2b5   :  { %14398 = vst [vmem:[#allocation394_spill] sm:$0xff] %v11643_v50  ;;  %v2102_v43 = vpop.f32.mrf.mxu0  ;;  %v11651_v18 = vadd.f32 %v2737_v22, %v2087_v35  ;;  %3291 = vmatmul.mubr.f32.gmra.mxu0 %v14402_v32  ;;  %3827 = vmatprep.mubr.f32.mxu1 %v13686_v57  ;;  %v14406_v50 = vld [vmem:[#allocation34_spill] sm:$0xff] }
 0x2b6   :  { %v2103_v12 = vadd.f32 %v2102_v43, %v14403_v17  ;;  %v2739_v8 = vpop.f32.mrf.mxu1  ;;  %3296 = vmatprep.mubr.f32.mxu0 %v13686_v57  ;;  %14404 = vst [vmem:[#allocation32_spill] sm:$0xff] %v11659_v56 }
 0x2b7   :  { %14401 = vst [vmem:[#allocation395_spill] sm:$0xff] %v11651_v18  ;;  %v2104_v36 = vpop.f32.mrf.mxu0  ;;  %v11661_v49 = vadd.f32 %v2739_v8, %v2089_v11  ;;  %v4917_v18 = vsub.f32 %v11649_v52, %v11659_v56  ;;  %v14413_v56 = vld [vmem:[#allocation155_spill] sm:$0xff] }
 0x2b8   :  { %v2105_v35 = vadd.f32 %v2104_v36, %v14406_v50  ;;  %v2746_v22 = vpop.f32.mrf.mxu1  ;;  %3829 = vmatmul.mubr.f32.gmra.mxu1 %v14395_v61  ;;  %v14411_v36 = vld [vmem:[#allocation36_spill] sm:$0xff] }
 0x2b9   :  { %14405 = vst [vmem:[#allocation396_spill] sm:$0xff] %v11661_v49  ;;  %v2110_v17 = vpop.f32.mrf.mxu0  ;;  %v11667_v43 = vadd.f32 %v2746_v22, %v2095_v54  ;;  %3298 = vmatmul.mubr.f32.gmra.mxu0 %v14408_v16  ;;  %3834 = vmatprep.mubr.f32.mxu1 %v13686_v57  ;;  %v4918_v11 = vand.u32 4294901760, %v4917_v18  ;;  %v14416_v18 = vld [vmem:[#allocation316_spill] sm:$0xff] }
 0x2ba   :  { %v2111_v31 = vadd.f32 %v2110_v17, %v14409_v48  ;;  %v2748_v7 = vpop.f32.mrf.mxu1  ;;  %3303 = vmatprep.mubr.f32.mxu0 %v13686_v57  ;;  %v14414_v48 = vld [vmem:[#allocation315_spill] sm:$0xff] }
 0x2bb   :  { %14407 = vst [vmem:[#allocation34_spill] sm:$0xff] %v11667_v43  ;;  %v2112_v50 = vpop.f32.mrf.mxu0  ;;  %v11673_v8 = vadd.f32 %v2748_v7, %v2097_v19  ;;  %8290 = vmatprep.subr.mxu1 %v4918_v11 }
 0x2bc   :  { %v2113_v49 = vadd.f32 %v2112_v50, %v14411_v36  ;;  %v2755_v61 = vpop.f32.mrf.mxu1  ;;  %3836 = vmatmul.mubr.f32.gmra.mxu1 %v14402_v32 }
 0x2bd   :  { %14410 = vst [vmem:[#allocation35_spill] sm:$0xff] %v11673_v8  ;;  %v2118_v54 = vpop.f32.mrf.mxu0  ;;  %v11677_v22 = vadd.f32 %v2755_v61, %v2103_v12  ;;  %3305 = vmatmul.mubr.f32.gmra.mxu0 %v14413_v56  ;;  %3841 = vmatprep.mubr.f32.mxu1 %v13686_v57 }
 0x2be   :  { %v2119_v17 = vadd.f32 %v2118_v54, %v14414_v48  ;;  %v2757_v43 = vpop.f32.mrf.mxu1  ;;  %3310 = vmatprep.mubr.f32.mxu0 %v13686_v57  ;;  %8291 = vmatpush3.msra.mxu1 %v4918_v11  ;;  %v106_v54 = vld [vmem:[#allocation5 + $0x10] sm:$0xff] }
 0x2bf   :  { %14412 = vst [vmem:[#allocation36_spill] sm:$0xff] %v11677_v22  ;;  %v2120_v7 = vpop.f32.mrf.mxu0  ;;  %v11683_v19 = vadd.f32 %v2757_v43, %v2105_v35  ;;  %v14418_v22 = vld [vmem:[#allocation159_spill] sm:$0xff]  ;;  %v14419_v48 = vld [vmem:[#allocation317_spill] sm:$0xff]  ;;  %v11693_v35 = vand.u32 4294901760, %v106_v54 }
 0x2c0   :  { %v2121_v50 = vadd.f32 %v2120_v7, %v14416_v18  ;;  %v2764_v36 = vpop.f32.mrf.mxu1  ;;  %3843 = vmatmul.mubr.f32.gmra.mxu1 %v14408_v16  ;;  %v14422_v7 = vld [vmem:[#allocation318_spill] sm:$0xff]  ;;  %v14432_v16 = vld [vmem:[#allocation321_spill] sm:$0xff] }
 0x2c1   :  { %14415 = vst [vmem:[#allocation315_spill] sm:$0xff] %v11683_v19  ;;  %v2126_v61 = vpop.f32.mrf.mxu0  ;;  %v11687_v12 = vadd.f32 %v2764_v36, %v2111_v31  ;;  %3312 = vmatmul.mubr.f32.gmra.mxu0 %v14418_v22  ;;  %3848 = vmatprep.mubr.f32.mxu1 %v13686_v57  ;;  %14420 = vst [vmem:[#allocation317_spill] sm:$0xff] %v11693_v35  ;;  %v11701_v31 = vsub.f32 %v106_v54, %v11693_v35 }
 0x2c2   :  { %v2127_v8 = vadd.f32 %v2126_v61, %v14419_v48  ;;  %v2766_v32 = vpop.f32.mrf.mxu1  ;;  %3317 = vmatprep.mubr.f32.mxu0 %v13686_v57  ;;  %8164 = vmatprep.subr.mxu0 %v11693_v35  ;;  %v14424_v48 = vld [vmem:[#allocation160_spill] sm:$0xff] }
 0x2c3   :  { %14417 = vst [vmem:[#allocation316_spill] sm:$0xff] %v11687_v12  ;;  %v2128_v43 = vpop.f32.mrf.mxu0  ;;  %v11695_v11 = vadd.f32 %v2766_v32, %v2113_v49  ;;  %v14425_v12 = vld [vmem:[#allocation319_spill] sm:$0xff]  ;;  %8165 = vmatpush3.msra.mxu0 %v11693_v35  ;;  %v14431_v35 = vld [vmem:[#allocation164_spill] sm:$0xff] }
 0x2c4   :  { %v2129_v18 = vadd.f32 %v2128_v43, %v14422_v7  ;;  %v2773_v19 = vpop.f32.mrf.mxu1  ;;  %3850 = vmatmul.mubr.f32.gmra.mxu1 %v14413_v56  ;;  %v11711_v43 = vand.u32 4294901760, %v11701_v31 }
 0x2c5   :  { %14421 = vst [vmem:[#allocation397_spill] sm:$0xff] %v11695_v11  ;;  %v2134_v36 = vpop.f32.mrf.mxu0  ;;  %v11703_v61 = vadd.f32 %v2773_v19, %v2119_v17  ;;  %3319 = vmatmul.mubr.f32.gmra.mxu0 %v14424_v48  ;;  %3855 = vmatprep.mubr.f32.mxu1 %v13686_v57  ;;  %v14428_v11 = vld [vmem:[#allocation323_spill] sm:$0xff]  ;;  %v14429_v17 = vld [vmem:[#allocation320_spill] sm:$0xff] }
 0x2c6   :  { %v2135_v32 = vadd.f32 %v2134_v36, %v14425_v12  ;;  %v2775_v49 = vpop.f32.mrf.mxu1  ;;  %3324 = vmatprep.mubr.f32.mxu0 %v13686_v57  ;;  %14426 = vst [vmem:[#allocation319_spill] sm:$0xff] %v11711_v43  ;;  %8390 = vmatprep.subr.mxu0 %v14428_v11  ;;  %v4924_v12 = vsub.f32 %v11701_v31, %v11711_v43  ;;  %v14436_v43 = vld [vmem:[#allocation168_spill] sm:$0xff] }
 0x2c7   :  { %14423 = vst [vmem:[#allocation318_spill] sm:$0xff] %v11703_v61  ;;  %v2136_v7 = vpop.f32.mrf.mxu0  ;;  %v11713_v54 = vadd.f32 %v2775_v49, %v2121_v50 }
 0x2c8   :  { %v2137_v19 = vadd.f32 %v2136_v7, %v14429_v17  ;;  %v2782_v61 = vpop.f32.mrf.mxu1  ;;  %3857 = vmatmul.mubr.f32.gmra.mxu1 %v14418_v22  ;;  %v14434_v22 = vld [vmem:[#allocation322_spill] sm:$0xff] }
 0x2c9   :  { %14427 = vst [vmem:[#allocation398_spill] sm:$0xff] %v11713_v54  ;;  %v2142_v36 = vpop.f32.mrf.mxu0  ;;  %v11720_v56 = vadd.f32 %v2782_v61, %v2127_v8  ;;  %3326 = vmatmul.mubr.f32.gmra.mxu0 %v14431_v35  ;;  %3862 = vmatprep.mubr.f32.mxu1 %v13686_v57  ;;  %v4925_v54 = vand.u32 4294901760, %v4924_v12 }
 0x2ca   :  { %v2143_v50 = vadd.f32 %v2142_v36, %v14432_v16  ;;  %v2784_v49 = vpop.f32.mrf.mxu1  ;;  %3331 = vmatprep.mubr.f32.mxu0 %v13686_v57  ;;  %v14437_v16 = vld [vmem:[#allocation324_spill] sm:$0xff] }
 0x2cb   :  { %14430 = vst [vmem:[#allocation323_spill] sm:$0xff] %v11720_v56  ;;  %v2144_v7 = vpop.f32.mrf.mxu0  ;;  %v11726_v17 = vadd.f32 %v2784_v49, %v2129_v18  ;;  %8292 = vmatprep.subr.mxu1 %v4925_v54 }
 0x2cc   :  { %v2145_v52 = vadd.f32 %v2144_v7, %v14434_v22  ;;  %v2791_v1 = vpop.f32.mrf.mxu1  ;;  %3864 = vmatmul.mubr.f32.gmra.mxu1 %v14424_v48  ;;  %v14439_v22 = vld [vmem:[#allocation326_spill] sm:$0xff] }
 0x2cd   :  { %14433 = vst [vmem:[#allocation320_spill] sm:$0xff] %v11726_v17  ;;  %v2150_v8 = vpop.f32.mrf.mxu0  ;;  %v11730_v61 = vadd.f32 %v2791_v1, %v2135_v32  ;;  %3333 = vmatmul.mubr.f32.gmra.mxu0 %v14436_v43  ;;  %3869 = vmatprep.mubr.f32.mxu1 %v13686_v57 }
 0x2ce   :  { %v2151_v36 = vadd.f32 %v2150_v8, %v14437_v16  ;;  %v2793_v56 = vpop.f32.mrf.mxu1  ;;  %3338 = vmatprep.mubr.f32.mxu0 %v13686_v57  ;;  %8293 = vmatpush3.msra.mxu1 %v4925_v54  ;;  %v14442_v8 = vld [vmem:[#allocation327_spill] sm:$0xff] }
 0x2cf   :  { %14435 = vst [vmem:[#allocation321_spill] sm:$0xff] %v11730_v61  ;;  %v2152_v18 = vpop.f32.mrf.mxu0  ;;  %v11736_v12 = vadd.f32 %v2793_v56, %v2137_v19  ;;  %8518 = vmatprep.subr.mxu1 %v10935_v15  ;;  %v14441_v61 = vld [vmem:[#allocation175_spill] sm:$0xff] }
 0x2d0   :  { %v2153_v49 = vadd.f32 %v2152_v18, %v14439_v22  ;;  %v2800_v7 = vpop.f32.mrf.mxu1  ;;  %3871 = vmatmul.mubr.f32.gmra.mxu1 %v14431_v35 }
 0x2d1   :  { %14438 = vst [vmem:[#allocation322_spill] sm:$0xff] %v11736_v12  ;;  %v2158_v1 = vpop.f32.mrf.mxu0  ;;  %v11741_v32 = vadd.f32 %v2800_v7, %v2143_v50  ;;  %3340 = vmatmul.mubr.f32.gmra.mxu0 %v14441_v61  ;;  %3876 = vmatprep.mubr.f32.mxu1 %v13686_v57  ;;  %v14444_v12 = vld [vmem:[#allocation328_spill] sm:$0xff] }
 0x2d2   :  { %v2159_v16 = vadd.f32 %v2158_v1, %v14442_v8  ;;  %v2802_v54 = vpop.f32.mrf.mxu1  ;;  %3345 = vmatprep.mubr.f32.mxu0 %v13686_v57  ;;  %v14446_v7 = vld [vmem:[#allocation176_spill] sm:$0xff] }
 0x2d3   :  { %14440 = vst [vmem:[#allocation324_spill] sm:$0xff] %v11741_v32  ;;  %v2160_v56 = vpop.f32.mrf.mxu0  ;;  %v11747_v19 = vadd.f32 %v2802_v54, %v2145_v52  ;;  %v14447_v32 = vld [vmem:[#allocation329_spill] sm:$0xff]  ;;  %v14449_v54 = vld [vmem:[#allocation330_spill] sm:$0xff] }
 0x2d4   :  { %v2161_v18 = vadd.f32 %v2160_v56, %v14444_v12  ;;  %v2809_v22 = vpop.f32.mrf.mxu1  ;;  %3878 = vmatmul.mubr.f32.gmra.mxu1 %v14436_v43 }
 0x2d5   :  { %14443 = vst [vmem:[#allocation326_spill] sm:$0xff] %v11747_v19  ;;  %v2166_v17 = vpop.f32.mrf.mxu0  ;;  %v11751_v50 = vadd.f32 %v2809_v22, %v2151_v36  ;;  %3347 = vmatmul.mubr.f32.gmra.mxu0 %v14446_v7  ;;  %3883 = vmatprep.mubr.f32.mxu1 %v13686_v57  ;;  %v14451_v22 = vld [vmem:[#allocation180_spill] sm:$0xff] }
 0x2d6   :  { %v2167_v1 = vadd.f32 %v2166_v17, %v14447_v32  ;;  %v2811_v8 = vpop.f32.mrf.mxu1  ;;  %3352 = vmatprep.mubr.f32.mxu0 %v13686_v57 }
 0x2d7   :  { %14445 = vst [vmem:[#allocation327_spill] sm:$0xff] %v11751_v50  ;;  %v2168_v35 = vpop.f32.mrf.mxu0  ;;  %v11757_v52 = vadd.f32 %v2811_v8, %v2153_v49  ;;  %v14452_v50 = vld [vmem:[#allocation331_spill] sm:$0xff]  ;;  %v14454_v8 = vld [vmem:[#allocation332_spill] sm:$0xff] }
 0x2d8   :  { %v2169_v12 = vadd.f32 %v2168_v35, %v14449_v54  ;;  %v2818_v56 = vpop.f32.mrf.mxu1  ;;  %3885 = vmatmul.mubr.f32.gmra.mxu1 %v14441_v61 }
 0x2d9   :  { %14448 = vst [vmem:[#allocation328_spill] sm:$0xff] %v11757_v52  ;;  %v2174_v19 = vpop.f32.mrf.mxu0  ;;  %v11761_v36 = vadd.f32 %v2818_v56, %v2159_v16  ;;  %3354 = vmatmul.mubr.f32.gmra.mxu0 %v14451_v22  ;;  %3890 = vmatprep.mubr.f32.mxu1 %v13686_v57  ;;  %v14456_v56 = vld [vmem:[#allocation187_spill] sm:$0xff] }
 0x2da   :  { %v2175_v17 = vadd.f32 %v2174_v19, %v14452_v50  ;;  %v2820_v32 = vpop.f32.mrf.mxu1  ;;  %3359 = vmatprep.mubr.f32.mxu0 %v13686_v57 }
 0x2db   :  { %14450 = vst [vmem:[#allocation329_spill] sm:$0xff] %v11761_v36  ;;  %v2176_v43 = vpop.f32.mrf.mxu0  ;;  %v11767_v49 = vadd.f32 %v2820_v32, %v2161_v18  ;;  %v14457_v36 = vld [vmem:[#allocation333_spill] sm:$0xff]  ;;  %v14459_v32 = vld [vmem:[#allocation334_spill] sm:$0xff] }
 0x2dc   :  { %v2177_v35 = vadd.f32 %v2176_v43, %v14454_v8  ;;  %v2827_v54 = vpop.f32.mrf.mxu1  ;;  %3892 = vmatmul.mubr.f32.gmra.mxu1 %v14446_v7 }
 0x2dd   :  { %14453 = vst [vmem:[#allocation330_spill] sm:$0xff] %v11767_v49  ;;  %v2182_v52 = vpop.f32.mrf.mxu0  ;;  %v11771_v16 = vadd.f32 %v2827_v54, %v2167_v1  ;;  %3361 = vmatmul.mubr.f32.gmra.mxu0 %v14456_v56  ;;  %3897 = vmatprep.mubr.f32.mxu1 %v13686_v57  ;;  %v14461_v54 = vld [vmem:[#allocation191_spill] sm:$0xff] }
 0x2de   :  { %v2183_v19 = vadd.f32 %v2182_v52, %v14457_v36  ;;  %v2829_v50 = vpop.f32.mrf.mxu1  ;;  %3366 = vmatprep.mubr.f32.mxu0 %v13686_v57 }
 0x2df   :  { %14455 = vst [vmem:[#allocation331_spill] sm:$0xff] %v11771_v16  ;;  %v2184_v61 = vpop.f32.mrf.mxu0  ;;  %v11777_v18 = vadd.f32 %v2829_v50, %v2169_v12  ;;  %v14462_v16 = vld [vmem:[#allocation335_spill] sm:$0xff]  ;;  %v14464_v50 = vld [vmem:[#allocation336_spill] sm:$0xff] }
 0x2e0   :  { %v2185_v43 = vadd.f32 %v2184_v61, %v14459_v32  ;;  %v2836_v8 = vpop.f32.mrf.mxu1  ;;  %3899 = vmatmul.mubr.f32.gmra.mxu1 %v14451_v22 }
 0x2e1   :  { %14458 = vst [vmem:[#allocation332_spill] sm:$0xff] %v11777_v18  ;;  %v2190_v49 = vpop.f32.mrf.mxu0  ;;  %v11781_v1 = vadd.f32 %v2836_v8, %v2175_v17  ;;  %3368 = vmatmul.mubr.f32.gmra.mxu0 %v14461_v54  ;;  %3904 = vmatprep.mubr.f32.mxu1 %v13686_v57  ;;  %v14466_v8 = vld [vmem:[#allocation192_spill] sm:$0xff] }
 0x2e2   :  { %v2191_v52 = vadd.f32 %v2190_v49, %v14462_v16  ;;  %v2838_v36 = vpop.f32.mrf.mxu1  ;;  %3373 = vmatprep.mubr.f32.mxu0 %v13686_v57 }
 0x2e3   :  { %14460 = vst [vmem:[#allocation333_spill] sm:$0xff] %v11781_v1  ;;  %v2192_v7 = vpop.f32.mrf.mxu0  ;;  %v11787_v12 = vadd.f32 %v2838_v36, %v2177_v35  ;;  %v14467_v1 = vld [vmem:[#allocation337_spill] sm:$0xff]  ;;  %v14469_v36 = vld [vmem:[#allocation338_spill] sm:$0xff] }
 0x2e4   :  { %v2193_v61 = vadd.f32 %v2192_v7, %v14464_v50  ;;  %v2845_v32 = vpop.f32.mrf.mxu1  ;;  %3906 = vmatmul.mubr.f32.gmra.mxu1 %v14456_v56 }
 0x2e5   :  { %14463 = vst [vmem:[#allocation334_spill] sm:$0xff] %v11787_v12  ;;  %v2198_v18 = vpop.f32.mrf.mxu0  ;;  %v11791_v17 = vadd.f32 %v2845_v32, %v2183_v19  ;;  %3375 = vmatmul.mubr.f32.gmra.mxu0 %v14466_v8  ;;  %3911 = vmatprep.mubr.f32.mxu1 %v13686_v57  ;;  %v14471_v32 = vld [vmem:[#allocation196_spill] sm:$0xff] }
 0x2e6   :  { %v2199_v49 = vadd.f32 %v2198_v18, %v14467_v1  ;;  %v2847_v16 = vpop.f32.mrf.mxu1  ;;  %3380 = vmatprep.mubr.f32.mxu0 %v13686_v57 }
 0x2e7   :  { %14465 = vst [vmem:[#allocation335_spill] sm:$0xff] %v11791_v17  ;;  %v2200_v22 = vpop.f32.mrf.mxu0  ;;  %v11797_v35 = vadd.f32 %v2847_v16, %v2185_v43  ;;  %v14472_v17 = vld [vmem:[#allocation339_spill] sm:$0xff]  ;;  %v14474_v16 = vld [vmem:[#allocation340_spill] sm:$0xff] }
 0x2e8   :  { %v2201_v7 = vadd.f32 %v2200_v22, %v14469_v36  ;;  %v2854_v50 = vpop.f32.mrf.mxu1  ;;  %3913 = vmatmul.mubr.f32.gmra.mxu1 %v14461_v54 }
 0x2e9   :  { %14468 = vst [vmem:[#allocation336_spill] sm:$0xff] %v11797_v35  ;;  %v2206_v12 = vpop.f32.mrf.mxu0  ;;  %v11801_v19 = vadd.f32 %v2854_v50, %v2191_v52  ;;  %3382 = vmatmul.mubr.f32.gmra.mxu0 %v14471_v32  ;;  %3918 = vmatprep.mubr.f32.mxu1 %v13686_v57  ;;  %v14476_v50 = vld [vmem:[#allocation200_spill] sm:$0xff] }
 0x2ea   :  { %v2207_v18 = vadd.f32 %v2206_v12, %v14472_v17  ;;  %v2856_v1 = vpop.f32.mrf.mxu1  ;;  %3387 = vmatprep.mubr.f32.mxu0 %v13686_v57 }
 0x2eb   :  { %14470 = vst [vmem:[#allocation337_spill] sm:$0xff] %v11801_v19  ;;  %v2208_v56 = vpop.f32.mrf.mxu0  ;;  %v11807_v43 = vadd.f32 %v2856_v1, %v2193_v61  ;;  %v14477_v19 = vld [vmem:[#allocation341_spill] sm:$0xff]  ;;  %v14479_v1 = vld [vmem:[#allocation342_spill] sm:$0xff] }
 0x2ec   :  { %v2209_v22 = vadd.f32 %v2208_v56, %v14474_v16  ;;  %v2863_v36 = vpop.f32.mrf.mxu1  ;;  %3920 = vmatmul.mubr.f32.gmra.mxu1 %v14466_v8 }
 0x2ed   :  { %14473 = vst [vmem:[#allocation338_spill] sm:$0xff] %v11807_v43  ;;  %v2214_v35 = vpop.f32.mrf.mxu0  ;;  %v11811_v52 = vadd.f32 %v2863_v36, %v2199_v49  ;;  %3389 = vmatmul.mubr.f32.gmra.mxu0 %v14476_v50  ;;  %3925 = vmatprep.mubr.f32.mxu1 %v13686_v57  ;;  %v14481_v36 = vld [vmem:[#allocation207_spill] sm:$0xff] }
 0x2ee   :  { %v2215_v12 = vadd.f32 %v2214_v35, %v14477_v19  ;;  %v2865_v17 = vpop.f32.mrf.mxu1  ;;  %3394 = vmatprep.mubr.f32.mxu0 %v13686_v57 }
 0x2ef   :  { %14475 = vst [vmem:[#allocation339_spill] sm:$0xff] %v11811_v52  ;;  %v2216_v54 = vpop.f32.mrf.mxu0  ;;  %v11817_v61 = vadd.f32 %v2865_v17, %v2201_v7  ;;  %v14482_v52 = vld [vmem:[#allocation343_spill] sm:$0xff]  ;;  %v14484_v17 = vld [vmem:[#allocation344_spill] sm:$0xff] }
 0x2f0   :  { %v2217_v56 = vadd.f32 %v2216_v54, %v14479_v1  ;;  %v2872_v16 = vpop.f32.mrf.mxu1  ;;  %3927 = vmatmul.mubr.f32.gmra.mxu1 %v14471_v32 }
 0x2f1   :  { %14478 = vst [vmem:[#allocation340_spill] sm:$0xff] %v11817_v61  ;;  %v2222_v43 = vpop.f32.mrf.mxu0  ;;  %v11821_v49 = vadd.f32 %v2872_v16, %v2207_v18  ;;  %3396 = vmatmul.mubr.f32.gmra.mxu0 %v14481_v36  ;;  %3932 = vmatprep.mubr.f32.mxu1 %v13686_v57  ;;  %v14486_v16 = vld [vmem:[#allocation208_spill] sm:$0xff] }
 0x2f2   :  { %v2223_v35 = vadd.f32 %v2222_v43, %v14482_v52  ;;  %v2874_v19 = vpop.f32.mrf.mxu1  ;;  %3401 = vmatprep.mubr.f32.mxu0 %v13686_v57 }
 0x2f3   :  { %14480 = vst [vmem:[#allocation341_spill] sm:$0xff] %v11821_v49  ;;  %v2224_v8 = vpop.f32.mrf.mxu0  ;;  %v11827_v7 = vadd.f32 %v2874_v19, %v2209_v22  ;;  %v14487_v49 = vld [vmem:[#allocation345_spill] sm:$0xff]  ;;  %v14489_v19 = vld [vmem:[#allocation346_spill] sm:$0xff] }
 0x2f4   :  { %v2225_v54 = vadd.f32 %v2224_v8, %v14484_v17  ;;  %v2881_v1 = vpop.f32.mrf.mxu1  ;;  %3934 = vmatmul.mubr.f32.gmra.mxu1 %v14476_v50 }
 0x2f5   :  { %14483 = vst [vmem:[#allocation342_spill] sm:$0xff] %v11827_v7  ;;  %v2230_v61 = vpop.f32.mrf.mxu0  ;;  %v11831_v18 = vadd.f32 %v2881_v1, %v2215_v12  ;;  %3403 = vmatmul.mubr.f32.gmra.mxu0 %v14486_v16  ;;  %3939 = vmatprep.mubr.f32.mxu1 %v13686_v57  ;;  %v14491_v1 = vld [vmem:[#allocation212_spill] sm:$0xff] }
 0x2f6   :  { %v2231_v43 = vadd.f32 %v2230_v61, %v14487_v49  ;;  %v2883_v52 = vpop.f32.mrf.mxu1  ;;  %3408 = vmatprep.mubr.f32.mxu0 %v13686_v57 }
 0x2f7   :  { %14485 = vst [vmem:[#allocation343_spill] sm:$0xff] %v11831_v18  ;;  %v2232_v32 = vpop.f32.mrf.mxu0  ;;  %v11837_v22 = vadd.f32 %v2883_v52, %v2217_v56  ;;  %v14492_v18 = vld [vmem:[#allocation347_spill] sm:$0xff]  ;;  %v14494_v52 = vld [vmem:[#allocation348_spill] sm:$0xff] }
 0x2f8   :  { %v2233_v8 = vadd.f32 %v2232_v32, %v14489_v19  ;;  %v2890_v17 = vpop.f32.mrf.mxu1  ;;  %3941 = vmatmul.mubr.f32.gmra.mxu1 %v14481_v36 }
 0x2f9   :  { %14488 = vst [vmem:[#allocation344_spill] sm:$0xff] %v11837_v22  ;;  %v2238_v7 = vpop.f32.mrf.mxu0  ;;  %v11841_v12 = vadd.f32 %v2890_v17, %v2223_v35  ;;  %3410 = vmatmul.mubr.f32.gmra.mxu0 %v14491_v1  ;;  %3946 = vmatprep.mubr.f32.mxu1 %v13686_v57  ;;  %v14496_v17 = vld [vmem:[#allocation219_spill] sm:$0xff] }
 0x2fa   :  { %v2239_v61 = vadd.f32 %v2238_v7, %v14492_v18  ;;  %v2892_v49 = vpop.f32.mrf.mxu1  ;;  %3415 = vmatprep.mubr.f32.mxu0 %v13686_v57 }
 0x2fb   :  { %14490 = vst [vmem:[#allocation345_spill] sm:$0xff] %v11841_v12  ;;  %v2240_v50 = vpop.f32.mrf.mxu0  ;;  %v11847_v56 = vadd.f32 %v2892_v49, %v2225_v54  ;;  %v14497_v12 = vld [vmem:[#allocation349_spill] sm:$0xff]  ;;  %v14499_v49 = vld [vmem:[#allocation350_spill] sm:$0xff] }
 0x2fc   :  { %v2241_v32 = vadd.f32 %v2240_v50, %v14494_v52  ;;  %v2899_v19 = vpop.f32.mrf.mxu1  ;;  %3948 = vmatmul.mubr.f32.gmra.mxu1 %v14486_v16 }
 0x2fd   :  { %14493 = vst [vmem:[#allocation346_spill] sm:$0xff] %v11847_v56  ;;  %v2246_v22 = vpop.f32.mrf.mxu0  ;;  %v11851_v35 = vadd.f32 %v2899_v19, %v2231_v43  ;;  %3417 = vmatmul.mubr.f32.gmra.mxu0 %v14496_v17  ;;  %3953 = vmatprep.mubr.f32.mxu1 %v13686_v57  ;;  %v14501_v19 = vld [vmem:[#allocation223_spill] sm:$0xff] }
 0x2fe   :  { %v2247_v7 = vadd.f32 %v2246_v22, %v14497_v12  ;;  %v2901_v18 = vpop.f32.mrf.mxu1  ;;  %3422 = vmatprep.mubr.f32.mxu0 %v13686_v57 }
 0x2ff   :  { %14495 = vst [vmem:[#allocation347_spill] sm:$0xff] %v11851_v35  ;;  %v2248_v36 = vpop.f32.mrf.mxu0  ;;  %v11857_v54 = vadd.f32 %v2901_v18, %v2233_v8  ;;  %v14502_v35 = vld [vmem:[#allocation351_spill] sm:$0xff]  ;;  %v14504_v18 = vld [vmem:[#allocation258_spill] sm:$0xff] }
 0x300   :  { %v2249_v50 = vadd.f32 %v2248_v36, %v14499_v49  ;;  %v2908_v52 = vpop.f32.mrf.mxu1  ;;  %3955 = vmatmul.mubr.f32.gmra.mxu1 %v14491_v1 }
 0x301   :  { %14498 = vst [vmem:[#allocation348_spill] sm:$0xff] %v11857_v54  ;;  %v2254_v56 = vpop.f32.mrf.mxu0  ;;  %v11861_v43 = vadd.f32 %v2908_v52, %v2239_v61  ;;  %3424 = vmatmul.mubr.f32.gmra.mxu0 %v14501_v19  ;;  %3960 = vmatprep.mubr.f32.mxu1 %v13686_v57  ;;  %v14506_v52 = vld [vmem:[#allocation224_spill] sm:$0xff] }
 0x302   :  { %v2255_v22 = vadd.f32 %v2254_v56, %v14502_v35  ;;  %v2910_v12 = vpop.f32.mrf.mxu1  ;;  %3429 = vmatprep.mubr.f32.mxu0 %v13686_v57 }
 0x303   :  { %14500 = vst [vmem:[#allocation349_spill] sm:$0xff] %v11861_v43  ;;  %v2256_v16 = vpop.f32.mrf.mxu0  ;;  %v11867_v8 = vadd.f32 %v2910_v12, %v2241_v32  ;;  %v14507_v43 = vld [vmem:[#allocation261_spill] sm:$0xff]  ;;  %v14509_v12 = vld [vmem:[#allocation264_spill] sm:$0xff] }
 0x304   :  { %v2257_v36 = vadd.f32 %v2256_v16, %v14504_v18  ;;  %v2917_v49 = vpop.f32.mrf.mxu1  ;;  %3962 = vmatmul.mubr.f32.gmra.mxu1 %v14496_v17  ;;  %v14519_v17 = vld [vmem:[#allocation273_spill] sm:$0xff] }
 0x305   :  { %14503 = vst [vmem:[#allocation350_spill] sm:$0xff] %v11867_v8  ;;  %v2262_v54 = vpop.f32.mrf.mxu0  ;;  %v11871_v61 = vadd.f32 %v2917_v49, %v2247_v7  ;;  %3431 = vmatmul.mubr.f32.gmra.mxu0 %v14506_v52  ;;  %3967 = vmatprep.mubr.f32.mxu1 %v13686_v57  ;;  %v14511_v49 = vld [vmem:[#allocation228_spill] sm:$0xff] }
 0x306   :  { %v2263_v56 = vadd.f32 %v2262_v54, %v14507_v43  ;;  %v2919_v35 = vpop.f32.mrf.mxu1  ;;  %3436 = vmatprep.mubr.f32.mxu0 %v13686_v57 }
 0x307   :  { %14505 = vst [vmem:[#allocation351_spill] sm:$0xff] %v11871_v61  ;;  %v2264_v1 = vpop.f32.mrf.mxu0  ;;  %v11877_v32 = vadd.f32 %v2919_v35, %v2249_v50 }
 0x308   :  { %v2265_v16 = vadd.f32 %v2264_v1, %v14509_v12  ;;  %v2926_v18 = vpop.f32.mrf.mxu1  ;;  %3969 = vmatmul.mubr.f32.gmra.mxu1 %v14501_v19  ;;  %v14514_v12 = vld [vmem:[#allocation232_spill] sm:$0xff] }
 0x309   :  { %14508 = vst [vmem:[#allocation258_spill] sm:$0xff] %v11877_v32  ;;  %v11881_v8 = vadd.f32 %v2926_v18, %v2255_v22  ;;  %v3103_v7 = vpop.f32.mrf.mxu0  ;;  %3438 = vmatmul.mubr.f32.gmra.mxu0 %v14511_v49  ;;  %3974 = vmatprep.mubr.f32.mxu1 %v13686_v57  ;;  %v14515_v18 = vld [vmem:[#allocation267_spill] sm:$0xff] }
 0x30a   :  { %v2928_v61 = vpop.f32.mrf.mxu1  ;;  %3443 = vmatprep.mubr.f32.mxu0 %v13686_v57 }
 0x30b   :  { %14510 = vst [vmem:[#allocation261_spill] sm:$0xff] %v11881_v8  ;;  %v11886_v54 = vadd.f32 %v2928_v61, %v2257_v36  ;;  %v3105_v43 = vpop.f32.mrf.mxu0  ;;  %v3104_v8 = vadd.f32 %v3103_v7, %v14515_v18  ;;  %v14520_v18 = vld [vmem:[#allocation275_spill] sm:$0xff] }
 0x30c   :  { %v2935_v50 = vpop.f32.mrf.mxu1  ;;  %3976 = vmatmul.mubr.f32.gmra.mxu1 %v14506_v52 }
 0x30d   :  { %14512 = vst [vmem:[#allocation264_spill] sm:$0xff] %v11886_v54  ;;  %v11889_v1 = vadd.f32 %v2935_v50, %v2263_v56  ;;  %v3110_v35 = vpop.f32.mrf.mxu0  ;;  %3445 = vmatmul.mubr.f32.gmra.mxu0 %v14514_v12  ;;  %3981 = vmatprep.mubr.f32.mxu1 %v13686_v57  ;;  %v14517_v54 = vld [vmem:[#allocation269_spill] sm:$0xff]  ;;  %v14518_v50 = vld [vmem:[#allocation239_spill] sm:$0xff] }
 0x30e   :  { %v2937_v22 = vpop.f32.mrf.mxu1  ;;  %3450 = vmatprep.mubr.f32.mxu0 %v13686_v57  ;;  %v3106_v52 = vadd.f32 %v3105_v43, %v14517_v54  ;;  %v3111_v48 = vadd.f32 %v3110_v35, %v14519_v17  ;;  %v14521_v43 = vld [vmem:[#allocation243_spill] sm:$0xff]  ;;  %v14523_v35 = vld [vmem:[#allocation282_spill] sm:$0xff] }
 0x30f   :  { %14513 = vst [vmem:[#allocation399_spill] sm:$0xff] %v11889_v1  ;;  %v11895_v32 = vadd.f32 %v2937_v22, %v2265_v16  ;;  %v3112_v36 = vpop.f32.mrf.mxu0 }
 0x310   :  { %v3648_v61 = vpop.f32.mrf.mxu1  ;;  %3983 = vmatmul.mubr.f32.gmra.mxu1 %v14511_v49  ;;  %v14522_v49 = vld [vmem:[#allocation279_spill] sm:$0xff] }
 0x311   :  { %14516 = vst [vmem:[#allocation232_spill] sm:$0xff] %v11895_v32  ;;  %v3117_v56 = vpop.f32.mrf.mxu0  ;;  %3452 = vmatmul.mubr.f32.gmra.mxu0 %v14518_v50  ;;  %v3649_v1 = vadd.f32 %v3648_v61, %v3104_v8  ;;  %3988 = vmatprep.mubr.f32.mxu1 %v13686_v57  ;;  %v3113_v32 = vadd.f32 %v3112_v36, %v14520_v18  ;;  %v14524_v18 = vld [vmem:[#allocation247_spill] sm:$0xff] }
 0x312   :  { %v3650_v19 = vpop.f32.mrf.mxu1  ;;  %3457 = vmatprep.mubr.f32.mxu0 %v13686_v57  ;;  %v3118_v17 = vadd.f32 %v3117_v56, %v14522_v49 }
 0x313   :  { %7444 = vst [vmem:[#allocation7] sm:$0xff] %v3649_v1  ;;  %v3119_v16 = vpop.f32.mrf.mxu0  ;;  %v3651_v7 = vadd.f32 %v3650_v19, %v3106_v52 }
 0x314   :  { %v3655_v22 = vpop.f32.mrf.mxu1  ;;  %3990 = vmatmul.mubr.f32.gmra.mxu1 %v14514_v12  ;;  %v3120_v36 = vadd.f32 %v3119_v16, %v14523_v35  ;;  %v14526_v35 = vld [vmem:[#allocation251_spill] sm:$0xff] }
 0x315   :  { %7445 = vst [vmem:[#allocation7 + $0x8] sm:$0xff] %v3651_v7  ;;  %v3124_v54 = vpop.f32.mrf.mxu0  ;;  %3459 = vmatmul.mubr.f32.gmra.mxu0 %v14521_v43  ;;  %v3656_v8 = vadd.f32 %v3655_v22, %v3111_v48  ;;  %3995 = vmatprep.mubr.f32.mxu1 %v13686_v57 }
 0x316   :  { %v3657_v61 = vpop.f32.mrf.mxu1  ;;  %3464 = vmatprep.mubr.f32.mxu0 %v13686_v57  ;;  %v3125_v49 = vadd.f32 %v3124_v54, %v11108_v5 }
 0x317   :  { %7447 = vst [vmem:[#allocation7 + $0x18] sm:$0xff] %v3656_v8  ;;  %v3126_v1 = vpop.f32.mrf.mxu0  ;;  %v3658_v19 = vadd.f32 %v3657_v61, %v3113_v32  ;;  %v14525_v61 = vld [vmem:[#allocation285_spill] sm:$0xff] }
 0x318   :  { %v3662_v52 = vpop.f32.mrf.mxu1  ;;  %3997 = vmatmul.mubr.f32.gmra.mxu1 %v14518_v50  ;;  %v3127_v16 = vadd.f32 %v3126_v1, %v14525_v61 }
 0x319   :  { %7448 = vst [vmem:[#allocation7 + $0x20] sm:$0xff] %v3658_v19  ;;  %v3131_v7 = vpop.f32.mrf.mxu0  ;;  %3466 = vmatmul.mubr.f32.gmra.mxu0 %v14524_v18  ;;  %v3663_v48 = vadd.f32 %v3662_v52, %v3118_v17  ;;  %4002 = vmatprep.mubr.f32.mxu1 %v13686_v57 }
 0x31a   :  { %v3664_v22 = vpop.f32.mrf.mxu1  ;;  %3471 = vmatprep.mubr.f32.mxu0 %v13686_v57  ;;  %v3132_v5 = vadd.f32 %v3131_v7, %v11118_v24 }
 0x31b   :  { %7450 = vst [vmem:[#allocation7 + $0x30] sm:$0xff] %v3663_v48  ;;  %v3133_v56 = vpop.f32.mrf.mxu0  ;;  %v3665_v32 = vadd.f32 %v3664_v22, %v3120_v36 }
 0x31c   :  { %v3669_v8 = vpop.f32.mrf.mxu1  ;;  %4004 = vmatmul.mubr.f32.gmra.mxu1 %v14521_v43  ;;  %v3134_v1 = vadd.f32 %v3133_v56, %v11123_v25 }
 0x31d   :  { %7451 = vst [vmem:[#allocation7 + $0x38] sm:$0xff] %v3665_v32  ;;  %v3138_v19 = vpop.f32.mrf.mxu0  ;;  %3473 = vmatmul.mubr.f32.gmra.mxu0 %v14526_v35  ;;  %v3670_v17 = vadd.f32 %v3669_v8, %v3125_v49  ;;  %4009 = vmatprep.mubr.f32.mxu1 %v13686_v57  ;;  %v14527_v32 = vld [vmem:[#allocation252_spill] sm:$0xff] }
 0x31e   :  { %v3671_v52 = vpop.f32.mrf.mxu1  ;;  %3478 = vmatprep.mubr.f32.mxu0 %v13686_v57  ;;  %v3139_v24 = vadd.f32 %v3138_v19, %v11128_v47 }
 0x31f   :  { %7453 = vst [vmem:[#allocation7 + $0x48] sm:$0xff] %v3670_v17  ;;  %v3140_v54 = vpop.f32.mrf.mxu0  ;;  %v3672_v36 = vadd.f32 %v3671_v52, %v3127_v16  ;;  %v14528_v17 = vld [vmem:[#allocation288_spill] sm:$0xff]  ;;  %v14529_v52 = vld [vmem:[#allocation257_spill] sm:$0xff] }
 0x320   :  { %v3676_v48 = vpop.f32.mrf.mxu1  ;;  %4011 = vmatmul.mubr.f32.gmra.mxu1 %v14524_v18  ;;  %v3141_v25 = vadd.f32 %v3140_v54, %v14528_v17 }
 0x321   :  { %7454 = vst [vmem:[#allocation7 + $0x50] sm:$0xff] %v3672_v36  ;;  %v3145_v22 = vpop.f32.mrf.mxu0  ;;  %3480 = vmatmul.mubr.f32.gmra.mxu0 %v14527_v32  ;;  %v3677_v49 = vadd.f32 %v3676_v48, %v3132_v5  ;;  %4016 = vmatprep.mubr.f32.mxu1 %v13686_v57 }
 0x322   :  { %v3678_v8 = vpop.f32.mrf.mxu1  ;;  %3485 = vmatprep.mubr.f32.mxu0 %v13686_v57  ;;  %v3146_v47 = vadd.f32 %v3145_v22, %v11138_v2 }
 0x323   :  { %7456 = vst [vmem:[#allocation7 + $0x60] sm:$0xff] %v3677_v49  ;;  %v3147_v7 = vpop.f32.mrf.mxu0  ;;  %v3679_v61 = vadd.f32 %v3678_v8, %v3134_v1  ;;  %v14530_v49 = vld [vmem:[#allocation291_spill] sm:$0xff] }
 0x324   :  { %v3683_v16 = vpop.f32.mrf.mxu1  ;;  %4018 = vmatmul.mubr.f32.gmra.mxu1 %v14526_v35  ;;  %v3148_v54 = vadd.f32 %v3147_v7, %v14530_v49 }
 0x325   :  { %7457 = vst [vmem:[#allocation7 + $0x68] sm:$0xff] %v3679_v61  ;;  %v3152_v56 = vpop.f32.mrf.mxu0  ;;  %3487 = vmatmul.mubr.f32.gmra.mxu0 %v14529_v52  ;;  %v3684_v5 = vadd.f32 %v3683_v16, %v3139_v24  ;;  %4023 = vmatprep.mubr.f32.mxu1 %v13686_v57  ;;  %v14531_v61 = vld [vmem:[#allocation266_spill] sm:$0xff] }
 0x326   :  { %v3685_v36 = vpop.f32.mrf.mxu1  ;;  %3492 = vmatprep.mubr.f32.mxu0 %v13686_v57  ;;  %v3153_v2 = vadd.f32 %v3152_v56, %v11148_v14 }
 0x327   :  { %7459 = vst [vmem:[#allocation7 + $0x78] sm:$0xff] %v3684_v5  ;;  %v3154_v19 = vpop.f32.mrf.mxu0  ;;  %v3686_v48 = vadd.f32 %v3685_v36, %v3141_v25  ;;  %v14532_v36 = vld [vmem:[#allocation272_spill] sm:$0xff] }
 0x328   :  { %v3690_v1 = vpop.f32.mrf.mxu1  ;;  %4025 = vmatmul.mubr.f32.gmra.mxu1 %v14527_v32  ;;  %v3155_v7 = vadd.f32 %v3154_v19, %v11153_v51 }
 0x329   :  { %7460 = vst [vmem:[#allocation7 + $0x80] sm:$0xff] %v3686_v48  ;;  %v3159_v8 = vpop.f32.mrf.mxu0  ;;  %3494 = vmatmul.mubr.f32.gmra.mxu0 %v14531_v61  ;;  %v3691_v24 = vadd.f32 %v3690_v1, %v3146_v47  ;;  %4030 = vmatprep.mubr.f32.mxu1 %v13686_v57 }
 0x32a   :  { %v3692_v16 = vpop.f32.mrf.mxu1  ;;  %3499 = vmatprep.mubr.f32.mxu0 %v13686_v57  ;;  %v3160_v14 = vadd.f32 %v3159_v8, %v11158_v0 }
 0x32b   :  { %7462 = vst [vmem:[#allocation7 + $0x90] sm:$0xff] %v3691_v24  ;;  %v3161_v22 = vpop.f32.mrf.mxu0  ;;  %v3693_v17 = vadd.f32 %v3692_v16, %v3148_v54  ;;  %v14533_v54 = vld [vmem:[#allocation278_spill] sm:$0xff] }
 0x32c   :  { %v3697_v25 = vpop.f32.mrf.mxu1  ;;  %4032 = vmatmul.mubr.f32.gmra.mxu1 %v14529_v52  ;;  %v3162_v51 = vadd.f32 %v3161_v22, %v11163_v38 }
 0x32d   :  { %7463 = vst [vmem:[#allocation7 + $0x98] sm:$0xff] %v3693_v17  ;;  %v3166_v5 = vpop.f32.mrf.mxu0  ;;  %3501 = vmatmul.mubr.f32.gmra.mxu0 %v14532_v36  ;;  %v3698_v47 = vadd.f32 %v3697_v25, %v3153_v2  ;;  %4037 = vmatprep.mubr.f32.mxu1 %v13686_v57  ;;  %v14534_v25 = vld [vmem:[#allocation281_spill] sm:$0xff] }
 0x32e   :  { %v3699_v48 = vpop.f32.mrf.mxu1  ;;  %3506 = vmatprep.mubr.f32.mxu0 %v13686_v57  ;;  %v3167_v0 = vadd.f32 %v3166_v5, %v11168_v30 }
 0x32f   :  { %7465 = vst [vmem:[#allocation7 + $0xa8] sm:$0xff] %v3698_v47  ;;  %v3168_v56 = vpop.f32.mrf.mxu0  ;;  %v3700_v1 = vadd.f32 %v3699_v48, %v3155_v7 }
 0x330   :  { %v3704_v49 = vpop.f32.mrf.mxu1  ;;  %4039 = vmatmul.mubr.f32.gmra.mxu1 %v14531_v61  ;;  %v3169_v38 = vadd.f32 %v3168_v56, %v11173_v21 }
 0x331   :  { %7466 = vst [vmem:[#allocation7 + $0xb0] sm:$0xff] %v3700_v1  ;;  %v3173_v19 = vpop.f32.mrf.mxu0  ;;  %3508 = vmatmul.mubr.f32.gmra.mxu0 %v14533_v54  ;;  %v3705_v24 = vadd.f32 %v3704_v49, %v3160_v14  ;;  %4044 = vmatprep.mubr.f32.mxu1 %v13686_v57  ;;  %v14535_v1 = vld [vmem:[#allocation296_spill] sm:$0xff]  ;;  %v14536_v49 = vld [vmem:[#allocation287_spill] sm:$0xff] }
 0x332   :  { %v3706_v16 = vpop.f32.mrf.mxu1  ;;  %3513 = vmatprep.mubr.f32.mxu0 %v13686_v57  ;;  %v3174_v30 = vadd.f32 %v3173_v19, %v11178_v40 }
 0x333   :  { %7468 = vst [vmem:[#allocation7 + $0xc0] sm:$0xff] %v3705_v24  ;;  %v3175_v8 = vpop.f32.mrf.mxu0  ;;  %v3707_v2 = vadd.f32 %v3706_v16, %v3162_v51  ;;  %v14537_v16 = vld [vmem:[#allocation302_spill] sm:$0xff] }
 0x334   :  { %v3711_v17 = vpop.f32.mrf.mxu1  ;;  %4046 = vmatmul.mubr.f32.gmra.mxu1 %v14532_v36  ;;  %v3176_v21 = vadd.f32 %v3175_v8, %v14535_v1 }
 0x335   :  { %7469 = vst [vmem:[#allocation7 + $0xc8] sm:$0xff] %v3707_v2  ;;  %v3180_v22 = vpop.f32.mrf.mxu0  ;;  %3515 = vmatmul.mubr.f32.gmra.mxu0 %v14534_v25  ;;  %v3712_v7 = vadd.f32 %v3711_v17, %v3167_v0  ;;  %4051 = vmatprep.mubr.f32.mxu1 %v13686_v57  ;;  %v14538_v17 = vld [vmem:[#allocation352_spill] sm:$0xff] }
 0x336   :  { %v3713_v47 = vpop.f32.mrf.mxu1  ;;  %3520 = vmatprep.mubr.f32.mxu0 %v13686_v57  ;;  %v3181_v40 = vadd.f32 %v3180_v22, %v14537_v16  ;;  %v14542_v16 = vld [vmem:[#allocation300_spill] sm:$0xff] }
 0x337   :  { %7471 = vst [vmem:[#allocation7 + $0xd8] sm:$0xff] %v3712_v7  ;;  %v3182_v5 = vpop.f32.mrf.mxu0  ;;  %v3714_v48 = vadd.f32 %v3713_v47, %v3169_v38  ;;  %v14539_v7 = vld [vmem:[#allocation295_spill] sm:$0xff] }
 0x338   :  { %v3718_v14 = vpop.f32.mrf.mxu1  ;;  %4053 = vmatmul.mubr.f32.gmra.mxu1 %v14533_v54  ;;  %v3183_v8 = vadd.f32 %v3182_v5, %v14538_v17 }
 0x339   :  { %7472 = vst [vmem:[#allocation7 + $0xe0] sm:$0xff] %v3714_v48  ;;  %v3187_v56 = vpop.f32.mrf.mxu0  ;;  %3522 = vmatmul.mubr.f32.gmra.mxu0 %v14536_v49  ;;  %v3719_v51 = vadd.f32 %v3718_v14, %v3174_v30  ;;  %4058 = vmatprep.mubr.f32.mxu1 %v13686_v57  ;;  %v14540_v48 = vld [vmem:[#allocation353_spill] sm:$0xff] }
 0x33a   :  { %v3720_v24 = vpop.f32.mrf.mxu1  ;;  %3527 = vmatprep.mubr.f32.mxu0 %v13686_v57  ;;  %v3188_v22 = vadd.f32 %v3187_v56, %v14540_v48 }
 0x33b   :  { %7474 = vst [vmem:[#allocation7 + $0xf0] sm:$0xff] %v3719_v51  ;;  %v3189_v19 = vpop.f32.mrf.mxu0  ;;  %v3721_v0 = vadd.f32 %v3720_v24, %v3176_v21  ;;  %v14541_v51 = vld [vmem:[#allocation354_spill] sm:$0xff] }
 0x33c   :  { %v3725_v2 = vpop.f32.mrf.mxu1  ;;  %4060 = vmatmul.mubr.f32.gmra.mxu1 %v14534_v25  ;;  %v3190_v5 = vadd.f32 %v3189_v19, %v14541_v51  ;;  %v14546_v51 = vld [vmem:[#allocation48_spill] sm:$0xff] }
 0x33d   :  { %7475 = vst [vmem:[#allocation7 + $0xf8] sm:$0xff] %v3721_v0  ;;  %v3194_v38 = vpop.f32.mrf.mxu0  ;;  %3529 = vmatmul.mubr.f32.gmra.mxu0 %v14539_v7  ;;  %v3726_v47 = vadd.f32 %v3725_v2, %v3181_v40  ;;  %4065 = vmatprep.mubr.f32.mxu1 %v13686_v57  ;;  %v14543_v2 = vld [vmem:[#allocation356_spill] sm:$0xff] }
 0x33e   :  { %v3727_v30 = vpop.f32.mrf.mxu1  ;;  %3534 = vmatprep.mubr.f32.mxu0 %v13686_v57  ;;  %v3195_v56 = vadd.f32 %v3194_v38, %v14543_v2  ;;  %v14548_v2 = vld [vmem:[#allocation363_spill] sm:$0xff] }
 0x33f   :  { %7477 = vst [vmem:[#allocation7 + $0x108] sm:$0xff] %v3726_v47  ;;  %v3196_v14 = vpop.f32.mrf.mxu0  ;;  %v3728_v1 = vadd.f32 %v3727_v30, %v3183_v8  ;;  %v14544_v30 = vld [vmem:[#allocation358_spill] sm:$0xff] }
 0x340   :  { %v3732_v21 = vpop.f32.mrf.mxu1  ;;  %4067 = vmatmul.mubr.f32.gmra.mxu1 %v14536_v49  ;;  %v3197_v19 = vadd.f32 %v3196_v14, %v14544_v30  ;;  %v14547_v49 = vld [vmem:[#allocation361_spill] sm:$0xff] }
 0x341   :  { %7478 = vst [vmem:[#allocation7 + $0x110] sm:$0xff] %v3728_v1  ;;  %v3201_v24 = vpop.f32.mrf.mxu0  ;;  %3536 = vmatmul.mubr.f32.gmra.mxu0 %v14542_v16  ;;  %v3733_v40 = vadd.f32 %v3732_v21, %v3188_v22  ;;  %4072 = vmatprep.mubr.f32.mxu1 %v13686_v57  ;;  %v14545_v1 = vld [vmem:[#allocation305_spill] sm:$0xff] }
 0x342   :  { %v3734_v0 = vpop.f32.mrf.mxu1  ;;  %3541 = vmatprep.mubr.f32.mxu0 %v13686_v57  ;;  %v3202_v38 = vadd.f32 %v3201_v24, %v14547_v49 }
 0x343   :  { %7480 = vst [vmem:[#allocation7 + $0x120] sm:$0xff] %v3733_v40  ;;  %v3203_v17 = vpop.f32.mrf.mxu0  ;;  %v3735_v8 = vadd.f32 %v3734_v0, %v3190_v5 }
 0x344   :  { %v3739_v47 = vpop.f32.mrf.mxu1  ;;  %4074 = vmatmul.mubr.f32.gmra.mxu1 %v14539_v7  ;;  %v3204_v14 = vadd.f32 %v3203_v17, %v14548_v2  ;;  %v14549_v7 = vld [vmem:[#allocation55_spill] sm:$0xff] }
 0x345   :  { %7481 = vst [vmem:[#allocation7 + $0x128] sm:$0xff] %v3735_v8  ;;  %v3208_v48 = vpop.f32.mrf.mxu0  ;;  %3543 = vmatmul.mubr.f32.gmra.mxu0 %v14545_v1  ;;  %v3740_v22 = vadd.f32 %v3739_v47, %v3195_v56  ;;  %4079 = vmatprep.mubr.f32.mxu1 %v13686_v57  ;;  %v14550_v47 = vld [vmem:[#allocation65_spill] sm:$0xff] }
 0x346   :  { %v3741_v21 = vpop.f32.mrf.mxu1  ;;  %8166 = vmatprep.mubr.f32.mxu0 %v14546_v51  ;;  %v3209_v49 = vadd.f32 %v3208_v48, %v11255_v62  ;;  %v14552_v51 = vld [vmem:[#allocation67_spill] sm:$0xff] }
 0x347   :  { %7483 = vst [vmem:[#allocation7 + $0x138] sm:$0xff] %v3740_v22  ;;  %v3210_v40 = vpop.f32.mrf.mxu0  ;;  %v3742_v5 = vadd.f32 %v3741_v21, %v3197_v19  ;;  %v14551_v22 = vld [vmem:[#allocation314_spill] sm:$0xff]  ;;  %v14554_v48 = vld [vmem:[#allocation71_spill] sm:$0xff] }
 0x348   :  { %v3746_v0 = vpop.f32.mrf.mxu1  ;;  %4081 = vmatmul.mubr.f32.gmra.mxu1 %v14542_v16 }
 0x349   :  { %7484 = vst [vmem:[#allocation7 + $0x140] sm:$0xff] %v3742_v5  ;;  %v3215_v8 = vpop.f32.mrf.mxu0  ;;  %v3747_v30 = vadd.f32 %v3746_v0, %v3202_v38  ;;  %8167 = vmatmul.mubr.f32.vlgmr.msra.gmra.mxu0 %v14549_v7  ;;  %4086 = vmatprep.mubr.f32.mxu1 %v13686_v57  ;;  %v3211_v7 = vadd.f32 %v3210_v40, %v11265_v33  ;;  %v14555_v38 = vld [vmem:[#allocation359_spill] sm:$0xff]  ;;  %v14557_v40 = vld [vmem:[#allocation369_spill] sm:$0xff] }
 0x34a   :  { %v3748_v56 = vpop.f32.mrf.mxu1  ;;  %8169 = vmatprep.mubr.f32.mxu0 %v14550_v47  ;;  %8391 = vmatpush3.msra.mxu0 %v14428_v11  ;;  %v14553_v11 = vld [vmem:[#allocation37_spill] sm:$0xff]  ;;  %v14556_v5 = vld [vmem:[#allocation367_spill] sm:$0xff] }
 0x34b   :  { %7486 = vst [vmem:[#allocation7 + $0x150] sm:$0xff] %v3747_v30  ;;  %v3217_v24 = vpop.f32.mrf.mxu0  ;;  %v3749_v19 = vadd.f32 %v3748_v56, %v3204_v14  ;;  %8392 = vmatprep.subr.mxu0 %v14551_v22  ;;  %v3216_v0 = vadd.f32 %v3215_v8, %v14556_v5 }
 0x34c   :  { %v3753_v17 = vpop.f32.mrf.mxu1  ;;  %4088 = vmatmul.mubr.f32.gmra.mxu1 %v14545_v1  ;;  %8393 = vmatpush3.msra.mxu0 %v14551_v22  ;;  %v3218_v30 = vadd.f32 %v3217_v24, %v14557_v40  ;;  %v14565_v40 = vld [vmem:[#allocation355_spill] sm:$0xff] }
 0x34d   :  { %7487 = vst [vmem:[#allocation7 + $0x158] sm:$0xff] %v3749_v19  ;;  %v3222_v57 = vpop.f32.mrf.mxu0  ;;  %v3754_v21 = vadd.f32 %v3753_v17, %v3209_v49  ;;  %8170 = vmatmul.mubr.f32.gmra.mxu0 %v14552_v51  ;;  %8294 = vmatprep.mubr.f32.mxu1 %v14553_v11  ;;  %v14558_v49 = vld [vmem:[#allocation75_spill] sm:$0xff]  ;;  %v14561_v51 = vld [vmem:[#allocation44_spill] sm:$0xff] }
 0x34e   :  { %v3755_v62 = vpop.f32.mrf.mxu1  ;;  %8172 = vmatprep.mubr.f32.mxu0 %v14554_v48  ;;  %8394 = vmatprep.subr.mxu0 %v14555_v38  ;;  %v14559_v19 = vld [vmem:[#allocation79_spill] sm:$0xff]  ;;  %v3223_v22 = vadd.f32 %v3222_v57, %v11301_v34 }
 0x34f   :  { %7489 = vst [vmem:[#allocation7 + $0x168] sm:$0xff] %v3754_v21  ;;  %v3224_v2 = vpop.f32.mrf.mxu0  ;;  %v3756_v14 = vadd.f32 %v3755_v62, %v3211_v7  ;;  %8395 = vmatpush3.msra.mxu0 %v14555_v38  ;;  %v14560_v21 = vld [vmem:[#allocation309_spill] sm:$0xff]  ;;  %v14564_v57 = vld [vmem:[#allocation87_spill] sm:$0xff] }
 0x350   :  { %v3760_v33 = vpop.f32.mrf.mxu1  ;;  %8295 = vmatmul.mubr.f32.vlgmr.msra.gmra.mxu1 %v14277_v6  ;;  %8396 = vmatprep.subr.mxu0 %v11250_v55  ;;  %v14562_v62 = vld [vmem:[#allocation53_spill] sm:$0xff] }
 0x351   :  { %7490 = vst [vmem:[#allocation7 + $0x170] sm:$0xff] %v3756_v14  ;;  %v3229_v56 = vpop.f32.mrf.mxu0  ;;  %v3761_v47 = vadd.f32 %v3760_v33, %v3216_v0  ;;  %8173 = vmatmul.mubr.f32.gmra.mxu0 %v14558_v49  ;;  %8519 = vmatpush3.msra.mxu1 %v10935_v15  ;;  %v3225_v48 = vadd.f32 %v3224_v2, %v14562_v62  ;;  %v14563_v0 = vld [vmem:[#allocation83_spill] sm:$0xff]  ;;  %v14570_v62 = vld [vmem:[#allocation61_spill] sm:$0xff] }
 0x352   :  { %v3762_v8 = vpop.f32.mrf.mxu1  ;;  %8175 = vmatprep.mubr.f32.mxu0 %v14559_v19  ;;  %8297 = vmatprep.mubr.f32.mxu1 %v14282_v41  ;;  %v14567_v19 = vld [vmem:[#allocation91_spill] sm:$0xff] }
 0x353   :  { %7492 = vst [vmem:[#allocation7 + $0x180] sm:$0xff] %v3761_v47  ;;  %v3231_v17 = vpop.f32.mrf.mxu0  ;;  %v3763_v7 = vadd.f32 %v3762_v8, %v3218_v30  ;;  %8520 = vmatprep.subr.mxu1 %v14560_v21  ;;  %8397 = vmatpush3.msra.mxu0 %v11250_v55  ;;  %v3230_v55 = vadd.f32 %v3229_v56, %v11323_v45  ;;  %v14566_v30 = vld [vmem:[#allocation372_spill] sm:$0xff]  ;;  %v14568_v56 = vld [vmem:[#allocation95_spill] sm:$0xff] }
 0x354   :  { %v3767_v24 = vpop.f32.mrf.mxu1  ;;  %8298 = vmatmul.mubr.f32.gmra.mxu1 %v14286_v42  ;;  %8398 = vmatprep.subr.mxu0 %v14561_v51  ;;  %v3232_v47 = vadd.f32 %v3231_v17, %v14566_v30 }
 0x355   :  { %7493 = vst [vmem:[#allocation7 + $0x188] sm:$0xff] %v3763_v7  ;;  %v3236_v38 = vpop.f32.mrf.mxu0  ;;  %v3768_v5 = vadd.f32 %v3767_v24, %v3223_v22  ;;  %8176 = vmatmul.mubr.f32.gmra.mxu0 %v14563_v0  ;;  %8300 = vmatprep.mubr.f32.mxu1 %v14290_v37 }
 0x356   :  { %v3769_v34 = vpop.f32.mrf.mxu1  ;;  %8178 = vmatprep.mubr.f32.mxu0 %v14564_v57  ;;  %8521 = vmatpush3.msra.mxu1 %v14560_v21  ;;  %v3237_v22 = vadd.f32 %v3236_v38, %v11345_v20  ;;  %v14572_v38 = vld [vmem:[#allocation102_spill] sm:$0xff] }
 0x357   :  { %7495 = vst [vmem:[#allocation7 + $0x198] sm:$0xff] %v3768_v5  ;;  %v3238_v14 = vpop.f32.mrf.mxu0  ;;  %v3770_v33 = vadd.f32 %v3769_v34, %v3225_v48  ;;  %8522 = vmatprep.subr.mxu1 %v14565_v40  ;;  %8399 = vmatpush3.msra.mxu0 %v14561_v51  ;;  %v14569_v51 = vld [vmem:[#allocation360_spill] sm:$0xff]  ;;  %v14571_v34 = vld [vmem:[#allocation99_spill] sm:$0xff] }
 0x358   :  { %v3774_v2 = vpop.f32.mrf.mxu1  ;;  %8301 = vmatmul.mubr.f32.gmra.mxu1 %v14294_v13  ;;  %8400 = vmatprep.subr.mxu0 %v11296_v10  ;;  %v3239_v48 = vadd.f32 %v3238_v14, %v14570_v62 }
 0x359   :  { %7496 = vst [vmem:[#allocation7 + $0x1a0] sm:$0xff] %v3770_v33  ;;  %v3243_v49 = vpop.f32.mrf.mxu0  ;;  %v3775_v8 = vadd.f32 %v3774_v2, %v3230_v55  ;;  %8179 = vmatmul.mubr.f32.gmra.mxu0 %v14567_v19  ;;  %8303 = vmatprep.mubr.f32.mxu1 %v14298_v39  ;;  %v14574_v2 = vld [vmem:[#allocation362_spill] sm:$0xff] }
 0x35a   :  { %v3776_v45 = vpop.f32.mrf.mxu1  ;;  %8181 = vmatprep.mubr.f32.mxu0 %v14568_v56  ;;  %8523 = vmatpush3.msra.mxu1 %v14565_v40  ;;  %v14575_v19 = vld [vmem:[#allocation106_spill] sm:$0xff] }
 0x35b   :  { %7498 = vst [vmem:[#allocation7 + $0x1b0] sm:$0xff] %v3775_v8  ;;  %v3245_v7 = vpop.f32.mrf.mxu0  ;;  %v3777_v24 = vadd.f32 %v3776_v45, %v3232_v47  ;;  %8524 = vmatprep.subr.mxu1 %v14569_v51  ;;  %8401 = vmatpush3.msra.mxu0 %v11296_v10  ;;  %v14573_v10 = vld [vmem:[#allocation375_spill] sm:$0xff]  ;;  %v14576_v45 = vld [vmem:[#allocation110_spill] sm:$0xff] }
 0x35c   :  { %v3781_v17 = vpop.f32.mrf.mxu1  ;;  %8304 = vmatmul.mubr.f32.gmra.mxu1 %v14301_v60  ;;  %8402 = vmatprep.subr.mxu0 %v11310_v26  ;;  %v3244_v57 = vadd.f32 %v3243_v49, %v14573_v10  ;;  %v3246_v30 = vadd.f32 %v3245_v7, %v11373_v29 }
 0x35d   :  { %7499 = vst [vmem:[#allocation7 + $0x1b8] sm:$0xff] %v3777_v24  ;;  %v3250_v5 = vpop.f32.mrf.mxu0  ;;  %v3782_v0 = vadd.f32 %v3781_v17, %v3237_v22  ;;  %8182 = vmatmul.mubr.f32.gmra.mxu0 %v14571_v34  ;;  %8306 = vmatprep.mubr.f32.mxu1 %v14304_v46  ;;  %v14577_v24 = vld [vmem:[#allocation366_spill] sm:$0xff] }
 0x35e   :  { %v3783_v20 = vpop.f32.mrf.mxu1  ;;  %8184 = vmatprep.mubr.f32.mxu0 %v14572_v38  ;;  %8525 = vmatpush3.msra.mxu1 %v14569_v51  ;;  %v14581_v38 = vld [vmem:[#allocation368_spill] sm:$0xff] }
 0x35f   :  { %7501 = vst [vmem:[#allocation7 + $0x1c8] sm:$0xff] %v3782_v0  ;;  %v3252_v55 = vpop.f32.mrf.mxu0  ;;  %v3784_v33 = vadd.f32 %v3783_v20, %v3239_v48  ;;  %8526 = vmatprep.subr.mxu1 %v14574_v2  ;;  %8403 = vmatpush3.msra.mxu0 %v11310_v26  ;;  %v3251_v26 = vadd.f32 %v3250_v5, %v11387_v53  ;;  %v14578_v48 = vld [vmem:[#allocation114_spill] sm:$0xff] }
 0x360   :  { %v3788_v14 = vpop.f32.mrf.mxu1  ;;  %8307 = vmatmul.mubr.f32.gmra.mxu1 %v14306_v4  ;;  %8404 = vmatprep.subr.mxu0 %v11338_v28  ;;  %v3253_v7 = vadd.f32 %v3252_v55, %v11393_v59  ;;  %v14579_v5 = vld [vmem:[#allocation118_spill] sm:$0xff] }
 0x361   :  { %7502 = vst [vmem:[#allocation7 + $0x1d0] sm:$0xff] %v3784_v33  ;;  %v3257_v47 = vpop.f32.mrf.mxu0  ;;  %v3789_v8 = vadd.f32 %v3788_v14, %v3244_v57  ;;  %8185 = vmatmul.mubr.f32.gmra.mxu0 %v14575_v19  ;;  %8309 = vmatprep.mubr.f32.mxu1 %v14309_v3  ;;  %v14582_v33 = vld [vmem:[#allocation11_spill] sm:$0xff]  ;;  %v14583_v14 = vld [vmem:[#allocation94_spill] sm:$0xff] }
 0x362   :  { %v3790_v49 = vpop.f32.mrf.mxu1  ;;  %8187 = vmatprep.mubr.f32.mxu0 %v14576_v45  ;;  %8527 = vmatpush3.msra.mxu1 %v14574_v2  ;;  %v14586_v45 = vld [vmem:[#allocation371_spill] sm:$0xff] }
 0x363   :  { %7504 = vst [vmem:[#allocation7 + $0x1e0] sm:$0xff] %v3789_v8  ;;  %v3259_v56 = vpop.f32.mrf.mxu0  ;;  %v3791_v22 = vadd.f32 %v3790_v49, %v3246_v30  ;;  %8528 = vmatprep.subr.mxu1 %v14577_v24  ;;  %8405 = vmatpush3.msra.mxu0 %v11338_v28  ;;  %v14580_v28 = vld [vmem:[#allocation377_spill] sm:$0xff] }
 0x364   :  { %v3795_v29 = vpop.f32.mrf.mxu1  ;;  %8310 = vmatmul.mubr.f32.gmra.mxu1 %v14314_v9  ;;  %8406 = vmatprep.subr.mxu0 %v11360_v58  ;;  %v3258_v0 = vadd.f32 %v3257_v47, %v14580_v28  ;;  %v3260_v10 = vadd.f32 %v3259_v56, %v11410_v23  ;;  %v14584_v47 = vld [vmem:[#allocation125_spill] sm:$0xff]  ;;  %v14588_v56 = vld [vmem:[#allocation380_spill] sm:$0xff] }
 0x365   :  { %7505 = vst [vmem:[#allocation7 + $0x1e8] sm:$0xff] %v3791_v22  ;;  %v3264_v17 = vpop.f32.mrf.mxu0  ;;  %v3796_v62 = vadd.f32 %v3795_v29, %v3251_v26  ;;  %8188 = vmatmul.mubr.f32.gmra.mxu0 %v14578_v48  ;;  %8312 = vmatprep.mubr.f32.mxu1 %v14318_v44  ;;  %v14587_v26 = vld [vmem:[#allocation98_spill] sm:$0xff]  ;;  %v14590_v48 = vld [vmem:[#allocation129_spill] sm:$0xff] }
 0x366   :  { %v3797_v53 = vpop.f32.mrf.mxu1  ;;  %8190 = vmatprep.mubr.f32.mxu0 %v14579_v5  ;;  %8529 = vmatpush3.msra.mxu1 %v14577_v24  ;;  %v14589_v22 = vld [vmem:[#allocation74_spill] sm:$0xff]  ;;  %v14592_v5 = vld [vmem:[#allocation133_spill] sm:$0xff] }
 0x367   :  { %7507 = vst [vmem:[#allocation7 + $0x1f8] sm:$0xff] %v3796_v62  ;;  %v3266_v34 = vpop.f32.mrf.mxu0  ;;  %v3798_v20 = vadd.f32 %v3797_v53, %v3253_v7  ;;  %8530 = vmatprep.subr.mxu1 %v14581_v38  ;;  %8407 = vmatpush3.msra.mxu0 %v11360_v58  ;;  %v14585_v58 = vld [vmem:[#allocation73_spill] sm:$0xff] }
 0x368   :  { %v3802_v59 = vpop.f32.mrf.mxu1  ;;  %8313 = vmatmul.mubr.f32.gmra.mxu1 %v14321_v63  ;;  %8408 = vmatprep.subr.mxu0 %v11382_v27  ;;  %v3265_v8 = vadd.f32 %v3264_v17, %v14585_v58  ;;  %v3267_v29 = vadd.f32 %v3266_v34, %v14589_v22  ;;  %v14591_v17 = vld [vmem:[#allocation104_spill] sm:$0xff] }
 0x369   :  { %7508 = vst [vmem:[#allocation7 + $0x200] sm:$0xff] %v3798_v20  ;;  %v3271_v57 = vpop.f32.mrf.mxu0  ;;  %v3803_v55 = vadd.f32 %v3802_v59, %v3258_v0  ;;  %8191 = vmatmul.mubr.f32.gmra.mxu0 %v14582_v33  ;;  %8315 = vmatprep.mubr.f32.mxu1 %v14583_v14  ;;  %v14594_v59 = vld [vmem:[#allocation373_spill] sm:$0xff]  ;;  %v14597_v33 = vld [vmem:[#allocation379_spill] sm:$0xff]  ;;  %v14661_v63 = vld [vmem:[#allocation176_spill] sm:$0xff] }
 0x36a   :  { %v3804_v30 = vpop.f32.mrf.mxu1  ;;  %8193 = vmatprep.mubr.f32.mxu0 %v14584_v47  ;;  %8531 = vmatpush3.msra.mxu1 %v14581_v38  ;;  %v14653_v14 = vld [vmem:[#allocation197_spill] sm:$0xff] }
 0x36b   :  { %7510 = vst [vmem:[#allocation7 + $0x210] sm:$0xff] %v3803_v55  ;;  %v3273_v19 = vpop.f32.mrf.mxu0  ;;  %v3805_v49 = vadd.f32 %v3804_v30, %v3260_v10  ;;  %8532 = vmatprep.subr.mxu1 %v14586_v45  ;;  %8409 = vmatpush3.msra.mxu0 %v11382_v27  ;;  %v14593_v27 = vld [vmem:[#allocation378_spill] sm:$0xff]  ;;  %v14595_v10 = vld [vmem:[#allocation105_spill] sm:$0xff] }
 0x36c   :  { %v3809_v23 = vpop.f32.mrf.mxu1  ;;  %8316 = vmatmul.mubr.f32.gmra.mxu1 %v14587_v26  ;;  %8410 = vmatprep.subr.mxu0 %v14588_v56  ;;  %v3272_v28 = vadd.f32 %v3271_v57, %v14593_v27  ;;  %v14596_v55 = vld [vmem:[#allocation386_spill] sm:$0xff]  ;;  %v3274_v30 = vadd.f32 %v3273_v19, %v14597_v33  ;;  %v14599_v57 = vld [vmem:[#allocation112_spill] sm:$0xff]  ;;  %v14606_v33 = vld [vmem:[#allocation145_spill] sm:$0xff] }
 0x36d   :  { %7511 = vst [vmem:[#allocation7 + $0x218] sm:$0xff] %v3805_v49  ;;  %v3278_v7 = vpop.f32.mrf.mxu0  ;;  %v3810_v62 = vadd.f32 %v3809_v23, %v3265_v8  ;;  %8194 = vmatmul.mubr.f32.gmra.mxu0 %v14590_v48  ;;  %8318 = vmatprep.mubr.f32.mxu1 %v14591_v17  ;;  %v14598_v8 = vld [vmem:[#allocation137_spill] sm:$0xff]  ;;  %v14602_v48 = vld [vmem:[#allocation62_spill] sm:$0xff] }
 0x36e   :  { %v3811_v53 = vpop.f32.mrf.mxu1  ;;  %8196 = vmatprep.mubr.f32.mxu0 %v14592_v5  ;;  %8533 = vmatpush3.msra.mxu1 %v14586_v45  ;;  %v14600_v23 = vld [vmem:[#allocation141_spill] sm:$0xff]  ;;  %v14605_v27 = vld [vmem:[#allocation382_spill] sm:$0xff] }
 0x36f   :  { %7513 = vst [vmem:[#allocation7 + $0x228] sm:$0xff] %v3810_v62  ;;  %v3280_v0 = vpop.f32.mrf.mxu0  ;;  %v3812_v20 = vadd.f32 %v3811_v53, %v3267_v29  ;;  %8534 = vmatprep.subr.mxu1 %v14594_v59  ;;  %8411 = vmatpush3.msra.mxu0 %v14588_v56  ;;  %v14601_v56 = vld [vmem:[#allocation381_spill] sm:$0xff] }
 0x370   :  { %v3816_v34 = vpop.f32.mrf.mxu1  ;;  %8319 = vmatmul.mubr.f32.gmra.mxu1 %v14595_v10  ;;  %8412 = vmatprep.subr.mxu0 %v14596_v55  ;;  %v3279_v22 = vadd.f32 %v3278_v7, %v14601_v56  ;;  %v14603_v53 = vld [vmem:[#allocation113_spill] sm:$0xff]  ;;  %v14641_v10 = vld [vmem:[#allocation51_spill] sm:$0xff] }
 0x371   :  { %7514 = vst [vmem:[#allocation7 + $0x230] sm:$0xff] %v3812_v20  ;;  %v3285_v47 = vpop.f32.mrf.mxu0  ;;  %v3817_v58 = vadd.f32 %v3816_v34, %v3272_v28  ;;  %8197 = vmatmul.mubr.f32.gmra.mxu0 %v14598_v8  ;;  %8321 = vmatprep.mubr.f32.mxu1 %v14599_v57  ;;  %v14604_v5 = vld [vmem:[#allocation389_spill] sm:$0xff]  ;;  %v3281_v28 = vadd.f32 %v3280_v0, %v14605_v27  ;;  %v14626_v57 = vld [vmem:[#allocation388_spill] sm:$0xff] }
 0x372   :  { %v3818_v49 = vpop.f32.mrf.mxu1  ;;  %8199 = vmatprep.mubr.f32.mxu0 %v14600_v23  ;;  %8535 = vmatpush3.msra.mxu1 %v14594_v59  ;;  %v14607_v7 = vld [vmem:[#allocation117_spill] sm:$0xff] }
 0x373   :  { %7516 = vst [vmem:[#allocation7 + $0x240] sm:$0xff] %v3817_v58  ;;  %v3287_v29 = vpop.f32.mrf.mxu0  ;;  %v3819_v62 = vadd.f32 %v3818_v49, %v3274_v30  ;;  %8536 = vmatprep.subr.mxu1 %v14602_v48  ;;  %8413 = vmatpush3.msra.mxu0 %v14596_v55  ;;  %v14608_v30 = vld [vmem:[#allocation149_spill] sm:$0xff]  ;;  %v14609_v55 = vld [vmem:[#allocation383_spill] sm:$0xff] }
 0x374   :  { %v3823_v19 = vpop.f32.mrf.mxu1  ;;  %8322 = vmatmul.mubr.f32.gmra.mxu1 %v14603_v53  ;;  %8414 = vmatprep.subr.mxu0 %v14604_v5  ;;  %v3286_v8 = vadd.f32 %v3285_v47, %v14609_v55  ;;  %v14610_v56 = vld [vmem:[#allocation81_spill] sm:$0xff]  ;;  %v14615_v47 = vld [vmem:[#allocation124_spill] sm:$0xff] }
 0x375   :  { %7517 = vst [vmem:[#allocation7 + $0x248] sm:$0xff] %v3819_v62  ;;  %v3292_v20 = vpop.f32.mrf.mxu0  ;;  %v3824_v34 = vadd.f32 %v3823_v19, %v3279_v22  ;;  %8200 = vmatmul.mubr.f32.gmra.mxu0 %v14606_v33  ;;  %8324 = vmatprep.mubr.f32.mxu1 %v14607_v7  ;;  %v14611_v22 = vld [vmem:[#allocation123_spill] sm:$0xff]  ;;  %v14612_v62 = vld [vmem:[#allocation46_spill] sm:$0xff]  ;;  %v14614_v7 = vld [vmem:[#allocation153_spill] sm:$0xff] }
 0x376   :  { %v3825_v58 = vpop.f32.mrf.mxu1  ;;  %8202 = vmatprep.mubr.f32.mxu0 %v14608_v30  ;;  %8537 = vmatpush3.msra.mxu1 %v14602_v48  ;;  %v14613_v19 = vld [vmem:[#allocation86_spill] sm:$0xff]  ;;  %v14618_v53 = vld [vmem:[#allocation385_spill] sm:$0xff] }
 0x377   :  { %7519 = vst [vmem:[#allocation7 + $0x258] sm:$0xff] %v3824_v34  ;;  %v3294_v49 = vpop.f32.mrf.mxu0  ;;  %v3826_v23 = vadd.f32 %v3825_v58, %v3281_v28  ;;  %8538 = vmatprep.subr.mxu1 %v14610_v56  ;;  %8415 = vmatpush3.msra.mxu0 %v14604_v5  ;;  %v3288_v27 = vadd.f32 %v3287_v29, %v14613_v19  ;;  %v14616_v28 = vld [vmem:[#allocation157_spill] sm:$0xff]  ;;  %v14617_v5 = vld [vmem:[#allocation384_spill] sm:$0xff] }
 0x378   :  { %v3830_v0 = vpop.f32.mrf.mxu1  ;;  %8325 = vmatmul.mubr.f32.gmra.mxu1 %v14611_v22  ;;  %8416 = vmatprep.subr.mxu0 %v14612_v62  ;;  %v3293_v58 = vadd.f32 %v3292_v20, %v14617_v5  ;;  %v14623_v20 = vld [vmem:[#allocation132_spill] sm:$0xff]  ;;  %v14646_v26 = vld [vmem:[#allocation189_spill] sm:$0xff] }
 0x379   :  { %7520 = vst [vmem:[#allocation7 + $0x260] sm:$0xff] %v3826_v23  ;;  %v3299_v33 = vpop.f32.mrf.mxu0  ;;  %v3831_v30 = vadd.f32 %v3830_v0, %v3286_v8  ;;  %8203 = vmatmul.mubr.f32.gmra.mxu0 %v14614_v7  ;;  %8327 = vmatprep.mubr.f32.mxu1 %v14615_v47  ;;  %v14619_v8 = vld [vmem:[#allocation128_spill] sm:$0xff]  ;;  %v14620_v7 = vld [vmem:[#allocation31_spill] sm:$0xff]  ;;  %v14622_v47 = vld [vmem:[#allocation161_spill] sm:$0xff] }
 0x37a   :  { %v3832_v34 = vpop.f32.mrf.mxu1  ;;  %8205 = vmatprep.mubr.f32.mxu0 %v14616_v28  ;;  %8539 = vmatpush3.msra.mxu1 %v14610_v56  ;;  %v14621_v23 = vld [vmem:[#allocation12_spill] sm:$0xff] }
 0x37b   :  { %7522 = vst [vmem:[#allocation7 + $0x270] sm:$0xff] %v3831_v30  ;;  %v3301_v55 = vpop.f32.mrf.mxu0  ;;  %v3833_v22 = vadd.f32 %v3832_v34, %v3288_v27  ;;  %8540 = vmatprep.subr.mxu1 %v14618_v53  ;;  %8417 = vmatpush3.msra.mxu0 %v14612_v62  ;;  %v3295_v0 = vadd.f32 %v3294_v49, %v14621_v23  ;;  %v14624_v27 = vld [vmem:[#allocation165_spill] sm:$0xff] }
 0x37c   :  { %v3837_v29 = vpop.f32.mrf.mxu1  ;;  %8328 = vmatmul.mubr.f32.gmra.mxu1 %v14619_v8  ;;  %8418 = vmatprep.subr.mxu0 %v14620_v7  ;;  %v14625_v62 = vld [vmem:[#allocation13_spill] sm:$0xff] }
 0x37d   :  { %7523 = vst [vmem:[#allocation7 + $0x278] sm:$0xff] %v3833_v22  ;;  %v3306_v19 = vpop.f32.mrf.mxu0  ;;  %v3838_v28 = vadd.f32 %v3837_v29, %v3293_v58  ;;  %8206 = vmatmul.mubr.f32.gmra.mxu0 %v14622_v47  ;;  %8330 = vmatprep.mubr.f32.mxu1 %v14623_v20  ;;  %v3300_v34 = vadd.f32 %v3299_v33, %v14625_v62  ;;  %v14627_v22 = vld [vmem:[#allocation136_spill] sm:$0xff]  ;;  %v14628_v47 = vld [vmem:[#allocation14_spill] sm:$0xff]  ;;  %v14630_v33 = vld [vmem:[#allocation143_spill] sm:$0xff] }
 0x37e   :  { %v3839_v30 = vpop.f32.mrf.mxu1  ;;  %8208 = vmatprep.mubr.f32.mxu0 %v14624_v27  ;;  %8541 = vmatpush3.msra.mxu1 %v14618_v53  ;;  %v3302_v58 = vadd.f32 %v3301_v55, %v14628_v47  ;;  %v14629_v27 = vld [vmem:[#allocation169_spill] sm:$0xff]  ;;  %v14633_v20 = vld [vmem:[#allocation42_spill] sm:$0xff] }
 0x37f   :  { %7525 = vst [vmem:[#allocation7 + $0x288] sm:$0xff] %v3838_v28  ;;  %v3308_v5 = vpop.f32.mrf.mxu0  ;;  %v3840_v8 = vadd.f32 %v3839_v30, %v3295_v0  ;;  %8542 = vmatprep.subr.mxu1 %v14626_v57  ;;  %8419 = vmatpush3.msra.mxu0 %v14620_v7  ;;  %v14631_v0 = vld [vmem:[#allocation173_spill] sm:$0xff]  ;;  %v14632_v7 = vld [vmem:[#allocation28_spill] sm:$0xff] }
 0x380   :  { %v3844_v49 = vpop.f32.mrf.mxu1  ;;  %8331 = vmatmul.mubr.f32.gmra.mxu1 %v14627_v22  ;;  %8420 = vmatprep.subr.mxu0 %v11701_v31  ;;  %v3307_v30 = vadd.f32 %v3306_v19, %v14632_v7  ;;  %v14638_v19 = vld [vmem:[#allocation148_spill] sm:$0xff] }
 0x381   :  { %7526 = vst [vmem:[#allocation7 + $0x290] sm:$0xff] %v3840_v8  ;;  %v3313_v29 = vpop.f32.mrf.mxu0  ;;  %v3845_v23 = vadd.f32 %v3844_v49, %v3300_v34  ;;  %8209 = vmatmul.mubr.f32.gmra.mxu0 %v14629_v27  ;;  %8333 = vmatprep.mubr.f32.mxu1 %v14630_v33  ;;  %v14634_v8 = vld [vmem:[#allocation144_spill] sm:$0xff]  ;;  %v14635_v34 = vld [vmem:[#allocation325_spill] sm:$0xff]  ;;  %v14636_v49 = vld [vmem:[#allocation30_spill] sm:$0xff] }
 0x382   :  { %v3846_v28 = vpop.f32.mrf.mxu1  ;;  %8211 = vmatprep.mubr.f32.mxu0 %v14631_v0  ;;  %8543 = vmatpush3.msra.mxu1 %v14626_v57  ;;  %v3309_v47 = vadd.f32 %v3308_v5, %v14636_v49  ;;  %v14637_v33 = vld [vmem:[#allocation177_spill] sm:$0xff] }
 0x383   :  { %7528 = vst [vmem:[#allocation7 + $0x2a0] sm:$0xff] %v3845_v23  ;;  %v3315_v62 = vpop.f32.mrf.mxu0  ;;  %v3847_v22 = vadd.f32 %v3846_v28, %v3302_v58  ;;  %8544 = vmatprep.subr.mxu1 %v14633_v20  ;;  %8421 = vmatpush3.msra.mxu0 %v11701_v31  ;;  %v14639_v58 = vld [vmem:[#allocation181_spill] sm:$0xff]  ;;  %v14640_v31 = vld [vmem:[#allocation15_spill] sm:$0xff] }
 0x384   :  { %v3851_v55 = vpop.f32.mrf.mxu1  ;;  %8334 = vmatmul.mubr.f32.gmra.mxu1 %v14634_v8  ;;  %8646 = vmatprep.subr.mxu0 %v14635_v34  ;;  %v3314_v28 = vadd.f32 %v3313_v29, %v14640_v31  ;;  %v14647_v29 = vld [vmem:[#allocation33_spill] sm:$0xff] }
 0x385   :  { %7529 = vst [vmem:[#allocation7 + $0x2a8] sm:$0xff] %v3847_v22  ;;  %v3320_v27 = vpop.f32.mrf.mxu0  ;;  %v3852_v0 = vadd.f32 %v3851_v55, %v3307_v30  ;;  %8212 = vmatmul.mubr.f32.gmra.mxu0 %v14637_v33  ;;  %8336 = vmatprep.mubr.f32.mxu1 %v14638_v19  ;;  %v14642_v22 = vld [vmem:[#allocation155_spill] sm:$0xff]  ;;  %v14643_v30 = vld [vmem:[#allocation16_spill] sm:$0xff]  ;;  %v14644_v19 = vld [vmem:[#allocation185_spill] sm:$0xff] }
 0x386   :  { %v3853_v23 = vpop.f32.mrf.mxu1  ;;  %8214 = vmatprep.mubr.f32.mxu0 %v14639_v58  ;;  %8545 = vmatpush3.msra.mxu1 %v14633_v20  ;;  %v3316_v55 = vadd.f32 %v3315_v62, %v14643_v30  ;;  %v14645_v58 = vld [vmem:[#allocation159_spill] sm:$0xff]  ;;  %v14648_v31 = vld [vmem:[#allocation317_spill] sm:$0xff] }
 0x387   :  { %7531 = vst [vmem:[#allocation7 + $0x2b8] sm:$0xff] %v3852_v0  ;;  %v3322_v7 = vpop.f32.mrf.mxu0  ;;  %v3854_v8 = vadd.f32 %v3853_v23, %v3309_v47  ;;  %8546 = vmatprep.subr.mxu1 %v14641_v10  ;;  %v3321_v47 = vadd.f32 %v3320_v27, %v14647_v29  ;;  %v14655_v29 = vld [vmem:[#allocation168_spill] sm:$0xff] }
 0x388   :  { %v3858_v5 = vpop.f32.mrf.mxu1  ;;  %8337 = vmatmul.mubr.f32.gmra.mxu1 %v14642_v22 }
 0x389   :  { %7532 = vst [vmem:[#allocation7 + $0x2c0] sm:$0xff] %v3854_v8  ;;  %v3327_v33 = vpop.f32.mrf.mxu0  ;;  %v3859_v49 = vadd.f32 %v3858_v5, %v3314_v28  ;;  %8215 = vmatmul.mubr.f32.gmra.mxu0 %v14644_v19  ;;  %8339 = vmatprep.mubr.f32.mxu1 %v14645_v58  ;;  %v14649_v8 = vld [vmem:[#allocation160_spill] sm:$0xff]  ;;  %v14650_v28 = vld [vmem:[#allocation17_spill] sm:$0xff] }
 0x38a   :  { %v3860_v17 = vpop.f32.mrf.mxu1  ;;  %8217 = vmatprep.mubr.f32.mxu0 %v14646_v26  ;;  %8547 = vmatpush3.msra.mxu1 %v14641_v10  ;;  %v3323_v5 = vadd.f32 %v3322_v7, %v14650_v28  ;;  %v14651_v58 = vld [vmem:[#allocation193_spill] sm:$0xff]  ;;  %v14652_v26 = vld [vmem:[#allocation164_spill] sm:$0xff] }
 0x38b   :  { %7534 = vst [vmem:[#allocation7 + $0x2d0] sm:$0xff] %v3859_v49  ;;  %v3329_v0 = vpop.f32.mrf.mxu0  ;;  %v3861_v23 = vadd.f32 %v3860_v17, %v3316_v55  ;;  %8548 = vmatprep.subr.mxu1 %v14648_v31  ;;  %v14654_v17 = vld [vmem:[#allocation18_spill] sm:$0xff]  ;;  %v14657_v28 = vld [vmem:[#allocation201_spill] sm:$0xff] }
 0x38c   :  { %v3865_v62 = vpop.f32.mrf.mxu1  ;;  %8340 = vmatmul.mubr.f32.gmra.mxu1 %v14649_v8  ;;  %v3328_v27 = vadd.f32 %v3327_v33, %v14654_v17  ;;  %v14659_v8 = vld [vmem:[#allocation205_spill] sm:$0xff]  ;;  %v14660_v33 = vld [vmem:[#allocation38_spill] sm:$0xff] }
 0x38d   :  { %7535 = vst [vmem:[#allocation7 + $0x2d8] sm:$0xff] %v3861_v23  ;;  %v3334_v19 = vpop.f32.mrf.mxu0  ;;  %v3866_v30 = vadd.f32 %v3865_v62, %v3321_v47  ;;  %8218 = vmatmul.mubr.f32.gmra.mxu0 %v14651_v58  ;;  %8342 = vmatprep.mubr.f32.mxu1 %v14652_v26  ;;  %v14656_v47 = vld [vmem:[#allocation20_spill] sm:$0xff] }
 0x38e   :  { %v3867_v22 = vpop.f32.mrf.mxu1  ;;  %8220 = vmatprep.mubr.f32.mxu0 %v14653_v14  ;;  %8549 = vmatpush3.msra.mxu1 %v14648_v31  ;;  %v3330_v23 = vadd.f32 %v3329_v0, %v14656_v47  ;;  %v14658_v14 = vld [vmem:[#allocation175_spill] sm:$0xff]  ;;  %v14664_v47 = vld [vmem:[#allocation180_spill] sm:$0xff] }
 0x38f   :  { %7537 = vst [vmem:[#allocation7 + $0x2e8] sm:$0xff] %v3866_v30  ;;  %v3336_v55 = vpop.f32.mrf.mxu0  ;;  %v3868_v49 = vadd.f32 %v3867_v22, %v3323_v5  ;;  %8774 = vmatprep.subr.mxu1 %v10935_v15  ;;  %v3335_v30 = vadd.f32 %v3334_v19, %v14660_v33  ;;  %v14667_v33 = vld [vmem:[#allocation187_spill] sm:$0xff] }
 0x390   :  { %v3872_v7 = vpop.f32.mrf.mxu1  ;;  %8343 = vmatmul.mubr.f32.gmra.mxu1 %v14655_v29  ;;  %v14662_v29 = vld [vmem:[#allocation21_spill] sm:$0xff] }
 0x391   :  { %7538 = vst [vmem:[#allocation7 + $0x2f0] sm:$0xff] %v3868_v49  ;;  %v3341_v58 = vpop.f32.mrf.mxu0  ;;  %v3873_v62 = vadd.f32 %v3872_v7, %v3328_v27  ;;  %8221 = vmatmul.mubr.f32.gmra.mxu0 %v14657_v28  ;;  %8345 = vmatprep.mubr.f32.mxu1 %v14658_v14  ;;  %v3337_v0 = vadd.f32 %v3336_v55, %v14662_v29  ;;  %v14663_v7 = vld [vmem:[#allocation209_spill] sm:$0xff] }
 0x392   :  { %v3874_v26 = vpop.f32.mrf.mxu1  ;;  %8223 = vmatprep.mubr.f32.mxu0 %v14659_v8  ;;  %v14665_v14 = vld [vmem:[#allocation213_spill] sm:$0xff]  ;;  %v14666_v8 = vld [vmem:[#allocation22_spill] sm:$0xff] }
 0x393   :  { %7540 = vst [vmem:[#allocation7 + $0x300] sm:$0xff] %v3873_v62  ;;  %v3343_v22 = vpop.f32.mrf.mxu0  ;;  %v3875_v5 = vadd.f32 %v3874_v26, %v3330_v23  ;;  %v3342_v19 = vadd.f32 %v3341_v58, %v14666_v8  ;;  %v14673_v8 = vld [vmem:[#allocation192_spill] sm:$0xff] }
 0x394   :  { %v3879_v17 = vpop.f32.mrf.mxu1  ;;  %8346 = vmatmul.mubr.f32.gmra.mxu1 %v14661_v63  ;;  %v14668_v63 = vld [vmem:[#allocation39_spill] sm:$0xff] }
 0x395   :  { %7541 = vst [vmem:[#allocation7 + $0x308] sm:$0xff] %v3875_v5  ;;  %v3348_v49 = vpop.f32.mrf.mxu0  ;;  %v3880_v27 = vadd.f32 %v3879_v17, %v3335_v30  ;;  %8224 = vmatmul.mubr.f32.gmra.mxu0 %v14663_v7  ;;  %8348 = vmatprep.mubr.f32.mxu1 %v14664_v47  ;;  %v3344_v55 = vadd.f32 %v3343_v22, %v14668_v63  ;;  %v14669_v5 = vld [vmem:[#allocation217_spill] sm:$0xff]  ;;  %v14670_v17 = vld [vmem:[#allocation191_spill] sm:$0xff] }
 0x396   :  { %v3881_v28 = vpop.f32.mrf.mxu1  ;;  %8226 = vmatprep.mubr.f32.mxu0 %v14665_v14  ;;  %v14671_v47 = vld [vmem:[#allocation221_spill] sm:$0xff] }
 0x397   :  { %7543 = vst [vmem:[#allocation7 + $0x318] sm:$0xff] %v3880_v27  ;;  %v3350_v62 = vpop.f32.mrf.mxu0  ;;  %v3882_v26 = vadd.f32 %v3881_v28, %v3337_v0  ;;  %v14672_v14 = vld [vmem:[#allocation41_spill] sm:$0xff] }
 0x398   :  { %v3886_v23 = vpop.f32.mrf.mxu1  ;;  %8349 = vmatmul.mubr.f32.gmra.mxu1 %v14667_v33  ;;  %v3349_v58 = vadd.f32 %v3348_v49, %v14672_v14  ;;  %v14674_v33 = vld [vmem:[#allocation23_spill] sm:$0xff]  ;;  %v14679_v14 = vld [vmem:[#allocation200_spill] sm:$0xff] }
 0x399   :  { %7544 = vst [vmem:[#allocation7 + $0x320] sm:$0xff] %v3882_v26  ;;  %v3355_v29 = vpop.f32.mrf.mxu0  ;;  %v3887_v30 = vadd.f32 %v3886_v23, %v3342_v19  ;;  %8227 = vmatmul.mubr.f32.gmra.mxu0 %v14669_v5  ;;  %8351 = vmatprep.mubr.f32.mxu1 %v14670_v17  ;;  %v3351_v63 = vadd.f32 %v3350_v62, %v14674_v33  ;;  %v14675_v26 = vld [vmem:[#allocation225_spill] sm:$0xff]  ;;  %v14676_v23 = vld [vmem:[#allocation196_spill] sm:$0xff] }
 0x39a   :  { %v3888_v7 = vpop.f32.mrf.mxu1  ;;  %8229 = vmatprep.mubr.f32.mxu0 %v14671_v47  ;;  %v14677_v17 = vld [vmem:[#allocation229_spill] sm:$0xff]  ;;  %v14678_v47 = vld [vmem:[#allocation24_spill] sm:$0xff] }
 0x39b   :  { %7546 = vst [vmem:[#allocation7 + $0x330] sm:$0xff] %v3887_v30  ;;  %v3357_v27 = vpop.f32.mrf.mxu0  ;;  %v3889_v0 = vadd.f32 %v3888_v7, %v3344_v55  ;;  %v3356_v49 = vadd.f32 %v3355_v29, %v14678_v47  ;;  %v14685_v47 = vld [vmem:[#allocation208_spill] sm:$0xff] }
 0x39c   :  { %v3893_v28 = vpop.f32.mrf.mxu1  ;;  %8352 = vmatmul.mubr.f32.gmra.mxu1 %v14673_v8  ;;  %v14680_v8 = vld [vmem:[#allocation391_spill] sm:$0xff] }
 0x39d   :  { %7547 = vst [vmem:[#allocation7 + $0x338] sm:$0xff] %v3889_v0  ;;  %v3362_v22 = vpop.f32.mrf.mxu0  ;;  %v3894_v19 = vadd.f32 %v3893_v28, %v3349_v58  ;;  %8230 = vmatmul.mubr.f32.gmra.mxu0 %v14675_v26  ;;  %8354 = vmatprep.mubr.f32.mxu1 %v14676_v23  ;;  %v3358_v62 = vadd.f32 %v3357_v27, %v14680_v8  ;;  %v14681_v0 = vld [vmem:[#allocation233_spill] sm:$0xff]  ;;  %v14682_v28 = vld [vmem:[#allocation207_spill] sm:$0xff] }
 0x39e   :  { %v3895_v5 = vpop.f32.mrf.mxu1  ;;  %8232 = vmatprep.mubr.f32.mxu0 %v14677_v17  ;;  %v14683_v23 = vld [vmem:[#allocation237_spill] sm:$0xff]  ;;  %v14684_v17 = vld [vmem:[#allocation392_spill] sm:$0xff] }
 0x39f   :  { %7549 = vst [vmem:[#allocation7 + $0x348] sm:$0xff] %v3894_v19  ;;  %v3364_v30 = vpop.f32.mrf.mxu0  ;;  %v3896_v55 = vadd.f32 %v3895_v5, %v3351_v63  ;;  %v3363_v29 = vadd.f32 %v3362_v22, %v14684_v17  ;;  %v14691_v17 = vld [vmem:[#allocation219_spill] sm:$0xff] }
 0x3a0   :  { %v3900_v7 = vpop.f32.mrf.mxu1  ;;  %8355 = vmatmul.mubr.f32.gmra.mxu1 %v14679_v14  ;;  %v14686_v14 = vld [vmem:[#allocation393_spill] sm:$0xff] }
 0x3a1   :  { %7550 = vst [vmem:[#allocation7 + $0x350] sm:$0xff] %v3896_v55  ;;  %v3369_v33 = vpop.f32.mrf.mxu0  ;;  %v3901_v58 = vadd.f32 %v3900_v7, %v3356_v49  ;;  %8233 = vmatmul.mubr.f32.gmra.mxu0 %v14681_v0  ;;  %8357 = vmatprep.mubr.f32.mxu1 %v14682_v28  ;;  %v3365_v27 = vadd.f32 %v3364_v30, %v14686_v14  ;;  %v14687_v55 = vld [vmem:[#allocation241_spill] sm:$0xff]  ;;  %v14688_v7 = vld [vmem:[#allocation212_spill] sm:$0xff] }
 0x3a2   :  { %v3902_v26 = vpop.f32.mrf.mxu1  ;;  %8235 = vmatprep.mubr.f32.mxu0 %v14683_v23  ;;  %v14689_v28 = vld [vmem:[#allocation244_spill] sm:$0xff]  ;;  %v14690_v23 = vld [vmem:[#allocation26_spill] sm:$0xff] }
 0x3a3   :  { %7552 = vst [vmem:[#allocation7 + $0x360] sm:$0xff] %v3901_v58  ;;  %v3371_v19 = vpop.f32.mrf.mxu0  ;;  %v3903_v63 = vadd.f32 %v3902_v26, %v3358_v62  ;;  %v3370_v22 = vadd.f32 %v3369_v33, %v14690_v23  ;;  %v14697_v23 = vld [vmem:[#allocation224_spill] sm:$0xff] }
 0x3a4   :  { %v3907_v5 = vpop.f32.mrf.mxu1  ;;  %8358 = vmatmul.mubr.f32.gmra.mxu1 %v14685_v47  ;;  %v14692_v47 = vld [vmem:[#allocation47_spill] sm:$0xff] }
 0x3a5   :  { %7553 = vst [vmem:[#allocation7 + $0x368] sm:$0xff] %v3903_v63  ;;  %v3376_v8 = vpop.f32.mrf.mxu0  ;;  %v3908_v49 = vadd.f32 %v3907_v5, %v3363_v29  ;;  %8236 = vmatmul.mubr.f32.gmra.mxu0 %v14687_v55  ;;  %8360 = vmatprep.mubr.f32.mxu1 %v14688_v7  ;;  %v3372_v30 = vadd.f32 %v3371_v19, %v14692_v47  ;;  %v14693_v63 = vld [vmem:[#allocation248_spill] sm:$0xff]  ;;  %v14694_v5 = vld [vmem:[#allocation223_spill] sm:$0xff]  ;;  %v14695_v7 = vld [vmem:[#allocation253_spill] sm:$0xff] }
 0x3a6   :  { %v3909_v0 = vpop.f32.mrf.mxu1  ;;  %8238 = vmatprep.mubr.f32.mxu0 %v14689_v28  ;;  %v14696_v28 = vld [vmem:[#allocation50_spill] sm:$0xff] }
 0x3a7   :  { %7555 = vst [vmem:[#allocation7 + $0x378] sm:$0xff] %v3908_v49  ;;  %v3378_v58 = vpop.f32.mrf.mxu0  ;;  %v3910_v62 = vadd.f32 %v3909_v0, %v3365_v27  ;;  %v3377_v33 = vadd.f32 %v3376_v8, %v14696_v28  ;;  %v14703_v28 = vld [vmem:[#allocation394_spill] sm:$0xff] }
 0x3a8   :  { %v3914_v26 = vpop.f32.mrf.mxu1  ;;  %8361 = vmatmul.mubr.f32.gmra.mxu1 %v14691_v17  ;;  %v14698_v17 = vld [vmem:[#allocation27_spill] sm:$0xff] }
 0x3a9   :  { %7556 = vst [vmem:[#allocation7 + $0x380] sm:$0xff] %v3910_v62  ;;  %v3383_v14 = vpop.f32.mrf.mxu0  ;;  %v3915_v29 = vadd.f32 %v3914_v26, %v3370_v22  ;;  %8239 = vmatmul.mubr.f32.gmra.mxu0 %v14693_v63  ;;  %8363 = vmatprep.mubr.f32.mxu1 %v14694_v5  ;;  %v3379_v19 = vadd.f32 %v3378_v58, %v14698_v17  ;;  %v14699_v62 = vld [vmem:[#allocation259_spill] sm:$0xff]  ;;  %v14700_v26 = vld [vmem:[#allocation228_spill] sm:$0xff]  ;;  %v14701_v5 = vld [vmem:[#allocation265_spill] sm:$0xff] }
 0x3aa   :  { %v3916_v55 = vpop.f32.mrf.mxu1  ;;  %8241 = vmatprep.mubr.f32.mxu0 %v14695_v7  ;;  %v14702_v7 = vld [vmem:[#allocation29_spill] sm:$0xff] }
 0x3ab   :  { %7558 = vst [vmem:[#allocation7 + $0x390] sm:$0xff] %v3915_v29  ;;  %v3385_v49 = vpop.f32.mrf.mxu0  ;;  %v3917_v27 = vadd.f32 %v3916_v55, %v3372_v30  ;;  %v3384_v8 = vadd.f32 %v3383_v14, %v14702_v7  ;;  %v14707_v7 = vld [vmem:[#allocation396_spill] sm:$0xff] }
 0x3ac   :  { %v3921_v0 = vpop.f32.mrf.mxu1  ;;  %8364 = vmatmul.mubr.f32.gmra.mxu1 %v14697_v23  ;;  %v3386_v58 = vadd.f32 %v3385_v49, %v14703_v28 }
 0x3ad   :  { %7559 = vst [vmem:[#allocation7 + $0x398] sm:$0xff] %v3917_v27  ;;  %v3390_v47 = vpop.f32.mrf.mxu0  ;;  %v3922_v22 = vadd.f32 %v3921_v0, %v3377_v33  ;;  %8242 = vmatmul.mubr.f32.gmra.mxu0 %v14699_v62  ;;  %8366 = vmatprep.mubr.f32.mxu1 %v14700_v26  ;;  %v14704_v27 = vld [vmem:[#allocation270_spill] sm:$0xff] }
 0x3ae   :  { %v3923_v63 = vpop.f32.mrf.mxu1  ;;  %8244 = vmatprep.mubr.f32.mxu0 %v14701_v5  ;;  %v14705_v62 = vld [vmem:[#allocation274_spill] sm:$0xff]  ;;  %v14706_v5 = vld [vmem:[#allocation395_spill] sm:$0xff] }
 0x3af   :  { %7561 = vst [vmem:[#allocation7 + $0x3a8] sm:$0xff] %v3922_v22  ;;  %v3392_v29 = vpop.f32.mrf.mxu0  ;;  %v3924_v30 = vadd.f32 %v3923_v63, %v3379_v19  ;;  %v3391_v14 = vadd.f32 %v3390_v47, %v14706_v5  ;;  %v14711_v5 = vld [vmem:[#allocation35_spill] sm:$0xff] }
 0x3b0   :  { %v3928_v55 = vpop.f32.mrf.mxu1  ;;  %8367 = vmatmul.mubr.f32.gmra.mxu1 %v14514_v12  ;;  %v3393_v49 = vadd.f32 %v3392_v29, %v14707_v7 }
 0x3b1   :  { %7562 = vst [vmem:[#allocation7 + $0x3b0] sm:$0xff] %v3924_v30  ;;  %v3397_v17 = vpop.f32.mrf.mxu0  ;;  %v3929_v33 = vadd.f32 %v3928_v55, %v3384_v8  ;;  %8245 = vmatmul.mubr.f32.gmra.mxu0 %v14704_v27  ;;  %8369 = vmatprep.mubr.f32.mxu1 %v14518_v50  ;;  %v14708_v55 = vld [vmem:[#allocation280_spill] sm:$0xff]  ;;  %v14709_v27 = vld [vmem:[#allocation289_spill] sm:$0xff] }
 0x3b2   :  { %v3930_v0 = vpop.f32.mrf.mxu1  ;;  %8247 = vmatprep.mubr.f32.mxu0 %v14705_v62  ;;  %v14710_v62 = vld [vmem:[#allocation34_spill] sm:$0xff] }
 0x3b3   :  { %7564 = vst [vmem:[#allocation7 + $0x3c0] sm:$0xff] %v3929_v33  ;;  %v3399_v22 = vpop.f32.mrf.mxu0  ;;  %v3931_v19 = vadd.f32 %v3930_v0, %v3386_v58  ;;  %v3398_v47 = vadd.f32 %v3397_v17, %v14710_v62  ;;  %v14715_v62 = vld [vmem:[#allocation315_spill] sm:$0xff] }
 0x3b4   :  { %v3935_v63 = vpop.f32.mrf.mxu1  ;;  %8370 = vmatmul.mubr.f32.gmra.mxu1 %v14521_v43  ;;  %v3400_v29 = vadd.f32 %v3399_v22, %v14711_v5 }
 0x3b5   :  { %7565 = vst [vmem:[#allocation7 + $0x3c8] sm:$0xff] %v3931_v19  ;;  %v3404_v30 = vpop.f32.mrf.mxu0  ;;  %v3936_v8 = vadd.f32 %v3935_v63, %v3391_v14  ;;  %8248 = vmatmul.mubr.f32.gmra.mxu0 %v14708_v55  ;;  %8372 = vmatprep.mubr.f32.mxu1 %v14524_v18  ;;  %v14712_v63 = vld [vmem:[#allocation294_spill] sm:$0xff] }
 0x3b6   :  { %v3937_v28 = vpop.f32.mrf.mxu1  ;;  %8250 = vmatprep.mubr.f32.mxu0 %v14709_v27  ;;  %v14713_v55 = vld [vmem:[#allocation298_spill] sm:$0xff]  ;;  %v14714_v27 = vld [vmem:[#allocation36_spill] sm:$0xff] }
 0x3b7   :  { %7567 = vst [vmem:[#allocation7 + $0x3d8] sm:$0xff] %v3936_v8  ;;  %v3406_v33 = vpop.f32.mrf.mxu0  ;;  %v3938_v58 = vadd.f32 %v3937_v28, %v3393_v49  ;;  %v3405_v17 = vadd.f32 %v3404_v30, %v14714_v27  ;;  %v14719_v27 = vld [vmem:[#allocation397_spill] sm:$0xff] }
 0x3b8   :  { %v3942_v0 = vpop.f32.mrf.mxu1  ;;  %8373 = vmatmul.mubr.f32.gmra.mxu1 %v14526_v35  ;;  %v3407_v22 = vadd.f32 %v3406_v33, %v14715_v62 }
 0x3b9   :  { %7568 = vst [vmem:[#allocation7 + $0x3e0] sm:$0xff] %v3938_v58  ;;  %v3411_v19 = vpop.f32.mrf.mxu0  ;;  %v3943_v14 = vadd.f32 %v3942_v0, %v3398_v47  ;;  %8251 = vmatmul.mubr.f32.gmra.mxu0 %v14712_v63  ;;  %8375 = vmatprep.mubr.f32.mxu1 %v14527_v32  ;;  %v14716_v0 = vld [vmem:[#allocation301_spill] sm:$0xff]  ;;  %v14717_v63 = vld [vmem:[#allocation306_spill] sm:$0xff] }
 0x3ba   :  { %v3944_v7 = vpop.f32.mrf.mxu1  ;;  %8253 = vmatprep.mubr.f32.mxu0 %v14713_v55  ;;  %v14718_v55 = vld [vmem:[#allocation316_spill] sm:$0xff] }
 0x3bb   :  { %7570 = vst [vmem:[#allocation7 + $0x3f0] sm:$0xff] %v3943_v14  ;;  %v3413_v8 = vpop.f32.mrf.mxu0  ;;  %v3945_v49 = vadd.f32 %v3944_v7, %v3400_v29  ;;  %v3412_v30 = vadd.f32 %v3411_v19, %v14718_v55  ;;  %v14723_v55 = vld [vmem:[#allocation398_spill] sm:$0xff] }
 0x3bc   :  { %v3949_v28 = vpop.f32.mrf.mxu1  ;;  %8376 = vmatmul.mubr.f32.gmra.mxu1 %v14529_v52  ;;  %v3414_v33 = vadd.f32 %v3413_v8, %v14719_v27  ;;  %v14725_v27 = vld [vmem:[#allocation287_spill] sm:$0xff] }
 0x3bd   :  { %7571 = vst [vmem:[#allocation7 + $0x3f8] sm:$0xff] %v3945_v49  ;;  %v3418_v58 = vpop.f32.mrf.mxu0  ;;  %v3950_v47 = vadd.f32 %v3949_v28, %v3405_v17  ;;  %8254 = vmatmul.mubr.f32.gmra.mxu0 %v14716_v0  ;;  %8378 = vmatprep.mubr.f32.mxu1 %v14531_v61  ;;  %v14720_v28 = vld [vmem:[#allocation310_spill] sm:$0xff]  ;;  %v14721_v0 = vld [vmem:[#allocation312_spill] sm:$0xff] }
 0x3be   :  { %v3951_v5 = vpop.f32.mrf.mxu1  ;;  %8256 = vmatprep.mubr.f32.mxu0 %v14717_v63  ;;  %v14722_v63 = vld [vmem:[#allocation318_spill] sm:$0xff]  ;;  %v14901_v61 = vld [vmem:[#allocation292_spill] sm:$0xff] }
 0x3bf   :  { %7573 = vst [vmem:[#allocation7 + $0x408] sm:$0xff] %v3950_v47  ;;  %v3420_v14 = vpop.f32.mrf.mxu0  ;;  %v3952_v29 = vadd.f32 %v3951_v5, %v3407_v22  ;;  %v3419_v19 = vadd.f32 %v3418_v58, %v14722_v63  ;;  %v14728_v63 = vld [vmem:[#allocation295_spill] sm:$0xff] }
 0x3c0   :  { %v3956_v7 = vpop.f32.mrf.mxu1  ;;  %8379 = vmatmul.mubr.f32.gmra.mxu1 %v14532_v36  ;;  %v3421_v8 = vadd.f32 %v3420_v14, %v14723_v55 }
 0x3c1   :  { %7574 = vst [vmem:[#allocation7 + $0x410] sm:$0xff] %v3952_v29  ;;  %v3425_v49 = vpop.f32.mrf.mxu0  ;;  %v3957_v17 = vadd.f32 %v3956_v7, %v3412_v30  ;;  %8257 = vmatmul.mubr.f32.gmra.mxu0 %v14720_v28  ;;  %8381 = vmatprep.mubr.f32.mxu1 %v14533_v54  ;;  %v14724_v7 = vld [vmem:[#allocation313_spill] sm:$0xff]  ;;  %v14726_v54 = vld [vmem:[#allocation40_spill] sm:$0xff] }
 0x3c2   :  { %v3958_v62 = vpop.f32.mrf.mxu1  ;;  %8259 = vmatprep.mubr.f32.mxu0 %v14721_v0  ;;  %v14727_v0 = vld [vmem:[#allocation323_spill] sm:$0xff] }
 0x3c3   :  { %7576 = vst [vmem:[#allocation7 + $0x420] sm:$0xff] %v3957_v17  ;;  %v3427_v47 = vpop.f32.mrf.mxu0  ;;  %v3959_v22 = vadd.f32 %v3958_v62, %v3414_v33  ;;  %v3426_v58 = vadd.f32 %v3425_v49, %v14727_v0 }
 0x3c4   :  { %v3963_v5 = vpop.f32.mrf.mxu1  ;;  %8382 = vmatmul.mubr.f32.gmra.mxu1 %v14534_v25  ;;  %v14729_v25 = vld [vmem:[#allocation320_spill] sm:$0xff] }
 0x3c5   :  { %7577 = vst [vmem:[#allocation7 + $0x428] sm:$0xff] %v3959_v22  ;;  %v3432_v29 = vpop.f32.mrf.mxu0  ;;  %v3964_v30 = vadd.f32 %v3963_v5, %v3419_v19  ;;  %8260 = vmatmul.mubr.f32.gmra.mxu0 %v14724_v7  ;;  %8384 = vmatprep.mubr.f32.mxu1 %v14725_v27  ;;  %v3428_v14 = vadd.f32 %v3427_v47, %v14729_v25  ;;  %v14730_v5 = vld [vmem:[#allocation45_spill] sm:$0xff]  ;;  %v14731_v7 = vld [vmem:[#allocation56_spill] sm:$0xff]  ;;  %v14734_v47 = vld [vmem:[#allocation322_spill] sm:$0xff] }
 0x3c6   :  { %v3965_v28 = vpop.f32.mrf.mxu1  ;;  %8422 = vmatprep.mubr.f32.mxu0 %v14726_v54  ;;  %v14732_v54 = vld [vmem:[#allocation321_spill] sm:$0xff]  ;;  %v14896_v27 = vld [vmem:[#allocation283_spill] sm:$0xff] }
 0x3c7   :  { %7579 = vst [vmem:[#allocation7 + $0x438] sm:$0xff] %v3964_v30  ;;  %v3434_v17 = vpop.f32.mrf.mxu0  ;;  %v3966_v33 = vadd.f32 %v3965_v28, %v3421_v8  ;;  %v3433_v49 = vadd.f32 %v3432_v29, %v14732_v54  ;;  %v14733_v28 = vld [vmem:[#allocation357_spill] sm:$0xff] }
 0x3c8   :  { %v3970_v62 = vpop.f32.mrf.mxu1  ;;  %8385 = vmatmul.mubr.f32.gmra.mxu1 %v14728_v63  ;;  %v3435_v0 = vadd.f32 %v3434_v17, %v14734_v47 }
 0x3c9   :  { %7580 = vst [vmem:[#allocation7 + $0x440] sm:$0xff] %v3966_v33  ;;  %v3439_v22 = vpop.f32.mrf.mxu0  ;;  %v3971_v19 = vadd.f32 %v3970_v62, %v3426_v58  ;;  %8423 = vmatmul.mubr.f32.vlgmr.msra.gmra.mxu0 %v14730_v5  ;;  %8387 = vmatprep.mubr.f32.mxu1 %v14542_v16  ;;  %v14735_v62 = vld [vmem:[#allocation57_spill] sm:$0xff]  ;;  %v14739_v5 = vld [vmem:[#allocation324_spill] sm:$0xff] }
 0x3ca   :  { %v3972_v55 = vpop.f32.mrf.mxu1  ;;  %8425 = vmatprep.mubr.f32.mxu0 %v14731_v7  ;;  %8647 = vmatpush3.msra.mxu0 %v14635_v34  ;;  %v14736_v34 = vld [vmem:[#allocation43_spill] sm:$0xff]  ;;  %v14892_v16 = vld [vmem:[#allocation268_spill] sm:$0xff] }
 0x3cb   :  { %7582 = vst [vmem:[#allocation7 + $0x450] sm:$0xff] %v3971_v19  ;;  %v3441_v8 = vpop.f32.mrf.mxu0  ;;  %v3973_v30 = vadd.f32 %v3972_v55, %v3428_v14  ;;  %8648 = vmatprep.subr.mxu0 %v14733_v28  ;;  %v14737_v19 = vld [vmem:[#allocation58_spill] sm:$0xff]  ;;  %v14738_v14 = vld [vmem:[#allocation364_spill] sm:$0xff]  ;;  %v3440_v55 = vadd.f32 %v3439_v22, %v14739_v5 }
 0x3cc   :  { %v3977_v25 = vpop.f32.mrf.mxu1  ;;  %8388 = vmatmul.mubr.f32.gmra.mxu1 %v14545_v1  ;;  %8649 = vmatpush3.msra.mxu0 %v14733_v28  ;;  %v14742_v28 = vld [vmem:[#allocation326_spill] sm:$0xff] }
 0x3cd   :  { %7583 = vst [vmem:[#allocation7 + $0x458] sm:$0xff] %v3973_v30  ;;  %v3446_v58 = vpop.f32.mrf.mxu0  ;;  %v3978_v33 = vadd.f32 %v3977_v25, %v3433_v49  ;;  %8426 = vmatmul.mubr.f32.gmra.mxu0 %v14735_v62  ;;  %8550 = vmatprep.mubr.f32.mxu1 %v14736_v34  ;;  %v14740_v30 = vld [vmem:[#allocation49_spill] sm:$0xff]  ;;  %v3442_v25 = vadd.f32 %v3441_v8, %v14742_v28  ;;  %v14743_v34 = vld [vmem:[#allocation64_spill] sm:$0xff] }
 0x3ce   :  { %v3979_v29 = vpop.f32.mrf.mxu1  ;;  %8428 = vmatprep.mubr.f32.mxu0 %v14737_v19  ;;  %8650 = vmatprep.subr.mxu0 %v14738_v14  ;;  %v14741_v49 = vld [vmem:[#allocation365_spill] sm:$0xff] }
 0x3cf   :  { %7585 = vst [vmem:[#allocation7 + $0x468] sm:$0xff] %v3978_v33  ;;  %v3448_v7 = vpop.f32.mrf.mxu0  ;;  %v3980_v54 = vadd.f32 %v3979_v29, %v3435_v0  ;;  %8651 = vmatpush3.msra.mxu0 %v14738_v14  ;;  %v14744_v33 = vld [vmem:[#allocation69_spill] sm:$0xff]  ;;  %v14745_v0 = vld [vmem:[#allocation59_spill] sm:$0xff] }
 0x3d0   :  { %v3984_v17 = vpop.f32.mrf.mxu1  ;;  %8551 = vmatmul.mubr.f32.vlgmr.msra.gmra.mxu1 %v14740_v30  ;;  %8652 = vmatprep.subr.mxu0 %v14741_v49  ;;  %v14746_v29 = vld [vmem:[#allocation327_spill] sm:$0xff] }
 0x3d1   :  { %7586 = vst [vmem:[#allocation7 + $0x470] sm:$0xff] %v3980_v54  ;;  %v3453_v47 = vpop.f32.mrf.mxu0  ;;  %v3985_v62 = vadd.f32 %v3984_v17, %v3440_v55  ;;  %8429 = vmatmul.mubr.f32.gmra.mxu0 %v14743_v34  ;;  %8775 = vmatpush3.msra.mxu1 %v10935_v15  ;;  %v3447_v19 = vadd.f32 %v3446_v58, %v14746_v29  ;;  %v14747_v55 = vld [vmem:[#allocation60_spill] sm:$0xff]  ;;  %v14750_v34 = vld [vmem:[#allocation70_spill] sm:$0xff]  ;;  %v14751_v58 = vld [vmem:[#allocation63_spill] sm:$0xff] }
 0x3d2   :  { %v3986_v22 = vpop.f32.mrf.mxu1  ;;  %8431 = vmatprep.mubr.f32.mxu0 %v14744_v33  ;;  %8553 = vmatprep.mubr.f32.mxu1 %v14745_v0  ;;  %v14748_v54 = vld [vmem:[#allocation52_spill] sm:$0xff] }
 0x3d3   :  { %7588 = vst [vmem:[#allocation7 + $0x480] sm:$0xff] %v3985_v62  ;;  %v3455_v14 = vpop.f32.mrf.mxu0  ;;  %v3987_v5 = vadd.f32 %v3986_v22, %v3442_v25  ;;  %8776 = vmatprep.subr.mxu1 %v14560_v21  ;;  %8653 = vmatpush3.msra.mxu0 %v14741_v49  ;;  %v14749_v15 = vld [vmem:[#allocation328_spill] sm:$0xff]  ;;  %v14752_v25 = vld [vmem:[#allocation77_spill] sm:$0xff] }
 0x3d4   :  { %v3991_v8 = vpop.f32.mrf.mxu1  ;;  %8554 = vmatmul.mubr.f32.gmra.mxu1 %v14747_v55  ;;  %8654 = vmatprep.subr.mxu0 %v14748_v54  ;;  %v3449_v17 = vadd.f32 %v3448_v7, %v14749_v15  ;;  %v14753_v49 = vld [vmem:[#allocation329_spill] sm:$0xff]  ;;  %v14754_v29 = vld [vmem:[#allocation68_spill] sm:$0xff] }
 0x3d5   :  { %7589 = vst [vmem:[#allocation7 + $0x488] sm:$0xff] %v3987_v5  ;;  %v3460_v30 = vpop.f32.mrf.mxu0  ;;  %v3992_v28 = vadd.f32 %v3991_v8, %v3447_v19  ;;  %8432 = vmatmul.mubr.f32.gmra.mxu0 %v14750_v34  ;;  %8556 = vmatprep.mubr.f32.mxu1 %v14751_v58  ;;  %v3454_v22 = vadd.f32 %v3453_v47, %v14753_v49  ;;  %v14755_v19 = vld [vmem:[#allocation370_spill] sm:$0xff]  ;;  %v14758_v47 = vld [vmem:[#allocation72_spill] sm:$0xff] }
 0x3d6   :  { %v3993_v62 = vpop.f32.mrf.mxu1  ;;  %8434 = vmatprep.mubr.f32.mxu0 %v14752_v25  ;;  %8777 = vmatpush3.msra.mxu1 %v14560_v21  ;;  %v14756_v5 = vld [vmem:[#allocation330_spill] sm:$0xff]  ;;  %v14761_v25 = vld [vmem:[#allocation76_spill] sm:$0xff] }
 0x3d7   :  { %7591 = vst [vmem:[#allocation7 + $0x498] sm:$0xff] %v3992_v28  ;;  %v3462_v33 = vpop.f32.mrf.mxu0  ;;  %v3994_v0 = vadd.f32 %v3993_v62, %v3449_v17  ;;  %8778 = vmatprep.subr.mxu1 %v14565_v40  ;;  %8655 = vmatpush3.msra.mxu0 %v14748_v54  ;;  %v3456_v8 = vadd.f32 %v3455_v14, %v14756_v5  ;;  %v14757_v21 = vld [vmem:[#allocation78_spill] sm:$0xff]  ;;  %v14759_v17 = vld [vmem:[#allocation85_spill] sm:$0xff]  ;;  %v14760_v54 = vld [vmem:[#allocation331_spill] sm:$0xff] }
 0x3d8   :  { %v3998_v7 = vpop.f32.mrf.mxu1  ;;  %8557 = vmatmul.mubr.f32.gmra.mxu1 %v14754_v29  ;;  %8656 = vmatprep.subr.mxu0 %v14755_v19  ;;  %v3461_v34 = vadd.f32 %v3460_v30, %v14760_v54  ;;  %v14762_v49 = vld [vmem:[#allocation54_spill] sm:$0xff]  ;;  %v14765_v30 = vld [vmem:[#allocation80_spill] sm:$0xff] }
 0x3d9   :  { %7592 = vst [vmem:[#allocation7 + $0x4a0] sm:$0xff] %v3994_v0  ;;  %v3467_v55 = vpop.f32.mrf.mxu0  ;;  %v3999_v15 = vadd.f32 %v3998_v7, %v3454_v22  ;;  %8435 = vmatmul.mubr.f32.gmra.mxu0 %v14757_v21  ;;  %8559 = vmatprep.mubr.f32.mxu1 %v14758_v47  ;;  %v14763_v22 = vld [vmem:[#allocation332_spill] sm:$0xff]  ;;  %v14770_v54 = vld [vmem:[#allocation334_spill] sm:$0xff] }
 0x3da   :  { %v4000_v28 = vpop.f32.mrf.mxu1  ;;  %8437 = vmatprep.mubr.f32.mxu0 %v14759_v17  ;;  %8779 = vmatpush3.msra.mxu1 %v14565_v40  ;;  %v3463_v0 = vadd.f32 %v3462_v33, %v14763_v22  ;;  %v14764_v40 = vld [vmem:[#allocation89_spill] sm:$0xff]  ;;  %v14769_v17 = vld [vmem:[#allocation374_spill] sm:$0xff] }
 0x3db   :  { %7594 = vst [vmem:[#allocation7 + $0x4b0] sm:$0xff] %v3999_v15  ;;  %v3469_v58 = vpop.f32.mrf.mxu0  ;;  %v4001_v62 = vadd.f32 %v4000_v28, %v3456_v8  ;;  %8780 = vmatprep.subr.mxu1 %v14569_v51  ;;  %8657 = vmatpush3.msra.mxu0 %v14755_v19  ;;  %v14766_v8 = vld [vmem:[#allocation90_spill] sm:$0xff]  ;;  %v14767_v19 = vld [vmem:[#allocation333_spill] sm:$0xff]  ;;  %v14768_v28 = vld [vmem:[#allocation84_spill] sm:$0xff] }
 0x3dc   :  { %v4005_v14 = vpop.f32.mrf.mxu1  ;;  %8560 = vmatmul.mubr.f32.gmra.mxu1 %v14761_v25  ;;  %8658 = vmatprep.subr.mxu0 %v14762_v49  ;;  %v3468_v15 = vadd.f32 %v3467_v55, %v14767_v19  ;;  %v14772_v55 = vld [vmem:[#allocation88_spill] sm:$0xff]  ;;  %v14773_v22 = vld [vmem:[#allocation101_spill] sm:$0xff] }
 0x3dd   :  { %7595 = vst [vmem:[#allocation7 + $0x4b8] sm:$0xff] %v4001_v62  ;;  %v3474_v7 = vpop.f32.mrf.mxu0  ;;  %v4006_v29 = vadd.f32 %v4005_v14, %v3461_v34  ;;  %8438 = vmatmul.mubr.f32.gmra.mxu0 %v14764_v40  ;;  %8562 = vmatprep.mubr.f32.mxu1 %v14765_v30  ;;  %v3470_v34 = vadd.f32 %v3469_v58, %v14770_v54  ;;  %v14775_v30 = vld [vmem:[#allocation92_spill] sm:$0xff] }
 0x3de   :  { %v4007_v5 = vpop.f32.mrf.mxu1  ;;  %8440 = vmatprep.mubr.f32.mxu0 %v14766_v8  ;;  %8781 = vmatpush3.msra.mxu1 %v14569_v51  ;;  %v14771_v51 = vld [vmem:[#allocation97_spill] sm:$0xff]  ;;  %v14777_v8 = vld [vmem:[#allocation336_spill] sm:$0xff] }
 0x3df   :  { %7597 = vst [vmem:[#allocation7 + $0x4c8] sm:$0xff] %v4006_v29  ;;  %v3476_v21 = vpop.f32.mrf.mxu0  ;;  %v4008_v47 = vadd.f32 %v4007_v5, %v3463_v0  ;;  %8782 = vmatprep.subr.mxu1 %v14574_v2  ;;  %8659 = vmatpush3.msra.mxu0 %v14762_v49  ;;  %v14774_v49 = vld [vmem:[#allocation335_spill] sm:$0xff]  ;;  %v14776_v5 = vld [vmem:[#allocation376_spill] sm:$0xff] }
 0x3e0   :  { %v4012_v33 = vpop.f32.mrf.mxu1  ;;  %8563 = vmatmul.mubr.f32.gmra.mxu1 %v14768_v28  ;;  %8660 = vmatprep.subr.mxu0 %v14769_v17  ;;  %v3475_v0 = vadd.f32 %v3474_v7, %v14774_v49  ;;  %v3477_v19 = vadd.f32 %v3476_v21, %v14777_v8  ;;  %v14779_v7 = vld [vmem:[#allocation96_spill] sm:$0xff] }
 0x3e1   :  { %7598 = vst [vmem:[#allocation7 + $0x4d0] sm:$0xff] %v4008_v47  ;;  %v3481_v62 = vpop.f32.mrf.mxu0  ;;  %v4013_v14 = vadd.f32 %v4012_v33, %v3468_v15  ;;  %8441 = vmatmul.mubr.f32.gmra.mxu0 %v14771_v51  ;;  %8565 = vmatprep.mubr.f32.mxu1 %v14772_v55  ;;  %v14780_v28 = vld [vmem:[#allocation108_spill] sm:$0xff]  ;;  %v14783_v55 = vld [vmem:[#allocation66_spill] sm:$0xff] }
 0x3e2   :  { %v4014_v25 = vpop.f32.mrf.mxu1  ;;  %8443 = vmatprep.mubr.f32.mxu0 %v14773_v22  ;;  %8783 = vmatpush3.msra.mxu1 %v14574_v2  ;;  %v14778_v2 = vld [vmem:[#allocation19_spill] sm:$0xff]  ;;  %v14782_v51 = vld [vmem:[#allocation100_spill] sm:$0xff] }
 0x3e3   :  { %7600 = vst [vmem:[#allocation7 + $0x4e0] sm:$0xff] %v4013_v14  ;;  %v3483_v29 = vpop.f32.mrf.mxu0  ;;  %v4015_v40 = vadd.f32 %v4014_v25, %v3470_v34  ;;  %8784 = vmatprep.subr.mxu1 %v14577_v24  ;;  %8661 = vmatpush3.msra.mxu0 %v14769_v17  ;;  %v14781_v17 = vld [vmem:[#allocation337_spill] sm:$0xff]  ;;  %v14784_v25 = vld [vmem:[#allocation338_spill] sm:$0xff] }
 0x3e4   :  { %v4019_v58 = vpop.f32.mrf.mxu1  ;;  %8566 = vmatmul.mubr.f32.gmra.mxu1 %v14775_v30  ;;  %8662 = vmatprep.subr.mxu0 %v14776_v5  ;;  %v3482_v54 = vadd.f32 %v3481_v62, %v14781_v17  ;;  %v3484_v22 = vadd.f32 %v3483_v29, %v14784_v25  ;;  %v14786_v62 = vld [vmem:[#allocation103_spill] sm:$0xff] }
 0x3e5   :  { %7601 = vst [vmem:[#allocation7 + $0x4e8] sm:$0xff] %v4015_v40  ;;  %v3488_v15 = vpop.f32.mrf.mxu0  ;;  %v4020_v47 = vadd.f32 %v4019_v58, %v3475_v0  ;;  %8444 = vmatmul.mubr.f32.gmra.mxu0 %v14778_v2  ;;  %8568 = vmatprep.mubr.f32.mxu1 %v14779_v7  ;;  %v14787_v58 = vld [vmem:[#allocation116_spill] sm:$0xff]  ;;  %v14788_v30 = vld [vmem:[#allocation339_spill] sm:$0xff]  ;;  %v14790_v2 = vld [vmem:[#allocation82_spill] sm:$0xff] }
 0x3e6   :  { %v4021_v33 = vpop.f32.mrf.mxu1  ;;  %8446 = vmatprep.mubr.f32.mxu0 %v14780_v28  ;;  %8785 = vmatpush3.msra.mxu1 %v14577_v24  ;;  %v14785_v24 = vld [vmem:[#allocation109_spill] sm:$0xff]  ;;  %v14791_v7 = vld [vmem:[#allocation340_spill] sm:$0xff] }
 0x3e7   :  { %7603 = vst [vmem:[#allocation7 + $0x4f8] sm:$0xff] %v4020_v47  ;;  %v3490_v34 = vpop.f32.mrf.mxu0  ;;  %v4022_v14 = vadd.f32 %v4021_v33, %v3477_v19  ;;  %8786 = vmatprep.subr.mxu1 %v14581_v38  ;;  %8663 = vmatpush3.msra.mxu0 %v14776_v5  ;;  %v3489_v5 = vadd.f32 %v3488_v15, %v14788_v30  ;;  %v14789_v47 = vld [vmem:[#allocation107_spill] sm:$0xff] }
 0x3e8   :  { %v4026_v21 = vpop.f32.mrf.mxu1  ;;  %8569 = vmatmul.mubr.f32.gmra.mxu1 %v14782_v51  ;;  %8664 = vmatprep.subr.mxu0 %v14783_v55  ;;  %v3491_v33 = vadd.f32 %v3490_v34, %v14791_v7  ;;  %v14793_v15 = vld [vmem:[#allocation111_spill] sm:$0xff]  ;;  %v14803_v7 = vld [vmem:[#allocation122_spill] sm:$0xff] }
 0x3e9   :  { %7604 = vst [vmem:[#allocation7 + $0x500] sm:$0xff] %v4022_v14  ;;  %v3495_v49 = vpop.f32.mrf.mxu0  ;;  %v4027_v0 = vadd.f32 %v4026_v21, %v3482_v54  ;;  %8447 = vmatmul.mubr.f32.gmra.mxu0 %v14785_v24  ;;  %8571 = vmatprep.mubr.f32.mxu1 %v14786_v62  ;;  %v14794_v14 = vld [vmem:[#allocation121_spill] sm:$0xff]  ;;  %v14798_v24 = vld [vmem:[#allocation342_spill] sm:$0xff] }
 0x3ea   :  { %v4028_v40 = vpop.f32.mrf.mxu1  ;;  %8449 = vmatprep.mubr.f32.mxu0 %v14787_v58  ;;  %8787 = vmatpush3.msra.mxu1 %v14581_v38  ;;  %v14792_v38 = vld [vmem:[#allocation120_spill] sm:$0xff]  ;;  %v14795_v21 = vld [vmem:[#allocation341_spill] sm:$0xff] }
 0x3eb   :  { %7606 = vst [vmem:[#allocation7 + $0x510] sm:$0xff] %v4027_v0  ;;  %v3497_v8 = vpop.f32.mrf.mxu0  ;;  %v4029_v19 = vadd.f32 %v4028_v40, %v3484_v22  ;;  %8788 = vmatprep.subr.mxu1 %v14586_v45  ;;  %8665 = vmatpush3.msra.mxu0 %v14783_v55  ;;  %v3496_v51 = vadd.f32 %v3495_v49, %v14795_v21  ;;  %v14796_v22 = vld [vmem:[#allocation115_spill] sm:$0xff] }
 0x3ec   :  { %v4033_v29 = vpop.f32.mrf.mxu1  ;;  %8572 = vmatmul.mubr.f32.gmra.mxu1 %v14789_v47  ;;  %8666 = vmatprep.subr.mxu0 %v14790_v2  ;;  %v14797_v0 = vld [vmem:[#allocation387_spill] sm:$0xff]  ;;  %v3498_v62 = vadd.f32 %v3497_v8, %v14798_v24  ;;  %v14811_v24 = vld [vmem:[#allocation25_spill] sm:$0xff] }
 0x3ed   :  { %7607 = vst [vmem:[#allocation7 + $0x518] sm:$0xff] %v4029_v19  ;;  %v3502_v28 = vpop.f32.mrf.mxu0  ;;  %v4034_v17 = vadd.f32 %v4033_v29, %v3489_v5  ;;  %8450 = vmatmul.mubr.f32.gmra.mxu0 %v14792_v38  ;;  %8574 = vmatprep.mubr.f32.mxu1 %v14793_v15  ;;  %v14800_v49 = vld [vmem:[#allocation119_spill] sm:$0xff] }
 0x3ee   :  { %v4035_v54 = vpop.f32.mrf.mxu1  ;;  %8452 = vmatprep.mubr.f32.mxu0 %v14794_v14  ;;  %8789 = vmatpush3.msra.mxu1 %v14586_v45  ;;  %v14799_v45 = vld [vmem:[#allocation127_spill] sm:$0xff] }
 0x3ef   :  { %7609 = vst [vmem:[#allocation7 + $0x528] sm:$0xff] %v4034_v17  ;;  %v3504_v55 = vpop.f32.mrf.mxu0  ;;  %v4036_v25 = vadd.f32 %v4035_v54, %v3491_v33  ;;  %8790 = vmatprep.subr.mxu1 %v14594_v59  ;;  %8667 = vmatpush3.msra.mxu0 %v14790_v2  ;;  %v14801_v5 = vld [vmem:[#allocation131_spill] sm:$0xff]  ;;  %v14804_v33 = vld [vmem:[#allocation390_spill] sm:$0xff]  ;;  %v14805_v17 = vld [vmem:[#allocation344_spill] sm:$0xff] }
 0x3f0   :  { %v4040_v34 = vpop.f32.mrf.mxu1  ;;  %8575 = vmatmul.mubr.f32.gmra.mxu1 %v14796_v22  ;;  %8668 = vmatprep.subr.mxu0 %v14797_v0  ;;  %v14802_v19 = vld [vmem:[#allocation343_spill] sm:$0xff]  ;;  %v3505_v38 = vadd.f32 %v3504_v55, %v14805_v17  ;;  %v14819_v17 = vld [vmem:[#allocation348_spill] sm:$0xff] }
 0x3f1   :  { %7610 = vst [vmem:[#allocation7 + $0x530] sm:$0xff] %v4036_v25  ;;  %v3509_v40 = vpop.f32.mrf.mxu0  ;;  %v4041_v58 = vadd.f32 %v4040_v34, %v3496_v51  ;;  %8453 = vmatmul.mubr.f32.gmra.mxu0 %v14799_v45  ;;  %8577 = vmatprep.mubr.f32.mxu1 %v14800_v49  ;;  %v3503_v29 = vadd.f32 %v3502_v28, %v14802_v19  ;;  %v14807_v28 = vld [vmem:[#allocation126_spill] sm:$0xff]  ;;  %v14808_v21 = vld [vmem:[#allocation139_spill] sm:$0xff]  ;;  %v14809_v51 = vld [vmem:[#allocation345_spill] sm:$0xff] }
 0x3f2   :  { %v4042_v30 = vpop.f32.mrf.mxu1  ;;  %8455 = vmatprep.mubr.f32.mxu0 %v14801_v5  ;;  %8791 = vmatpush3.msra.mxu1 %v14594_v59  ;;  %v14806_v59 = vld [vmem:[#allocation135_spill] sm:$0xff]  ;;  %v3510_v25 = vadd.f32 %v3509_v40, %v14809_v51  ;;  %v14814_v40 = vld [vmem:[#allocation134_spill] sm:$0xff] }
 0x3f3   :  { %7612 = vst [vmem:[#allocation7 + $0x540] sm:$0xff] %v4041_v58  ;;  %v3511_v47 = vpop.f32.mrf.mxu0  ;;  %v4043_v2 = vadd.f32 %v4042_v30, %v3498_v62  ;;  %8792 = vmatprep.subr.mxu1 %v14602_v48  ;;  %8669 = vmatpush3.msra.mxu0 %v14797_v0  ;;  %v14810_v0 = vld [vmem:[#allocation130_spill] sm:$0xff]  ;;  %v14815_v5 = vld [vmem:[#allocation147_spill] sm:$0xff] }
 0x3f4   :  { %v4047_v8 = vpop.f32.mrf.mxu1  ;;  %8578 = vmatmul.mubr.f32.gmra.mxu1 %v14803_v7  ;;  %8670 = vmatprep.subr.mxu0 %v14804_v33  ;;  %v14812_v62 = vld [vmem:[#allocation346_spill] sm:$0xff]  ;;  %v14816_v19 = vld [vmem:[#allocation347_spill] sm:$0xff] }
 0x3f5   :  { %7613 = vst [vmem:[#allocation7 + $0x548] sm:$0xff] %v4043_v2  ;;  %v3516_v15 = vpop.f32.mrf.mxu0  ;;  %v4048_v54 = vadd.f32 %v4047_v8, %v3503_v29  ;;  %8456 = vmatmul.mubr.f32.gmra.mxu0 %v14806_v59  ;;  %8580 = vmatprep.mubr.f32.mxu1 %v14807_v28  ;;  %v3512_v58 = vadd.f32 %v3511_v47, %v14812_v62  ;;  %v14817_v7 = vld [vmem:[#allocation138_spill] sm:$0xff] }
 0x3f6   :  { %v4049_v14 = vpop.f32.mrf.mxu1  ;;  %8458 = vmatprep.mubr.f32.mxu0 %v14808_v21  ;;  %8793 = vmatpush3.msra.mxu1 %v14602_v48  ;;  %v14813_v48 = vld [vmem:[#allocation140_spill] sm:$0xff]  ;;  %v3517_v29 = vadd.f32 %v3516_v15, %v14816_v19  ;;  %v14821_v15 = vld [vmem:[#allocation142_spill] sm:$0xff]  ;;  %v14823_v21 = vld [vmem:[#allocation349_spill] sm:$0xff] }
 0x3f7   :  { %7615 = vst [vmem:[#allocation7 + $0x558] sm:$0xff] %v4048_v54  ;;  %v3518_v34 = vpop.f32.mrf.mxu0  ;;  %v4050_v22 = vadd.f32 %v4049_v14, %v3505_v38  ;;  %8794 = vmatprep.subr.mxu1 %v14610_v56  ;;  %8671 = vmatpush3.msra.mxu0 %v14804_v33  ;;  %v14818_v33 = vld [vmem:[#allocation32_spill] sm:$0xff] }
 0x3f8   :  { %v4054_v55 = vpop.f32.mrf.mxu1  ;;  %8581 = vmatmul.mubr.f32.gmra.mxu1 %v14810_v0  ;;  %8672 = vmatprep.subr.mxu0 %v14811_v24  ;;  %v3519_v38 = vadd.f32 %v3518_v34, %v14819_v17  ;;  %v14822_v14 = vld [vmem:[#allocation152_spill] sm:$0xff]  ;;  %v14825_v0 = vld [vmem:[#allocation319_spill] sm:$0xff] }
 0x3f9   :  { %7616 = vst [vmem:[#allocation7 + $0x560] sm:$0xff] %v4050_v22  ;;  %v3523_v45 = vpop.f32.mrf.mxu0  ;;  %v4055_v49 = vadd.f32 %v4054_v55, %v3510_v25  ;;  %8459 = vmatmul.mubr.f32.gmra.mxu0 %v14813_v48  ;;  %8583 = vmatprep.mubr.f32.mxu1 %v14814_v40  ;;  %v14824_v55 = vld [vmem:[#allocation146_spill] sm:$0xff]  ;;  %v14829_v40 = vld [vmem:[#allocation163_spill] sm:$0xff] }
 0x3fa   :  { %v4056_v30 = vpop.f32.mrf.mxu1  ;;  %8461 = vmatprep.mubr.f32.mxu0 %v14815_v5  ;;  %8795 = vmatpush3.msra.mxu1 %v14610_v56  ;;  %v14820_v56 = vld [vmem:[#allocation151_spill] sm:$0xff]  ;;  %v3524_v51 = vadd.f32 %v3523_v45, %v14823_v21  ;;  %v14828_v45 = vld [vmem:[#allocation150_spill] sm:$0xff] }
 0x3fb   :  { %7618 = vst [vmem:[#allocation7 + $0x570] sm:$0xff] %v4055_v49  ;;  %v3525_v2 = vpop.f32.mrf.mxu0  ;;  %v4057_v8 = vadd.f32 %v4056_v30, %v3512_v58  ;;  %8796 = vmatprep.subr.mxu1 %v14618_v53  ;;  %8673 = vmatpush3.msra.mxu0 %v14811_v24  ;;  %v14826_v24 = vld [vmem:[#allocation350_spill] sm:$0xff]  ;;  %v14830_v30 = vld [vmem:[#allocation351_spill] sm:$0xff] }
 0x3fc   :  { %v4061_v47 = vpop.f32.mrf.mxu1  ;;  %8584 = vmatmul.mubr.f32.gmra.mxu1 %v14817_v7  ;;  %8674 = vmatprep.subr.mxu0 %v14818_v33  ;;  %v3526_v62 = vadd.f32 %v3525_v2, %v14826_v24  ;;  %v14840_v24 = vld [vmem:[#allocation166_spill] sm:$0xff] }
 0x3fd   :  { %7619 = vst [vmem:[#allocation7 + $0x578] sm:$0xff] %v4057_v8  ;;  %v3530_v54 = vpop.f32.mrf.mxu0  ;;  %v4062_v59 = vadd.f32 %v4061_v47, %v3517_v29  ;;  %8462 = vmatmul.mubr.f32.gmra.mxu0 %v14820_v56  ;;  %8586 = vmatprep.mubr.f32.mxu1 %v14821_v15  ;;  %v14831_v8 = vld [vmem:[#allocation154_spill] sm:$0xff]  ;;  %v14836_v56 = vld [vmem:[#allocation261_spill] sm:$0xff] }
 0x3fe   :  { %v4063_v28 = vpop.f32.mrf.mxu1  ;;  %8464 = vmatprep.mubr.f32.mxu0 %v14822_v14  ;;  %8797 = vmatpush3.msra.mxu1 %v14618_v53  ;;  %v14827_v53 = vld [vmem:[#allocation158_spill] sm:$0xff]  ;;  %v3531_v5 = vadd.f32 %v3530_v54, %v14830_v30  ;;  %v14844_v30 = vld [vmem:[#allocation232_spill] sm:$0xff] }
 0x3ff   :  { %7621 = vst [vmem:[#allocation7 + $0x588] sm:$0xff] %v4062_v59  ;;  %v3532_v25 = vpop.f32.mrf.mxu0  ;;  %v4064_v22 = vadd.f32 %v4063_v28, %v3519_v38  ;;  %8798 = vmatprep.subr.mxu1 %v14626_v57  ;;  %8675 = vmatpush3.msra.mxu0 %v14818_v33  ;;  %v14832_v47 = vld [vmem:[#allocation258_spill] sm:$0xff]  ;;  %v14833_v38 = vld [vmem:[#allocation167_spill] sm:$0xff] }
 0x400   :  { %v4068_v34 = vpop.f32.mrf.mxu1  ;;  %8587 = vmatmul.mubr.f32.gmra.mxu1 %v14824_v55  ;;  %8676 = vmatprep.subr.mxu0 %v14825_v0  ;;  %v3533_v7 = vadd.f32 %v3532_v25, %v14832_v47  ;;  %v14835_v59 = vld [vmem:[#allocation171_spill] sm:$0xff]  ;;  %v14838_v25 = vld [vmem:[#allocation264_spill] sm:$0xff] }
 0x401   :  { %7622 = vst [vmem:[#allocation7 + $0x590] sm:$0xff] %v4064_v22  ;;  %v3537_v58 = vpop.f32.mrf.mxu0  ;;  %v4069_v49 = vadd.f32 %v4068_v34, %v3524_v51  ;;  %8465 = vmatmul.mubr.f32.gmra.mxu0 %v14827_v53  ;;  %8589 = vmatprep.mubr.f32.mxu1 %v14828_v45  ;;  %v14837_v51 = vld [vmem:[#allocation162_spill] sm:$0xff]  ;;  %v14847_v47 = vld [vmem:[#allocation184_spill] sm:$0xff] }
 0x402   :  { %v4070_v48 = vpop.f32.mrf.mxu1  ;;  %8467 = vmatprep.mubr.f32.mxu0 %v14829_v40  ;;  %8799 = vmatpush3.msra.mxu1 %v14626_v57  ;;  %v14834_v57 = vld [vmem:[#allocation156_spill] sm:$0xff]  ;;  %v3538_v15 = vadd.f32 %v3537_v58, %v14836_v56  ;;  %v14842_v58 = vld [vmem:[#allocation399_spill] sm:$0xff]  ;;  %v14843_v40 = vld [vmem:[#allocation170_spill] sm:$0xff] }
 0x403   :  { %7624 = vst [vmem:[#allocation7 + $0x5a0] sm:$0xff] %v4069_v49  ;;  %v3539_v19 = vpop.f32.mrf.mxu0  ;;  %v4071_v29 = vadd.f32 %v4070_v48, %v3526_v62  ;;  %8800 = vmatprep.subr.mxu1 %v14633_v20  ;;  %8677 = vmatpush3.msra.mxu0 %v14825_v0  ;;  %v14839_v0 = vld [vmem:[#allocation172_spill] sm:$0xff]  ;;  %v14841_v62 = vld [vmem:[#allocation179_spill] sm:$0xff]  ;;  %v14850_v56 = vld [vmem:[#allocation182_spill] sm:$0xff] }
 0x404   :  { %v4075_v2 = vpop.f32.mrf.mxu1  ;;  %8590 = vmatmul.mubr.f32.gmra.mxu1 %v14831_v8  ;;  %v3540_v22 = vadd.f32 %v3539_v19, %v14838_v25  ;;  %v14846_v8 = vld [vmem:[#allocation174_spill] sm:$0xff] }
 0x405   :  { %7625 = vst [vmem:[#allocation7 + $0x5a8] sm:$0xff] %v4071_v29  ;;  %v3544_v33 = vpop.f32.mrf.mxu0  ;;  %v4076_v17 = vadd.f32 %v4075_v2, %v3531_v5  ;;  %8468 = vmatmul.mubr.f32.gmra.mxu0 %v14833_v38  ;;  %8592 = vmatprep.mubr.f32.mxu1 %v14834_v57  ;;  %v14845_v2 = vld [vmem:[#allocation183_spill] sm:$0xff]  ;;  %v14848_v38 = vld [vmem:[#allocation178_spill] sm:$0xff] }
 0x406   :  { %v4077_v54 = vpop.f32.mrf.mxu1  ;;  %8470 = vmatprep.mubr.f32.mxu0 %v14835_v59  ;;  %8801 = vmatpush3.msra.mxu1 %v14633_v20  ;;  %v3545_v49 = vadd.f32 %v3544_v33, %v14842_v58  ;;  %v14849_v59 = vld [vmem:[#allocation190_spill] sm:$0xff] }
 0x407   :  { %7627 = vst [vmem:[#allocation7 + $0x5b8] sm:$0xff] %v4076_v17  ;;  %v3546_v28 = vpop.f32.mrf.mxu0  ;;  %v4078_v14 = vadd.f32 %v4077_v54, %v3533_v7  ;;  %8802 = vmatprep.subr.mxu1 %v14641_v10 }
 0x408   :  { %v4082_v21 = vpop.f32.mrf.mxu1  ;;  %8593 = vmatmul.mubr.f32.gmra.mxu1 %v14837_v51  ;;  %v3547_v5 = vadd.f32 %v3546_v28, %v14844_v30  ;;  %v14851_v28 = vld [vmem:[#allocation195_spill] sm:$0xff]  ;;  %v14852_v51 = vld [vmem:[#allocation186_spill] sm:$0xff] }
 0x409   :  { %7628 = vst [vmem:[#allocation7 + $0x5c0] sm:$0xff] %v4078_v14  ;;  %v4083_v34 = vadd.f32 %v4082_v21, %v3538_v15  ;;  %v8168_v55 = vpop.f32.mrf.mxu0  ;;  %8471 = vmatmul.mubr.f32.gmra.mxu0 %v14839_v0  ;;  %8595 = vmatprep.mubr.f32.mxu1 %v14840_v24  ;;  %v14855_v24 = vld [vmem:[#allocation203_spill] sm:$0xff] }
 0x40a   :  { %v4084_v20 = vpop.f32.mrf.mxu1  ;;  %8473 = vmatprep.mubr.f32.mxu0 %v14841_v62  ;;  %8803 = vmatpush3.msra.mxu1 %v14641_v10 }
 0x40b   :  { %7630 = vst [vmem:[#allocation7 + $0x5d0] sm:$0xff] %v4083_v34  ;;  %v4085_v53 = vadd.f32 %v4084_v20, %v3540_v22  ;;  %v4181_v45 = vpop.f32.mrf.mxu0  ;;  %8804 = vmatprep.subr.mxu1 %v14648_v31  ;;  %v14853_v34 = vld [vmem:[#allocation199_spill] sm:$0xff] }
 0x40c   :  { %v4089_v48 = vpop.f32.mrf.mxu1  ;;  %8596 = vmatmul.mubr.f32.gmra.mxu1 %v14843_v40  ;;  %v14858_v40 = vld [vmem:[#allocation198_spill] sm:$0xff] }
 0x40d   :  { %7631 = vst [vmem:[#allocation7 + $0x5d8] sm:$0xff] %v4085_v53  ;;  %v4090_v19 = vadd.f32 %v4089_v48, %v3545_v49  ;;  %v8171_v29 = vpop.f32.mrf.mxu0  ;;  %8474 = vmatmul.mubr.f32.gmra.mxu0 %v14845_v2  ;;  %8598 = vmatprep.mubr.f32.mxu1 %v14846_v8  ;;  %v14856_v49 = vld [vmem:[#allocation194_spill] sm:$0xff]  ;;  %v14857_v48 = vld [vmem:[#allocation204_spill] sm:$0xff] }
 0x40e   :  { %v4091_v10 = vpop.f32.mrf.mxu1  ;;  %8476 = vmatprep.mubr.f32.mxu0 %v14847_v47  ;;  %8805 = vmatpush3.msra.mxu1 %v14648_v31  ;;  %v14860_v8 = vld [vmem:[#allocation202_spill] sm:$0xff] }
 0x40f   :  { %7633 = vst [vmem:[#allocation7 + $0x5e8] sm:$0xff] %v4090_v19  ;;  %v4092_v7 = vadd.f32 %v4091_v10, %v3547_v5  ;;  %v4201_v33 = vpop.f32.mrf.mxu0  ;;  %v14859_v5 = vld [vmem:[#allocation211_spill] sm:$0xff] }
 0x410   :  { %v8296_v17 = vpop.f32.mrf.mxu1  ;;  %8599 = vmatmul.mubr.f32.gmra.mxu1 %v14848_v38  ;;  %v14863_v38 = vld [vmem:[#allocation216_spill] sm:$0xff] }
 0x411   :  { %7634 = vst [vmem:[#allocation7 + $0x5f0] sm:$0xff] %v4092_v7  ;;  %v8174_v57 = vpop.f32.mrf.mxu0  ;;  %v12407_v54 = vadd.f32 %v8296_v17, %v8168_v55  ;;  %8477 = vmatmul.mubr.f32.gmra.mxu0 %v14849_v59  ;;  %8601 = vmatprep.mubr.f32.mxu1 %v14850_v56  ;;  %v14854_v55 = vld [vmem:[#allocation188_spill] sm:$0xff]  ;;  %v14861_v7 = vld [vmem:[#allocation215_spill] sm:$0xff] }
 0x412   :  { %v4962_v15 = vpop.f32.mrf.mxu1  ;;  %8479 = vmatprep.mubr.f32.mxu0 %v14851_v28 }
 0x413   :  { %v4221_v14 = vpop.f32.mrf.mxu0  ;;  %v12412_v21 = vadd.f32 %v4962_v15, %v4181_v45  ;;  %v14864_v15 = vld [vmem:[#allocation210_spill] sm:$0xff] }
 0x414   :  { %v8299_v31 = vpop.f32.mrf.mxu1  ;;  %8602 = vmatmul.mubr.f32.gmra.mxu1 %v14852_v51  ;;  %v14866_v51 = vld [vmem:[#allocation214_spill] sm:$0xff] }
 0x415   :  { %v8177_v25 = vpop.f32.mrf.mxu0  ;;  %v12415_v22 = vadd.f32 %v8299_v31, %v8171_v29  ;;  %8480 = vmatmul.mubr.f32.gmra.mxu0 %v14853_v34  ;;  %8604 = vmatprep.mubr.f32.mxu1 %v14854_v55  ;;  %v14865_v31 = vld [vmem:[#allocation222_spill] sm:$0xff]  ;;  %v14867_v34 = vld [vmem:[#allocation227_spill] sm:$0xff] }
 0x416   :  { %v4974_v0 = vpop.f32.mrf.mxu1  ;;  %8482 = vmatprep.mubr.f32.mxu0 %v14855_v24 }
 0x417   :  { %v4241_v20 = vpop.f32.mrf.mxu0  ;;  %v12420_v62 = vadd.f32 %v4974_v0, %v4201_v33  ;;  %v14862_v33 = vld [vmem:[#allocation206_spill] sm:$0xff] }
 0x418   :  { %v8302_v58 = vpop.f32.mrf.mxu1  ;;  %8605 = vmatmul.mubr.f32.gmra.mxu1 %v14856_v49 }
 0x419   :  { %v8180_v53 = vpop.f32.mrf.mxu0  ;;  %v12423_v45 = vadd.f32 %v8302_v58, %v8174_v57  ;;  %8483 = vmatmul.mubr.f32.gmra.mxu0 %v14857_v48  ;;  %8607 = vmatprep.mubr.f32.mxu1 %v14858_v40  ;;  %v14868_v58 = vld [vmem:[#allocation218_spill] sm:$0xff]  ;;  %v14869_v48 = vld [vmem:[#allocation231_spill] sm:$0xff] }
 0x41a   :  { %v4986_v30 = vpop.f32.mrf.mxu1  ;;  %8485 = vmatprep.mubr.f32.mxu0 %v14859_v5 }
 0x41b   :  { %v4261_v19 = vpop.f32.mrf.mxu0  ;;  %v12428_v29 = vadd.f32 %v4986_v30, %v4221_v14  ;;  %v14871_v30 = vld [vmem:[#allocation235_spill] sm:$0xff] }
 0x41c   :  { %v8305_v2 = vpop.f32.mrf.mxu1  ;;  %8608 = vmatmul.mubr.f32.gmra.mxu1 %v14860_v8 }
 0x41d   :  { %v8183_v10 = vpop.f32.mrf.mxu0  ;;  %v12431_v47 = vadd.f32 %v8305_v2, %v8177_v25  ;;  %8486 = vmatmul.mubr.f32.gmra.mxu0 %v14861_v7  ;;  %8610 = vmatprep.mubr.f32.mxu1 %v14862_v33  ;;  %v14872_v7 = vld [vmem:[#allocation226_spill] sm:$0xff] }
 0x41e   :  { %v4998_v17 = vpop.f32.mrf.mxu1  ;;  %8488 = vmatprep.mubr.f32.mxu0 %v14863_v38 }
 0x41f   :  { %v4281_v57 = vpop.f32.mrf.mxu0  ;;  %v12436_v59 = vadd.f32 %v4998_v17, %v4241_v20  ;;  %v14873_v17 = vld [vmem:[#allocation236_spill] sm:$0xff] }
 0x420   :  { %v8308_v56 = vpop.f32.mrf.mxu1  ;;  %8611 = vmatmul.mubr.f32.gmra.mxu1 %v14864_v15 }
 0x421   :  { %v8186_v28 = vpop.f32.mrf.mxu0  ;;  %v12439_v14 = vadd.f32 %v8308_v56, %v8180_v53  ;;  %8489 = vmatmul.mubr.f32.gmra.mxu0 %v14865_v31  ;;  %8613 = vmatprep.mubr.f32.mxu1 %v14866_v51  ;;  %v14870_v53 = vld [vmem:[#allocation220_spill] sm:$0xff]  ;;  %v14875_v56 = vld [vmem:[#allocation242_spill] sm:$0xff] }
 0x422   :  { %v5010_v25 = vpop.f32.mrf.mxu1  ;;  %8491 = vmatprep.mubr.f32.mxu0 %v14867_v34 }
 0x423   :  { %v4301_v55 = vpop.f32.mrf.mxu0  ;;  %v12444_v0 = vadd.f32 %v5010_v25, %v4261_v19  ;;  %v14876_v25 = vld [vmem:[#allocation234_spill] sm:$0xff] }
 0x424   :  { %v8311_v24 = vpop.f32.mrf.mxu1  ;;  %8614 = vmatmul.mubr.f32.gmra.mxu1 %v14868_v58 }
 0x425   :  { %v8189_v20 = vpop.f32.mrf.mxu0  ;;  %v12447_v49 = vadd.f32 %v8311_v24, %v8183_v10  ;;  %8492 = vmatmul.mubr.f32.gmra.mxu0 %v14869_v48  ;;  %8616 = vmatprep.mubr.f32.mxu1 %v14870_v53  ;;  %v14874_v10 = vld [vmem:[#allocation230_spill] sm:$0xff] }
 0x426   :  { %v5022_v40 = vpop.f32.mrf.mxu1  ;;  %8494 = vmatprep.mubr.f32.mxu0 %v14871_v30  ;;  %v14877_v24 = vld [vmem:[#allocation246_spill] sm:$0xff] }
 0x427   :  { %v4321_v5 = vpop.f32.mrf.mxu0  ;;  %v12452_v2 = vadd.f32 %v5022_v40, %v4281_v57  ;;  %v14879_v48 = vld [vmem:[#allocation250_spill] sm:$0xff] }
 0x428   :  { %v8314_v8 = vpop.f32.mrf.mxu1  ;;  %8617 = vmatmul.mubr.f32.gmra.mxu1 %v14872_v7 }
 0x429   :  { %v8192_v19 = vpop.f32.mrf.mxu0  ;;  %v12455_v33 = vadd.f32 %v8314_v8, %v8186_v28  ;;  %8495 = vmatmul.mubr.f32.gmra.mxu0 %v14873_v17  ;;  %8619 = vmatprep.mubr.f32.mxu1 %v14874_v10  ;;  %v14878_v28 = vld [vmem:[#allocation238_spill] sm:$0xff]  ;;  %v14880_v8 = vld [vmem:[#allocation240_spill] sm:$0xff]  ;;  %v14881_v17 = vld [vmem:[#allocation255_spill] sm:$0xff] }
 0x42a   :  { %v5034_v38 = vpop.f32.mrf.mxu1  ;;  %8497 = vmatprep.mubr.f32.mxu0 %v14875_v56 }
 0x42b   :  { %v4341_v15 = vpop.f32.mrf.mxu0  ;;  %v12460_v31 = vadd.f32 %v5034_v38, %v4301_v55  ;;  %v14883_v38 = vld [vmem:[#allocation256_spill] sm:$0xff] }
 0x42c   :  { %v8317_v51 = vpop.f32.mrf.mxu1  ;;  %8620 = vmatmul.mubr.f32.gmra.mxu1 %v14876_v25 }
 0x42d   :  { %v8195_v57 = vpop.f32.mrf.mxu0  ;;  %v12463_v34 = vadd.f32 %v8317_v51, %v8189_v20  ;;  %8498 = vmatmul.mubr.f32.gmra.mxu0 %v14877_v24  ;;  %8622 = vmatprep.mubr.f32.mxu1 %v14878_v28  ;;  %v14882_v20 = vld [vmem:[#allocation245_spill] sm:$0xff] }
 0x42e   :  { %v5046_v58 = vpop.f32.mrf.mxu1  ;;  %8500 = vmatprep.mubr.f32.mxu0 %v14879_v48  ;;  %v14884_v24 = vld [vmem:[#allocation249_spill] sm:$0xff] }
 0x42f   :  { %v4361_v53 = vpop.f32.mrf.mxu0  ;;  %v12468_v40 = vadd.f32 %v5046_v58, %v4321_v5  ;;  %v14885_v58 = vld [vmem:[#allocation263_spill] sm:$0xff] }
 0x430   :  { %v8320_v30 = vpop.f32.mrf.mxu1  ;;  %8623 = vmatmul.mubr.f32.gmra.mxu1 %v14880_v8 }
 0x431   :  { %v8198_v55 = vpop.f32.mrf.mxu0  ;;  %v12471_v7 = vadd.f32 %v8320_v30, %v8192_v19  ;;  %8501 = vmatmul.mubr.f32.gmra.mxu0 %v14881_v17  ;;  %8625 = vmatprep.mubr.f32.mxu1 %v14882_v20  ;;  %v14886_v19 = vld [vmem:[#allocation254_spill] sm:$0xff]  ;;  %v14887_v30 = vld [vmem:[#allocation271_spill] sm:$0xff] }
 0x432   :  { %v5058_v10 = vpop.f32.mrf.mxu1  ;;  %8503 = vmatprep.mubr.f32.mxu0 %v14883_v38  ;;  %v14888_v38 = vld [vmem:[#allocation260_spill] sm:$0xff] }
 0x433   :  { %v4381_v56 = vpop.f32.mrf.mxu0  ;;  %v12476_v51 = vadd.f32 %v5058_v10, %v4341_v15 }
 0x434   :  { %v8323_v25 = vpop.f32.mrf.mxu1  ;;  %8626 = vmatmul.mubr.f32.gmra.mxu1 %v14884_v24  ;;  %v14889_v24 = vld [vmem:[#allocation277_spill] sm:$0xff] }
 0x435   :  { %v8201_v5 = vpop.f32.mrf.mxu0  ;;  %v12479_v28 = vadd.f32 %v8323_v25, %v8195_v57  ;;  %8504 = vmatmul.mubr.f32.gmra.mxu0 %v14885_v58  ;;  %8628 = vmatprep.mubr.f32.mxu1 %v14886_v19  ;;  %v14890_v57 = vld [vmem:[#allocation262_spill] sm:$0xff]  ;;  %v14891_v58 = vld [vmem:[#allocation284_spill] sm:$0xff] }
 0x436   :  { %v5070_v48 = vpop.f32.mrf.mxu1  ;;  %8506 = vmatprep.mubr.f32.mxu0 %v14887_v30 }
 0x437   :  { %v4401_v8 = vpop.f32.mrf.mxu0  ;;  %v12484_v17 = vadd.f32 %v5070_v48, %v4361_v53 }
 0x438   :  { %v8326_v20 = vpop.f32.mrf.mxu1  ;;  %8629 = vmatmul.mubr.f32.gmra.mxu1 %v14888_v38  ;;  %v14893_v38 = vld [vmem:[#allocation286_spill] sm:$0xff] }
 0x439   :  { %v8204_v15 = vpop.f32.mrf.mxu0  ;;  %v12487_v10 = vadd.f32 %v8326_v20, %v8198_v55  ;;  %8507 = vmatmul.mubr.f32.gmra.mxu0 %v14889_v24  ;;  %8631 = vmatprep.mubr.f32.mxu1 %v14890_v57  ;;  %v14894_v55 = vld [vmem:[#allocation276_spill] sm:$0xff]  ;;  %v14895_v24 = vld [vmem:[#allocation293_spill] sm:$0xff] }
 0x43a   :  { %v5082_v25 = vpop.f32.mrf.mxu1  ;;  %8509 = vmatprep.mubr.f32.mxu0 %v14891_v58 }
 0x43b   :  { %v4421_v19 = vpop.f32.mrf.mxu0  ;;  %v12492_v1 = vadd.f32 %v5082_v25, %v4381_v56 }
 0x43c   :  { %v8329_v30 = vpop.f32.mrf.mxu1  ;;  %8632 = vmatmul.mubr.f32.gmra.mxu1 %v14892_v16  ;;  %v14898_v16 = vld [vmem:[#allocation299_spill] sm:$0xff] }
 0x43d   :  { %v8207_v53 = vpop.f32.mrf.mxu0  ;;  %v12495_v48 = vadd.f32 %v8329_v30, %v8201_v5  ;;  %8510 = vmatmul.mubr.f32.gmra.mxu0 %v14893_v38  ;;  %8634 = vmatprep.mubr.f32.mxu1 %v14894_v55  ;;  %v14899_v5 = vld [vmem:[#allocation290_spill] sm:$0xff]  ;;  %v14900_v38 = vld [vmem:[#allocation304_spill] sm:$0xff] }
 0x43e   :  { %v5094_v20 = vpop.f32.mrf.mxu1  ;;  %8512 = vmatprep.mubr.f32.mxu0 %v14895_v24 }
 0x43f   :  { %v4441_v57 = vpop.f32.mrf.mxu0  ;;  %v12500_v63 = vadd.f32 %v5094_v20, %v4401_v8 }
 0x440   :  { %v8332_v58 = vpop.f32.mrf.mxu1  ;;  %8635 = vmatmul.mubr.f32.gmra.mxu1 %v14896_v27  ;;  %v14903_v27 = vld [vmem:[#allocation308_spill] sm:$0xff] }
 0x441   :  { %v8210_v56 = vpop.f32.mrf.mxu0  ;;  %v12503_v25 = vadd.f32 %v8332_v58, %v8204_v15  ;;  %8513 = vmatmul.mubr.f32.gmra.mxu0 %v14898_v16  ;;  %8637 = vmatprep.mubr.f32.mxu1 %v14899_v5  ;;  %v14904_v15 = vld [vmem:[#allocation297_spill] sm:$0xff] }
 0x442   :  { %v5106_v30 = vpop.f32.mrf.mxu1  ;;  %8515 = vmatprep.mubr.f32.mxu0 %v14900_v38 }
 0x443   :  { %14897 = vst [vmem:[#allocation267_spill] sm:$0xff] %v12503_v25  ;;  %v4461_v55 = vpop.f32.mrf.mxu0  ;;  %v12508_v36 = vadd.f32 %v5106_v30, %v4421_v19  ;;  %v14905_v25 = vld [vmem:[#allocation303_spill] sm:$0xff] }
 0x444   :  { %v8335_v24 = vpop.f32.mrf.mxu1  ;;  %8638 = vmatmul.mubr.f32.gmra.mxu1 %v14901_v61  ;;  %v14906_v61 = vld [vmem:[#allocation307_spill] sm:$0xff] }
 0x445   :  { %v8213_v8 = vpop.f32.mrf.mxu0  ;;  %v12511_v20 = vadd.f32 %v8335_v24, %v8207_v53  ;;  %8516 = vmatmul.mubr.f32.gmra.mxu0 %v14903_v27  ;;  %8640 = vmatprep.mubr.f32.mxu1 %v14904_v15 }
 0x446   :  { %v5118_v58 = vpop.f32.mrf.mxu1  ;;  %8678 = vmatprep.mubr.f32.mxu0 %v14553_v11 }
 0x447   :  { %14902 = vst [vmem:[#allocation269_spill] sm:$0xff] %v12511_v20  ;;  %v4481_v16 = vpop.f32.mrf.mxu0  ;;  %v12516_v5 = vadd.f32 %v5118_v58, %v4441_v57  ;;  %v14907_v20 = vld [vmem:[#allocation311_spill] sm:$0xff] }
 0x448   :  { %v8338_v38 = vpop.f32.mrf.mxu1  ;;  %8641 = vmatmul.mubr.f32.gmra.mxu1 %v14905_v25 }
 0x449   :  { %v8216_v19 = vpop.f32.mrf.mxu0  ;;  %v12519_v30 = vadd.f32 %v8338_v38, %v8210_v56  ;;  %8679 = vmatmul.mubr.f32.vlgmr.msra.gmra.mxu0 %v14277_v6  ;;  %8643 = vmatprep.mubr.f32.mxu1 %v14906_v61 }
 0x44a   :  { %v5130_v53 = vpop.f32.mrf.mxu1  ;;  %8681 = vmatprep.mubr.f32.mxu0 %v14282_v41 }
 0x44b   :  { %v4501_v24 = vpop.f32.mrf.mxu0  ;;  %v12524_v27 = vadd.f32 %v5130_v53, %v4461_v55 }
 0x44c   :  { %v8341_v15 = vpop.f32.mrf.mxu1  ;;  %8644 = vmatmul.mubr.f32.gmra.mxu1 %v14907_v20 }
 0x44d   :  { %v8219_v57 = vpop.f32.mrf.mxu0  ;;  %v12527_v58 = vadd.f32 %v8341_v15, %v8213_v8  ;;  %8682 = vmatmul.mubr.f32.gmra.mxu0 %v14286_v42  ;;  %8806 = vmatprep.mubr.f32.mxu1 %v14553_v11 }
 0x44e   :  { %v5142_v56 = vpop.f32.mrf.mxu1  ;;  %8684 = vmatprep.mubr.f32.mxu0 %v14290_v37 }
 0x44f   :  { %v4521_v25 = vpop.f32.mrf.mxu0  ;;  %v12532_v38 = vadd.f32 %v5142_v56, %v4481_v16 }
 0x450   :  { %v8344_v61 = vpop.f32.mrf.mxu1  ;;  %8807 = vmatmul.mubr.f32.vlgmr.msra.gmra.mxu1 %v14277_v6 }
 0x451   :  { %v8222_v55 = vpop.f32.mrf.mxu0  ;;  %v12535_v53 = vadd.f32 %v8344_v61, %v8216_v19  ;;  %8685 = vmatmul.mubr.f32.gmra.mxu0 %v14294_v13  ;;  %8809 = vmatprep.mubr.f32.mxu1 %v14282_v41 }
 0x452   :  { %v5154_v8 = vpop.f32.mrf.mxu1  ;;  %8687 = vmatprep.mubr.f32.mxu0 %v14298_v39 }
 0x453   :  { %v4541_v11 = vpop.f32.mrf.mxu0  ;;  %v12540_v20 = vadd.f32 %v5154_v8, %v4501_v24 }
 0x454   :  { %v8347_v15 = vpop.f32.mrf.mxu1  ;;  %8810 = vmatmul.mubr.f32.gmra.mxu1 %v14286_v42 }
 0x455   :  { %v8225_v16 = vpop.f32.mrf.mxu0  ;;  %v12543_v56 = vadd.f32 %v8347_v15, %v8219_v57  ;;  %8688 = vmatmul.mubr.f32.gmra.mxu0 %v14301_v60  ;;  %8812 = vmatprep.mubr.f32.mxu1 %v14290_v37 }
 0x456   :  { %v5166_v6 = vpop.f32.mrf.mxu1  ;;  %8690 = vmatprep.mubr.f32.mxu0 %v14304_v46 }
 0x457   :  { %v4561_v41 = vpop.f32.mrf.mxu0  ;;  %v12548_v19 = vadd.f32 %v5166_v6, %v4521_v25 }
 0x458   :  { %v8350_v61 = vpop.f32.mrf.mxu1  ;;  %8813 = vmatmul.mubr.f32.gmra.mxu1 %v14294_v13 }
 0x459   :  { %v8228_v24 = vpop.f32.mrf.mxu0  ;;  %v12551_v8 = vadd.f32 %v8350_v61, %v8222_v55  ;;  %8691 = vmatmul.mubr.f32.gmra.mxu0 %v14306_v4  ;;  %8815 = vmatprep.mubr.f32.mxu1 %v14298_v39 }
 0x45a   :  { %v5178_v42 = vpop.f32.mrf.mxu1  ;;  %8693 = vmatprep.mubr.f32.mxu0 %v14309_v3 }
 0x45b   :  { %v4581_v37 = vpop.f32.mrf.mxu0  ;;  %v12556_v57 = vadd.f32 %v5178_v42, %v4541_v11 }
 0x45c   :  { %v8353_v15 = vpop.f32.mrf.mxu1  ;;  %8816 = vmatmul.mubr.f32.gmra.mxu1 %v14301_v60  ;;  %v14912_v60 = vld [vmem:[#allocation93_spill] sm:$0xff] }
 0x45d   :  { %14908 = vst [vmem:[#allocation239_spill] sm:$0xff] %v12556_v57  ;;  %v8231_v25 = vpop.f32.mrf.mxu0  ;;  %v12559_v6 = vadd.f32 %v8353_v15, %v8225_v16  ;;  %8694 = vmatmul.mubr.f32.gmra.mxu0 %v14314_v9  ;;  %8818 = vmatprep.mubr.f32.mxu1 %v14304_v46  ;;  %v14913_v15 = vld [vmem:[#allocation94_spill] sm:$0xff] }
 0x45e   :  { %v5190_v13 = vpop.f32.mrf.mxu1  ;;  %8696 = vmatprep.mubr.f32.mxu0 %v14318_v44 }
 0x45f   :  { %14909 = vst [vmem:[#allocation273_spill] sm:$0xff] %v12559_v6  ;;  %v4601_v39 = vpop.f32.mrf.mxu0  ;;  %v12564_v55 = vadd.f32 %v5190_v13, %v4561_v41 }
 0x460   :  { %v8356_v61 = vpop.f32.mrf.mxu1  ;;  %8819 = vmatmul.mubr.f32.gmra.mxu1 %v14306_v4  ;;  %v14916_v4 = vld [vmem:[#allocation98_spill] sm:$0xff] }
 0x461   :  { %14910 = vst [vmem:[#allocation275_spill] sm:$0xff] %v12564_v55  ;;  %v8234_v11 = vpop.f32.mrf.mxu0  ;;  %v12567_v42 = vadd.f32 %v8356_v61, %v8228_v24  ;;  %8697 = vmatmul.mubr.f32.gmra.mxu0 %v14912_v60  ;;  %8821 = vmatprep.mubr.f32.mxu1 %v14309_v3  ;;  %v14917_v61 = vld [vmem:[#allocation104_spill] sm:$0xff] }
 0x462   :  { %v5202_v16 = vpop.f32.mrf.mxu1  ;;  %8699 = vmatprep.mubr.f32.mxu0 %v14913_v15 }
 0x463   :  { %14911 = vst [vmem:[#allocation243_spill] sm:$0xff] %v12567_v42  ;;  %v4621_v46 = vpop.f32.mrf.mxu0  ;;  %v12572_v6 = vadd.f32 %v5202_v16, %v4581_v37 }
 0x464   :  { %v8359_v57 = vpop.f32.mrf.mxu1  ;;  %8822 = vmatmul.mubr.f32.gmra.mxu1 %v14314_v9  ;;  %v14920_v9 = vld [vmem:[#allocation105_spill] sm:$0xff] }
 0x465   :  { %14914 = vst [vmem:[#allocation279_spill] sm:$0xff] %v12572_v6  ;;  %v8237_v41 = vpop.f32.mrf.mxu0  ;;  %v12575_v13 = vadd.f32 %v8359_v57, %v8231_v25  ;;  %8700 = vmatmul.mubr.f32.gmra.mxu0 %v14916_v4  ;;  %8824 = vmatprep.mubr.f32.mxu1 %v14318_v44  ;;  %v14921_v25 = vld [vmem:[#allocation112_spill] sm:$0xff] }
 0x466   :  { %v5214_v24 = vpop.f32.mrf.mxu1  ;;  %8702 = vmatprep.mubr.f32.mxu0 %v14917_v61 }
 0x467   :  { %14915 = vst [vmem:[#allocation282_spill] sm:$0xff] %v12575_v13  ;;  %v4641_v3 = vpop.f32.mrf.mxu0  ;;  %v12580_v42 = vadd.f32 %v5214_v24, %v4601_v39 }
 0x468   :  { %v8362_v55 = vpop.f32.mrf.mxu1  ;;  %8825 = vmatmul.mubr.f32.gmra.mxu1 %v14912_v60  ;;  %v14924_v60 = vld [vmem:[#allocation113_spill] sm:$0xff] }
 0x469   :  { %14918 = vst [vmem:[#allocation247_spill] sm:$0xff] %v12580_v42  ;;  %v8240_v37 = vpop.f32.mrf.mxu0  ;;  %v12583_v16 = vadd.f32 %v8362_v55, %v8234_v11  ;;  %8703 = vmatmul.mubr.f32.gmra.mxu0 %v14920_v9  ;;  %8827 = vmatprep.mubr.f32.mxu1 %v14913_v15  ;;  %v14925_v11 = vld [vmem:[#allocation117_spill] sm:$0xff] }
 0x46a   :  { %v5226_v57 = vpop.f32.mrf.mxu1  ;;  %8705 = vmatprep.mubr.f32.mxu0 %v14921_v25 }
 0x46b   :  { %14919 = vst [vmem:[#allocation285_spill] sm:$0xff] %v12583_v16  ;;  %v4661_v44 = vpop.f32.mrf.mxu0  ;;  %v12588_v13 = vadd.f32 %v5226_v57, %v4621_v46 }
 0x46c   :  { %v8365_v6 = vpop.f32.mrf.mxu1  ;;  %8828 = vmatmul.mubr.f32.gmra.mxu1 %v14916_v4  ;;  %v14928_v4 = vld [vmem:[#allocation123_spill] sm:$0xff] }
 0x46d   :  { %14922 = vst [vmem:[#allocation251_spill] sm:$0xff] %v12588_v13  ;;  %v8243_v39 = vpop.f32.mrf.mxu0  ;;  %v12591_v24 = vadd.f32 %v8365_v6, %v8237_v41  ;;  %8706 = vmatmul.mubr.f32.gmra.mxu0 %v14924_v60  ;;  %8830 = vmatprep.mubr.f32.mxu1 %v14917_v61  ;;  %v14929_v41 = vld [vmem:[#allocation124_spill] sm:$0xff] }
 0x46e   :  { %v5238_v55 = vpop.f32.mrf.mxu1  ;;  %8708 = vmatprep.mubr.f32.mxu0 %v14925_v11 }
 0x46f   :  { %14923 = vst [vmem:[#allocation252_spill] sm:$0xff] %v12591_v24  ;;  %v4681_v15 = vpop.f32.mrf.mxu0  ;;  %v12596_v16 = vadd.f32 %v5238_v55, %v4641_v3 }
 0x470   :  { %v8368_v42 = vpop.f32.mrf.mxu1  ;;  %8831 = vmatmul.mubr.f32.gmra.mxu1 %v14920_v9  ;;  %v14932_v9 = vld [vmem:[#allocation128_spill] sm:$0xff] }
 0x471   :  { %14926 = vst [vmem:[#allocation288_spill] sm:$0xff] %v12596_v16  ;;  %v8246_v46 = vpop.f32.mrf.mxu0  ;;  %v12599_v57 = vadd.f32 %v8368_v42, %v8240_v37  ;;  %8709 = vmatmul.mubr.f32.gmra.mxu0 %v14928_v4  ;;  %8833 = vmatprep.mubr.f32.mxu1 %v14921_v25  ;;  %v14933_v37 = vld [vmem:[#allocation132_spill] sm:$0xff] }
 0x472   :  { %v5250_v6 = vpop.f32.mrf.mxu1  ;;  %8711 = vmatprep.mubr.f32.mxu0 %v14929_v41 }
 0x473   :  { %14927 = vst [vmem:[#allocation257_spill] sm:$0xff] %v12599_v57  ;;  %v4701_v61 = vpop.f32.mrf.mxu0  ;;  %v12604_v24 = vadd.f32 %v5250_v6, %v4661_v44 }
 0x474   :  { %v8371_v13 = vpop.f32.mrf.mxu1  ;;  %8834 = vmatmul.mubr.f32.gmra.mxu1 %v14924_v60  ;;  %v14936_v60 = vld [vmem:[#allocation136_spill] sm:$0xff] }
 0x475   :  { %14930 = vst [vmem:[#allocation291_spill] sm:$0xff] %v12604_v24  ;;  %v8249_v3 = vpop.f32.mrf.mxu0  ;;  %v12607_v55 = vadd.f32 %v8371_v13, %v8243_v39  ;;  %8712 = vmatmul.mubr.f32.gmra.mxu0 %v14932_v9  ;;  %8836 = vmatprep.mubr.f32.mxu1 %v14925_v11  ;;  %v14937_v39 = vld [vmem:[#allocation143_spill] sm:$0xff] }
 0x476   :  { %v5262_v42 = vpop.f32.mrf.mxu1  ;;  %8714 = vmatprep.mubr.f32.mxu0 %v14933_v37 }
 0x477   :  { %14931 = vst [vmem:[#allocation296_spill] sm:$0xff] %v12607_v55  ;;  %v4721_v25 = vpop.f32.mrf.mxu0  ;;  %v12612_v57 = vadd.f32 %v5262_v42, %v4681_v15 }
 0x478   :  { %v8374_v16 = vpop.f32.mrf.mxu1  ;;  %8837 = vmatmul.mubr.f32.gmra.mxu1 %v14928_v4  ;;  %v14940_v4 = vld [vmem:[#allocation144_spill] sm:$0xff] }
 0x479   :  { %14934 = vst [vmem:[#allocation302_spill] sm:$0xff] %v12612_v57  ;;  %v8252_v44 = vpop.f32.mrf.mxu0  ;;  %v12615_v6 = vadd.f32 %v8374_v16, %v8246_v46  ;;  %8715 = vmatmul.mubr.f32.gmra.mxu0 %v14936_v60  ;;  %8839 = vmatprep.mubr.f32.mxu1 %v14929_v41  ;;  %v14941_v46 = vld [vmem:[#allocation148_spill] sm:$0xff] }
 0x47a   :  { %v5274_v13 = vpop.f32.mrf.mxu1  ;;  %8717 = vmatprep.mubr.f32.mxu0 %v14937_v39 }
 0x47b   :  { %14935 = vst [vmem:[#allocation352_spill] sm:$0xff] %v12615_v6  ;;  %v4741_v11 = vpop.f32.mrf.mxu0  ;;  %v12620_v55 = vadd.f32 %v5274_v13, %v4701_v61 }
 0x47c   :  { %v8377_v24 = vpop.f32.mrf.mxu1  ;;  %8840 = vmatmul.mubr.f32.gmra.mxu1 %v14932_v9  ;;  %v14944_v9 = vld [vmem:[#allocation155_spill] sm:$0xff] }
 0x47d   :  { %14938 = vst [vmem:[#allocation353_spill] sm:$0xff] %v12620_v55  ;;  %v8255_v15 = vpop.f32.mrf.mxu0  ;;  %v12623_v42 = vadd.f32 %v8377_v24, %v8249_v3  ;;  %8718 = vmatmul.mubr.f32.gmra.mxu0 %v14940_v4  ;;  %8842 = vmatprep.mubr.f32.mxu1 %v14933_v37  ;;  %v14945_v3 = vld [vmem:[#allocation159_spill] sm:$0xff] }
 0x47e   :  { %v5286_v16 = vpop.f32.mrf.mxu1  ;;  %8720 = vmatprep.mubr.f32.mxu0 %v14941_v46 }
 0x47f   :  { %14939 = vst [vmem:[#allocation354_spill] sm:$0xff] %v12623_v42  ;;  %v4761_v41 = vpop.f32.mrf.mxu0  ;;  %v12628_v6 = vadd.f32 %v5286_v16, %v4721_v25 }
 0x480   :  { %v8380_v57 = vpop.f32.mrf.mxu1  ;;  %8843 = vmatmul.mubr.f32.gmra.mxu1 %v14936_v60  ;;  %v14948_v60 = vld [vmem:[#allocation160_spill] sm:$0xff] }
 0x481   :  { %14942 = vst [vmem:[#allocation356_spill] sm:$0xff] %v12628_v6  ;;  %v8258_v61 = vpop.f32.mrf.mxu0  ;;  %v12631_v13 = vadd.f32 %v8380_v57, %v8252_v44  ;;  %8721 = vmatmul.mubr.f32.gmra.mxu0 %v14944_v9  ;;  %8845 = vmatprep.mubr.f32.mxu1 %v14937_v39  ;;  %v14949_v44 = vld [vmem:[#allocation164_spill] sm:$0xff] }
 0x482   :  { %v5298_v24 = vpop.f32.mrf.mxu1  ;;  %8723 = vmatprep.mubr.f32.mxu0 %v14945_v3 }
 0x483   :  { %14943 = vst [vmem:[#allocation358_spill] sm:$0xff] %v12631_v13  ;;  %v4781_v37 = vpop.f32.mrf.mxu0  ;;  %v12636_v42 = vadd.f32 %v5298_v24, %v4741_v11 }
 0x484   :  { %v8383_v55 = vpop.f32.mrf.mxu1  ;;  %8846 = vmatmul.mubr.f32.gmra.mxu1 %v14940_v4  ;;  %v14950_v4 = vld [vmem:[#allocation168_spill] sm:$0xff] }
 0x485   :  { %14946 = vst [vmem:[#allocation48_spill] sm:$0xff] %v12636_v42  ;;  %v8261_v25 = vpop.f32.mrf.mxu0  ;;  %v12639_v16 = vadd.f32 %v8383_v55, %v8255_v15  ;;  %8724 = vmatmul.mubr.f32.gmra.mxu0 %v14948_v60  ;;  %8848 = vmatprep.mubr.f32.mxu1 %v14941_v46  ;;  %v14951_v46 = vld [vmem:[#allocation175_spill] sm:$0xff] }
 0x486   :  { %v5310_v57 = vpop.f32.mrf.mxu1  ;;  %8726 = vmatprep.mubr.f32.mxu0 %v14949_v44 }
 0x487   :  { %14947 = vst [vmem:[#allocation361_spill] sm:$0xff] %v12639_v16  ;;  %v4801_v39 = vpop.f32.mrf.mxu0  ;;  %v12644_v13 = vadd.f32 %v5310_v57, %v4761_v41 }
 0x488   :  { %v8386_v6 = vpop.f32.mrf.mxu1  ;;  %8849 = vmatmul.mubr.f32.gmra.mxu1 %v14944_v9  ;;  %v14952_v9 = vld [vmem:[#allocation176_spill] sm:$0xff] }
 0x489   :  { %v12647_v11 = vadd.f32 %v8386_v6, %v8258_v61  ;;  %v8424_v24 = vpop.f32.mrf.mxu0  ;;  %8727 = vmatmul.mubr.f32.gmra.mxu0 %v14950_v4  ;;  %8851 = vmatprep.mubr.f32.mxu1 %v14945_v3 }
 0x48a   :  { %v5452_v55 = vadd.f32 %v8424_v24, %v12407_v54  ;;  %v5322_v15 = vpop.f32.mrf.mxu1  ;;  %8729 = vmatprep.mubr.f32.mxu0 %v14951_v46  ;;  %v14953_v24 = vld [vmem:[#allocation180_spill] sm:$0xff] }
 0x48b   :  { %v12653_v16 = vadd.f32 %v5322_v15, %v4781_v37  ;;  %v5444_v42 = vpop.f32.mrf.mxu0 }
 0x48c   :  { %v5445_v41 = vadd.f32 %v5444_v42, %v12412_v21  ;;  %v8389_v57 = vpop.f32.mrf.mxu1  ;;  %8852 = vmatmul.mubr.f32.gmra.mxu1 %v14948_v60 }
 0x48d   :  { %v12657_v6 = vadd.f32 %v8389_v57, %v8261_v25  ;;  %v8427_v61 = vpop.f32.mrf.mxu0  ;;  %8730 = vmatmul.mubr.f32.gmra.mxu0 %v14952_v9  ;;  %8854 = vmatprep.mubr.f32.mxu1 %v14949_v44  ;;  %v14955_v57 = vld [vmem:[#allocation187_spill] sm:$0xff] }
 0x48e   :  { %v5466_v54 = vadd.f32 %v8427_v61, %v12415_v22  ;;  %v5334_v3 = vpop.f32.mrf.mxu1  ;;  %8732 = vmatprep.mubr.f32.mxu0 %v14953_v24  ;;  %v14956_v61 = vld [vmem:[#allocation191_spill] sm:$0xff] }
 0x48f   :  { %v12663_v37 = vadd.f32 %v5334_v3, %v4801_v39  ;;  %v5458_v15 = vpop.f32.mrf.mxu0 }
 0x490   :  { %v5459_v21 = vadd.f32 %v5458_v15, %v12420_v62  ;;  %v8552_v42 = vpop.f32.mrf.mxu1  ;;  %8855 = vmatmul.mubr.f32.gmra.mxu1 %v14950_v4 }
 0x491   :  { %v8430_v25 = vpop.f32.mrf.mxu0  ;;  %v12667_v60 = vadd.f32 %v8552_v42, %v5452_v55  ;;  %8733 = vmatmul.mubr.f32.gmra.mxu0 %v14955_v57  ;;  %8857 = vmatprep.mubr.f32.mxu1 %v14951_v46  ;;  %v14957_v42 = vld [vmem:[#allocation192_spill] sm:$0xff] }
 0x492   :  { %v5480_v22 = vadd.f32 %v8430_v25, %v12423_v45  ;;  %v5974_v44 = vpop.f32.mrf.mxu1  ;;  %8735 = vmatprep.mubr.f32.mxu0 %v14956_v61  ;;  %v14958_v25 = vld [vmem:[#allocation196_spill] sm:$0xff] }
 0x493   :  { %14954 = vst [vmem:[#allocation363_spill] sm:$0xff] %v12667_v60  ;;  %v5472_v39 = vpop.f32.mrf.mxu0  ;;  %v12673_v3 = vadd.f32 %v5974_v44, %v5445_v41 }
 0x494   :  { %v5473_v62 = vadd.f32 %v5472_v39, %v12428_v29  ;;  %v8555_v15 = vpop.f32.mrf.mxu1  ;;  %8858 = vmatmul.mubr.f32.gmra.mxu1 %v14952_v9  ;;  %v14959_v39 = vld [vmem:[#allocation200_spill] sm:$0xff] }
 0x495   :  { %v8433_v4 = vpop.f32.mrf.mxu0  ;;  %v12677_v55 = vadd.f32 %v8555_v15, %v5466_v54  ;;  %8736 = vmatmul.mubr.f32.gmra.mxu0 %v14957_v42  ;;  %8860 = vmatprep.mubr.f32.mxu1 %v14953_v24  ;;  %v14960_v15 = vld [vmem:[#allocation207_spill] sm:$0xff] }
 0x496   :  { %v5494_v45 = vadd.f32 %v8433_v4, %v12431_v47  ;;  %v5990_v46 = vpop.f32.mrf.mxu1  ;;  %8738 = vmatprep.mubr.f32.mxu0 %v14958_v25 }
 0x497   :  { %v5486_v60 = vpop.f32.mrf.mxu0  ;;  %v12683_v41 = vadd.f32 %v5990_v46, %v5459_v21  ;;  %v14961_v46 = vld [vmem:[#allocation208_spill] sm:$0xff] }
 0x498   :  { %v5487_v29 = vadd.f32 %v5486_v60, %v12436_v59  ;;  %v8558_v44 = vpop.f32.mrf.mxu1  ;;  %8861 = vmatmul.mubr.f32.gmra.mxu1 %v14955_v57 }
 0x499   :  { %v8436_v9 = vpop.f32.mrf.mxu0  ;;  %v12687_v54 = vadd.f32 %v8558_v44, %v5480_v22  ;;  %8739 = vmatmul.mubr.f32.gmra.mxu0 %v14959_v39  ;;  %8863 = vmatprep.mubr.f32.mxu1 %v14956_v61  ;;  %v14962_v44 = vld [vmem:[#allocation212_spill] sm:$0xff] }
 0x49a   :  { %v5508_v47 = vadd.f32 %v8436_v9, %v12439_v14  ;;  %v6006_v24 = vpop.f32.mrf.mxu1  ;;  %8741 = vmatprep.mubr.f32.mxu0 %v14960_v15 }
 0x49b   :  { %v5500_v4 = vpop.f32.mrf.mxu0  ;;  %v12693_v21 = vadd.f32 %v6006_v24, %v5473_v62 }
 0x49c   :  { %v5501_v59 = vadd.f32 %v5500_v4, %v12444_v0  ;;  %v8561_v60 = vpop.f32.mrf.mxu1  ;;  %8864 = vmatmul.mubr.f32.gmra.mxu1 %v14957_v42  ;;  %v14963_v4 = vld [vmem:[#allocation219_spill] sm:$0xff] }
 0x49d   :  { %v8439_v57 = vpop.f32.mrf.mxu0  ;;  %v12697_v22 = vadd.f32 %v8561_v60, %v5494_v45  ;;  %8742 = vmatmul.mubr.f32.gmra.mxu0 %v14961_v46  ;;  %8866 = vmatprep.mubr.f32.mxu1 %v14958_v25  ;;  %v14964_v60 = vld [vmem:[#allocation223_spill] sm:$0xff] }
 0x49e   :  { %v5522_v14 = vadd.f32 %v8439_v57, %v12447_v49  ;;  %v6022_v61 = vpop.f32.mrf.mxu1  ;;  %8744 = vmatprep.mubr.f32.mxu0 %v14962_v44 }
 0x49f   :  { %v5514_v9 = vpop.f32.mrf.mxu0  ;;  %v12703_v62 = vadd.f32 %v6022_v61, %v5487_v29 }
 0x4a0   :  { %v5515_v0 = vadd.f32 %v5514_v9, %v12452_v2  ;;  %v8564_v24 = vpop.f32.mrf.mxu1  ;;  %8867 = vmatmul.mubr.f32.gmra.mxu1 %v14959_v39 }
 0x4a1   :  { %v8442_v42 = vpop.f32.mrf.mxu0  ;;  %v12707_v45 = vadd.f32 %v8564_v24, %v5508_v47  ;;  %8745 = vmatmul.mubr.f32.gmra.mxu0 %v14963_v4  ;;  %8869 = vmatprep.mubr.f32.mxu1 %v14960_v15 }
 0x4a2   :  { %v5536_v49 = vadd.f32 %v8442_v42, %v12455_v33  ;;  %v6038_v25 = vpop.f32.mrf.mxu1  ;;  %8747 = vmatprep.mubr.f32.mxu0 %v14964_v60 }
 0x4a3   :  { %v5528_v57 = vpop.f32.mrf.mxu0  ;;  %v12713_v29 = vadd.f32 %v6038_v25, %v5501_v59 }
 0x4a4   :  { %v5529_v2 = vadd.f32 %v5528_v57, %v12460_v31  ;;  %v8567_v61 = vpop.f32.mrf.mxu1  ;;  %8870 = vmatmul.mubr.f32.gmra.mxu1 %v14961_v46 }
 0x4a5   :  { %v8445_v39 = vpop.f32.mrf.mxu0  ;;  %v12717_v47 = vadd.f32 %v8567_v61, %v5522_v14  ;;  %8748 = vmatmul.mubr.f32.gmra.mxu0 %v14697_v23  ;;  %8872 = vmatprep.mubr.f32.mxu1 %v14962_v44 }
 0x4a6   :  { %v5550_v33 = vadd.f32 %v8445_v39, %v12463_v34  ;;  %v6054_v15 = vpop.f32.mrf.mxu1  ;;  %8750 = vmatprep.mubr.f32.mxu0 %v14700_v26 }
 0x4a7   :  { %v5542_v9 = vpop.f32.mrf.mxu0  ;;  %v12723_v59 = vadd.f32 %v6054_v15, %v5515_v0 }
 0x4a8   :  { %v5543_v31 = vadd.f32 %v5542_v9, %v12468_v40  ;;  %v8570_v24 = vpop.f32.mrf.mxu1  ;;  %8873 = vmatmul.mubr.f32.gmra.mxu1 %v14963_v4 }
 0x4a9   :  { %v8448_v46 = vpop.f32.mrf.mxu0  ;;  %v12727_v14 = vadd.f32 %v8570_v24, %v5536_v49  ;;  %8751 = vmatmul.mubr.f32.gmra.mxu0 %v14514_v12  ;;  %8875 = vmatprep.mubr.f32.mxu1 %v14964_v60  ;;  %v14965_v24 = vld [vmem:[#allocation266_spill] sm:$0xff] }
 0x4aa   :  { %v5564_v34 = vadd.f32 %v8448_v46, %v12471_v7  ;;  %v6070_v44 = vpop.f32.mrf.mxu1  ;;  %8753 = vmatprep.mubr.f32.mxu0 %v14518_v50 }
 0x4ab   :  { %v5556_v42 = vpop.f32.mrf.mxu0  ;;  %v12733_v0 = vadd.f32 %v6070_v44, %v5529_v2 }
 0x4ac   :  { %v5557_v40 = vadd.f32 %v5556_v42, %v12476_v51  ;;  %v8573_v25 = vpop.f32.mrf.mxu1  ;;  %8876 = vmatmul.mubr.f32.gmra.mxu1 %v14697_v23 }
 0x4ad   :  { %v8451_v4 = vpop.f32.mrf.mxu0  ;;  %v12737_v49 = vadd.f32 %v8573_v25, %v5550_v33  ;;  %8754 = vmatmul.mubr.f32.gmra.mxu0 %v14521_v43  ;;  %8878 = vmatprep.mubr.f32.mxu1 %v14700_v26 }
 0x4ae   :  { %v5578_v7 = vadd.f32 %v8451_v4, %v12479_v28  ;;  %v6086_v60 = vpop.f32.mrf.mxu1  ;;  %8756 = vmatprep.mubr.f32.mxu0 %v14524_v18  ;;  %v14968_v4 = vld [vmem:[#allocation278_spill] sm:$0xff] }
 0x4af   :  { %v5570_v57 = vpop.f32.mrf.mxu0  ;;  %v12743_v2 = vadd.f32 %v6086_v60, %v5543_v31 }
 0x4b0   :  { %v5571_v51 = vadd.f32 %v5570_v57, %v12484_v17  ;;  %v8576_v61 = vpop.f32.mrf.mxu1  ;;  %8879 = vmatmul.mubr.f32.gmra.mxu1 %v14514_v12 }
 0x4b1   :  { %v8454_v23 = vpop.f32.mrf.mxu0  ;;  %v12747_v39 = vadd.f32 %v8576_v61, %v5564_v34  ;;  %8757 = vmatmul.mubr.f32.gmra.mxu0 %v14526_v35  ;;  %8881 = vmatprep.mubr.f32.mxu1 %v14518_v50  ;;  %v14969_v61 = vld [vmem:[#allocation281_spill] sm:$0xff] }
 0x4b2   :  { %v5592_v26 = vadd.f32 %v8454_v23, %v12487_v10  ;;  %v6102_v28 = vpop.f32.mrf.mxu1  ;;  %8759 = vmatprep.mubr.f32.mxu0 %v14527_v32 }
 0x4b3   :  { %v5584_v33 = vpop.f32.mrf.mxu0  ;;  %v12753_v15 = vadd.f32 %v6102_v28, %v5557_v40  ;;  %v14966_v40 = vld [vmem:[#allocation272_spill] sm:$0xff]  ;;  %v14971_v28 = vld [vmem:[#allocation287_spill] sm:$0xff] }
 0x4b4   :  { %v5585_v17 = vadd.f32 %v5584_v33, %v12492_v1  ;;  %v8579_v9 = vpop.f32.mrf.mxu1  ;;  %8882 = vmatmul.mubr.f32.gmra.mxu1 %v14521_v43 }
 0x4b5   :  { %v8457_v12 = vpop.f32.mrf.mxu0  ;;  %v12757_v31 = vadd.f32 %v8579_v9, %v5578_v7  ;;  %8760 = vmatmul.mubr.f32.gmra.mxu0 %v14529_v52  ;;  %8884 = vmatprep.mubr.f32.mxu1 %v14524_v18  ;;  %v14967_v18 = vld [vmem:[#allocation267_spill] sm:$0xff] }
 0x4b6   :  { %v5606_v50 = vadd.f32 %v8457_v12, %v12495_v48  ;;  %v6118_v10 = vpop.f32.mrf.mxu1  ;;  %8762 = vmatprep.mubr.f32.mxu0 %v14965_v24 }
 0x4b7   :  { %v5598_v46 = vpop.f32.mrf.mxu0  ;;  %v12763_v34 = vadd.f32 %v6118_v10, %v5571_v51 }
 0x4b8   :  { %v5599_v1 = vadd.f32 %v5598_v46, %v12500_v63  ;;  %v8582_v44 = vpop.f32.mrf.mxu1  ;;  %8885 = vmatmul.mubr.f32.gmra.mxu1 %v14526_v35  ;;  %v14973_v46 = vld [vmem:[#allocation300_spill] sm:$0xff] }
 0x4b9   :  { %v8460_v43 = vpop.f32.mrf.mxu0  ;;  %v12767_v42 = vadd.f32 %v8582_v44, %v5592_v26  ;;  %8763 = vmatmul.mubr.f32.gmra.mxu0 %v14966_v40  ;;  %8887 = vmatprep.mubr.f32.mxu1 %v14527_v32  ;;  %v14970_v32 = vld [vmem:[#allocation269_spill] sm:$0xff] }
 0x4ba   :  { %v5620_v48 = vadd.f32 %v8460_v43, %v14967_v18  ;;  %v6134_v25 = vpop.f32.mrf.mxu1  ;;  %8765 = vmatprep.mubr.f32.mxu0 %v14968_v4 }
 0x4bb   :  { %v5612_v7 = vpop.f32.mrf.mxu0  ;;  %v12773_v60 = vadd.f32 %v6134_v25, %v5585_v17 }
 0x4bc   :  { %v5613_v63 = vadd.f32 %v5612_v7, %v12508_v36  ;;  %v8585_v57 = vpop.f32.mrf.mxu1  ;;  %8888 = vmatmul.mubr.f32.gmra.mxu1 %v14529_v52 }
 0x4bd   :  { %v8463_v35 = vpop.f32.mrf.mxu0  ;;  %v12777_v51 = vadd.f32 %v8585_v57, %v5606_v50  ;;  %8766 = vmatmul.mubr.f32.gmra.mxu0 %v14969_v61  ;;  %8890 = vmatprep.mubr.f32.mxu1 %v14965_v24  ;;  %v14972_v50 = vld [vmem:[#allocation295_spill] sm:$0xff] }
 0x4be   :  { %v5634_v23 = vadd.f32 %v8463_v35, %v14970_v32  ;;  %v6150_v26 = vpop.f32.mrf.mxu1  ;;  %8768 = vmatprep.mubr.f32.mxu0 %v14971_v28 }
 0x4bf   :  { %v5626_v33 = vpop.f32.mrf.mxu0  ;;  %v12783_v17 = vadd.f32 %v6150_v26, %v5599_v1 }
 0x4c0   :  { %v5627_v36 = vadd.f32 %v5626_v33, %v12516_v5  ;;  %v8588_v9 = vpop.f32.mrf.mxu1  ;;  %8891 = vmatmul.mubr.f32.gmra.mxu1 %v14966_v40 }
 0x4c1   :  { %v8466_v52 = vpop.f32.mrf.mxu0  ;;  %v12787_v12 = vadd.f32 %v8588_v9, %v5620_v48  ;;  %8769 = vmatmul.mubr.f32.gmra.mxu0 %v14972_v50  ;;  %8893 = vmatprep.mubr.f32.mxu1 %v14968_v4  ;;  %v14974_v48 = vld [vmem:[#allocation305_spill] sm:$0xff] }
 0x4c2   :  { %v5648_v10 = vadd.f32 %v8466_v52, %v12519_v30  ;;  %v6166_v24 = vpop.f32.mrf.mxu1  ;;  %8771 = vmatprep.mubr.f32.mxu0 %v14973_v46 }
 0x4c3   :  { %v5640_v44 = vpop.f32.mrf.mxu0  ;;  %v12793_v1 = vadd.f32 %v6166_v24, %v5613_v63 }
 0x4c4   :  { %v5641_v5 = vadd.f32 %v5640_v44, %v12524_v27  ;;  %v8591_v43 = vpop.f32.mrf.mxu1  ;;  %8894 = vmatmul.mubr.f32.gmra.mxu1 %v14969_v61 }
 0x4c5   :  { %v8469_v40 = vpop.f32.mrf.mxu0  ;;  %v12797_v18 = vadd.f32 %v8591_v43, %v5634_v23  ;;  %8772 = vmatmul.mubr.f32.gmra.mxu0 %v14974_v48  ;;  %8896 = vmatprep.mubr.f32.mxu1 %v14971_v28 }
 0x4c6   :  { %v5662_v30 = vadd.f32 %v8469_v40, %v12527_v58  ;;  %v6182_v25 = vpop.f32.mrf.mxu1  ;;  %v14975_v40 = vld [vmem:[#allocation239_spill] sm:$0xff] }
 0x4c7   :  { %v5654_v4 = vpop.f32.mrf.mxu0  ;;  %v12802_v7 = vadd.f32 %v6182_v25, %v5627_v36 }
 0x4c8   :  { %v5655_v63 = vadd.f32 %v5654_v4, %v12532_v38  ;;  %v8594_v57 = vpop.f32.mrf.mxu1  ;;  %8897 = vmatmul.mubr.f32.gmra.mxu1 %v14972_v50  ;;  %v14976_v4 = vld [vmem:[#allocation273_spill] sm:$0xff] }
 0x4c9   :  { %v8472_v27 = vpop.f32.mrf.mxu0  ;;  %v12806_v35 = vadd.f32 %v8594_v57, %v5648_v10  ;;  %8899 = vmatprep.mubr.f32.mxu1 %v14973_v46 }
 0x4ca   :  { %v5676_v61 = vadd.f32 %v8472_v27, %v12535_v53  ;;  %v6198_v32 = vpop.f32.mrf.mxu1 }
 0x4cb   :  { %v5668_v23 = vpop.f32.mrf.mxu0  ;;  %v12810_v26 = vadd.f32 %v6198_v32, %v5641_v5 }
 0x4cc   :  { %v5669_v58 = vadd.f32 %v5668_v23, %v12540_v20  ;;  %v8597_v28 = vpop.f32.mrf.mxu1  ;;  %8900 = vmatmul.mubr.f32.gmra.mxu1 %v14974_v48 }
 0x4cd   :  { %v8475_v38 = vpop.f32.mrf.mxu0  ;;  %v12814_v33 = vadd.f32 %v8597_v28, %v5662_v30 }
 0x4ce   :  { %v5690_v36 = vadd.f32 %v8475_v38, %v12543_v56  ;;  %v6214_v9 = vpop.f32.mrf.mxu1 }
 0x4cf   :  { %v5682_v52 = vpop.f32.mrf.mxu0  ;;  %v12817_v50 = vadd.f32 %v6214_v9, %v5655_v63 }
 0x4d0   :  { %v5683_v53 = vadd.f32 %v5682_v52, %v12548_v19  ;;  %v8600_v10 = vpop.f32.mrf.mxu1 }
 0x4d1   :  { %v8478_v24 = vpop.f32.mrf.mxu0  ;;  %v12820_v46 = vadd.f32 %v8600_v10, %v5676_v61  ;;  %v14977_v61 = vld [vmem:[#allocation275_spill] sm:$0xff] }
 0x4d2   :  { %v5704_v20 = vadd.f32 %v8478_v24, %v12551_v8  ;;  %v6230_v44 = vpop.f32.mrf.mxu1 }
 0x4d3   :  { %v5696_v5 = vpop.f32.mrf.mxu0  ;;  %v12823_v43 = vadd.f32 %v6230_v44, %v5669_v58  ;;  %v14978_v58 = vld [vmem:[#allocation243_spill] sm:$0xff] }
 0x4d4   :  { %v5697_v48 = vadd.f32 %v5696_v5, %v14975_v40  ;;  %v8603_v30 = vpop.f32.mrf.mxu1 }
 0x4d5   :  { %v8481_v56 = vpop.f32.mrf.mxu0  ;;  %v12826_v25 = vadd.f32 %v8603_v30, %v5690_v36  ;;  %v14979_v36 = vld [vmem:[#allocation279_spill] sm:$0xff] }
 0x4d6   :  { %v5718_v63 = vadd.f32 %v8481_v56, %v14976_v4  ;;  %v6246_v57 = vpop.f32.mrf.mxu1 }
 0x4d7   :  { %v5710_v19 = vpop.f32.mrf.mxu0  ;;  %v12829_v27 = vadd.f32 %v6246_v57, %v5683_v53  ;;  %v14981_v53 = vld [vmem:[#allocation282_spill] sm:$0xff] }
 0x4d8   :  { %v5711_v32 = vadd.f32 %v5710_v19, %v14977_v61  ;;  %v8606_v23 = vpop.f32.mrf.mxu1 }
 0x4d9   :  { %v8484_v8 = vpop.f32.mrf.mxu0  ;;  %v12832_v28 = vadd.f32 %v8606_v23, %v5704_v20  ;;  %v14983_v20 = vld [vmem:[#allocation247_spill] sm:$0xff] }
 0x4da   :  { %v5732_v38 = vadd.f32 %v8484_v8, %v14978_v58  ;;  %v6262_v9 = vpop.f32.mrf.mxu1 }
 0x4db   :  { %v5724_v52 = vpop.f32.mrf.mxu0  ;;  %v12835_v10 = vadd.f32 %v6262_v9, %v5697_v48  ;;  %v14985_v48 = vld [vmem:[#allocation285_spill] sm:$0xff] }
 0x4dc   :  { %v5725_v24 = vadd.f32 %v5724_v52, %v14979_v36  ;;  %v8609_v44 = vpop.f32.mrf.mxu1 }
 0x4dd   :  { %v8487_v5 = vpop.f32.mrf.mxu0  ;;  %v12838_v40 = vadd.f32 %v8609_v44, %v5718_v63  ;;  %v14987_v63 = vld [vmem:[#allocation251_spill] sm:$0xff] }
 0x4de   :  { %v5746_v30 = vadd.f32 %v8487_v5, %v14981_v53  ;;  %v6278_v56 = vpop.f32.mrf.mxu1 }
 0x4df   :  { %14980 = vst [vmem:[#allocation55_spill] sm:$0xff] %v12838_v40  ;;  %v5738_v4 = vpop.f32.mrf.mxu0  ;;  %v12841_v57 = vadd.f32 %v6278_v56, %v5711_v32  ;;  %v14989_v32 = vld [vmem:[#allocation252_spill] sm:$0xff] }
 0x4e0   :  { %v5739_v19 = vadd.f32 %v5738_v4, %v14983_v20  ;;  %v8612_v61 = vpop.f32.mrf.mxu1 }
 0x4e1   :  { %14982 = vst [vmem:[#allocation65_spill] sm:$0xff] %v12841_v57  ;;  %v8490_v23 = vpop.f32.mrf.mxu0  ;;  %v12844_v8 = vadd.f32 %v8612_v61, %v5732_v38  ;;  %v14991_v38 = vld [vmem:[#allocation288_spill] sm:$0xff] }
 0x4e2   :  { %v5760_v58 = vadd.f32 %v8490_v23, %v14985_v48  ;;  %v6294_v9 = vpop.f32.mrf.mxu1 }
 0x4e3   :  { %14984 = vst [vmem:[#allocation314_spill] sm:$0xff] %v12844_v8  ;;  %v5752_v52 = vpop.f32.mrf.mxu0  ;;  %v12847_v36 = vadd.f32 %v6294_v9, %v5725_v24  ;;  %v14993_v24 = vld [vmem:[#allocation257_spill] sm:$0xff] }
 0x4e4   :  { %v5753_v44 = vadd.f32 %v5752_v52, %v14987_v63  ;;  %v8615_v40 = vpop.f32.mrf.mxu1 }
 0x4e5   :  { %14986 = vst [vmem:[#allocation67_spill] sm:$0xff] %v12847_v36  ;;  %v8493_v5 = vpop.f32.mrf.mxu0  ;;  %v12850_v53 = vadd.f32 %v8615_v40, %v5746_v30  ;;  %v14995_v40 = vld [vmem:[#allocation291_spill] sm:$0xff] }
 0x4e6   :  { %v5774_v56 = vadd.f32 %v8493_v5, %v14989_v32  ;;  %v6310_v57 = vpop.f32.mrf.mxu1 }
 0x4e7   :  { %14988 = vst [vmem:[#allocation37_spill] sm:$0xff] %v12850_v53  ;;  %v5766_v4 = vpop.f32.mrf.mxu0  ;;  %v12853_v20 = vadd.f32 %v6310_v57, %v5739_v19  ;;  %v14997_v57 = vld [vmem:[#allocation296_spill] sm:$0xff] }
 0x4e8   :  { %v5767_v61 = vadd.f32 %v5766_v4, %v14991_v38  ;;  %v8618_v8 = vpop.f32.mrf.mxu1 }
 0x4e9   :  { %14990 = vst [vmem:[#allocation71_spill] sm:$0xff] %v12853_v20  ;;  %v8496_v23 = vpop.f32.mrf.mxu0  ;;  %v12856_v48 = vadd.f32 %v8618_v8, %v5760_v58  ;;  %v14999_v8 = vld [vmem:[#allocation302_spill] sm:$0xff] }
 0x4ea   :  { %v5788_v9 = vadd.f32 %v8496_v23, %v14993_v24  ;;  %v6326_v36 = vpop.f32.mrf.mxu1 }
 0x4eb   :  { %14992 = vst [vmem:[#allocation359_spill] sm:$0xff] %v12856_v48  ;;  %v5780_v52 = vpop.f32.mrf.mxu0  ;;  %v12859_v63 = vadd.f32 %v6326_v36, %v5753_v44  ;;  %v15001_v36 = vld [vmem:[#allocation352_spill] sm:$0xff] }
 0x4ec   :  { %v5781_v30 = vadd.f32 %v5780_v52, %v14995_v40  ;;  %v8621_v53 = vpop.f32.mrf.mxu1 }
 0x4ed   :  { %14994 = vst [vmem:[#allocation367_spill] sm:$0xff] %v12859_v63  ;;  %v8499_v5 = vpop.f32.mrf.mxu0  ;;  %v12862_v32 = vadd.f32 %v8621_v53, %v5774_v56  ;;  %v15003_v53 = vld [vmem:[#allocation353_spill] sm:$0xff] }
 0x4ee   :  { %v5802_v19 = vadd.f32 %v8499_v5, %v14997_v57  ;;  %v6342_v20 = vpop.f32.mrf.mxu1 }
 0x4ef   :  { %14996 = vst [vmem:[#allocation369_spill] sm:$0xff] %v12862_v32  ;;  %v5794_v4 = vpop.f32.mrf.mxu0  ;;  %v12865_v38 = vadd.f32 %v6342_v20, %v5767_v61  ;;  %v15005_v20 = vld [vmem:[#allocation354_spill] sm:$0xff] }
 0x4f0   :  { %v5795_v58 = vadd.f32 %v5794_v4, %v14999_v8  ;;  %v8624_v48 = vpop.f32.mrf.mxu1 }
 0x4f1   :  { %14998 = vst [vmem:[#allocation75_spill] sm:$0xff] %v12865_v38  ;;  %v8502_v23 = vpop.f32.mrf.mxu0  ;;  %v12868_v24 = vadd.f32 %v8624_v48, %v5788_v9  ;;  %v15007_v48 = vld [vmem:[#allocation356_spill] sm:$0xff] }
 0x4f2   :  { %v5816_v44 = vadd.f32 %v8502_v23, %v15001_v36  ;;  %v6358_v63 = vpop.f32.mrf.mxu1 }
 0x4f3   :  { %15000 = vst [vmem:[#allocation79_spill] sm:$0xff] %v12868_v24  ;;  %v5808_v52 = vpop.f32.mrf.mxu0  ;;  %v12871_v40 = vadd.f32 %v6358_v63, %v5781_v30  ;;  %v15008_v63 = vld [vmem:[#allocation358_spill] sm:$0xff] }
 0x4f4   :  { %v5809_v56 = vadd.f32 %v5808_v52, %v15003_v53  ;;  %v8627_v32 = vpop.f32.mrf.mxu1 }
 0x4f5   :  { %15002 = vst [vmem:[#allocation309_spill] sm:$0xff] %v12871_v40  ;;  %v8505_v5 = vpop.f32.mrf.mxu0  ;;  %v12874_v57 = vadd.f32 %v8627_v32, %v5802_v19  ;;  %v15009_v32 = vld [vmem:[#allocation48_spill] sm:$0xff] }
 0x4f6   :  { %v5830_v61 = vadd.f32 %v8505_v5, %v15005_v20  ;;  %v6374_v38 = vpop.f32.mrf.mxu1 }
 0x4f7   :  { %15004 = vst [vmem:[#allocation44_spill] sm:$0xff] %v12874_v57  ;;  %v5822_v4 = vpop.f32.mrf.mxu0  ;;  %v12877_v8 = vadd.f32 %v6374_v38, %v5795_v58  ;;  %v15010_v38 = vld [vmem:[#allocation361_spill] sm:$0xff] }
 0x4f8   :  { %v5823_v9 = vadd.f32 %v5822_v4, %v15007_v48  ;;  %v8630_v24 = vpop.f32.mrf.mxu1 }
 0x4f9   :  { %15006 = vst [vmem:[#allocation53_spill] sm:$0xff] %v12877_v8  ;;  %v8508_v23 = vpop.f32.mrf.mxu0  ;;  %v12880_v36 = vadd.f32 %v8630_v24, %v5816_v44 }
 0x4fa   :  { %v5844_v30 = vadd.f32 %v8508_v23, %v15008_v63  ;;  %v6390_v40 = vpop.f32.mrf.mxu1 }
 0x4fb   :  { %v5836_v52 = vpop.f32.mrf.mxu0  ;;  %v12883_v53 = vadd.f32 %v6390_v40, %v5809_v56 }
 0x4fc   :  { %v5837_v19 = vadd.f32 %v5836_v52, %v15009_v32  ;;  %v8633_v57 = vpop.f32.mrf.mxu1 }
 0x4fd   :  { %v8511_v5 = vpop.f32.mrf.mxu0  ;;  %v12886_v20 = vadd.f32 %v8633_v57, %v5830_v61 }
 0x4fe   :  { %v5858_v58 = vadd.f32 %v8511_v5, %v15010_v38  ;;  %v6406_v8 = vpop.f32.mrf.mxu1 }
 0x4ff   :  { %v5850_v4 = vpop.f32.mrf.mxu0  ;;  %v12889_v48 = vadd.f32 %v6406_v8, %v5823_v9 }
 0x500   :  { %v5851_v24 = vadd.f32 %v5850_v4, %v12644_v13  ;;  %v8636_v44 = vpop.f32.mrf.mxu1 }
 0x501   :  { %v8514_v23 = vpop.f32.mrf.mxu0  ;;  %v12892_v63 = vadd.f32 %v8636_v44, %v5844_v30 }
 0x502   :  { %v5872_v40 = vadd.f32 %v8514_v23, %v12647_v11  ;;  %v6422_v56 = vpop.f32.mrf.mxu1 }
 0x503   :  { %v5864_v52 = vpop.f32.mrf.mxu0  ;;  %v12895_v32 = vadd.f32 %v6422_v56, %v5837_v19 }
 0x504   :  { %v5865_v57 = vadd.f32 %v5864_v52, %v12653_v16  ;;  %v8639_v61 = vpop.f32.mrf.mxu1 }
 0x505   :  { %15011 = vst [vmem:[#allocation83_spill] sm:$0xff] %v12895_v32  ;;  %v8517_v5 = vpop.f32.mrf.mxu0  ;;  %v12898_v38 = vadd.f32 %v8639_v61, %v5858_v58 }
 0x506   :  { %v5886_v8 = vadd.f32 %v8517_v5, %v12657_v6  ;;  %v6438_v9 = vpop.f32.mrf.mxu1  ;;  %v15015_v6 = vld [vmem:[#allocation363_spill] sm:$0xff] }
 0x507   :  { %15012 = vst [vmem:[#allocation87_spill] sm:$0xff] %v12898_v38  ;;  %v5878_v13 = vpop.f32.mrf.mxu0  ;;  %v12901_v4 = vadd.f32 %v6438_v9, %v5851_v24 }
 0x508   :  { %v5879_v30 = vadd.f32 %v5878_v13, %v12663_v37  ;;  %v8642_v44 = vpop.f32.mrf.mxu1 }
 0x509   :  { %v12904_v11 = vadd.f32 %v8642_v44, %v5872_v40  ;;  %v8680_v23 = vpop.f32.mrf.mxu0 }
 0x50a   :  { %v6454_v19 = vpop.f32.mrf.mxu1  ;;  %v6604_v5 = vadd.f32 %v8680_v23, %v15015_v6 }
 0x50b   :  { %v12906_v56 = vadd.f32 %v6454_v19, %v5865_v57  ;;  %v6597_v16 = vpop.f32.mrf.mxu0 }
 0x50c   :  { %v8645_v52 = vpop.f32.mrf.mxu1  ;;  %v6598_v37 = vadd.f32 %v6597_v16, %v12673_v3 }
 0x50d   :  { %15013 = vst [vmem:[#allocation355_spill] sm:$0xff] %v12906_v56  ;;  %v12908_v32 = vadd.f32 %v8645_v52, %v5886_v8  ;;  %v8683_v58 = vpop.f32.mrf.mxu0 }
 0x50e   :  { %v6470_v61 = vpop.f32.mrf.mxu1  ;;  %v6616_v57 = vadd.f32 %v8683_v58, %v12677_v55 }
 0x50f   :  { %15014 = vst [vmem:[#allocation372_spill] sm:$0xff] %v12908_v32  ;;  %v12911_v38 = vadd.f32 %v6470_v61, %v5879_v30  ;;  %v6609_v24 = vpop.f32.mrf.mxu0 }
 0x510   :  { %v8808_v9 = vpop.f32.mrf.mxu1  ;;  %v6610_v52 = vadd.f32 %v6609_v24, %v12683_v41 }
 0x511   :  { %v8686_v40 = vpop.f32.mrf.mxu0  ;;  %v7069_v13 = vadd.f32 %v8808_v9, %v6604_v5 }
 0x512   :  { %v7062_v44 = vpop.f32.mrf.mxu1  ;;  %v6628_v61 = vadd.f32 %v8686_v40, %v12687_v54 }
 0x513   :  { %7449 = vst [vmem:[#allocation7 + $0x28] sm:$0xff] %v7069_v13  ;;  %v6621_v19 = vpop.f32.mrf.mxu0  ;;  %v7063_v56 = vadd.f32 %v7062_v44, %v6598_v37 }
 0x514   :  { %v8811_v8 = vpop.f32.mrf.mxu1  ;;  %v6622_v5 = vadd.f32 %v6621_v19, %v12693_v21 }
 0x515   :  { %7446 = vst [vmem:[#allocation7 + $0x10] sm:$0xff] %v7063_v56  ;;  %v8689_v32 = vpop.f32.mrf.mxu0  ;;  %v7081_v23 = vadd.f32 %v8811_v8, %v6616_v57 }
 0x516   :  { %v7074_v30 = vpop.f32.mrf.mxu1  ;;  %v6640_v37 = vadd.f32 %v8689_v32, %v12697_v22 }
 0x517   :  { %7455 = vst [vmem:[#allocation7 + $0x58] sm:$0xff] %v7081_v23  ;;  %v6633_v6 = vpop.f32.mrf.mxu0  ;;  %v7075_v3 = vadd.f32 %v7074_v30, %v6610_v52 }
 0x518   :  { %v8814_v16 = vpop.f32.mrf.mxu1  ;;  %v6634_v13 = vadd.f32 %v6633_v6, %v12703_v62 }
 0x519   :  { %7452 = vst [vmem:[#allocation7 + $0x40] sm:$0xff] %v7075_v3  ;;  %v8692_v55 = vpop.f32.mrf.mxu0  ;;  %v7093_v58 = vadd.f32 %v8814_v16, %v6628_v61 }
 0x51a   :  { %v7086_v9 = vpop.f32.mrf.mxu1  ;;  %v6652_v57 = vadd.f32 %v8692_v55, %v12707_v45 }
 0x51b   :  { %7461 = vst [vmem:[#allocation7 + $0x88] sm:$0xff] %v7093_v58  ;;  %v6645_v41 = vpop.f32.mrf.mxu0  ;;  %v7087_v56 = vadd.f32 %v7086_v9, %v6622_v5 }
 0x51c   :  { %v8817_v24 = vpop.f32.mrf.mxu1  ;;  %v6646_v52 = vadd.f32 %v6645_v41, %v12713_v29 }
 0x51d   :  { %7458 = vst [vmem:[#allocation7 + $0x70] sm:$0xff] %v7087_v56  ;;  %v8695_v54 = vpop.f32.mrf.mxu0  ;;  %v7105_v40 = vadd.f32 %v8817_v24, %v6640_v37 }
 0x51e   :  { %v7098_v44 = vpop.f32.mrf.mxu1  ;;  %v6664_v30 = vadd.f32 %v8695_v54, %v12717_v47 }
 0x51f   :  { %7467 = vst [vmem:[#allocation7 + $0xb8] sm:$0xff] %v7105_v40  ;;  %v6657_v21 = vpop.f32.mrf.mxu0  ;;  %v7099_v19 = vadd.f32 %v7098_v44, %v6634_v13 }
 0x520   :  { %v8820_v8 = vpop.f32.mrf.mxu1  ;;  %v6658_v3 = vadd.f32 %v6657_v21, %v12723_v59 }
 0x521   :  { %7464 = vst [vmem:[#allocation7 + $0xa0] sm:$0xff] %v7099_v19  ;;  %v8698_v22 = vpop.f32.mrf.mxu0  ;;  %v7117_v32 = vadd.f32 %v8820_v8, %v6652_v57 }
 0x522   :  { %v7110_v23 = vpop.f32.mrf.mxu1  ;;  %v6676_v55 = vadd.f32 %v8698_v22, %v12727_v14 }
 0x523   :  { %7473 = vst [vmem:[#allocation7 + $0xe8] sm:$0xff] %v7117_v32  ;;  %v6669_v62 = vpop.f32.mrf.mxu0  ;;  %v7111_v61 = vadd.f32 %v7110_v23, %v6646_v52 }
 0x524   :  { %v8823_v6 = vpop.f32.mrf.mxu1  ;;  %v6670_v37 = vadd.f32 %v6669_v62, %v12733_v0 }
 0x525   :  { %7470 = vst [vmem:[#allocation7 + $0xd0] sm:$0xff] %v7111_v61  ;;  %v8701_v45 = vpop.f32.mrf.mxu0  ;;  %v7129_v16 = vadd.f32 %v8823_v6, %v6664_v30 }
 0x526   :  { %v7122_v5 = vpop.f32.mrf.mxu1  ;;  %v6688_v24 = vadd.f32 %v8701_v45, %v12737_v49 }
 0x527   :  { %7479 = vst [vmem:[#allocation7 + $0x118] sm:$0xff] %v7129_v16  ;;  %v6681_v29 = vpop.f32.mrf.mxu0  ;;  %v7123_v58 = vadd.f32 %v7122_v5, %v6658_v3 }
 0x528   :  { %v8826_v9 = vpop.f32.mrf.mxu1  ;;  %v6682_v40 = vadd.f32 %v6681_v29, %v12743_v2 }
 0x529   :  { %7476 = vst [vmem:[#allocation7 + $0x100] sm:$0xff] %v7123_v58  ;;  %v8704_v47 = vpop.f32.mrf.mxu0  ;;  %v7141_v41 = vadd.f32 %v8826_v9, %v6676_v55 }
 0x52a   :  { %v7134_v56 = vpop.f32.mrf.mxu1  ;;  %v6700_v21 = vadd.f32 %v8704_v47, %v12747_v39 }
 0x52b   :  { %7485 = vst [vmem:[#allocation7 + $0x148] sm:$0xff] %v7141_v41  ;;  %v6693_v59 = vpop.f32.mrf.mxu0  ;;  %v7135_v13 = vadd.f32 %v7134_v56, %v6670_v37 }
 0x52c   :  { %v8829_v54 = vpop.f32.mrf.mxu1  ;;  %v6694_v52 = vadd.f32 %v6693_v59, %v12753_v15 }
 0x52d   :  { %7482 = vst [vmem:[#allocation7 + $0x130] sm:$0xff] %v7135_v13  ;;  %v8707_v14 = vpop.f32.mrf.mxu0  ;;  %v7153_v44 = vadd.f32 %v8829_v54, %v6688_v24 }
 0x52e   :  { %v7146_v57 = vpop.f32.mrf.mxu1  ;;  %v6712_v23 = vadd.f32 %v8707_v14, %v12757_v31 }
 0x52f   :  { %7491 = vst [vmem:[#allocation7 + $0x178] sm:$0xff] %v7153_v44  ;;  %v6705_v0 = vpop.f32.mrf.mxu0  ;;  %v7147_v19 = vadd.f32 %v7146_v57, %v6682_v40 }
 0x530   :  { %v8832_v8 = vpop.f32.mrf.mxu1  ;;  %v6706_v61 = vadd.f32 %v6705_v0, %v12763_v34 }
 0x531   :  { %7488 = vst [vmem:[#allocation7 + $0x160] sm:$0xff] %v7147_v19  ;;  %v8710_v49 = vpop.f32.mrf.mxu0  ;;  %v7165_v22 = vadd.f32 %v8832_v8, %v6700_v21 }
 0x532   :  { %v7158_v32 = vpop.f32.mrf.mxu1  ;;  %v6724_v45 = vadd.f32 %v8710_v49, %v12767_v42 }
 0x533   :  { %7497 = vst [vmem:[#allocation7 + $0x1a8] sm:$0xff] %v7165_v22  ;;  %v6717_v2 = vpop.f32.mrf.mxu0  ;;  %v7159_v30 = vadd.f32 %v7158_v32, %v6694_v52 }
 0x534   :  { %v8835_v62 = vpop.f32.mrf.mxu1  ;;  %v6718_v55 = vadd.f32 %v6717_v2, %v12773_v60 }
 0x535   :  { %7494 = vst [vmem:[#allocation7 + $0x190] sm:$0xff] %v7159_v30  ;;  %v8713_v39 = vpop.f32.mrf.mxu0  ;;  %v7177_v6 = vadd.f32 %v8835_v62, %v6712_v23 }
 0x536   :  { %v7170_v3 = vpop.f32.mrf.mxu1  ;;  %v6736_v9 = vadd.f32 %v8713_v39, %v12777_v51 }
 0x537   :  { %7503 = vst [vmem:[#allocation7 + $0x1d8] sm:$0xff] %v7177_v6  ;;  %v6729_v15 = vpop.f32.mrf.mxu0  ;;  %v7171_v16 = vadd.f32 %v7170_v3, %v6706_v61 }
 0x538   :  { %v8838_v5 = vpop.f32.mrf.mxu1  ;;  %v6730_v41 = vadd.f32 %v6729_v15, %v12783_v17 }
 0x539   :  { %7500 = vst [vmem:[#allocation7 + $0x1c0] sm:$0xff] %v7171_v16  ;;  %v8716_v31 = vpop.f32.mrf.mxu0  ;;  %v7189_v29 = vadd.f32 %v8838_v5, %v6724_v45 }
 0x53a   :  { %v7182_v58 = vpop.f32.mrf.mxu1  ;;  %v6748_v59 = vadd.f32 %v8716_v31, %v12787_v12 }
 0x53b   :  { %7509 = vst [vmem:[#allocation7 + $0x208] sm:$0xff] %v7189_v29  ;;  %v6741_v34 = vpop.f32.mrf.mxu0  ;;  %v7183_v37 = vadd.f32 %v7182_v58, %v6718_v55 }
 0x53c   :  { %v8841_v47 = vpop.f32.mrf.mxu1  ;;  %v6742_v40 = vadd.f32 %v6741_v34, %v12793_v1 }
 0x53d   :  { %7506 = vst [vmem:[#allocation7 + $0x1f0] sm:$0xff] %v7183_v37  ;;  %v8719_v42 = vpop.f32.mrf.mxu0  ;;  %v7201_v56 = vadd.f32 %v8841_v47, %v6736_v9 }
 0x53e   :  { %v7194_v24 = vpop.f32.mrf.mxu1  ;;  %v6760_v57 = vadd.f32 %v8719_v42, %v12797_v18 }
 0x53f   :  { %7515 = vst [vmem:[#allocation7 + $0x238] sm:$0xff] %v7201_v56  ;;  %v6753_v60 = vpop.f32.mrf.mxu0  ;;  %v7195_v13 = vadd.f32 %v7194_v24, %v6730_v41 }
 0x540   :  { %v8844_v54 = vpop.f32.mrf.mxu1  ;;  %v6754_v19 = vadd.f32 %v6753_v60, %v12802_v7 }
 0x541   :  { %7512 = vst [vmem:[#allocation7 + $0x220] sm:$0xff] %v7195_v13  ;;  %v8722_v51 = vpop.f32.mrf.mxu0  ;;  %v7213_v14 = vadd.f32 %v8844_v54, %v6748_v59  ;;  %v15016_v54 = vld [vmem:[#allocation55_spill] sm:$0xff] }
 0x542   :  { %v7206_v44 = vpop.f32.mrf.mxu1  ;;  %v6772_v49 = vadd.f32 %v8722_v51, %v12806_v35 }
 0x543   :  { %7521 = vst [vmem:[#allocation7 + $0x268] sm:$0xff] %v7213_v14  ;;  %v6765_v17 = vpop.f32.mrf.mxu0  ;;  %v7207_v21 = vadd.f32 %v7206_v44, %v6742_v40  ;;  %v15017_v44 = vld [vmem:[#allocation65_spill] sm:$0xff] }
 0x544   :  { %v8847_v0 = vpop.f32.mrf.mxu1  ;;  %v6766_v23 = vadd.f32 %v6765_v17, %v12810_v26 }
 0x545   :  { %7518 = vst [vmem:[#allocation7 + $0x250] sm:$0xff] %v7207_v21  ;;  %v8725_v12 = vpop.f32.mrf.mxu0  ;;  %v7225_v8 = vadd.f32 %v8847_v0, %v6760_v57  ;;  %v15018_v0 = vld [vmem:[#allocation314_spill] sm:$0xff] }
 0x546   :  { %v7218_v52 = vpop.f32.mrf.mxu1  ;;  %v6784_v62 = vadd.f32 %v8725_v12, %v12814_v33 }
 0x547   :  { %7527 = vst [vmem:[#allocation7 + $0x298] sm:$0xff] %v7225_v8  ;;  %v6777_v1 = vpop.f32.mrf.mxu0  ;;  %v7219_v22 = vadd.f32 %v7218_v52, %v6754_v19  ;;  %v15019_v52 = vld [vmem:[#allocation67_spill] sm:$0xff] }
 0x548   :  { %v8850_v32 = vpop.f32.mrf.mxu1  ;;  %v6778_v6 = vadd.f32 %v6777_v1, %v12817_v50 }
 0x549   :  { %7524 = vst [vmem:[#allocation7 + $0x280] sm:$0xff] %v7219_v22  ;;  %v8728_v18 = vpop.f32.mrf.mxu0  ;;  %v7237_v2 = vadd.f32 %v8850_v32, %v6772_v49 }
 0x54a   :  { %v7230_v30 = vpop.f32.mrf.mxu1  ;;  %v6796_v15 = vadd.f32 %v8728_v18, %v12820_v46 }
 0x54b   :  { %7533 = vst [vmem:[#allocation7 + $0x2c8] sm:$0xff] %v7237_v2  ;;  %v6789_v7 = vpop.f32.mrf.mxu0  ;;  %v7231_v61 = vadd.f32 %v7230_v30, %v6766_v23  ;;  %v15020_v23 = vld [vmem:[#allocation37_spill] sm:$0xff] }
 0x54c   :  { %v8853_v39 = vpop.f32.mrf.mxu1  ;;  %v6790_v55 = vadd.f32 %v6789_v7, %v12823_v43  ;;  %v15021_v7 = vld [vmem:[#allocation71_spill] sm:$0xff] }
 0x54d   :  { %7530 = vst [vmem:[#allocation7 + $0x2b0] sm:$0xff] %v7231_v61  ;;  %v8731_v35 = vpop.f32.mrf.mxu0  ;;  %v7249_v3 = vadd.f32 %v8853_v39, %v6784_v62 }
 0x54e   :  { %v7242_v45 = vpop.f32.mrf.mxu1  ;;  %v6808_v58 = vadd.f32 %v8731_v35, %v12826_v25 }
 0x54f   :  { %7539 = vst [vmem:[#allocation7 + $0x2f8] sm:$0xff] %v7249_v3  ;;  %v6801_v26 = vpop.f32.mrf.mxu0  ;;  %v7243_v16 = vadd.f32 %v7242_v45, %v6778_v6  ;;  %v15022_v3 = vld [vmem:[#allocation359_spill] sm:$0xff] }
 0x550   :  { %v8856_v5 = vpop.f32.mrf.mxu1  ;;  %v6802_v37 = vadd.f32 %v6801_v26, %v12829_v27 }
 0x551   :  { %7536 = vst [vmem:[#allocation7 + $0x2e0] sm:$0xff] %v7243_v16  ;;  %v8734_v33 = vpop.f32.mrf.mxu0  ;;  %v7261_v31 = vadd.f32 %v8856_v5, %v6796_v15  ;;  %v15023_v5 = vld [vmem:[#allocation367_spill] sm:$0xff] }
 0x552   :  { %v7254_v29 = vpop.f32.mrf.mxu1  ;;  %v6820_v42 = vadd.f32 %v8734_v33, %v12832_v28 }
 0x553   :  { %7545 = vst [vmem:[#allocation7 + $0x328] sm:$0xff] %v7261_v31  ;;  %v6813_v50 = vpop.f32.mrf.mxu0  ;;  %v7255_v9 = vadd.f32 %v7254_v29, %v6790_v55 }
 0x554   :  { %v8859_v34 = vpop.f32.mrf.mxu1  ;;  %v6814_v59 = vadd.f32 %v6813_v50, %v12835_v10 }
 0x555   :  { %7542 = vst [vmem:[#allocation7 + $0x310] sm:$0xff] %v7255_v9  ;;  %v8737_v46 = vpop.f32.mrf.mxu0  ;;  %v7273_v47 = vadd.f32 %v8859_v34, %v6808_v58  ;;  %v15024_v58 = vld [vmem:[#allocation369_spill] sm:$0xff] }
 0x556   :  { %v7266_v41 = vpop.f32.mrf.mxu1  ;;  %v6832_v40 = vadd.f32 %v8737_v46, %v15016_v54  ;;  %v15025_v46 = vld [vmem:[#allocation75_spill] sm:$0xff] }
 0x557   :  { %7551 = vst [vmem:[#allocation7 + $0x358] sm:$0xff] %v7273_v47  ;;  %v6825_v43 = vpop.f32.mrf.mxu0  ;;  %v7267_v56 = vadd.f32 %v7266_v41, %v6802_v37 }
 0x558   :  { %v8862_v24 = vpop.f32.mrf.mxu1  ;;  %v6826_v57 = vadd.f32 %v6825_v43, %v15017_v44 }
 0x559   :  { %7548 = vst [vmem:[#allocation7 + $0x340] sm:$0xff] %v7267_v56  ;;  %v8740_v25 = vpop.f32.mrf.mxu0  ;;  %v7285_v60 = vadd.f32 %v8862_v24, %v6820_v42  ;;  %v15026_v56 = vld [vmem:[#allocation79_spill] sm:$0xff] }
 0x55a   :  { %v7278_v13 = vpop.f32.mrf.mxu1  ;;  %v6844_v19 = vadd.f32 %v8740_v25, %v15018_v0 }
 0x55b   :  { %7557 = vst [vmem:[#allocation7 + $0x388] sm:$0xff] %v7285_v60  ;;  %v6837_v27 = vpop.f32.mrf.mxu0  ;;  %v7279_v51 = vadd.f32 %v7278_v13, %v6814_v59  ;;  %v15027_v13 = vld [vmem:[#allocation309_spill] sm:$0xff] }
 0x55c   :  { %v8865_v14 = vpop.f32.mrf.mxu1  ;;  %v6838_v49 = vadd.f32 %v6837_v27, %v15019_v52 }
 0x55d   :  { %7554 = vst [vmem:[#allocation7 + $0x370] sm:$0xff] %v7279_v51  ;;  %v8743_v28 = vpop.f32.mrf.mxu0  ;;  %v7297_v17 = vadd.f32 %v8865_v14, %v6832_v40  ;;  %v15028_v14 = vld [vmem:[#allocation44_spill] sm:$0xff] }
 0x55e   :  { %v7290_v21 = vpop.f32.mrf.mxu1  ;;  %v6856_v18 = vadd.f32 %v8743_v28, %v15020_v23 }
 0x55f   :  { %7563 = vst [vmem:[#allocation7 + $0x3b8] sm:$0xff] %v7297_v17  ;;  %v6849_v10 = vpop.f32.mrf.mxu0  ;;  %v7291_v12 = vadd.f32 %v7290_v21, %v6826_v57  ;;  %v15029_v21 = vld [vmem:[#allocation53_spill] sm:$0xff] }
 0x560   :  { %v8868_v8 = vpop.f32.mrf.mxu1  ;;  %v6850_v61 = vadd.f32 %v6849_v10, %v15021_v7 }
 0x561   :  { %7560 = vst [vmem:[#allocation7 + $0x3a0] sm:$0xff] %v7291_v12  ;;  %v8746_v1 = vpop.f32.mrf.mxu0  ;;  %v7309_v22 = vadd.f32 %v8868_v8, %v6844_v19 }
 0x562   :  { %v7302_v32 = vpop.f32.mrf.mxu1  ;;  %v6868_v45 = vadd.f32 %v8746_v1, %v15022_v3 }
 0x563   :  { %7569 = vst [vmem:[#allocation7 + $0x3e8] sm:$0xff] %v7309_v22  ;;  %v6861_v2 = vpop.f32.mrf.mxu0  ;;  %v7303_v30 = vadd.f32 %v7302_v32, %v6838_v49 }
 0x564   :  { %v8871_v62 = vpop.f32.mrf.mxu1  ;;  %v6862_v55 = vadd.f32 %v6861_v2, %v15023_v5 }
 0x565   :  { %7566 = vst [vmem:[#allocation7 + $0x3d0] sm:$0xff] %v7303_v30  ;;  %v8749_v39 = vpop.f32.mrf.mxu0  ;;  %v7321_v6 = vadd.f32 %v8871_v62, %v6856_v18 }
 0x566   :  { %v7314_v35 = vpop.f32.mrf.mxu1  ;;  %v6880_v50 = vadd.f32 %v8749_v39, %v15024_v58 }
 0x567   :  { %7575 = vst [vmem:[#allocation7 + $0x418] sm:$0xff] %v7321_v6  ;;  %v6873_v15 = vpop.f32.mrf.mxu0  ;;  %v7315_v26 = vadd.f32 %v7314_v35, %v6850_v61 }
 0x568   :  { %v8874_v16 = vpop.f32.mrf.mxu1  ;;  %v6874_v47 = vadd.f32 %v6873_v15, %v15025_v46  ;;  %v15030_v15 = vld [vmem:[#allocation83_spill] sm:$0xff] }
 0x569   :  { %7572 = vst [vmem:[#allocation7 + $0x400] sm:$0xff] %v7315_v26  ;;  %v8752_v33 = vpop.f32.mrf.mxu0  ;;  %v7333_v31 = vadd.f32 %v8874_v16, %v6868_v45 }
 0x56a   :  { %v7326_v29 = vpop.f32.mrf.mxu1  ;;  %v6892_v24 = vadd.f32 %v8752_v33, %v15026_v56 }
 0x56b   :  { %7581 = vst [vmem:[#allocation7 + $0x448] sm:$0xff] %v7333_v31  ;;  %v6885_v9 = vpop.f32.mrf.mxu0  ;;  %v7327_v34 = vadd.f32 %v7326_v29, %v6862_v55  ;;  %v15031_v55 = vld [vmem:[#allocation87_spill] sm:$0xff] }
 0x56c   :  { %v8877_v37 = vpop.f32.mrf.mxu1  ;;  %v6886_v54 = vadd.f32 %v6885_v9, %v15027_v13 }
 0x56d   :  { %7578 = vst [vmem:[#allocation7 + $0x430] sm:$0xff] %v7327_v34  ;;  %v8755_v41 = vpop.f32.mrf.mxu0  ;;  %v7345_v42 = vadd.f32 %v8877_v37, %v6880_v50 }
 0x56e   :  { %v7338_v43 = vpop.f32.mrf.mxu1  ;;  %v6904_v44 = vadd.f32 %v8755_v41, %v15028_v14 }
 0x56f   :  { %7587 = vst [vmem:[#allocation7 + $0x478] sm:$0xff] %v7345_v42  ;;  %v6897_v59 = vpop.f32.mrf.mxu0  ;;  %v7339_v25 = vadd.f32 %v7338_v43, %v6874_v47  ;;  %v15032_v47 = vld [vmem:[#allocation355_spill] sm:$0xff] }
 0x570   :  { %v8880_v60 = vpop.f32.mrf.mxu1  ;;  %v6898_v0 = vadd.f32 %v6897_v59, %v15029_v21 }
 0x571   :  { %7584 = vst [vmem:[#allocation7 + $0x460] sm:$0xff] %v7339_v25  ;;  %v8758_v40 = vpop.f32.mrf.mxu0  ;;  %v7357_v27 = vadd.f32 %v8880_v60, %v6892_v24  ;;  %v15033_v24 = vld [vmem:[#allocation372_spill] sm:$0xff] }
 0x572   :  { %v7350_v51 = vpop.f32.mrf.mxu1  ;;  %v6916_v8 = vadd.f32 %v8758_v40, %v12880_v36 }
 0x573   :  { %7593 = vst [vmem:[#allocation7 + $0x4a8] sm:$0xff] %v7357_v27  ;;  %v6909_v57 = vpop.f32.mrf.mxu0  ;;  %v7351_v28 = vadd.f32 %v7350_v51, %v6886_v54 }
 0x574   :  { %v8883_v17 = vpop.f32.mrf.mxu1  ;;  %v6910_v22 = vadd.f32 %v6909_v57, %v12883_v53 }
 0x575   :  { %7590 = vst [vmem:[#allocation7 + $0x490] sm:$0xff] %v7351_v28  ;;  %v8761_v19 = vpop.f32.mrf.mxu0  ;;  %v7369_v10 = vadd.f32 %v8883_v17, %v6904_v44 }
 0x576   :  { %v7362_v12 = vpop.f32.mrf.mxu1  ;;  %v6928_v2 = vadd.f32 %v8761_v19, %v12886_v20 }
 0x577   :  { %7599 = vst [vmem:[#allocation7 + $0x4d8] sm:$0xff] %v7369_v10  ;;  %v6921_v52 = vpop.f32.mrf.mxu0  ;;  %v7363_v49 = vadd.f32 %v7362_v12, %v6898_v0 }
 0x578   :  { %v8886_v1 = vpop.f32.mrf.mxu1  ;;  %v6922_v61 = vadd.f32 %v6921_v52, %v12889_v48 }
 0x579   :  { %7596 = vst [vmem:[#allocation7 + $0x4c0] sm:$0xff] %v7363_v49  ;;  %v8764_v32 = vpop.f32.mrf.mxu0  ;;  %v7381_v23 = vadd.f32 %v8886_v1, %v6916_v8 }
 0x57a   :  { %v7374_v18 = vpop.f32.mrf.mxu1  ;;  %v6940_v35 = vadd.f32 %v8764_v32, %v12892_v63 }
 0x57b   :  { %7605 = vst [vmem:[#allocation7 + $0x508] sm:$0xff] %v7381_v23  ;;  %v6933_v30 = vpop.f32.mrf.mxu0  ;;  %v7375_v62 = vadd.f32 %v7374_v18, %v6910_v22 }
 0x57c   :  { %v8889_v7 = vpop.f32.mrf.mxu1  ;;  %v6934_v26 = vadd.f32 %v6933_v30, %v15030_v15 }
 0x57d   :  { %7602 = vst [vmem:[#allocation7 + $0x4f0] sm:$0xff] %v7375_v62  ;;  %v8767_v36 = vpop.f32.mrf.mxu0  ;;  %v7393_v39 = vadd.f32 %v8889_v7, %v6928_v2 }
 0x57e   :  { %v7386_v6 = vpop.f32.mrf.mxu1  ;;  %v6952_v33 = vadd.f32 %v8767_v36, %v15031_v55 }
 0x57f   :  { %7611 = vst [vmem:[#allocation7 + $0x538] sm:$0xff] %v7393_v39  ;;  %v6945_v53 = vpop.f32.mrf.mxu0  ;;  %v7387_v3 = vadd.f32 %v7386_v6, %v6922_v61 }
 0x580   :  { %v8892_v45 = vpop.f32.mrf.mxu1  ;;  %v6946_v58 = vadd.f32 %v6945_v53, %v12901_v4 }
 0x581   :  { %7608 = vst [vmem:[#allocation7 + $0x520] sm:$0xff] %v7387_v3  ;;  %v8770_v20 = vpop.f32.mrf.mxu0  ;;  %v7405_v16 = vadd.f32 %v8892_v45, %v6940_v35 }
 0x582   :  { %v7398_v5 = vpop.f32.mrf.mxu1  ;;  %v6964_v34 = vadd.f32 %v8770_v20, %v12904_v11 }
 0x583   :  { %7617 = vst [vmem:[#allocation7 + $0x568] sm:$0xff] %v7405_v16  ;;  %v6957_v48 = vpop.f32.mrf.mxu0  ;;  %v7399_v31 = vadd.f32 %v7398_v5, %v6934_v26 }
 0x584   :  { %v8895_v29 = vpop.f32.mrf.mxu1  ;;  %v6958_v41 = vadd.f32 %v6957_v48, %v15032_v47 }
 0x585   :  { %7614 = vst [vmem:[#allocation7 + $0x550] sm:$0xff] %v7399_v31  ;;  %v7417_v63 = vadd.f32 %v8895_v29, %v6952_v33  ;;  %v8773_v50 = vpop.f32.mrf.mxu0 }
 0x586   :  { %v7410_v9 = vpop.f32.mrf.mxu1  ;;  %v6976_v59 = vadd.f32 %v8773_v50, %v15033_v24 }
 0x587   :  { %7623 = vst [vmem:[#allocation7 + $0x598] sm:$0xff] %v7417_v63  ;;  %v7411_v37 = vadd.f32 %v7410_v9, %v6946_v58  ;;  %v6969_v43 = vpop.f32.mrf.mxu0 }
 0x588   :  { %v8898_v46 = vpop.f32.mrf.mxu1  ;;  %v6970_v60 = vadd.f32 %v6969_v43, %v12911_v38 }
 0x589   :  { %7620 = vst [vmem:[#allocation7 + $0x580] sm:$0xff] %v7411_v37  ;;  %v7429_v42 = vadd.f32 %v8898_v46, %v6964_v34 }
 0x58a   :  { %v7422_v56 = vpop.f32.mrf.mxu1 }
 0x58b   :  { %7629 = vst [vmem:[#allocation7 + $0x5c8] sm:$0xff] %v7429_v42  ;;  %v7423_v25 = vadd.f32 %v7422_v56, %v6958_v41 }
 0x58c   :  { %v8901_v4 = vpop.f32.mrf.mxu1 }
 0x58d   :  { %7626 = vst [vmem:[#allocation7 + $0x5b0] sm:$0xff] %v7423_v25  ;;  %v7441_v11 = vadd.f32 %v8901_v4, %v6976_v59 }
 0x58e   :  { %v7434_v13 = vpop.f32.mrf.mxu1 }
 0x58f   :  { %7635 = vst [vmem:[#allocation7 + $0x5f8] sm:$0xff] %v7441_v11  ;;  %v7435_v54 = vadd.f32 %v7434_v13, %v6970_v60 }
 0x591   :  { %7632 = vst [vmem:[#allocation7 + $0x5e0] sm:$0xff] %v7435_v54 }
 0x592   :  { %8961 = shalt.err (!%p8958_p0)
}
 0x593   :  { %7647 = dma.vmem_to_hbm [thread:$0]  %s7642_s1, 24576, %s12984_s2, [#allocation4], %s8980_s19, %s8980_s19, %s8981_s20  }
 0x594   :  { %8974 = dma.done.wait [#allocation4], 24576  }
 0x595   :  { %8975 = vsyncadd [#allocation4], 4294942720 }
 0x596   :  { %7651 = vsyncpa [#allocation3], 1 }
 0x597   :  { %7652 = vsyncpa [#allocation6], 1 }
 0x598   :  { %7653 = vsyncpa [#allocation4], 1 }

</bundles_post_ra>
